<compile_context>
chip_gen: v7x
topology: tpu7x:2x2x1
jax: 0.10.0
libtpu: 0.0.40
codegen_flags: <defaults>
</compile_context>

<pallas_src>
import functools

import numpy as np

import jax
import jax.numpy as jnp
from jax.experimental import pallas as pl
from jax.experimental.pallas import tpu as pltpu

ENC_NF = [16, 32, 32, 32]
DEC_NF = [32, 32, 32, 32, 8, 8]
NEG_SLOPE = 0.2


# ---------------------------------------------------------------------------
# Pallas kernel: one full conv layer (all taps) for one batch element.
# ---------------------------------------------------------------------------
def _conv_lrelu_kernel(x_ref, w_ref, b_ref, m_ref, o_ref, *, deltas, pad, length):
    """Whole-image conv + bias + LeakyReLU + border masking.

    x_ref: (1, Cin, pad + L + pad)  flat zero-extended input frame (VMEM)
    w_ref: (ntaps, Cout, Cin)       per-tap weight matrices
    b_ref: (Cout, 1)                bias
    m_ref: (1, L)                   interior mask (1 inside, 0 on frame border)
    o_ref: (1, Cout, L)             output frame, flattened spatial in lanes
    """
    cout = o_ref.shape[1]
    # init accumulator from broadcast bias (saves a separate bias pass)
    acc = jnp.broadcast_to(b_ref[...], (cout, length))
    for t, d in enumerate(deltas):
        start = pad + d                                   # static lane offset
        xs = x_ref[0, :, start:start + length]            # (Cin, L)
        acc = acc + jnp.dot(w_ref[t], xs,
                            preferred_element_type=jnp.float32)
    act = jnp.where(acc >= 0.0, acc, NEG_SLOPE * acc)     # LeakyReLU(0.2)
    o_ref[0] = act * m_ref[...]                           # zero the frame border


def _conv_lrelu(xk, wk, b, mask, deltas, pad, length):
    """pallas_call wrapper: grid=(N,), whole image per step."""
    n, cin, plen = xk.shape
    ntaps, cout, _ = wk.shape
    kernel = functools.partial(
        _conv_lrelu_kernel, deltas=tuple(deltas), pad=pad, length=length)
    return pl.pallas_call(
        kernel,
        out_shape=jax.ShapeDtypeStruct((n, cout, length), jnp.float32),
        grid=(n,),
        in_specs=[
            pl.BlockSpec((1, cin, plen), lambda i: (i, 0, 0)),
            pl.BlockSpec((ntaps, cout, cin), lambda i: (0, 0, 0)),
            pl.BlockSpec((cout, 1), lambda i: (0, 0)),
            pl.BlockSpec((1, length), lambda i: (0, 0)),
        ],
        out_specs=pl.BlockSpec((1, cout, length), lambda i: (i, 0, 0)),
        compiler_params=pltpu.CompilerParams(
            dimension_semantics=("parallel",)),
    )(xk, wk, b.reshape(cout, 1).astype(jnp.float32), mask)


def _interior_mask(hf, wf):
    m = np.zeros((hf, wf), np.float32)
    m[1:hf - 1, 1:wf - 1] = 1.0
    return jnp.asarray(m.reshape(1, hf * wf))


# ---------------------------------------------------------------------------
# Layer wrappers.  Activations are "frames": (N, C, H+2, W+2) with a zero
# border of width 1 (== the PyTorch pad=1 zero padding) and the real
# activation in the interior.
# ---------------------------------------------------------------------------
def conv_s1_frame(frame, w, b):
    """conv_block with stride=1 (k=3, pad=1) + LeakyReLU, frame -> frame."""
    n, cin, hf, wf = frame.shape
    cout = w.shape[3]
    length = hf * wf
    pad = wf + 1
    xk = jnp.pad(frame.reshape(n, cin, length), ((0, 0), (0, 0), (pad, pad)))
    # weights (kh,kw,ci,co) -> (9, Cout, Cin), tap index = kh*3 + kw
    wk = jnp.transpose(w, (0, 1, 3, 2)).reshape(9, cout, cin)
    deltas = [(i - 1) * wf + (j - 1) for i in range(3) for j in range(3)]
    out = _conv_lrelu(xk, wk, b, _interior_mask(hf, wf), deltas, pad, length)
    return out.reshape(n, cout, hf, wf)


def conv_s2_frame(frame, w, b):
    """conv_block with stride=2 (k=4, pad=1) + LeakyReLU, frame -> frame.

    Implemented directly (no 4x over-compute): the k=4/s=2 conv equals a
    k=2/s=1 conv over the space-to-depth (2x2 -> channels) transform of the
    zero-padded input, with correspondingly regrouped weights.
    """
    n, cin, hf, wf = frame.shape            # hf, wf even (H+2, W+2)
    cout = w.shape[3]
    hu, wu = hf // 2, wf // 2               # = Ho+1, Wo+1
    hfo, wfo = hu + 1, wu + 1               # output frame dims = Ho+2, Wo+2
    # space-to-depth, channel order (dy, dx, c)
    s = frame.reshape(n, cin, hu, 2, wu, 2)
    s = jnp.transpose(s, (0, 3, 5, 1, 2, 4)).reshape(n, 4 * cin, hu, wu)
    g = jnp.pad(s, ((0, 0), (0, 0), (0, 1), (0, 1)))   # embed into output frame grid
    length = hfo * wfo
    pad = wfo + 1
    xk = jnp.pad(g.reshape(n, 4 * cin, length), ((0, 0), (0, 0), (pad, pad)))
    # weights (kh,kw,ci,co), kh=2*ph+dy, kw=2*pw+dx -> (4, Cout, 4*Cin)
    w6 = w.reshape(2, 2, 2, 2, cin, cout)              # (ph, dy, pw, dx, ci, co)
    wk = jnp.transpose(w6, (0, 2, 5, 1, 3, 4)).reshape(4, cout, 4 * cin)
    deltas = [(i - 1) * wfo + (j - 1) for i in range(2) for j in range(2)]
    out = _conv_lrelu(xk, wk, b, _interior_mask(hfo, wfo), deltas, pad, length)
    return out.reshape(n, cout, hfo, wfo)


def upsample_frame(frame):
    """nn.Upsample(scale_factor=2, mode='nearest') on the frame interior."""
    interior = frame[:, :, 1:-1, 1:-1]
    up = jnp.repeat(jnp.repeat(interior, 2, axis=2), 2, axis=3)
    return jnp.pad(up, ((0, 0), (0, 0), (1, 1), (1, 1)))


# ---------------------------------------------------------------------------
# unet_core forward.
# ---------------------------------------------------------------------------
def unet_core_forward(x_nchw, params):
    """x_nchw: (N, 2, H, W) float32 -> (N, 8, H, W)."""
    x = x_nchw.astype(jnp.float32)
    f = jnp.pad(x, ((0, 0), (0, 0), (1, 1), (1, 1)))   # initial zero-bordered frame
    enc_frames = [f]
    for i in range(len(ENC_NF)):                       # encoder: k=4, s=2
        w, b = params["enc%d" % i]
        f = conv_s2_frame(f, w, b)
        enc_frames.append(f)

    y = enc_frames[-1]
    for i in range(3):                                 # decoder with skips
        w, b = params["dec%d" % i]
        y = conv_s1_frame(y, w, b)
        y = upsample_frame(y)
        y = jnp.concatenate([y, enc_frames[-(i + 2)]], axis=1)

    w, b = params["dec3"]
    y = conv_s1_frame(y, w, b)
    w, b = params["dec4"]
    y = conv_s1_frame(y, w, b)

    # full_size branch
    y = upsample_frame(y)
    y = jnp.concatenate([y, enc_frames[0]], axis=1)
    w, b = params["dec5"]
    y = conv_s1_frame(y, w, b)

    # len(DEC_NF) == 6 -> vm2 is False, no vm2_conv
    return y[:, :, 1:-1, 1:-1]                          # strip frame border (NCHW)


# ---------------------------------------------------------------------------
# Params + pure-JAX reference (for correctness verification).
# ---------------------------------------------------------------------------
def init_params(key):
    specs = []
    prev = 2
    for i, c in enumerate(ENC_NF):                     # encoder convs: k=4
        specs.append(("enc%d" % i, prev, c, 4))
        prev = c
    dec_in = [ENC_NF[-1], DEC_NF[0] * 2, DEC_NF[1] * 2,
              DEC_NF[2] + ENC_NF[0], DEC_NF[3], DEC_NF[4] + 2]
    for i, c in enumerate(DEC_NF):                     # decoder convs: k=3
        specs.append(("dec%d" % i, dec_in[i], c, 3))

    params = {}
    for name, cin, cout, k in specs:
        key, k1, k2 = jax.random.split(key, 3)
        fan_in = cin * k * k
        wscale = float(np.sqrt(6.0 / fan_in))          # keeps activations O(1)
        w = jax.random.uniform(k1, (k, k, cin, cout), jnp.float32, -wscale, wscale)
        b = jax.random.uniform(k2, (cout,), jnp.float32, -0.01, 0.01)
        params[name] = (w, b)
    return params


def reference_forward(x_nchw, params):
    def conv(x, w, b, stride):
        wt = jnp.transpose(w, (3, 2, 0, 1))            # (Cout, Cin, kh, kw)
        y = jax.lax.conv_general_dilated(
            x, wt, window_strides=(stride, stride), padding=[(1, 1), (1, 1)],
            dimension_numbers=("NCHW", "OIHW", "NCHW"),
            precision=jax.lax.Precision.HIGHEST)
        y = y + b.reshape(1, -1, 1, 1)
        return jnp.where(y >= 0.0, y, NEG_SLOPE * y)

    def up(x):
        return jnp.repeat(jnp.repeat(x, 2, axis=2), 2, axis=3)

    x = x_nchw.astype(jnp.float32)
    x_enc = [x]
    for i in range(len(ENC_NF)):
        w, b = params["enc%d" % i]
        x_enc.append(conv(x_enc[-1], w, b, 2))
    y = x_enc[-1]
    for i in range(3):
        w, b = params["dec%d" % i]
        y = conv(y, w, b, 1)
        y = up(y)
        y = jnp.concatenate([y, x_enc[-(i + 2)]], axis=1)
    w, b = params["dec3"]
    y = conv(y, w, b, 1)
    w, b = params["dec4"]
    y = conv(y, w, b, 1)
    y = up(y)
    y = jnp.concatenate([y, x_enc[0]], axis=1)
    w, b = params["dec5"]
    y = conv(y, w, b, 1)
    return y


if __name__ == "__main__":
    key = jax.random.PRNGKey(0)
    kp, kx = jax.random.split(key)
    params = init_params(kp)

    # batch=2, 2 channels (fixed+moving), 32x32 spatial (divisible by 2**4).
    x = jax.random.normal(kx, (2, 2, 32, 32), jnp.float32)

    fwd = jax.jit(lambda inp: unet_core_forward(inp, params))
    out = jax.block_until_ready(fwd(x))
    assert out.shape == (2, DEC_NF[5], 32, 32), out.shape
    assert out.dtype == jnp.float32

    ref = jax.block_until_ready(
        jax.jit(lambda inp: reference_forward(inp, params))(x))
    ref_max = float(jnp.max(jnp.abs(ref)))
    max_err = float(jnp.max(jnp.abs(out - ref)))
    assert max_err <= 2e-3 + 2e-2 * ref_max, (max_err, ref_max)

    print("KERNEL_OK")
</pallas_src>

<mosaic_0001>
module attributes {stable_mosaic.version = 11 : i64} {
  func.func @_conv_lrelu_kernel(%arg0: i32, %arg1: memref<1x8x362xf32, #tpu.memory_space<vmem>>, %arg2: memref<4x16x8xf32, #tpu.memory_space<vmem>>, %arg3: memref<16x1xf32, #tpu.memory_space<vmem>>, %arg4: memref<1x324xf32, #tpu.memory_space<vmem>>, %arg5: memref<1x16x324xf32, #tpu.memory_space<vmem>>) attributes {dimension_semantics = [#tpu.dimension_semantics<parallel>], iteration_bounds = array<i64: 2>, scalar_prefetch = 0 : i64, scratch_operands = 0 : i64, tpu.core_type = #tpu.core_type<tc>, window_params = [{transform_indices = @transform_0, window_bounds = array<i64: 1, 8, 362>}, {pipeline_mode = #tpu.pipeline_mode<synchronous>, transform_indices = @transform_1, window_bounds = array<i64: 4, 16, 8>}, {pipeline_mode = #tpu.pipeline_mode<synchronous>, transform_indices = @transform_2, window_bounds = array<i64: 16, 1>}, {pipeline_mode = #tpu.pipeline_mode<synchronous>, transform_indices = @transform_3, window_bounds = array<i64: 1, 324>}, {transform_indices = @transform_4, window_bounds = array<i64: 1, 16, 324>}]} {
    %c0 = arith.constant 0 : index
    %c0_0 = arith.constant 0 : index
    %0 = vector.load %arg3[%c0, %c0_0] : memref<16x1xf32, #tpu.memory_space<vmem>>, vector<16x1xf32>
    %1 = vector.shape_cast %0 : vector<16x1xf32> to vector<16x1xf32>
    %2 = vector.broadcast %1 : vector<16x1xf32> to vector<16x324xf32>
    %c0_1 = arith.constant 0 : index
    %c0_2 = arith.constant 0 : index
    %c0_3 = arith.constant 0 : index
    %3 = vector.load %arg1[%c0_1, %c0_2, %c0_3] : memref<1x8x362xf32, #tpu.memory_space<vmem>>, vector<1x8x324xf32>
    %4 = vector.shape_cast %3 : vector<1x8x324xf32> to vector<8x324xf32>
    %c0_4 = arith.constant 0 : index
    %c0_5 = arith.constant 0 : index
    %c0_6 = arith.constant 0 : index
    %5 = vector.load %arg2[%c0_4, %c0_5, %c0_6] : memref<4x16x8xf32, #tpu.memory_space<vmem>>, vector<1x16x8xf32>
    %6 = vector.shape_cast %5 : vector<1x16x8xf32> to vector<16x8xf32>
    %cst = arith.constant dense<0.000000e+00> : vector<16x324xf32>
    %7 = tpu.matmul %6, %4, %cst {dimension_numbers = #tpu.dot_dimension_numbers<[1], [0], [0], [1], [0, 0, 1, 1], [], []>} : vector<16x8xf32>, vector<8x324xf32>, vector<16x324xf32> -> vector<16x324xf32>
    %8 = arith.addf %2, %7 : vector<16x324xf32>
    %c0_7 = arith.constant 0 : index
    %c0_8 = arith.constant 0 : index
    %c1 = arith.constant 1 : index
    %9 = vector.load %arg1[%c0_7, %c0_8, %c1] : memref<1x8x362xf32, #tpu.memory_space<vmem>>, vector<1x8x324xf32>
    %10 = vector.shape_cast %9 : vector<1x8x324xf32> to vector<8x324xf32>
    %c1_9 = arith.constant 1 : index
    %c0_10 = arith.constant 0 : index
    %c0_11 = arith.constant 0 : index
    %11 = vector.load %arg2[%c1_9, %c0_10, %c0_11] : memref<4x16x8xf32, #tpu.memory_space<vmem>>, vector<1x16x8xf32>
    %12 = vector.shape_cast %11 : vector<1x16x8xf32> to vector<16x8xf32>
    %cst_12 = arith.constant dense<0.000000e+00> : vector<16x324xf32>
    %13 = tpu.matmul %12, %10, %cst_12 {dimension_numbers = #tpu.dot_dimension_numbers<[1], [0], [0], [1], [0, 0, 1, 1], [], []>} : vector<16x8xf32>, vector<8x324xf32>, vector<16x324xf32> -> vector<16x324xf32>
    %14 = arith.addf %8, %13 : vector<16x324xf32>
    %c0_13 = arith.constant 0 : index
    %c0_14 = arith.constant 0 : index
    %c18 = arith.constant 18 : index
    %15 = vector.load %arg1[%c0_13, %c0_14, %c18] : memref<1x8x362xf32, #tpu.memory_space<vmem>>, vector<1x8x324xf32>
    %16 = vector.shape_cast %15 : vector<1x8x324xf32> to vector<8x324xf32>
    %c2 = arith.constant 2 : index
    %c0_15 = arith.constant 0 : index
    %c0_16 = arith.constant 0 : index
    %17 = vector.load %arg2[%c2, %c0_15, %c0_16] : memref<4x16x8xf32, #tpu.memory_space<vmem>>, vector<1x16x8xf32>
    %18 = vector.shape_cast %17 : vector<1x16x8xf32> to vector<16x8xf32>
    %cst_17 = arith.constant dense<0.000000e+00> : vector<16x324xf32>
    %19 = tpu.matmul %18, %16, %cst_17 {dimension_numbers = #tpu.dot_dimension_numbers<[1], [0], [0], [1], [0, 0, 1, 1], [], []>} : vector<16x8xf32>, vector<8x324xf32>, vector<16x324xf32> -> vector<16x324xf32>
    %20 = arith.addf %14, %19 : vector<16x324xf32>
    %c0_18 = arith.constant 0 : index
    %c0_19 = arith.constant 0 : index
    %c19 = arith.constant 19 : index
    %21 = vector.load %arg1[%c0_18, %c0_19, %c19] : memref<1x8x362xf32, #tpu.memory_space<vmem>>, vector<1x8x324xf32>
    %22 = vector.shape_cast %21 : vector<1x8x324xf32> to vector<8x324xf32>
    %c3 = arith.constant 3 : index
    %c0_20 = arith.constant 0 : index
    %c0_21 = arith.constant 0 : index
    %23 = vector.load %arg2[%c3, %c0_20, %c0_21] : memref<4x16x8xf32, #tpu.memory_space<vmem>>, vector<1x16x8xf32>
    %24 = vector.shape_cast %23 : vector<1x16x8xf32> to vector<16x8xf32>
    %cst_22 = arith.constant dense<0.000000e+00> : vector<16x324xf32>
    %25 = tpu.matmul %24, %22, %cst_22 {dimension_numbers = #tpu.dot_dimension_numbers<[1], [0], [0], [1], [0, 0, 1, 1], [], []>} : vector<16x8xf32>, vector<8x324xf32>, vector<16x324xf32> -> vector<16x324xf32>
    %26 = arith.addf %20, %25 : vector<16x324xf32>
    %cst_23 = arith.constant 0.000000e+00 : f32
    %27 = vector.broadcast %cst_23 : f32 to vector<16x324xf32>
    %28 = arith.cmpf oge, %26, %27 : vector<16x324xf32>
    %cst_24 = arith.constant 2.000000e-01 : f32
    %29 = vector.broadcast %cst_24 : f32 to vector<16x324xf32>
    %30 = arith.mulf %29, %26 : vector<16x324xf32>
    %31 = arith.select %28, %26, %30 : vector<16x324xi1>, vector<16x324xf32>
    %c0_25 = arith.constant 0 : index
    %c0_26 = arith.constant 0 : index
    %32 = vector.load %arg4[%c0_25, %c0_26] : memref<1x324xf32, #tpu.memory_space<vmem>>, vector<1x324xf32>
    %33 = vector.broadcast %32 : vector<1x324xf32> to vector<16x324xf32>
    %34 = arith.mulf %31, %33 : vector<16x324xf32>
    %c0_27 = arith.constant 0 : index
    %c0_28 = arith.constant 0 : index
    %c0_29 = arith.constant 0 : index
    %35 = vector.load %arg5[%c0_27, %c0_28, %c0_29] : memref<1x16x324xf32, #tpu.memory_space<vmem>>, vector<1x16x324xf32>
    %36 = vector.shape_cast %35 : vector<1x16x324xf32> to vector<16x324xf32>
    %37 = vector.shape_cast %34 : vector<16x324xf32> to vector<1x16x324xf32>
    tpu.vector_store %arg5[%c0_27, %c0_28, %c0_29], %37 {strides = array<i32>} : memref<1x16x324xf32, #tpu.memory_space<vmem>>, vector<1x16x324xf32>,
    return
  }
  func.func @transform_0(%arg0: i32) -> (i32, i32, i32) {
    %c0_i32 = arith.constant 0 : i32
    %c0_i32_0 = arith.constant 0 : i32
    %c0_i32_1 = arith.constant 0 : i32
    return %arg0, %c0_i32, %c0_i32_0 : i32, i32, i32
  }
  func.func @transform_1(%arg0: i32) -> (i32, i32, i32) {
    %c0_i32 = arith.constant 0 : i32
    %c0_i32_0 = arith.constant 0 : i32
    %c0_i32_1 = arith.constant 0 : i32
    %c0_i32_2 = arith.constant 0 : i32
    return %c0_i32, %c0_i32_0, %c0_i32_1 : i32, i32, i32
  }
  func.func @transform_2(%arg0: i32) -> (i32, i32) {
    %c0_i32 = arith.constant 0 : i32
    %c0_i32_0 = arith.constant 0 : i32
    %c0_i32_1 = arith.constant 0 : i32
    return %c0_i32, %c0_i32_0 : i32, i32
  }
  func.func @transform_3(%arg0: i32) -> (i32, i32) {
    %c0_i32 = arith.constant 0 : i32
    %c0_i32_0 = arith.constant 0 : i32
    %c0_i32_1 = arith.constant 0 : i32
    return %c0_i32, %c0_i32_0 : i32, i32
  }
  func.func @transform_4(%arg0: i32) -> (i32, i32, i32) {
    %c0_i32 = arith.constant 0 : i32
    %c0_i32_0 = arith.constant 0 : i32
    %c0_i32_1 = arith.constant 0 : i32
    return %arg0, %c0_i32, %c0_i32_0 : i32, i32, i32
  }
}

module attributes {stable_mosaic.version = 11 : i64} {
  func.func @_conv_lrelu_kernel(%arg0: i32, %arg1: memref<1x64x122xf32, #tpu.memory_space<vmem>>, %arg2: memref<4x32x64xf32, #tpu.memory_space<vmem>>, %arg3: memref<32x1xf32, #tpu.memory_space<vmem>>, %arg4: memref<1x100xf32, #tpu.memory_space<vmem>>, %arg5: memref<1x32x100xf32, #tpu.memory_space<vmem>>) attributes {dimension_semantics = [#tpu.dimension_semantics<parallel>], iteration_bounds = array<i64: 2>, scalar_prefetch = 0 : i64, scratch_operands = 0 : i64, tpu.core_type = #tpu.core_type<tc>, window_params = [{transform_indices = @transform_0, window_bounds = array<i64: 1, 64, 122>}, {pipeline_mode = #tpu.pipeline_mode<synchronous>, transform_indices = @transform_1, window_bounds = array<i64: 4, 32, 64>}, {pipeline_mode = #tpu.pipeline_mode<synchronous>, transform_indices = @transform_2, window_bounds = array<i64: 32, 1>}, {pipeline_mode = #tpu.pipeline_mode<synchronous>, transform_indices = @transform_3, window_bounds = array<i64: 1, 100>}, {transform_indices = @transform_4, window_bounds = array<i64: 1, 32, 100>}]} {
    %c0 = arith.constant 0 : index
    %c0_0 = arith.constant 0 : index
    %0 = vector.load %arg3[%c0, %c0_0] : memref<32x1xf32, #tpu.memory_space<vmem>>, vector<32x1xf32>
    %1 = vector.shape_cast %0 : vector<32x1xf32> to vector<32x1xf32>
    %2 = vector.broadcast %1 : vector<32x1xf32> to vector<32x100xf32>
    %c0_1 = arith.constant 0 : index
    %c0_2 = arith.constant 0 : index
    %c0_3 = arith.constant 0 : index
    %3 = vector.load %arg1[%c0_1, %c0_2, %c0_3] : memref<1x64x122xf32, #tpu.memory_space<vmem>>, vector<1x64x100xf32>
    %4 = vector.shape_cast %3 : vector<1x64x100xf32> to vector<64x100xf32>
    %c0_4 = arith.constant 0 : index
    %c0_5 = arith.constant 0 : index
    %c0_6 = arith.constant 0 : index
    %5 = vector.load %arg2[%c0_4, %c0_5, %c0_6] : memref<4x32x64xf32, #tpu.memory_space<vmem>>, vector<1x32x64xf32>
    %6 = vector.shape_cast %5 : vector<1x32x64xf32> to vector<32x64xf32>
    %cst = arith.constant dense<0.000000e+00> : vector<32x100xf32>
    %7 = tpu.matmul %6, %4, %cst {dimension_numbers = #tpu.dot_dimension_numbers<[1], [0], [0], [1], [0, 0, 1, 1], [], []>} : vector<32x64xf32>, vector<64x100xf32>, vector<32x100xf32> -> vector<32x100xf32>
    %8 = arith.addf %2, %7 : vector<32x100xf32>
    %c0_7 = arith.constant 0 : index
    %c0_8 = arith.constant 0 : index
    %c1 = arith.constant 1 : index
    %9 = vector.load %arg1[%c0_7, %c0_8, %c1] : memref<1x64x122xf32, #tpu.memory_space<vmem>>, vector<1x64x100xf32>
    %10 = vector.shape_cast %9 : vector<1x64x100xf32> to vector<64x100xf32>
    %c1_9 = arith.constant 1 : index
    %c0_10 = arith.constant 0 : index
    %c0_11 = arith.constant 0 : index
    %11 = vector.load %arg2[%c1_9, %c0_10, %c0_11] : memref<4x32x64xf32, #tpu.memory_space<vmem>>, vector<1x32x64xf32>
    %12 = vector.shape_cast %11 : vector<1x32x64xf32> to vector<32x64xf32>
    %cst_12 = arith.constant dense<0.000000e+00> : vector<32x100xf32>
    %13 = tpu.matmul %12, %10, %cst_12 {dimension_numbers = #tpu.dot_dimension_numbers<[1], [0], [0], [1], [0, 0, 1, 1], [], []>} : vector<32x64xf32>, vector<64x100xf32>, vector<32x100xf32> -> vector<32x100xf32>
    %14 = arith.addf %8, %13 : vector<32x100xf32>
    %c0_13 = arith.constant 0 : index
    %c0_14 = arith.constant 0 : index
    %c10 = arith.constant 10 : index
    %15 = vector.load %arg1[%c0_13, %c0_14, %c10] : memref<1x64x122xf32, #tpu.memory_space<vmem>>, vector<1x64x100xf32>
    %16 = vector.shape_cast %15 : vector<1x64x100xf32> to vector<64x100xf32>
    %c2 = arith.constant 2 : index
    %c0_15 = arith.constant 0 : index
    %c0_16 = arith.constant 0 : index
    %17 = vector.load %arg2[%c2, %c0_15, %c0_16] : memref<4x32x64xf32, #tpu.memory_space<vmem>>, vector<1x32x64xf32>
    %18 = vector.shape_cast %17 : vector<1x32x64xf32> to vector<32x64xf32>
    %cst_17 = arith.constant dense<0.000000e+00> : vector<32x100xf32>
    %19 = tpu.matmul %18, %16, %cst_17 {dimension_numbers = #tpu.dot_dimension_numbers<[1], [0], [0], [1], [0, 0, 1, 1], [], []>} : vector<32x64xf32>, vector<64x100xf32>, vector<32x100xf32> -> vector<32x100xf32>
    %20 = arith.addf %14, %19 : vector<32x100xf32>
    %c0_18 = arith.constant 0 : index
    %c0_19 = arith.constant 0 : index
    %c11 = arith.constant 11 : index
    %21 = vector.load %arg1[%c0_18, %c0_19, %c11] : memref<1x64x122xf32, #tpu.memory_space<vmem>>, vector<1x64x100xf32>
    %22 = vector.shape_cast %21 : vector<1x64x100xf32> to vector<64x100xf32>
    %c3 = arith.constant 3 : index
    %c0_20 = arith.constant 0 : index
    %c0_21 = arith.constant 0 : index
    %23 = vector.load %arg2[%c3, %c0_20, %c0_21] : memref<4x32x64xf32, #tpu.memory_space<vmem>>, vector<1x32x64xf32>
    %24 = vector.shape_cast %23 : vector<1x32x64xf32> to vector<32x64xf32>
    %cst_22 = arith.constant dense<0.000000e+00> : vector<32x100xf32>
    %25 = tpu.matmul %24, %22, %cst_22 {dimension_numbers = #tpu.dot_dimension_numbers<[1], [0], [0], [1], [0, 0, 1, 1], [], []>} : vector<32x64xf32>, vector<64x100xf32>, vector<32x100xf32> -> vector<32x100xf32>
    %26 = arith.addf %20, %25 : vector<32x100xf32>
    %cst_23 = arith.constant 0.000000e+00 : f32
    %27 = vector.broadcast %cst_23 : f32 to vector<32x100xf32>
    %28 = arith.cmpf oge, %26, %27 : vector<32x100xf32>
    %cst_24 = arith.constant 2.000000e-01 : f32
    %29 = vector.broadcast %cst_24 : f32 to vector<32x100xf32>
    %30 = arith.mulf %29, %26 : vector<32x100xf32>
    %31 = arith.select %28, %26, %30 : vector<32x100xi1>, vector<32x100xf32>
    %c0_25 = arith.constant 0 : index
    %c0_26 = arith.constant 0 : index
    %32 = vector.load %arg4[%c0_25, %c0_26] : memref<1x100xf32, #tpu.memory_space<vmem>>, vector<1x100xf32>
    %33 = vector.broadcast %32 : vector<1x100xf32> to vector<32x100xf32>
    %34 = arith.mulf %31, %33 : vector<32x100xf32>
    %c0_27 = arith.constant 0 : index
    %c0_28 = arith.constant 0 : index
    %c0_29 = arith.constant 0 : index
    %35 = vector.load %arg5[%c0_27, %c0_28, %c0_29] : memref<1x32x100xf32, #tpu.memory_space<vmem>>, vector<1x32x100xf32>
    %36 = vector.shape_cast %35 : vector<1x32x100xf32> to vector<32x100xf32>
    %37 = vector.shape_cast %34 : vector<32x100xf32> to vector<1x32x100xf32>
    tpu.vector_store %arg5[%c0_27, %c0_28, %c0_29], %37 {strides = array<i32>} : memref<1x32x100xf32, #tpu.memory_space<vmem>>, vector<1x32x100xf32>,
    return
  }
  func.func @transform_0(%arg0: i32) -> (i32, i32, i32) {
    %c0_i32 = arith.constant 0 : i32
    %c0_i32_0 = arith.constant 0 : i32
    %c0_i32_1 = arith.constant 0 : i32
    return %arg0, %c0_i32, %c0_i32_0 : i32, i32, i32
  }
  func.func @transform_1(%arg0: i32) -> (i32, i32, i32) {
    %c0_i32 = arith.constant 0 : i32
    %c0_i32_0 = arith.constant 0 : i32
    %c0_i32_1 = arith.constant 0 : i32
    %c0_i32_2 = arith.constant 0 : i32
    return %c0_i32, %c0_i32_0, %c0_i32_1 : i32, i32, i32
  }
  func.func @transform_2(%arg0: i32) -> (i32, i32) {
    %c0_i32 = arith.constant 0 : i32
    %c0_i32_0 = arith.constant 0 : i32
    %c0_i32_1 = arith.constant 0 : i32
    return %c0_i32, %c0_i32_0 : i32, i32
  }
  func.func @transform_3(%arg0: i32) -> (i32, i32) {
    %c0_i32 = arith.constant 0 : i32
    %c0_i32_0 = arith.constant 0 : i32
    %c0_i32_1 = arith.constant 0 : i32
    return %c0_i32, %c0_i32_0 : i32, i32
  }
  func.func @transform_4(%arg0: i32) -> (i32, i32, i32) {
    %c0_i32 = arith.constant 0 : i32
    %c0_i32_0 = arith.constant 0 : i32
    %c0_i32_1 = arith.constant 0 : i32
    return %arg0, %c0_i32, %c0_i32_0 : i32, i32, i32
  }
}

module attributes {stable_mosaic.version = 11 : i64} {
  func.func @_conv_lrelu_kernel(%arg0: i32, %arg1: memref<1x128x50xf32, #tpu.memory_space<vmem>>, %arg2: memref<4x32x128xf32, #tpu.memory_space<vmem>>, %arg3: memref<32x1xf32, #tpu.memory_space<vmem>>, %arg4: memref<1x36xf32, #tpu.memory_space<vmem>>, %arg5: memref<1x32x36xf32, #tpu.memory_space<vmem>>) attributes {dimension_semantics = [#tpu.dimension_semantics<parallel>], iteration_bounds = array<i64: 2>, scalar_prefetch = 0 : i64, scratch_operands = 0 : i64, tpu.core_type = #tpu.core_type<tc>, window_params = [{transform_indices = @transform_0, window_bounds = array<i64: 1, 128, 50>}, {pipeline_mode = #tpu.pipeline_mode<synchronous>, transform_indices = @transform_1, window_bounds = array<i64: 4, 32, 128>}, {pipeline_mode = #tpu.pipeline_mode<synchronous>, transform_indices = @transform_2, window_bounds = array<i64: 32, 1>}, {pipeline_mode = #tpu.pipeline_mode<synchronous>, transform_indices = @transform_3, window_bounds = array<i64: 1, 36>}, {transform_indices = @transform_4, window_bounds = array<i64: 1, 32, 36>}]} {
    %c0 = arith.constant 0 : index
    %c0_0 = arith.constant 0 : index
    %0 = vector.load %arg3[%c0, %c0_0] : memref<32x1xf32, #tpu.memory_space<vmem>>, vector<32x1xf32>
    %1 = vector.shape_cast %0 : vector<32x1xf32> to vector<32x1xf32>
    %2 = vector.broadcast %1 : vector<32x1xf32> to vector<32x36xf32>
    %c0_1 = arith.constant 0 : index
    %c0_2 = arith.constant 0 : index
    %c0_3 = arith.constant 0 : index
    %3 = vector.load %arg1[%c0_1, %c0_2, %c0_3] : memref<1x128x50xf32, #tpu.memory_space<vmem>>, vector<1x128x36xf32>
    %4 = vector.shape_cast %3 : vector<1x128x36xf32> to vector<128x36xf32>
    %c0_4 = arith.constant 0 : index
    %c0_5 = arith.constant 0 : index
    %c0_6 = arith.constant 0 : index
    %5 = vector.load %arg2[%c0_4, %c0_5, %c0_6] : memref<4x32x128xf32, #tpu.memory_space<vmem>>, vector<1x32x128xf32>
    %6 = vector.shape_cast %5 : vector<1x32x128xf32> to vector<32x128xf32>
    %cst = arith.constant dense<0.000000e+00> : vector<32x36xf32>
    %7 = tpu.matmul %6, %4, %cst {dimension_numbers = #tpu.dot_dimension_numbers<[1], [0], [0], [1], [0, 0, 1, 1], [], []>} : vector<32x128xf32>, vector<128x36xf32>, vector<32x36xf32> -> vector<32x36xf32>
    %8 = arith.addf %2, %7 : vector<32x36xf32>
    %c0_7 = arith.constant 0 : index
    %c0_8 = arith.constant 0 : index
    %c1 = arith.constant 1 : index
    %9 = vector.load %arg1[%c0_7, %c0_8, %c1] : memref<1x128x50xf32, #tpu.memory_space<vmem>>, vector<1x128x36xf32>
    %10 = vector.shape_cast %9 : vector<1x128x36xf32> to vector<128x36xf32>
    %c1_9 = arith.constant 1 : index
    %c0_10 = arith.constant 0 : index
    %c0_11 = arith.constant 0 : index
    %11 = vector.load %arg2[%c1_9, %c0_10, %c0_11] : memref<4x32x128xf32, #tpu.memory_space<vmem>>, vector<1x32x128xf32>
    %12 = vector.shape_cast %11 : vector<1x32x128xf32> to vector<32x128xf32>
    %cst_12 = arith.constant dense<0.000000e+00> : vector<32x36xf32>
    %13 = tpu.matmul %12, %10, %cst_12 {dimension_numbers = #tpu.dot_dimension_numbers<[1], [0], [0], [1], [0, 0, 1, 1], [], []>} : vector<32x128xf32>, vector<128x36xf32>, vector<32x36xf32> -> vector<32x36xf32>
    %14 = arith.addf %8, %13 : vector<32x36xf32>
    %c0_13 = arith.constant 0 : index
    %c0_14 = arith.constant 0 : index
    %c6 = arith.constant 6 : index
    %15 = vector.load %arg1[%c0_13, %c0_14, %c6] : memref<1x128x50xf32, #tpu.memory_space<vmem>>, vector<1x128x36xf32>
    %16 = vector.shape_cast %15 : vector<1x128x36xf32> to vector<128x36xf32>
    %c2 = arith.constant 2 : index
    %c0_15 = arith.constant 0 : index
    %c0_16 = arith.constant 0 : index
    %17 = vector.load %arg2[%c2, %c0_15, %c0_16] : memref<4x32x128xf32, #tpu.memory_space<vmem>>, vector<1x32x128xf32>
    %18 = vector.shape_cast %17 : vector<1x32x128xf32> to vector<32x128xf32>
    %cst_17 = arith.constant dense<0.000000e+00> : vector<32x36xf32>
    %19 = tpu.matmul %18, %16, %cst_17 {dimension_numbers = #tpu.dot_dimension_numbers<[1], [0], [0], [1], [0, 0, 1, 1], [], []>} : vector<32x128xf32>, vector<128x36xf32>, vector<32x36xf32> -> vector<32x36xf32>
    %20 = arith.addf %14, %19 : vector<32x36xf32>
    %c0_18 = arith.constant 0 : index
    %c0_19 = arith.constant 0 : index
    %c7 = arith.constant 7 : index
    %21 = vector.load %arg1[%c0_18, %c0_19, %c7] : memref<1x128x50xf32, #tpu.memory_space<vmem>>, vector<1x128x36xf32>
    %22 = vector.shape_cast %21 : vector<1x128x36xf32> to vector<128x36xf32>
    %c3 = arith.constant 3 : index
    %c0_20 = arith.constant 0 : index
    %c0_21 = arith.constant 0 : index
    %23 = vector.load %arg2[%c3, %c0_20, %c0_21] : memref<4x32x128xf32, #tpu.memory_space<vmem>>, vector<1x32x128xf32>
    %24 = vector.shape_cast %23 : vector<1x32x128xf32> to vector<32x128xf32>
    %cst_22 = arith.constant dense<0.000000e+00> : vector<32x36xf32>
    %25 = tpu.matmul %24, %22, %cst_22 {dimension_numbers = #tpu.dot_dimension_numbers<[1], [0], [0], [1], [0, 0, 1, 1], [], []>} : vector<32x128xf32>, vector<128x36xf32>, vector<32x36xf32> -> vector<32x36xf32>
    %26 = arith.addf %20, %25 : vector<32x36xf32>
    %cst_23 = arith.constant 0.000000e+00 : f32
    %27 = vector.broadcast %cst_23 : f32 to vector<32x36xf32>
    %28 = arith.cmpf oge, %26, %27 : vector<32x36xf32>
    %cst_24 = arith.constant 2.000000e-01 : f32
    %29 = vector.broadcast %cst_24 : f32 to vector<32x36xf32>
    %30 = arith.mulf %29, %26 : vector<32x36xf32>
    %31 = arith.select %28, %26, %30 : vector<32x36xi1>, vector<32x36xf32>
    %c0_25 = arith.constant 0 : index
    %c0_26 = arith.constant 0 : index
    %32 = vector.load %arg4[%c0_25, %c0_26] : memref<1x36xf32, #tpu.memory_space<vmem>>, vector<1x36xf32>
    %33 = vector.broadcast %32 : vector<1x36xf32> to vector<32x36xf32>
    %34 = arith.mulf %31, %33 : vector<32x36xf32>
    %c0_27 = arith.constant 0 : index
    %c0_28 = arith.constant 0 : index
    %c0_29 = arith.constant 0 : index
    %35 = vector.load %arg5[%c0_27, %c0_28, %c0_29] : memref<1x32x36xf32, #tpu.memory_space<vmem>>, vector<1x32x36xf32>
    %36 = vector.shape_cast %35 : vector<1x32x36xf32> to vector<32x36xf32>
    %37 = vector.shape_cast %34 : vector<32x36xf32> to vector<1x32x36xf32>
    tpu.vector_store %arg5[%c0_27, %c0_28, %c0_29], %37 {strides = array<i32>} : memref<1x32x36xf32, #tpu.memory_space<vmem>>, vector<1x32x36xf32>,
    return
  }
  func.func @transform_0(%arg0: i32) -> (i32, i32, i32) {
    %c0_i32 = arith.constant 0 : i32
    %c0_i32_0 = arith.constant 0 : i32
    %c0_i32_1 = arith.constant 0 : i32
    return %arg0, %c0_i32, %c0_i32_0 : i32, i32, i32
  }
  func.func @transform_1(%arg0: i32) -> (i32, i32, i32) {
    %c0_i32 = arith.constant 0 : i32
    %c0_i32_0 = arith.constant 0 : i32
    %c0_i32_1 = arith.constant 0 : i32
    %c0_i32_2 = arith.constant 0 : i32
    return %c0_i32, %c0_i32_0, %c0_i32_1 : i32, i32, i32
  }
  func.func @transform_2(%arg0: i32) -> (i32, i32) {
    %c0_i32 = arith.constant 0 : i32
    %c0_i32_0 = arith.constant 0 : i32
    %c0_i32_1 = arith.constant 0 : i32
    return %c0_i32, %c0_i32_0 : i32, i32
  }
  func.func @transform_3(%arg0: i32) -> (i32, i32) {
    %c0_i32 = arith.constant 0 : i32
    %c0_i32_0 = arith.constant 0 : i32
    %c0_i32_1 = arith.constant 0 : i32
    return %c0_i32, %c0_i32_0 : i32, i32
  }
  func.func @transform_4(%arg0: i32) -> (i32, i32, i32) {
    %c0_i32 = arith.constant 0 : i32
    %c0_i32_0 = arith.constant 0 : i32
    %c0_i32_1 = arith.constant 0 : i32
    return %arg0, %c0_i32, %c0_i32_0 : i32, i32, i32
  }
}

module attributes {stable_mosaic.version = 11 : i64} {
  func.func @_conv_lrelu_kernel(%arg0: i32, %arg1: memref<1x128x26xf32, #tpu.memory_space<vmem>>, %arg2: memref<4x32x128xf32, #tpu.memory_space<vmem>>, %arg3: memref<32x1xf32, #tpu.memory_space<vmem>>, %arg4: memref<1x16xf32, #tpu.memory_space<vmem>>, %arg5: memref<1x32x16xf32, #tpu.memory_space<vmem>>) attributes {dimension_semantics = [#tpu.dimension_semantics<parallel>], iteration_bounds = array<i64: 2>, scalar_prefetch = 0 : i64, scratch_operands = 0 : i64, tpu.core_type = #tpu.core_type<tc>, window_params = [{transform_indices = @transform_0, window_bounds = array<i64: 1, 128, 26>}, {pipeline_mode = #tpu.pipeline_mode<synchronous>, transform_indices = @transform_1, window_bounds = array<i64: 4, 32, 128>}, {pipeline_mode = #tpu.pipeline_mode<synchronous>, transform_indices = @transform_2, window_bounds = array<i64: 32, 1>}, {pipeline_mode = #tpu.pipeline_mode<synchronous>, transform_indices = @transform_3, window_bounds = array<i64: 1, 16>}, {transform_indices = @transform_4, window_bounds = array<i64: 1, 32, 16>}]} {
    %c0 = arith.constant 0 : index
    %c0_0 = arith.constant 0 : index
    %0 = vector.load %arg3[%c0, %c0_0] : memref<32x1xf32, #tpu.memory_space<vmem>>, vector<32x1xf32>
    %1 = vector.shape_cast %0 : vector<32x1xf32> to vector<32x1xf32>
    %2 = vector.broadcast %1 : vector<32x1xf32> to vector<32x16xf32>
    %c0_1 = arith.constant 0 : index
    %c0_2 = arith.constant 0 : index
    %c0_3 = arith.constant 0 : index
    %3 = vector.load %arg1[%c0_1, %c0_2, %c0_3] : memref<1x128x26xf32, #tpu.memory_space<vmem>>, vector<1x128x16xf32>
    %4 = vector.shape_cast %3 : vector<1x128x16xf32> to vector<128x16xf32>
    %c0_4 = arith.constant 0 : index
    %c0_5 = arith.constant 0 : index
    %c0_6 = arith.constant 0 : index
    %5 = vector.load %arg2[%c0_4, %c0_5, %c0_6] : memref<4x32x128xf32, #tpu.memory_space<vmem>>, vector<1x32x128xf32>
    %6 = vector.shape_cast %5 : vector<1x32x128xf32> to vector<32x128xf32>
    %cst = arith.constant dense<0.000000e+00> : vector<32x16xf32>
    %7 = tpu.matmul %6, %4, %cst {dimension_numbers = #tpu.dot_dimension_numbers<[1], [0], [0], [1], [0, 0, 1, 1], [], []>} : vector<32x128xf32>, vector<128x16xf32>, vector<32x16xf32> -> vector<32x16xf32>
    %8 = arith.addf %2, %7 : vector<32x16xf32>
    %c0_7 = arith.constant 0 : index
    %c0_8 = arith.constant 0 : index
    %c1 = arith.constant 1 : index
    %9 = vector.load %arg1[%c0_7, %c0_8, %c1] : memref<1x128x26xf32, #tpu.memory_space<vmem>>, vector<1x128x16xf32>
    %10 = vector.shape_cast %9 : vector<1x128x16xf32> to vector<128x16xf32>
    %c1_9 = arith.constant 1 : index
    %c0_10 = arith.constant 0 : index
    %c0_11 = arith.constant 0 : index
    %11 = vector.load %arg2[%c1_9, %c0_10, %c0_11] : memref<4x32x128xf32, #tpu.memory_space<vmem>>, vector<1x32x128xf32>
    %12 = vector.shape_cast %11 : vector<1x32x128xf32> to vector<32x128xf32>
    %cst_12 = arith.constant dense<0.000000e+00> : vector<32x16xf32>
    %13 = tpu.matmul %12, %10, %cst_12 {dimension_numbers = #tpu.dot_dimension_numbers<[1], [0], [0], [1], [0, 0, 1, 1], [], []>} : vector<32x128xf32>, vector<128x16xf32>, vector<32x16xf32> -> vector<32x16xf32>
    %14 = arith.addf %8, %13 : vector<32x16xf32>
    %c0_13 = arith.constant 0 : index
    %c0_14 = arith.constant 0 : index
    %c4 = arith.constant 4 : index
    %15 = vector.load %arg1[%c0_13, %c0_14, %c4] : memref<1x128x26xf32, #tpu.memory_space<vmem>>, vector<1x128x16xf32>
    %16 = vector.shape_cast %15 : vector<1x128x16xf32> to vector<128x16xf32>
    %c2 = arith.constant 2 : index
    %c0_15 = arith.constant 0 : index
    %c0_16 = arith.constant 0 : index
    %17 = vector.load %arg2[%c2, %c0_15, %c0_16] : memref<4x32x128xf32, #tpu.memory_space<vmem>>, vector<1x32x128xf32>
    %18 = vector.shape_cast %17 : vector<1x32x128xf32> to vector<32x128xf32>
    %cst_17 = arith.constant dense<0.000000e+00> : vector<32x16xf32>
    %19 = tpu.matmul %18, %16, %cst_17 {dimension_numbers = #tpu.dot_dimension_numbers<[1], [0], [0], [1], [0, 0, 1, 1], [], []>} : vector<32x128xf32>, vector<128x16xf32>, vector<32x16xf32> -> vector<32x16xf32>
    %20 = arith.addf %14, %19 : vector<32x16xf32>
    %c0_18 = arith.constant 0 : index
    %c0_19 = arith.constant 0 : index
    %c5 = arith.constant 5 : index
    %21 = vector.load %arg1[%c0_18, %c0_19, %c5] : memref<1x128x26xf32, #tpu.memory_space<vmem>>, vector<1x128x16xf32>
    %22 = vector.shape_cast %21 : vector<1x128x16xf32> to vector<128x16xf32>
    %c3 = arith.constant 3 : index
    %c0_20 = arith.constant 0 : index
    %c0_21 = arith.constant 0 : index
    %23 = vector.load %arg2[%c3, %c0_20, %c0_21] : memref<4x32x128xf32, #tpu.memory_space<vmem>>, vector<1x32x128xf32>
    %24 = vector.shape_cast %23 : vector<1x32x128xf32> to vector<32x128xf32>
    %cst_22 = arith.constant dense<0.000000e+00> : vector<32x16xf32>
    %25 = tpu.matmul %24, %22, %cst_22 {dimension_numbers = #tpu.dot_dimension_numbers<[1], [0], [0], [1], [0, 0, 1, 1], [], []>} : vector<32x128xf32>, vector<128x16xf32>, vector<32x16xf32> -> vector<32x16xf32>
    %26 = arith.addf %20, %25 : vector<32x16xf32>
    %cst_23 = arith.constant 0.000000e+00 : f32
    %27 = vector.broadcast %cst_23 : f32 to vector<32x16xf32>
    %28 = arith.cmpf oge, %26, %27 : vector<32x16xf32>
    %cst_24 = arith.constant 2.000000e-01 : f32
    %29 = vector.broadcast %cst_24 : f32 to vector<32x16xf32>
    %30 = arith.mulf %29, %26 : vector<32x16xf32>
    %31 = arith.select %28, %26, %30 : vector<32x16xi1>, vector<32x16xf32>
    %c0_25 = arith.constant 0 : index
    %c0_26 = arith.constant 0 : index
    %32 = vector.load %arg4[%c0_25, %c0_26] : memref<1x16xf32, #tpu.memory_space<vmem>>, vector<1x16xf32>
    %33 = vector.broadcast %32 : vector<1x16xf32> to vector<32x16xf32>
    %34 = arith.mulf %31, %33 : vector<32x16xf32>
    %c0_27 = arith.constant 0 : index
    %c0_28 = arith.constant 0 : index
    %c0_29 = arith.constant 0 : index
    %35 = vector.load %arg5[%c0_27, %c0_28, %c0_29] : memref<1x32x16xf32, #tpu.memory_space<vmem>>, vector<1x32x16xf32>
    %36 = vector.shape_cast %35 : vector<1x32x16xf32> to vector<32x16xf32>
    %37 = vector.shape_cast %34 : vector<32x16xf32> to vector<1x32x16xf32>
    tpu.vector_store %arg5[%c0_27, %c0_28, %c0_29], %37 {strides = array<i32>} : memref<1x32x16xf32, #tpu.memory_space<vmem>>, vector<1x32x16xf32>,
    return
  }
  func.func @transform_0(%arg0: i32) -> (i32, i32, i32) {
    %c0_i32 = arith.constant 0 : i32
    %c0_i32_0 = arith.constant 0 : i32
    %c0_i32_1 = arith.constant 0 : i32
    return %arg0, %c0_i32, %c0_i32_0 : i32, i32, i32
  }
  func.func @transform_1(%arg0: i32) -> (i32, i32, i32) {
    %c0_i32 = arith.constant 0 : i32
    %c0_i32_0 = arith.constant 0 : i32
    %c0_i32_1 = arith.constant 0 : i32
    %c0_i32_2 = arith.constant 0 : i32
    return %c0_i32, %c0_i32_0, %c0_i32_1 : i32, i32, i32
  }
  func.func @transform_2(%arg0: i32) -> (i32, i32) {
    %c0_i32 = arith.constant 0 : i32
    %c0_i32_0 = arith.constant 0 : i32
    %c0_i32_1 = arith.constant 0 : i32
    return %c0_i32, %c0_i32_0 : i32, i32
  }
  func.func @transform_3(%arg0: i32) -> (i32, i32) {
    %c0_i32 = arith.constant 0 : i32
    %c0_i32_0 = arith.constant 0 : i32
    %c0_i32_1 = arith.constant 0 : i32
    return %c0_i32, %c0_i32_0 : i32, i32
  }
  func.func @transform_4(%arg0: i32) -> (i32, i32, i32) {
    %c0_i32 = arith.constant 0 : i32
    %c0_i32_0 = arith.constant 0 : i32
    %c0_i32_1 = arith.constant 0 : i32
    return %arg0, %c0_i32, %c0_i32_0 : i32, i32, i32
  }
}

module attributes {stable_mosaic.version = 11 : i64} {
  func.func @_conv_lrelu_kernel(%arg0: i32, %arg1: memref<1x32x26xf32, #tpu.memory_space<vmem>>, %arg2: memref<9x32x32xf32, #tpu.memory_space<vmem>>, %arg3: memref<32x1xf32, #tpu.memory_space<vmem>>, %arg4: memref<1x16xf32, #tpu.memory_space<vmem>>, %arg5: memref<1x32x16xf32, #tpu.memory_space<vmem>>) attributes {dimension_semantics = [#tpu.dimension_semantics<parallel>], iteration_bounds = array<i64: 2>, scalar_prefetch = 0 : i64, scratch_operands = 0 : i64, tpu.core_type = #tpu.core_type<tc>, window_params = [{transform_indices = @transform_0, window_bounds = array<i64: 1, 32, 26>}, {pipeline_mode = #tpu.pipeline_mode<synchronous>, transform_indices = @transform_1, window_bounds = array<i64: 9, 32, 32>}, {pipeline_mode = #tpu.pipeline_mode<synchronous>, transform_indices = @transform_2, window_bounds = array<i64: 32, 1>}, {pipeline_mode = #tpu.pipeline_mode<synchronous>, transform_indices = @transform_3, window_bounds = array<i64: 1, 16>}, {transform_indices = @transform_4, window_bounds = array<i64: 1, 32, 16>}]} {
    %c0 = arith.constant 0 : index
    %c0_0 = arith.constant 0 : index
    %0 = vector.load %arg3[%c0, %c0_0] : memref<32x1xf32, #tpu.memory_space<vmem>>, vector<32x1xf32>
    %1 = vector.shape_cast %0 : vector<32x1xf32> to vector<32x1xf32>
    %2 = vector.broadcast %1 : vector<32x1xf32> to vector<32x16xf32>
    %c0_1 = arith.constant 0 : index
    %c0_2 = arith.constant 0 : index
    %c0_3 = arith.constant 0 : index
    %3 = vector.load %arg1[%c0_1, %c0_2, %c0_3] : memref<1x32x26xf32, #tpu.memory_space<vmem>>, vector<1x32x16xf32>
    %4 = vector.shape_cast %3 : vector<1x32x16xf32> to vector<32x16xf32>
    %c0_4 = arith.constant 0 : index
    %c0_5 = arith.constant 0 : index
    %c0_6 = arith.constant 0 : index
    %5 = vector.load %arg2[%c0_4, %c0_5, %c0_6] : memref<9x32x32xf32, #tpu.memory_space<vmem>>, vector<1x32x32xf32>
    %6 = vector.shape_cast %5 : vector<1x32x32xf32> to vector<32x32xf32>
    %cst = arith.constant dense<0.000000e+00> : vector<32x16xf32>
    %7 = tpu.matmul %6, %4, %cst {dimension_numbers = #tpu.dot_dimension_numbers<[1], [0], [0], [1], [0, 0, 1, 1], [], []>} : vector<32x32xf32>, vector<32x16xf32>, vector<32x16xf32> -> vector<32x16xf32>
    %8 = arith.addf %2, %7 : vector<32x16xf32>
    %c0_7 = arith.constant 0 : index
    %c0_8 = arith.constant 0 : index
    %c1 = arith.constant 1 : index
    %9 = vector.load %arg1[%c0_7, %c0_8, %c1] : memref<1x32x26xf32, #tpu.memory_space<vmem>>, vector<1x32x16xf32>
    %10 = vector.shape_cast %9 : vector<1x32x16xf32> to vector<32x16xf32>
    %c1_9 = arith.constant 1 : index
    %c0_10 = arith.constant 0 : index
    %c0_11 = arith.constant 0 : index
    %11 = vector.load %arg2[%c1_9, %c0_10, %c0_11] : memref<9x32x32xf32, #tpu.memory_space<vmem>>, vector<1x32x32xf32>
    %12 = vector.shape_cast %11 : vector<1x32x32xf32> to vector<32x32xf32>
    %cst_12 = arith.constant dense<0.000000e+00> : vector<32x16xf32>
    %13 = tpu.matmul %12, %10, %cst_12 {dimension_numbers = #tpu.dot_dimension_numbers<[1], [0], [0], [1], [0, 0, 1, 1], [], []>} : vector<32x32xf32>, vector<32x16xf32>, vector<32x16xf32> -> vector<32x16xf32>
    %14 = arith.addf %8, %13 : vector<32x16xf32>
    %c0_13 = arith.constant 0 : index
    %c0_14 = arith.constant 0 : index
    %c2 = arith.constant 2 : index
    %15 = vector.load %arg1[%c0_13, %c0_14, %c2] : memref<1x32x26xf32, #tpu.memory_space<vmem>>, vector<1x32x16xf32>
    %16 = vector.shape_cast %15 : vector<1x32x16xf32> to vector<32x16xf32>
    %c2_15 = arith.constant 2 : index
    %c0_16 = arith.constant 0 : index
    %c0_17 = arith.constant 0 : index
    %17 = vector.load %arg2[%c2_15, %c0_16, %c0_17] : memref<9x32x32xf32, #tpu.memory_space<vmem>>, vector<1x32x32xf32>
    %18 = vector.shape_cast %17 : vector<1x32x32xf32> to vector<32x32xf32>
    %cst_18 = arith.constant dense<0.000000e+00> : vector<32x16xf32>
    %19 = tpu.matmul %18, %16, %cst_18 {dimension_numbers = #tpu.dot_dimension_numbers<[1], [0], [0], [1], [0, 0, 1, 1], [], []>} : vector<32x32xf32>, vector<32x16xf32>, vector<32x16xf32> -> vector<32x16xf32>
    %20 = arith.addf %14, %19 : vector<32x16xf32>
    %c0_19 = arith.constant 0 : index
    %c0_20 = arith.constant 0 : index
    %c4 = arith.constant 4 : index
    %21 = vector.load %arg1[%c0_19, %c0_20, %c4] : memref<1x32x26xf32, #tpu.memory_space<vmem>>, vector<1x32x16xf32>
    %22 = vector.shape_cast %21 : vector<1x32x16xf32> to vector<32x16xf32>
    %c3 = arith.constant 3 : index
    %c0_21 = arith.constant 0 : index
    %c0_22 = arith.constant 0 : index
    %23 = vector.load %arg2[%c3, %c0_21, %c0_22] : memref<9x32x32xf32, #tpu.memory_space<vmem>>, vector<1x32x32xf32>
    %24 = vector.shape_cast %23 : vector<1x32x32xf32> to vector<32x32xf32>
    %cst_23 = arith.constant dense<0.000000e+00> : vector<32x16xf32>
    %25 = tpu.matmul %24, %22, %cst_23 {dimension_numbers = #tpu.dot_dimension_numbers<[1], [0], [0], [1], [0, 0, 1, 1], [], []>} : vector<32x32xf32>, vector<32x16xf32>, vector<32x16xf32> -> vector<32x16xf32>
    %26 = arith.addf %20, %25 : vector<32x16xf32>
    %c0_24 = arith.constant 0 : index
    %c0_25 = arith.constant 0 : index
    %c5 = arith.constant 5 : index
    %27 = vector.load %arg1[%c0_24, %c0_25, %c5] : memref<1x32x26xf32, #tpu.memory_space<vmem>>, vector<1x32x16xf32>
    %28 = vector.shape_cast %27 : vector<1x32x16xf32> to vector<32x16xf32>
    %c4_26 = arith.constant 4 : index
    %c0_27 = arith.constant 0 : index
    %c0_28 = arith.constant 0 : index
    %29 = vector.load %arg2[%c4_26, %c0_27, %c0_28] : memref<9x32x32xf32, #tpu.memory_space<vmem>>, vector<1x32x32xf32>
    %30 = vector.shape_cast %29 : vector<1x32x32xf32> to vector<32x32xf32>
    %cst_29 = arith.constant dense<0.000000e+00> : vector<32x16xf32>
    %31 = tpu.matmul %30, %28, %cst_29 {dimension_numbers = #tpu.dot_dimension_numbers<[1], [0], [0], [1], [0, 0, 1, 1], [], []>} : vector<32x32xf32>, vector<32x16xf32>, vector<32x16xf32> -> vector<32x16xf32>
    %32 = arith.addf %26, %31 : vector<32x16xf32>
    %c0_30 = arith.constant 0 : index
    %c0_31 = arith.constant 0 : index
    %c6 = arith.constant 6 : index
    %33 = vector.load %arg1[%c0_30, %c0_31, %c6] : memref<1x32x26xf32, #tpu.memory_space<vmem>>, vector<1x32x16xf32>
    %34 = vector.shape_cast %33 : vector<1x32x16xf32> to vector<32x16xf32>
    %c5_32 = arith.constant 5 : index
    %c0_33 = arith.constant 0 : index
    %c0_34 = arith.constant 0 : index
    %35 = vector.load %arg2[%c5_32, %c0_33, %c0_34] : memref<9x32x32xf32, #tpu.memory_space<vmem>>, vector<1x32x32xf32>
    %36 = vector.shape_cast %35 : vector<1x32x32xf32> to vector<32x32xf32>
    %cst_35 = arith.constant dense<0.000000e+00> : vector<32x16xf32>
    %37 = tpu.matmul %36, %34, %cst_35 {dimension_numbers = #tpu.dot_dimension_numbers<[1], [0], [0], [1], [0, 0, 1, 1], [], []>} : vector<32x32xf32>, vector<32x16xf32>, vector<32x16xf32> -> vector<32x16xf32>
    %38 = arith.addf %32, %37 : vector<32x16xf32>
    %c0_36 = arith.constant 0 : index
    %c0_37 = arith.constant 0 : index
    %c8 = arith.constant 8 : index
    %39 = vector.load %arg1[%c0_36, %c0_37, %c8] : memref<1x32x26xf32, #tpu.memory_space<vmem>>, vector<1x32x16xf32>
    %40 = vector.shape_cast %39 : vector<1x32x16xf32> to vector<32x16xf32>
    %c6_38 = arith.constant 6 : index
    %c0_39 = arith.constant 0 : index
    %c0_40 = arith.constant 0 : index
    %41 = vector.load %arg2[%c6_38, %c0_39, %c0_40] : memref<9x32x32xf32, #tpu.memory_space<vmem>>, vector<1x32x32xf32>
    %42 = vector.shape_cast %41 : vector<1x32x32xf32> to vector<32x32xf32>
    %cst_41 = arith.constant dense<0.000000e+00> : vector<32x16xf32>
    %43 = tpu.matmul %42, %40, %cst_41 {dimension_numbers = #tpu.dot_dimension_numbers<[1], [0], [0], [1], [0, 0, 1, 1], [], []>} : vector<32x32xf32>, vector<32x16xf32>, vector<32x16xf32> -> vector<32x16xf32>
    %44 = arith.addf %38, %43 : vector<32x16xf32>
    %c0_42 = arith.constant 0 : index
    %c0_43 = arith.constant 0 : index
    %c9 = arith.constant 9 : index
    %45 = vector.load %arg1[%c0_42, %c0_43, %c9] : memref<1x32x26xf32, #tpu.memory_space<vmem>>, vector<1x32x16xf32>
    %46 = vector.shape_cast %45 : vector<1x32x16xf32> to vector<32x16xf32>
    %c7 = arith.constant 7 : index
    %c0_44 = arith.constant 0 : index
    %c0_45 = arith.constant 0 : index
    %47 = vector.load %arg2[%c7, %c0_44, %c0_45] : memref<9x32x32xf32, #tpu.memory_space<vmem>>, vector<1x32x32xf32>
    %48 = vector.shape_cast %47 : vector<1x32x32xf32> to vector<32x32xf32>
    %cst_46 = arith.constant dense<0.000000e+00> : vector<32x16xf32>
    %49 = tpu.matmul %48, %46, %cst_46 {dimension_numbers = #tpu.dot_dimension_numbers<[1], [0], [0], [1], [0, 0, 1, 1], [], []>} : vector<32x32xf32>, vector<32x16xf32>, vector<32x16xf32> -> vector<32x16xf32>
    %50 = arith.addf %44, %49 : vector<32x16xf32>
    %c0_47 = arith.constant 0 : index
    %c0_48 = arith.constant 0 : index
    %c10 = arith.constant 10 : index
    %51 = vector.load %arg1[%c0_47, %c0_48, %c10] : memref<1x32x26xf32, #tpu.memory_space<vmem>>, vector<1x32x16xf32>
    %52 = vector.shape_cast %51 : vector<1x32x16xf32> to vector<32x16xf32>
    %c8_49 = arith.constant 8 : index
    %c0_50 = arith.constant 0 : index
    %c0_51 = arith.constant 0 : index
    %53 = vector.load %arg2[%c8_49, %c0_50, %c0_51] : memref<9x32x32xf32, #tpu.memory_space<vmem>>, vector<1x32x32xf32>
    %54 = vector.shape_cast %53 : vector<1x32x32xf32> to vector<32x32xf32>
    %cst_52 = arith.constant dense<0.000000e+00> : vector<32x16xf32>
    %55 = tpu.matmul %54, %52, %cst_52 {dimension_numbers = #tpu.dot_dimension_numbers<[1], [0], [0], [1], [0, 0, 1, 1], [], []>} : vector<32x32xf32>, vector<32x16xf32>, vector<32x16xf32> -> vector<32x16xf32>
    %56 = arith.addf %50, %55 : vector<32x16xf32>
    %cst_53 = arith.constant 0.000000e+00 : f32
    %57 = vector.broadcast %cst_53 : f32 to vector<32x16xf32>
    %58 = arith.cmpf oge, %56, %57 : vector<32x16xf32>
    %cst_54 = arith.constant 2.000000e-01 : f32
    %59 = vector.broadcast %cst_54 : f32 to vector<32x16xf32>
    %60 = arith.mulf %59, %56 : vector<32x16xf32>
    %61 = arith.select %58, %56, %60 : vector<32x16xi1>, vector<32x16xf32>
    %c0_55 = arith.constant 0 : index
    %c0_56 = arith.constant 0 : index
    %62 = vector.load %arg4[%c0_55, %c0_56] : memref<1x16xf32, #tpu.memory_space<vmem>>, vector<1x16xf32>
    %63 = vector.broadcast %62 : vector<1x16xf32> to vector<32x16xf32>
    %64 = arith.mulf %61, %63 : vector<32x16xf32>
    %c0_57 = arith.constant 0 : index
    %c0_58 = arith.constant 0 : index
    %c0_59 = arith.constant 0 : index
    %65 = vector.load %arg5[%c0_57, %c0_58, %c0_59] : memref<1x32x16xf32, #tpu.memory_space<vmem>>, vector<1x32x16xf32>
    %66 = vector.shape_cast %65 : vector<1x32x16xf32> to vector<32x16xf32>
    %67 = vector.shape_cast %64 : vector<32x16xf32> to vector<1x32x16xf32>
    tpu.vector_store %arg5[%c0_57, %c0_58, %c0_59], %67 {strides = array<i32>} : memref<1x32x16xf32, #tpu.memory_space<vmem>>, vector<1x32x16xf32>,
    return
  }
  func.func @transform_0(%arg0: i32) -> (i32, i32, i32) {
    %c0_i32 = arith.constant 0 : i32
    %c0_i32_0 = arith.constant 0 : i32
    %c0_i32_1 = arith.constant 0 : i32
    return %arg0, %c0_i32, %c0_i32_0 : i32, i32, i32
  }
  func.func @transform_1(%arg0: i32) -> (i32, i32, i32) {
    %c0_i32 = arith.constant 0 : i32
    %c0_i32_0 = arith.constant 0 : i32
    %c0_i32_1 = arith.constant 0 : i32
    %c0_i32_2 = arith.constant 0 : i32
    return %c0_i32, %c0_i32_0, %c0_i32_1 : i32, i32, i32
  }
  func.func @transform_2(%arg0: i32) -> (i32, i32) {
    %c0_i32 = arith.constant 0 : i32
    %c0_i32_0 = arith.constant 0 : i32
    %c0_i32_1 = arith.constant 0 : i32
    return %c0_i32, %c0_i32_0 : i32, i32
  }
  func.func @transform_3(%arg0: i32) -> (i32, i32) {
    %c0_i32 = arith.constant 0 : i32
    %c0_i32_0 = arith.constant 0 : i32
    %c0_i32_1 = arith.constant 0 : i32
    return %c0_i32, %c0_i32_0 : i32, i32
  }
  func.func @transform_4(%arg0: i32) -> (i32, i32, i32) {
    %c0_i32 = arith.constant 0 : i32
    %c0_i32_0 = arith.constant 0 : i32
    %c0_i32_1 = arith.constant 0 : i32
    return %arg0, %c0_i32, %c0_i32_0 : i32, i32, i32
  }
}

module attributes {stable_mosaic.version = 11 : i64} {
  func.func @_conv_lrelu_kernel(%arg0: i32, %arg1: memref<1x64x50xf32, #tpu.memory_space<vmem>>, %arg2: memref<9x32x64xf32, #tpu.memory_space<vmem>>, %arg3: memref<32x1xf32, #tpu.memory_space<vmem>>, %arg4: memref<1x36xf32, #tpu.memory_space<vmem>>, %arg5: memref<1x32x36xf32, #tpu.memory_space<vmem>>) attributes {dimension_semantics = [#tpu.dimension_semantics<parallel>], iteration_bounds = array<i64: 2>, scalar_prefetch = 0 : i64, scratch_operands = 0 : i64, tpu.core_type = #tpu.core_type<tc>, window_params = [{transform_indices = @transform_0, window_bounds = array<i64: 1, 64, 50>}, {pipeline_mode = #tpu.pipeline_mode<synchronous>, transform_indices = @transform_1, window_bounds = array<i64: 9, 32, 64>}, {pipeline_mode = #tpu.pipeline_mode<synchronous>, transform_indices = @transform_2, window_bounds = array<i64: 32, 1>}, {pipeline_mode = #tpu.pipeline_mode<synchronous>, transform_indices = @transform_3, window_bounds = array<i64: 1, 36>}, {transform_indices = @transform_4, window_bounds = array<i64: 1, 32, 36>}]} {
    %c0 = arith.constant 0 : index
    %c0_0 = arith.constant 0 : index
    %0 = vector.load %arg3[%c0, %c0_0] : memref<32x1xf32, #tpu.memory_space<vmem>>, vector<32x1xf32>
    %1 = vector.shape_cast %0 : vector<32x1xf32> to vector<32x1xf32>
    %2 = vector.broadcast %1 : vector<32x1xf32> to vector<32x36xf32>
    %c0_1 = arith.constant 0 : index
    %c0_2 = arith.constant 0 : index
    %c0_3 = arith.constant 0 : index
    %3 = vector.load %arg1[%c0_1, %c0_2, %c0_3] : memref<1x64x50xf32, #tpu.memory_space<vmem>>, vector<1x64x36xf32>
    %4 = vector.shape_cast %3 : vector<1x64x36xf32> to vector<64x36xf32>
    %c0_4 = arith.constant 0 : index
    %c0_5 = arith.constant 0 : index
    %c0_6 = arith.constant 0 : index
    %5 = vector.load %arg2[%c0_4, %c0_5, %c0_6] : memref<9x32x64xf32, #tpu.memory_space<vmem>>, vector<1x32x64xf32>
    %6 = vector.shape_cast %5 : vector<1x32x64xf32> to vector<32x64xf32>
    %cst = arith.constant dense<0.000000e+00> : vector<32x36xf32>
    %7 = tpu.matmul %6, %4, %cst {dimension_numbers = #tpu.dot_dimension_numbers<[1], [0], [0], [1], [0, 0, 1, 1], [], []>} : vector<32x64xf32>, vector<64x36xf32>, vector<32x36xf32> -> vector<32x36xf32>
    %8 = arith.addf %2, %7 : vector<32x36xf32>
    %c0_7 = arith.constant 0 : index
    %c0_8 = arith.constant 0 : index
    %c1 = arith.constant 1 : index
    %9 = vector.load %arg1[%c0_7, %c0_8, %c1] : memref<1x64x50xf32, #tpu.memory_space<vmem>>, vector<1x64x36xf32>
    %10 = vector.shape_cast %9 : vector<1x64x36xf32> to vector<64x36xf32>
    %c1_9 = arith.constant 1 : index
    %c0_10 = arith.constant 0 : index
    %c0_11 = arith.constant 0 : index
    %11 = vector.load %arg2[%c1_9, %c0_10, %c0_11] : memref<9x32x64xf32, #tpu.memory_space<vmem>>, vector<1x32x64xf32>
    %12 = vector.shape_cast %11 : vector<1x32x64xf32> to vector<32x64xf32>
    %cst_12 = arith.constant dense<0.000000e+00> : vector<32x36xf32>
    %13 = tpu.matmul %12, %10, %cst_12 {dimension_numbers = #tpu.dot_dimension_numbers<[1], [0], [0], [1], [0, 0, 1, 1], [], []>} : vector<32x64xf32>, vector<64x36xf32>, vector<32x36xf32> -> vector<32x36xf32>
    %14 = arith.addf %8, %13 : vector<32x36xf32>
    %c0_13 = arith.constant 0 : index
    %c0_14 = arith.constant 0 : index
    %c2 = arith.constant 2 : index
    %15 = vector.load %arg1[%c0_13, %c0_14, %c2] : memref<1x64x50xf32, #tpu.memory_space<vmem>>, vector<1x64x36xf32>
    %16 = vector.shape_cast %15 : vector<1x64x36xf32> to vector<64x36xf32>
    %c2_15 = arith.constant 2 : index
    %c0_16 = arith.constant 0 : index
    %c0_17 = arith.constant 0 : index
    %17 = vector.load %arg2[%c2_15, %c0_16, %c0_17] : memref<9x32x64xf32, #tpu.memory_space<vmem>>, vector<1x32x64xf32>
    %18 = vector.shape_cast %17 : vector<1x32x64xf32> to vector<32x64xf32>
    %cst_18 = arith.constant dense<0.000000e+00> : vector<32x36xf32>
    %19 = tpu.matmul %18, %16, %cst_18 {dimension_numbers = #tpu.dot_dimension_numbers<[1], [0], [0], [1], [0, 0, 1, 1], [], []>} : vector<32x64xf32>, vector<64x36xf32>, vector<32x36xf32> -> vector<32x36xf32>
    %20 = arith.addf %14, %19 : vector<32x36xf32>
    %c0_19 = arith.constant 0 : index
    %c0_20 = arith.constant 0 : index
    %c6 = arith.constant 6 : index
    %21 = vector.load %arg1[%c0_19, %c0_20, %c6] : memref<1x64x50xf32, #tpu.memory_space<vmem>>, vector<1x64x36xf32>
    %22 = vector.shape_cast %21 : vector<1x64x36xf32> to vector<64x36xf32>
    %c3 = arith.constant 3 : index
    %c0_21 = arith.constant 0 : index
    %c0_22 = arith.constant 0 : index
    %23 = vector.load %arg2[%c3, %c0_21, %c0_22] : memref<9x32x64xf32, #tpu.memory_space<vmem>>, vector<1x32x64xf32>
    %24 = vector.shape_cast %23 : vector<1x32x64xf32> to vector<32x64xf32>
    %cst_23 = arith.constant dense<0.000000e+00> : vector<32x36xf32>
    %25 = tpu.matmul %24, %22, %cst_23 {dimension_numbers = #tpu.dot_dimension_numbers<[1], [0], [0], [1], [0, 0, 1, 1], [], []>} : vector<32x64xf32>, vector<64x36xf32>, vector<32x36xf32> -> vector<32x36xf32>
    %26 = arith.addf %20, %25 : vector<32x36xf32>
    %c0_24 = arith.constant 0 : index
    %c0_25 = arith.constant 0 : index
    %c7 = arith.constant 7 : index
    %27 = vector.load %arg1[%c0_24, %c0_25, %c7] : memref<1x64x50xf32, #tpu.memory_space<vmem>>, vector<1x64x36xf32>
    %28 = vector.shape_cast %27 : vector<1x64x36xf32> to vector<64x36xf32>
    %c4 = arith.constant 4 : index
    %c0_26 = arith.constant 0 : index
    %c0_27 = arith.constant 0 : index
    %29 = vector.load %arg2[%c4, %c0_26, %c0_27] : memref<9x32x64xf32, #tpu.memory_space<vmem>>, vector<1x32x64xf32>
    %30 = vector.shape_cast %29 : vector<1x32x64xf32> to vector<32x64xf32>
    %cst_28 = arith.constant dense<0.000000e+00> : vector<32x36xf32>
    %31 = tpu.matmul %30, %28, %cst_28 {dimension_numbers = #tpu.dot_dimension_numbers<[1], [0], [0], [1], [0, 0, 1, 1], [], []>} : vector<32x64xf32>, vector<64x36xf32>, vector<32x36xf32> -> vector<32x36xf32>
    %32 = arith.addf %26, %31 : vector<32x36xf32>
    %c0_29 = arith.constant 0 : index
    %c0_30 = arith.constant 0 : index
    %c8 = arith.constant 8 : index
    %33 = vector.load %arg1[%c0_29, %c0_30, %c8] : memref<1x64x50xf32, #tpu.memory_space<vmem>>, vector<1x64x36xf32>
    %34 = vector.shape_cast %33 : vector<1x64x36xf32> to vector<64x36xf32>
    %c5 = arith.constant 5 : index
    %c0_31 = arith.constant 0 : index
    %c0_32 = arith.constant 0 : index
    %35 = vector.load %arg2[%c5, %c0_31, %c0_32] : memref<9x32x64xf32, #tpu.memory_space<vmem>>, vector<1x32x64xf32>
    %36 = vector.shape_cast %35 : vector<1x32x64xf32> to vector<32x64xf32>
    %cst_33 = arith.constant dense<0.000000e+00> : vector<32x36xf32>
    %37 = tpu.matmul %36, %34, %cst_33 {dimension_numbers = #tpu.dot_dimension_numbers<[1], [0], [0], [1], [0, 0, 1, 1], [], []>} : vector<32x64xf32>, vector<64x36xf32>, vector<32x36xf32> -> vector<32x36xf32>
    %38 = arith.addf %32, %37 : vector<32x36xf32>
    %c0_34 = arith.constant 0 : index
    %c0_35 = arith.constant 0 : index
    %c12 = arith.constant 12 : index
    %39 = vector.load %arg1[%c0_34, %c0_35, %c12] : memref<1x64x50xf32, #tpu.memory_space<vmem>>, vector<1x64x36xf32>
    %40 = vector.shape_cast %39 : vector<1x64x36xf32> to vector<64x36xf32>
    %c6_36 = arith.constant 6 : index
    %c0_37 = arith.constant 0 : index
    %c0_38 = arith.constant 0 : index
    %41 = vector.load %arg2[%c6_36, %c0_37, %c0_38] : memref<9x32x64xf32, #tpu.memory_space<vmem>>, vector<1x32x64xf32>
    %42 = vector.shape_cast %41 : vector<1x32x64xf32> to vector<32x64xf32>
    %cst_39 = arith.constant dense<0.000000e+00> : vector<32x36xf32>
    %43 = tpu.matmul %42, %40, %cst_39 {dimension_numbers = #tpu.dot_dimension_numbers<[1], [0], [0], [1], [0, 0, 1, 1], [], []>} : vector<32x64xf32>, vector<64x36xf32>, vector<32x36xf32> -> vector<32x36xf32>
    %44 = arith.addf %38, %43 : vector<32x36xf32>
    %c0_40 = arith.constant 0 : index
    %c0_41 = arith.constant 0 : index
    %c13 = arith.constant 13 : index
    %45 = vector.load %arg1[%c0_40, %c0_41, %c13] : memref<1x64x50xf32, #tpu.memory_space<vmem>>, vector<1x64x36xf32>
    %46 = vector.shape_cast %45 : vector<1x64x36xf32> to vector<64x36xf32>
    %c7_42 = arith.constant 7 : index
    %c0_43 = arith.constant 0 : index
    %c0_44 = arith.constant 0 : index
    %47 = vector.load %arg2[%c7_42, %c0_43, %c0_44] : memref<9x32x64xf32, #tpu.memory_space<vmem>>, vector<1x32x64xf32>
    %48 = vector.shape_cast %47 : vector<1x32x64xf32> to vector<32x64xf32>
    %cst_45 = arith.constant dense<0.000000e+00> : vector<32x36xf32>
    %49 = tpu.matmul %48, %46, %cst_45 {dimension_numbers = #tpu.dot_dimension_numbers<[1], [0], [0], [1], [0, 0, 1, 1], [], []>} : vector<32x64xf32>, vector<64x36xf32>, vector<32x36xf32> -> vector<32x36xf32>
    %50 = arith.addf %44, %49 : vector<32x36xf32>
    %c0_46 = arith.constant 0 : index
    %c0_47 = arith.constant 0 : index
    %c14 = arith.constant 14 : index
    %51 = vector.load %arg1[%c0_46, %c0_47, %c14] : memref<1x64x50xf32, #tpu.memory_space<vmem>>, vector<1x64x36xf32>
    %52 = vector.shape_cast %51 : vector<1x64x36xf32> to vector<64x36xf32>
    %c8_48 = arith.constant 8 : index
    %c0_49 = arith.constant 0 : index
    %c0_50 = arith.constant 0 : index
    %53 = vector.load %arg2[%c8_48, %c0_49, %c0_50] : memref<9x32x64xf32, #tpu.memory_space<vmem>>, vector<1x32x64xf32>
    %54 = vector.shape_cast %53 : vector<1x32x64xf32> to vector<32x64xf32>
    %cst_51 = arith.constant dense<0.000000e+00> : vector<32x36xf32>
    %55 = tpu.matmul %54, %52, %cst_51 {dimension_numbers = #tpu.dot_dimension_numbers<[1], [0], [0], [1], [0, 0, 1, 1], [], []>} : vector<32x64xf32>, vector<64x36xf32>, vector<32x36xf32> -> vector<32x36xf32>
    %56 = arith.addf %50, %55 : vector<32x36xf32>
    %cst_52 = arith.constant 0.000000e+00 : f32
    %57 = vector.broadcast %cst_52 : f32 to vector<32x36xf32>
    %58 = arith.cmpf oge, %56, %57 : vector<32x36xf32>
    %cst_53 = arith.constant 2.000000e-01 : f32
    %59 = vector.broadcast %cst_53 : f32 to vector<32x36xf32>
    %60 = arith.mulf %59, %56 : vector<32x36xf32>
    %61 = arith.select %58, %56, %60 : vector<32x36xi1>, vector<32x36xf32>
    %c0_54 = arith.constant 0 : index
    %c0_55 = arith.constant 0 : index
    %62 = vector.load %arg4[%c0_54, %c0_55] : memref<1x36xf32, #tpu.memory_space<vmem>>, vector<1x36xf32>
    %63 = vector.broadcast %62 : vector<1x36xf32> to vector<32x36xf32>
    %64 = arith.mulf %61, %63 : vector<32x36xf32>
    %c0_56 = arith.constant 0 : index
    %c0_57 = arith.constant 0 : index
    %c0_58 = arith.constant 0 : index
    %65 = vector.load %arg5[%c0_56, %c0_57, %c0_58] : memref<1x32x36xf32, #tpu.memory_space<vmem>>, vector<1x32x36xf32>
    %66 = vector.shape_cast %65 : vector<1x32x36xf32> to vector<32x36xf32>
    %67 = vector.shape_cast %64 : vector<32x36xf32> to vector<1x32x36xf32>
    tpu.vector_store %arg5[%c0_56, %c0_57, %c0_58], %67 {strides = array<i32>} : memref<1x32x36xf32, #tpu.memory_space<vmem>>, vector<1x32x36xf32>,
    return
  }
  func.func @transform_0(%arg0: i32) -> (i32, i32, i32) {
    %c0_i32 = arith.constant 0 : i32
    %c0_i32_0 = arith.constant 0 : i32
    %c0_i32_1 = arith.constant 0 : i32
    return %arg0, %c0_i32, %c0_i32_0 : i32, i32, i32
  }
  func.func @transform_1(%arg0: i32) -> (i32, i32, i32) {
    %c0_i32 = arith.constant 0 : i32
    %c0_i32_0 = arith.constant 0 : i32
    %c0_i32_1 = arith.constant 0 : i32
    %c0_i32_2 = arith.constant 0 : i32
    return %c0_i32, %c0_i32_0, %c0_i32_1 : i32, i32, i32
  }
  func.func @transform_2(%arg0: i32) -> (i32, i32) {
    %c0_i32 = arith.constant 0 : i32
    %c0_i32_0 = arith.constant 0 : i32
    %c0_i32_1 = arith.constant 0 : i32
    return %c0_i32, %c0_i32_0 : i32, i32
  }
  func.func @transform_3(%arg0: i32) -> (i32, i32) {
    %c0_i32 = arith.constant 0 : i32
    %c0_i32_0 = arith.constant 0 : i32
    %c0_i32_1 = arith.constant 0 : i32
    return %c0_i32, %c0_i32_0 : i32, i32
  }
  func.func @transform_4(%arg0: i32) -> (i32, i32, i32) {
    %c0_i32 = arith.constant 0 : i32
    %c0_i32_0 = arith.constant 0 : i32
    %c0_i32_1 = arith.constant 0 : i32
    return %arg0, %c0_i32, %c0_i32_0 : i32, i32, i32
  }
}

module attributes {stable_mosaic.version = 11 : i64} {
  func.func @_conv_lrelu_kernel(%arg0: i32, %arg1: memref<1x64x122xf32, #tpu.memory_space<vmem>>, %arg2: memref<9x32x64xf32, #tpu.memory_space<vmem>>, %arg3: memref<32x1xf32, #tpu.memory_space<vmem>>, %arg4: memref<1x100xf32, #tpu.memory_space<vmem>>, %arg5: memref<1x32x100xf32, #tpu.memory_space<vmem>>) attributes {dimension_semantics = [#tpu.dimension_semantics<parallel>], iteration_bounds = array<i64: 2>, scalar_prefetch = 0 : i64, scratch_operands = 0 : i64, tpu.core_type = #tpu.core_type<tc>, window_params = [{transform_indices = @transform_0, window_bounds = array<i64: 1, 64, 122>}, {pipeline_mode = #tpu.pipeline_mode<synchronous>, transform_indices = @transform_1, window_bounds = array<i64: 9, 32, 64>}, {pipeline_mode = #tpu.pipeline_mode<synchronous>, transform_indices = @transform_2, window_bounds = array<i64: 32, 1>}, {pipeline_mode = #tpu.pipeline_mode<synchronous>, transform_indices = @transform_3, window_bounds = array<i64: 1, 100>}, {transform_indices = @transform_4, window_bounds = array<i64: 1, 32, 100>}]} {
    %c0 = arith.constant 0 : index
    %c0_0 = arith.constant 0 : index
    %0 = vector.load %arg3[%c0, %c0_0] : memref<32x1xf32, #tpu.memory_space<vmem>>, vector<32x1xf32>
    %1 = vector.shape_cast %0 : vector<32x1xf32> to vector<32x1xf32>
    %2 = vector.broadcast %1 : vector<32x1xf32> to vector<32x100xf32>
    %c0_1 = arith.constant 0 : index
    %c0_2 = arith.constant 0 : index
    %c0_3 = arith.constant 0 : index
    %3 = vector.load %arg1[%c0_1, %c0_2, %c0_3] : memref<1x64x122xf32, #tpu.memory_space<vmem>>, vector<1x64x100xf32>
    %4 = vector.shape_cast %3 : vector<1x64x100xf32> to vector<64x100xf32>
    %c0_4 = arith.constant 0 : index
    %c0_5 = arith.constant 0 : index
    %c0_6 = arith.constant 0 : index
    %5 = vector.load %arg2[%c0_4, %c0_5, %c0_6] : memref<9x32x64xf32, #tpu.memory_space<vmem>>, vector<1x32x64xf32>
    %6 = vector.shape_cast %5 : vector<1x32x64xf32> to vector<32x64xf32>
    %cst = arith.constant dense<0.000000e+00> : vector<32x100xf32>
    %7 = tpu.matmul %6, %4, %cst {dimension_numbers = #tpu.dot_dimension_numbers<[1], [0], [0], [1], [0, 0, 1, 1], [], []>} : vector<32x64xf32>, vector<64x100xf32>, vector<32x100xf32> -> vector<32x100xf32>
    %8 = arith.addf %2, %7 : vector<32x100xf32>
    %c0_7 = arith.constant 0 : index
    %c0_8 = arith.constant 0 : index
    %c1 = arith.constant 1 : index
    %9 = vector.load %arg1[%c0_7, %c0_8, %c1] : memref<1x64x122xf32, #tpu.memory_space<vmem>>, vector<1x64x100xf32>
    %10 = vector.shape_cast %9 : vector<1x64x100xf32> to vector<64x100xf32>
    %c1_9 = arith.constant 1 : index
    %c0_10 = arith.constant 0 : index
    %c0_11 = arith.constant 0 : index
    %11 = vector.load %arg2[%c1_9, %c0_10, %c0_11] : memref<9x32x64xf32, #tpu.memory_space<vmem>>, vector<1x32x64xf32>
    %12 = vector.shape_cast %11 : vector<1x32x64xf32> to vector<32x64xf32>
    %cst_12 = arith.constant dense<0.000000e+00> : vector<32x100xf32>
    %13 = tpu.matmul %12, %10, %cst_12 {dimension_numbers = #tpu.dot_dimension_numbers<[1], [0], [0], [1], [0, 0, 1, 1], [], []>} : vector<32x64xf32>, vector<64x100xf32>, vector<32x100xf32> -> vector<32x100xf32>
    %14 = arith.addf %8, %13 : vector<32x100xf32>
    %c0_13 = arith.constant 0 : index
    %c0_14 = arith.constant 0 : index
    %c2 = arith.constant 2 : index
    %15 = vector.load %arg1[%c0_13, %c0_14, %c2] : memref<1x64x122xf32, #tpu.memory_space<vmem>>, vector<1x64x100xf32>
    %16 = vector.shape_cast %15 : vector<1x64x100xf32> to vector<64x100xf32>
    %c2_15 = arith.constant 2 : index
    %c0_16 = arith.constant 0 : index
    %c0_17 = arith.constant 0 : index
    %17 = vector.load %arg2[%c2_15, %c0_16, %c0_17] : memref<9x32x64xf32, #tpu.memory_space<vmem>>, vector<1x32x64xf32>
    %18 = vector.shape_cast %17 : vector<1x32x64xf32> to vector<32x64xf32>
    %cst_18 = arith.constant dense<0.000000e+00> : vector<32x100xf32>
    %19 = tpu.matmul %18, %16, %cst_18 {dimension_numbers = #tpu.dot_dimension_numbers<[1], [0], [0], [1], [0, 0, 1, 1], [], []>} : vector<32x64xf32>, vector<64x100xf32>, vector<32x100xf32> -> vector<32x100xf32>
    %20 = arith.addf %14, %19 : vector<32x100xf32>
    %c0_19 = arith.constant 0 : index
    %c0_20 = arith.constant 0 : index
    %c10 = arith.constant 10 : index
    %21 = vector.load %arg1[%c0_19, %c0_20, %c10] : memref<1x64x122xf32, #tpu.memory_space<vmem>>, vector<1x64x100xf32>
    %22 = vector.shape_cast %21 : vector<1x64x100xf32> to vector<64x100xf32>
    %c3 = arith.constant 3 : index
    %c0_21 = arith.constant 0 : index
    %c0_22 = arith.constant 0 : index
    %23 = vector.load %arg2[%c3, %c0_21, %c0_22] : memref<9x32x64xf32, #tpu.memory_space<vmem>>, vector<1x32x64xf32>
    %24 = vector.shape_cast %23 : vector<1x32x64xf32> to vector<32x64xf32>
    %cst_23 = arith.constant dense<0.000000e+00> : vector<32x100xf32>
    %25 = tpu.matmul %24, %22, %cst_23 {dimension_numbers = #tpu.dot_dimension_numbers<[1], [0], [0], [1], [0, 0, 1, 1], [], []>} : vector<32x64xf32>, vector<64x100xf32>, vector<32x100xf32> -> vector<32x100xf32>
    %26 = arith.addf %20, %25 : vector<32x100xf32>
    %c0_24 = arith.constant 0 : index
    %c0_25 = arith.constant 0 : index
    %c11 = arith.constant 11 : index
    %27 = vector.load %arg1[%c0_24, %c0_25, %c11] : memref<1x64x122xf32, #tpu.memory_space<vmem>>, vector<1x64x100xf32>
    %28 = vector.shape_cast %27 : vector<1x64x100xf32> to vector<64x100xf32>
    %c4 = arith.constant 4 : index
    %c0_26 = arith.constant 0 : index
    %c0_27 = arith.constant 0 : index
    %29 = vector.load %arg2[%c4, %c0_26, %c0_27] : memref<9x32x64xf32, #tpu.memory_space<vmem>>, vector<1x32x64xf32>
    %30 = vector.shape_cast %29 : vector<1x32x64xf32> to vector<32x64xf32>
    %cst_28 = arith.constant dense<0.000000e+00> : vector<32x100xf32>
    %31 = tpu.matmul %30, %28, %cst_28 {dimension_numbers = #tpu.dot_dimension_numbers<[1], [0], [0], [1], [0, 0, 1, 1], [], []>} : vector<32x64xf32>, vector<64x100xf32>, vector<32x100xf32> -> vector<32x100xf32>
    %32 = arith.addf %26, %31 : vector<32x100xf32>
    %c0_29 = arith.constant 0 : index
    %c0_30 = arith.constant 0 : index
    %c12 = arith.constant 12 : index
    %33 = vector.load %arg1[%c0_29, %c0_30, %c12] : memref<1x64x122xf32, #tpu.memory_space<vmem>>, vector<1x64x100xf32>
    %34 = vector.shape_cast %33 : vector<1x64x100xf32> to vector<64x100xf32>
    %c5 = arith.constant 5 : index
    %c0_31 = arith.constant 0 : index
    %c0_32 = arith.constant 0 : index
    %35 = vector.load %arg2[%c5, %c0_31, %c0_32] : memref<9x32x64xf32, #tpu.memory_space<vmem>>, vector<1x32x64xf32>
    %36 = vector.shape_cast %35 : vector<1x32x64xf32> to vector<32x64xf32>
    %cst_33 = arith.constant dense<0.000000e+00> : vector<32x100xf32>
    %37 = tpu.matmul %36, %34, %cst_33 {dimension_numbers = #tpu.dot_dimension_numbers<[1], [0], [0], [1], [0, 0, 1, 1], [], []>} : vector<32x64xf32>, vector<64x100xf32>, vector<32x100xf32> -> vector<32x100xf32>
    %38 = arith.addf %32, %37 : vector<32x100xf32>
    %c0_34 = arith.constant 0 : index
    %c0_35 = arith.constant 0 : index
    %c20 = arith.constant 20 : index
    %39 = vector.load %arg1[%c0_34, %c0_35, %c20] : memref<1x64x122xf32, #tpu.memory_space<vmem>>, vector<1x64x100xf32>
    %40 = vector.shape_cast %39 : vector<1x64x100xf32> to vector<64x100xf32>
    %c6 = arith.constant 6 : index
    %c0_36 = arith.constant 0 : index
    %c0_37 = arith.constant 0 : index
    %41 = vector.load %arg2[%c6, %c0_36, %c0_37] : memref<9x32x64xf32, #tpu.memory_space<vmem>>, vector<1x32x64xf32>
    %42 = vector.shape_cast %41 : vector<1x32x64xf32> to vector<32x64xf32>
    %cst_38 = arith.constant dense<0.000000e+00> : vector<32x100xf32>
    %43 = tpu.matmul %42, %40, %cst_38 {dimension_numbers = #tpu.dot_dimension_numbers<[1], [0], [0], [1], [0, 0, 1, 1], [], []>} : vector<32x64xf32>, vector<64x100xf32>, vector<32x100xf32> -> vector<32x100xf32>
    %44 = arith.addf %38, %43 : vector<32x100xf32>
    %c0_39 = arith.constant 0 : index
    %c0_40 = arith.constant 0 : index
    %c21 = arith.constant 21 : index
    %45 = vector.load %arg1[%c0_39, %c0_40, %c21] : memref<1x64x122xf32, #tpu.memory_space<vmem>>, vector<1x64x100xf32>
    %46 = vector.shape_cast %45 : vector<1x64x100xf32> to vector<64x100xf32>
    %c7 = arith.constant 7 : index
    %c0_41 = arith.constant 0 : index
    %c0_42 = arith.constant 0 : index
    %47 = vector.load %arg2[%c7, %c0_41, %c0_42] : memref<9x32x64xf32, #tpu.memory_space<vmem>>, vector<1x32x64xf32>
    %48 = vector.shape_cast %47 : vector<1x32x64xf32> to vector<32x64xf32>
    %cst_43 = arith.constant dense<0.000000e+00> : vector<32x100xf32>
    %49 = tpu.matmul %48, %46, %cst_43 {dimension_numbers = #tpu.dot_dimension_numbers<[1], [0], [0], [1], [0, 0, 1, 1], [], []>} : vector<32x64xf32>, vector<64x100xf32>, vector<32x100xf32> -> vector<32x100xf32>
    %50 = arith.addf %44, %49 : vector<32x100xf32>
    %c0_44 = arith.constant 0 : index
    %c0_45 = arith.constant 0 : index
    %c22 = arith.constant 22 : index
    %51 = vector.load %arg1[%c0_44, %c0_45, %c22] : memref<1x64x122xf32, #tpu.memory_space<vmem>>, vector<1x64x100xf32>
    %52 = vector.shape_cast %51 : vector<1x64x100xf32> to vector<64x100xf32>
    %c8 = arith.constant 8 : index
    %c0_46 = arith.constant 0 : index
    %c0_47 = arith.constant 0 : index
    %53 = vector.load %arg2[%c8, %c0_46, %c0_47] : memref<9x32x64xf32, #tpu.memory_space<vmem>>, vector<1x32x64xf32>
    %54 = vector.shape_cast %53 : vector<1x32x64xf32> to vector<32x64xf32>
    %cst_48 = arith.constant dense<0.000000e+00> : vector<32x100xf32>
    %55 = tpu.matmul %54, %52, %cst_48 {dimension_numbers = #tpu.dot_dimension_numbers<[1], [0], [0], [1], [0, 0, 1, 1], [], []>} : vector<32x64xf32>, vector<64x100xf32>, vector<32x100xf32> -> vector<32x100xf32>
    %56 = arith.addf %50, %55 : vector<32x100xf32>
    %cst_49 = arith.constant 0.000000e+00 : f32
    %57 = vector.broadcast %cst_49 : f32 to vector<32x100xf32>
    %58 = arith.cmpf oge, %56, %57 : vector<32x100xf32>
    %cst_50 = arith.constant 2.000000e-01 : f32
    %59 = vector.broadcast %cst_50 : f32 to vector<32x100xf32>
    %60 = arith.mulf %59, %56 : vector<32x100xf32>
    %61 = arith.select %58, %56, %60 : vector<32x100xi1>, vector<32x100xf32>
    %c0_51 = arith.constant 0 : index
    %c0_52 = arith.constant 0 : index
    %62 = vector.load %arg4[%c0_51, %c0_52] : memref<1x100xf32, #tpu.memory_space<vmem>>, vector<1x100xf32>
    %63 = vector.broadcast %62 : vector<1x100xf32> to vector<32x100xf32>
    %64 = arith.mulf %61, %63 : vector<32x100xf32>
    %c0_53 = arith.constant 0 : index
    %c0_54 = arith.constant 0 : index
    %c0_55 = arith.constant 0 : index
    %65 = vector.load %arg5[%c0_53, %c0_54, %c0_55] : memref<1x32x100xf32, #tpu.memory_space<vmem>>, vector<1x32x100xf32>
    %66 = vector.shape_cast %65 : vector<1x32x100xf32> to vector<32x100xf32>
    %67 = vector.shape_cast %64 : vector<32x100xf32> to vector<1x32x100xf32>
    tpu.vector_store %arg5[%c0_53, %c0_54, %c0_55], %67 {strides = array<i32>} : memref<1x32x100xf32, #tpu.memory_space<vmem>>, vector<1x32x100xf32>,
    return
  }
  func.func @transform_0(%arg0: i32) -> (i32, i32, i32) {
    %c0_i32 = arith.constant 0 : i32
    %c0_i32_0 = arith.constant 0 : i32
    %c0_i32_1 = arith.constant 0 : i32
    return %arg0, %c0_i32, %c0_i32_0 : i32, i32, i32
  }
  func.func @transform_1(%arg0: i32) -> (i32, i32, i32) {
    %c0_i32 = arith.constant 0 : i32
    %c0_i32_0 = arith.constant 0 : i32
    %c0_i32_1 = arith.constant 0 : i32
    %c0_i32_2 = arith.constant 0 : i32
    return %c0_i32, %c0_i32_0, %c0_i32_1 : i32, i32, i32
  }
  func.func @transform_2(%arg0: i32) -> (i32, i32) {
    %c0_i32 = arith.constant 0 : i32
    %c0_i32_0 = arith.constant 0 : i32
    %c0_i32_1 = arith.constant 0 : i32
    return %c0_i32, %c0_i32_0 : i32, i32
  }
  func.func @transform_3(%arg0: i32) -> (i32, i32) {
    %c0_i32 = arith.constant 0 : i32
    %c0_i32_0 = arith.constant 0 : i32
    %c0_i32_1 = arith.constant 0 : i32
    return %c0_i32, %c0_i32_0 : i32, i32
  }
  func.func @transform_4(%arg0: i32) -> (i32, i32, i32) {
    %c0_i32 = arith.constant 0 : i32
    %c0_i32_0 = arith.constant 0 : i32
    %c0_i32_1 = arith.constant 0 : i32
    return %arg0, %c0_i32, %c0_i32_0 : i32, i32, i32
  }
}

module attributes {stable_mosaic.version = 11 : i64} {
  func.func @_conv_lrelu_kernel(%arg0: i32, %arg1: memref<1x48x362xf32, #tpu.memory_space<vmem>>, %arg2: memref<9x32x48xf32, #tpu.memory_space<vmem>>, %arg3: memref<32x1xf32, #tpu.memory_space<vmem>>, %arg4: memref<1x324xf32, #tpu.memory_space<vmem>>, %arg5: memref<1x32x324xf32, #tpu.memory_space<vmem>>) attributes {dimension_semantics = [#tpu.dimension_semantics<parallel>], iteration_bounds = array<i64: 2>, scalar_prefetch = 0 : i64, scratch_operands = 0 : i64, tpu.core_type = #tpu.core_type<tc>, window_params = [{transform_indices = @transform_0, window_bounds = array<i64: 1, 48, 362>}, {pipeline_mode = #tpu.pipeline_mode<synchronous>, transform_indices = @transform_1, window_bounds = array<i64: 9, 32, 48>}, {pipeline_mode = #tpu.pipeline_mode<synchronous>, transform_indices = @transform_2, window_bounds = array<i64: 32, 1>}, {pipeline_mode = #tpu.pipeline_mode<synchronous>, transform_indices = @transform_3, window_bounds = array<i64: 1, 324>}, {transform_indices = @transform_4, window_bounds = array<i64: 1, 32, 324>}]} {
    %c0 = arith.constant 0 : index
    %c0_0 = arith.constant 0 : index
    %0 = vector.load %arg3[%c0, %c0_0] : memref<32x1xf32, #tpu.memory_space<vmem>>, vector<32x1xf32>
    %1 = vector.shape_cast %0 : vector<32x1xf32> to vector<32x1xf32>
    %2 = vector.broadcast %1 : vector<32x1xf32> to vector<32x324xf32>
    %c0_1 = arith.constant 0 : index
    %c0_2 = arith.constant 0 : index
    %c0_3 = arith.constant 0 : index
    %3 = vector.load %arg1[%c0_1, %c0_2, %c0_3] : memref<1x48x362xf32, #tpu.memory_space<vmem>>, vector<1x48x324xf32>
    %4 = vector.shape_cast %3 : vector<1x48x324xf32> to vector<48x324xf32>
    %c0_4 = arith.constant 0 : index
    %c0_5 = arith.constant 0 : index
    %c0_6 = arith.constant 0 : index
    %5 = vector.load %arg2[%c0_4, %c0_5, %c0_6] : memref<9x32x48xf32, #tpu.memory_space<vmem>>, vector<1x32x48xf32>
    %6 = vector.shape_cast %5 : vector<1x32x48xf32> to vector<32x48xf32>
    %cst = arith.constant dense<0.000000e+00> : vector<32x324xf32>
    %7 = tpu.matmul %6, %4, %cst {dimension_numbers = #tpu.dot_dimension_numbers<[1], [0], [0], [1], [0, 0, 1, 1], [], []>} : vector<32x48xf32>, vector<48x324xf32>, vector<32x324xf32> -> vector<32x324xf32>
    %8 = arith.addf %2, %7 : vector<32x324xf32>
    %c0_7 = arith.constant 0 : index
    %c0_8 = arith.constant 0 : index
    %c1 = arith.constant 1 : index
    %9 = vector.load %arg1[%c0_7, %c0_8, %c1] : memref<1x48x362xf32, #tpu.memory_space<vmem>>, vector<1x48x324xf32>
    %10 = vector.shape_cast %9 : vector<1x48x324xf32> to vector<48x324xf32>
    %c1_9 = arith.constant 1 : index
    %c0_10 = arith.constant 0 : index
    %c0_11 = arith.constant 0 : index
    %11 = vector.load %arg2[%c1_9, %c0_10, %c0_11] : memref<9x32x48xf32, #tpu.memory_space<vmem>>, vector<1x32x48xf32>
    %12 = vector.shape_cast %11 : vector<1x32x48xf32> to vector<32x48xf32>
    %cst_12 = arith.constant dense<0.000000e+00> : vector<32x324xf32>
    %13 = tpu.matmul %12, %10, %cst_12 {dimension_numbers = #tpu.dot_dimension_numbers<[1], [0], [0], [1], [0, 0, 1, 1], [], []>} : vector<32x48xf32>, vector<48x324xf32>, vector<32x324xf32> -> vector<32x324xf32>
    %14 = arith.addf %8, %13 : vector<32x324xf32>
    %c0_13 = arith.constant 0 : index
    %c0_14 = arith.constant 0 : index
    %c2 = arith.constant 2 : index
    %15 = vector.load %arg1[%c0_13, %c0_14, %c2] : memref<1x48x362xf32, #tpu.memory_space<vmem>>, vector<1x48x324xf32>
    %16 = vector.shape_cast %15 : vector<1x48x324xf32> to vector<48x324xf32>
    %c2_15 = arith.constant 2 : index
    %c0_16 = arith.constant 0 : index
    %c0_17 = arith.constant 0 : index
    %17 = vector.load %arg2[%c2_15, %c0_16, %c0_17] : memref<9x32x48xf32, #tpu.memory_space<vmem>>, vector<1x32x48xf32>
    %18 = vector.shape_cast %17 : vector<1x32x48xf32> to vector<32x48xf32>
    %cst_18 = arith.constant dense<0.000000e+00> : vector<32x324xf32>
    %19 = tpu.matmul %18, %16, %cst_18 {dimension_numbers = #tpu.dot_dimension_numbers<[1], [0], [0], [1], [0, 0, 1, 1], [], []>} : vector<32x48xf32>, vector<48x324xf32>, vector<32x324xf32> -> vector<32x324xf32>
    %20 = arith.addf %14, %19 : vector<32x324xf32>
    %c0_19 = arith.constant 0 : index
    %c0_20 = arith.constant 0 : index
    %c18 = arith.constant 18 : index
    %21 = vector.load %arg1[%c0_19, %c0_20, %c18] : memref<1x48x362xf32, #tpu.memory_space<vmem>>, vector<1x48x324xf32>
    %22 = vector.shape_cast %21 : vector<1x48x324xf32> to vector<48x324xf32>
    %c3 = arith.constant 3 : index
    %c0_21 = arith.constant 0 : index
    %c0_22 = arith.constant 0 : index
    %23 = vector.load %arg2[%c3, %c0_21, %c0_22] : memref<9x32x48xf32, #tpu.memory_space<vmem>>, vector<1x32x48xf32>
    %24 = vector.shape_cast %23 : vector<1x32x48xf32> to vector<32x48xf32>
    %cst_23 = arith.constant dense<0.000000e+00> : vector<32x324xf32>
    %25 = tpu.matmul %24, %22, %cst_23 {dimension_numbers = #tpu.dot_dimension_numbers<[1], [0], [0], [1], [0, 0, 1, 1], [], []>} : vector<32x48xf32>, vector<48x324xf32>, vector<32x324xf32> -> vector<32x324xf32>
    %26 = arith.addf %20, %25 : vector<32x324xf32>
    %c0_24 = arith.constant 0 : index
    %c0_25 = arith.constant 0 : index
    %c19 = arith.constant 19 : index
    %27 = vector.load %arg1[%c0_24, %c0_25, %c19] : memref<1x48x362xf32, #tpu.memory_space<vmem>>, vector<1x48x324xf32>
    %28 = vector.shape_cast %27 : vector<1x48x324xf32> to vector<48x324xf32>
    %c4 = arith.constant 4 : index
    %c0_26 = arith.constant 0 : index
    %c0_27 = arith.constant 0 : index
    %29 = vector.load %arg2[%c4, %c0_26, %c0_27] : memref<9x32x48xf32, #tpu.memory_space<vmem>>, vector<1x32x48xf32>
    %30 = vector.shape_cast %29 : vector<1x32x48xf32> to vector<32x48xf32>
    %cst_28 = arith.constant dense<0.000000e+00> : vector<32x324xf32>
    %31 = tpu.matmul %30, %28, %cst_28 {dimension_numbers = #tpu.dot_dimension_numbers<[1], [0], [0], [1], [0, 0, 1, 1], [], []>} : vector<32x48xf32>, vector<48x324xf32>, vector<32x324xf32> -> vector<32x324xf32>
    %32 = arith.addf %26, %31 : vector<32x324xf32>
    %c0_29 = arith.constant 0 : index
    %c0_30 = arith.constant 0 : index
    %c20 = arith.constant 20 : index
    %33 = vector.load %arg1[%c0_29, %c0_30, %c20] : memref<1x48x362xf32, #tpu.memory_space<vmem>>, vector<1x48x324xf32>
    %34 = vector.shape_cast %33 : vector<1x48x324xf32> to vector<48x324xf32>
    %c5 = arith.constant 5 : index
    %c0_31 = arith.constant 0 : index
    %c0_32 = arith.constant 0 : index
    %35 = vector.load %arg2[%c5, %c0_31, %c0_32] : memref<9x32x48xf32, #tpu.memory_space<vmem>>, vector<1x32x48xf32>
    %36 = vector.shape_cast %35 : vector<1x32x48xf32> to vector<32x48xf32>
    %cst_33 = arith.constant dense<0.000000e+00> : vector<32x324xf32>
    %37 = tpu.matmul %36, %34, %cst_33 {dimension_numbers = #tpu.dot_dimension_numbers<[1], [0], [0], [1], [0, 0, 1, 1], [], []>} : vector<32x48xf32>, vector<48x324xf32>, vector<32x324xf32> -> vector<32x324xf32>
    %38 = arith.addf %32, %37 : vector<32x324xf32>
    %c0_34 = arith.constant 0 : index
    %c0_35 = arith.constant 0 : index
    %c36 = arith.constant 36 : index
    %39 = vector.load %arg1[%c0_34, %c0_35, %c36] : memref<1x48x362xf32, #tpu.memory_space<vmem>>, vector<1x48x324xf32>
    %40 = vector.shape_cast %39 : vector<1x48x324xf32> to vector<48x324xf32>
    %c6 = arith.constant 6 : index
    %c0_36 = arith.constant 0 : index
    %c0_37 = arith.constant 0 : index
    %41 = vector.load %arg2[%c6, %c0_36, %c0_37] : memref<9x32x48xf32, #tpu.memory_space<vmem>>, vector<1x32x48xf32>
    %42 = vector.shape_cast %41 : vector<1x32x48xf32> to vector<32x48xf32>
    %cst_38 = arith.constant dense<0.000000e+00> : vector<32x324xf32>
    %43 = tpu.matmul %42, %40, %cst_38 {dimension_numbers = #tpu.dot_dimension_numbers<[1], [0], [0], [1], [0, 0, 1, 1], [], []>} : vector<32x48xf32>, vector<48x324xf32>, vector<32x324xf32> -> vector<32x324xf32>
    %44 = arith.addf %38, %43 : vector<32x324xf32>
    %c0_39 = arith.constant 0 : index
    %c0_40 = arith.constant 0 : index
    %c37 = arith.constant 37 : index
    %45 = vector.load %arg1[%c0_39, %c0_40, %c37] : memref<1x48x362xf32, #tpu.memory_space<vmem>>, vector<1x48x324xf32>
    %46 = vector.shape_cast %45 : vector<1x48x324xf32> to vector<48x324xf32>
    %c7 = arith.constant 7 : index
    %c0_41 = arith.constant 0 : index
    %c0_42 = arith.constant 0 : index
    %47 = vector.load %arg2[%c7, %c0_41, %c0_42] : memref<9x32x48xf32, #tpu.memory_space<vmem>>, vector<1x32x48xf32>
    %48 = vector.shape_cast %47 : vector<1x32x48xf32> to vector<32x48xf32>
    %cst_43 = arith.constant dense<0.000000e+00> : vector<32x324xf32>
    %49 = tpu.matmul %48, %46, %cst_43 {dimension_numbers = #tpu.dot_dimension_numbers<[1], [0], [0], [1], [0, 0, 1, 1], [], []>} : vector<32x48xf32>, vector<48x324xf32>, vector<32x324xf32> -> vector<32x324xf32>
    %50 = arith.addf %44, %49 : vector<32x324xf32>
    %c0_44 = arith.constant 0 : index
    %c0_45 = arith.constant 0 : index
    %c38 = arith.constant 38 : index
    %51 = vector.load %arg1[%c0_44, %c0_45, %c38] : memref<1x48x362xf32, #tpu.memory_space<vmem>>, vector<1x48x324xf32>
    %52 = vector.shape_cast %51 : vector<1x48x324xf32> to vector<48x324xf32>
    %c8 = arith.constant 8 : index
    %c0_46 = arith.constant 0 : index
    %c0_47 = arith.constant 0 : index
    %53 = vector.load %arg2[%c8, %c0_46, %c0_47] : memref<9x32x48xf32, #tpu.memory_space<vmem>>, vector<1x32x48xf32>
    %54 = vector.shape_cast %53 : vector<1x32x48xf32> to vector<32x48xf32>
    %cst_48 = arith.constant dense<0.000000e+00> : vector<32x324xf32>
    %55 = tpu.matmul %54, %52, %cst_48 {dimension_numbers = #tpu.dot_dimension_numbers<[1], [0], [0], [1], [0, 0, 1, 1], [], []>} : vector<32x48xf32>, vector<48x324xf32>, vector<32x324xf32> -> vector<32x324xf32>
    %56 = arith.addf %50, %55 : vector<32x324xf32>
    %cst_49 = arith.constant 0.000000e+00 : f32
    %57 = vector.broadcast %cst_49 : f32 to vector<32x324xf32>
    %58 = arith.cmpf oge, %56, %57 : vector<32x324xf32>
    %cst_50 = arith.constant 2.000000e-01 : f32
    %59 = vector.broadcast %cst_50 : f32 to vector<32x324xf32>
    %60 = arith.mulf %59, %56 : vector<32x324xf32>
    %61 = arith.select %58, %56, %60 : vector<32x324xi1>, vector<32x324xf32>
    %c0_51 = arith.constant 0 : index
    %c0_52 = arith.constant 0 : index
    %62 = vector.load %arg4[%c0_51, %c0_52] : memref<1x324xf32, #tpu.memory_space<vmem>>, vector<1x324xf32>
    %63 = vector.broadcast %62 : vector<1x324xf32> to vector<32x324xf32>
    %64 = arith.mulf %61, %63 : vector<32x324xf32>
    %c0_53 = arith.constant 0 : index
    %c0_54 = arith.constant 0 : index
    %c0_55 = arith.constant 0 : index
    %65 = vector.load %arg5[%c0_53, %c0_54, %c0_55] : memref<1x32x324xf32, #tpu.memory_space<vmem>>, vector<1x32x324xf32>
    %66 = vector.shape_cast %65 : vector<1x32x324xf32> to vector<32x324xf32>
    %67 = vector.shape_cast %64 : vector<32x324xf32> to vector<1x32x324xf32>
    tpu.vector_store %arg5[%c0_53, %c0_54, %c0_55], %67 {strides = array<i32>} : memref<1x32x324xf32, #tpu.memory_space<vmem>>, vector<1x32x324xf32>,
    return
  }
  func.func @transform_0(%arg0: i32) -> (i32, i32, i32) {
    %c0_i32 = arith.constant 0 : i32
    %c0_i32_0 = arith.constant 0 : i32
    %c0_i32_1 = arith.constant 0 : i32
    return %arg0, %c0_i32, %c0_i32_0 : i32, i32, i32
  }
  func.func @transform_1(%arg0: i32) -> (i32, i32, i32) {
    %c0_i32 = arith.constant 0 : i32
    %c0_i32_0 = arith.constant 0 : i32
    %c0_i32_1 = arith.constant 0 : i32
    %c0_i32_2 = arith.constant 0 : i32
    return %c0_i32, %c0_i32_0, %c0_i32_1 : i32, i32, i32
  }
  func.func @transform_2(%arg0: i32) -> (i32, i32) {
    %c0_i32 = arith.constant 0 : i32
    %c0_i32_0 = arith.constant 0 : i32
    %c0_i32_1 = arith.constant 0 : i32
    return %c0_i32, %c0_i32_0 : i32, i32
  }
  func.func @transform_3(%arg0: i32) -> (i32, i32) {
    %c0_i32 = arith.constant 0 : i32
    %c0_i32_0 = arith.constant 0 : i32
    %c0_i32_1 = arith.constant 0 : i32
    return %c0_i32, %c0_i32_0 : i32, i32
  }
  func.func @transform_4(%arg0: i32) -> (i32, i32, i32) {
    %c0_i32 = arith.constant 0 : i32
    %c0_i32_0 = arith.constant 0 : i32
    %c0_i32_1 = arith.constant 0 : i32
    return %arg0, %c0_i32, %c0_i32_0 : i32, i32, i32
  }
}

module attributes {stable_mosaic.version = 11 : i64} {
  func.func @_conv_lrelu_kernel(%arg0: i32, %arg1: memref<1x32x362xf32, #tpu.memory_space<vmem>>, %arg2: memref<9x8x32xf32, #tpu.memory_space<vmem>>, %arg3: memref<8x1xf32, #tpu.memory_space<vmem>>, %arg4: memref<1x324xf32, #tpu.memory_space<vmem>>, %arg5: memref<1x8x324xf32, #tpu.memory_space<vmem>>) attributes {dimension_semantics = [#tpu.dimension_semantics<parallel>], iteration_bounds = array<i64: 2>, scalar_prefetch = 0 : i64, scratch_operands = 0 : i64, tpu.core_type = #tpu.core_type<tc>, window_params = [{transform_indices = @transform_0, window_bounds = array<i64: 1, 32, 362>}, {pipeline_mode = #tpu.pipeline_mode<synchronous>, transform_indices = @transform_1, window_bounds = array<i64: 9, 8, 32>}, {pipeline_mode = #tpu.pipeline_mode<synchronous>, transform_indices = @transform_2, window_bounds = array<i64: 8, 1>}, {pipeline_mode = #tpu.pipeline_mode<synchronous>, transform_indices = @transform_3, window_bounds = array<i64: 1, 324>}, {transform_indices = @transform_4, window_bounds = array<i64: 1, 8, 324>}]} {
    %c0 = arith.constant 0 : index
    %c0_0 = arith.constant 0 : index
    %0 = vector.load %arg3[%c0, %c0_0] : memref<8x1xf32, #tpu.memory_space<vmem>>, vector<8x1xf32>
    %1 = vector.shape_cast %0 : vector<8x1xf32> to vector<8x1xf32>
    %2 = vector.broadcast %1 : vector<8x1xf32> to vector<8x324xf32>
    %c0_1 = arith.constant 0 : index
    %c0_2 = arith.constant 0 : index
    %c0_3 = arith.constant 0 : index
    %3 = vector.load %arg1[%c0_1, %c0_2, %c0_3] : memref<1x32x362xf32, #tpu.memory_space<vmem>>, vector<1x32x324xf32>
    %4 = vector.shape_cast %3 : vector<1x32x324xf32> to vector<32x324xf32>
    %c0_4 = arith.constant 0 : index
    %c0_5 = arith.constant 0 : index
    %c0_6 = arith.constant 0 : index
    %5 = vector.load %arg2[%c0_4, %c0_5, %c0_6] : memref<9x8x32xf32, #tpu.memory_space<vmem>>, vector<1x8x32xf32>
    %6 = vector.shape_cast %5 : vector<1x8x32xf32> to vector<8x32xf32>
    %cst = arith.constant dense<0.000000e+00> : vector<8x324xf32>
    %7 = tpu.matmul %6, %4, %cst {dimension_numbers = #tpu.dot_dimension_numbers<[1], [0], [0], [1], [0, 0, 1, 1], [], []>} : vector<8x32xf32>, vector<32x324xf32>, vector<8x324xf32> -> vector<8x324xf32>
    %8 = arith.addf %2, %7 : vector<8x324xf32>
    %c0_7 = arith.constant 0 : index
    %c0_8 = arith.constant 0 : index
    %c1 = arith.constant 1 : index
    %9 = vector.load %arg1[%c0_7, %c0_8, %c1] : memref<1x32x362xf32, #tpu.memory_space<vmem>>, vector<1x32x324xf32>
    %10 = vector.shape_cast %9 : vector<1x32x324xf32> to vector<32x324xf32>
    %c1_9 = arith.constant 1 : index
    %c0_10 = arith.constant 0 : index
    %c0_11 = arith.constant 0 : index
    %11 = vector.load %arg2[%c1_9, %c0_10, %c0_11] : memref<9x8x32xf32, #tpu.memory_space<vmem>>, vector<1x8x32xf32>
    %12 = vector.shape_cast %11 : vector<1x8x32xf32> to vector<8x32xf32>
    %cst_12 = arith.constant dense<0.000000e+00> : vector<8x324xf32>
    %13 = tpu.matmul %12, %10, %cst_12 {dimension_numbers = #tpu.dot_dimension_numbers<[1], [0], [0], [1], [0, 0, 1, 1], [], []>} : vector<8x32xf32>, vector<32x324xf32>, vector<8x324xf32> -> vector<8x324xf32>
    %14 = arith.addf %8, %13 : vector<8x324xf32>
    %c0_13 = arith.constant 0 : index
    %c0_14 = arith.constant 0 : index
    %c2 = arith.constant 2 : index
    %15 = vector.load %arg1[%c0_13, %c0_14, %c2] : memref<1x32x362xf32, #tpu.memory_space<vmem>>, vector<1x32x324xf32>
    %16 = vector.shape_cast %15 : vector<1x32x324xf32> to vector<32x324xf32>
    %c2_15 = arith.constant 2 : index
    %c0_16 = arith.constant 0 : index
    %c0_17 = arith.constant 0 : index
    %17 = vector.load %arg2[%c2_15, %c0_16, %c0_17] : memref<9x8x32xf32, #tpu.memory_space<vmem>>, vector<1x8x32xf32>
    %18 = vector.shape_cast %17 : vector<1x8x32xf32> to vector<8x32xf32>
    %cst_18 = arith.constant dense<0.000000e+00> : vector<8x324xf32>
    %19 = tpu.matmul %18, %16, %cst_18 {dimension_numbers = #tpu.dot_dimension_numbers<[1], [0], [0], [1], [0, 0, 1, 1], [], []>} : vector<8x32xf32>, vector<32x324xf32>, vector<8x324xf32> -> vector<8x324xf32>
    %20 = arith.addf %14, %19 : vector<8x324xf32>
    %c0_19 = arith.constant 0 : index
    %c0_20 = arith.constant 0 : index
    %c18 = arith.constant 18 : index
    %21 = vector.load %arg1[%c0_19, %c0_20, %c18] : memref<1x32x362xf32, #tpu.memory_space<vmem>>, vector<1x32x324xf32>
    %22 = vector.shape_cast %21 : vector<1x32x324xf32> to vector<32x324xf32>
    %c3 = arith.constant 3 : index
    %c0_21 = arith.constant 0 : index
    %c0_22 = arith.constant 0 : index
    %23 = vector.load %arg2[%c3, %c0_21, %c0_22] : memref<9x8x32xf32, #tpu.memory_space<vmem>>, vector<1x8x32xf32>
    %24 = vector.shape_cast %23 : vector<1x8x32xf32> to vector<8x32xf32>
    %cst_23 = arith.constant dense<0.000000e+00> : vector<8x324xf32>
    %25 = tpu.matmul %24, %22, %cst_23 {dimension_numbers = #tpu.dot_dimension_numbers<[1], [0], [0], [1], [0, 0, 1, 1], [], []>} : vector<8x32xf32>, vector<32x324xf32>, vector<8x324xf32> -> vector<8x324xf32>
    %26 = arith.addf %20, %25 : vector<8x324xf32>
    %c0_24 = arith.constant 0 : index
    %c0_25 = arith.constant 0 : index
    %c19 = arith.constant 19 : index
    %27 = vector.load %arg1[%c0_24, %c0_25, %c19] : memref<1x32x362xf32, #tpu.memory_space<vmem>>, vector<1x32x324xf32>
    %28 = vector.shape_cast %27 : vector<1x32x324xf32> to vector<32x324xf32>
    %c4 = arith.constant 4 : index
    %c0_26 = arith.constant 0 : index
    %c0_27 = arith.constant 0 : index
    %29 = vector.load %arg2[%c4, %c0_26, %c0_27] : memref<9x8x32xf32, #tpu.memory_space<vmem>>, vector<1x8x32xf32>
    %30 = vector.shape_cast %29 : vector<1x8x32xf32> to vector<8x32xf32>
    %cst_28 = arith.constant dense<0.000000e+00> : vector<8x324xf32>
    %31 = tpu.matmul %30, %28, %cst_28 {dimension_numbers = #tpu.dot_dimension_numbers<[1], [0], [0], [1], [0, 0, 1, 1], [], []>} : vector<8x32xf32>, vector<32x324xf32>, vector<8x324xf32> -> vector<8x324xf32>
    %32 = arith.addf %26, %31 : vector<8x324xf32>
    %c0_29 = arith.constant 0 : index
    %c0_30 = arith.constant 0 : index
    %c20 = arith.constant 20 : index
    %33 = vector.load %arg1[%c0_29, %c0_30, %c20] : memref<1x32x362xf32, #tpu.memory_space<vmem>>, vector<1x32x324xf32>
    %34 = vector.shape_cast %33 : vector<1x32x324xf32> to vector<32x324xf32>
    %c5 = arith.constant 5 : index
    %c0_31 = arith.constant 0 : index
    %c0_32 = arith.constant 0 : index
    %35 = vector.load %arg2[%c5, %c0_31, %c0_32] : memref<9x8x32xf32, #tpu.memory_space<vmem>>, vector<1x8x32xf32>
    %36 = vector.shape_cast %35 : vector<1x8x32xf32> to vector<8x32xf32>
    %cst_33 = arith.constant dense<0.000000e+00> : vector<8x324xf32>
    %37 = tpu.matmul %36, %34, %cst_33 {dimension_numbers = #tpu.dot_dimension_numbers<[1], [0], [0], [1], [0, 0, 1, 1], [], []>} : vector<8x32xf32>, vector<32x324xf32>, vector<8x324xf32> -> vector<8x324xf32>
    %38 = arith.addf %32, %37 : vector<8x324xf32>
    %c0_34 = arith.constant 0 : index
    %c0_35 = arith.constant 0 : index
    %c36 = arith.constant 36 : index
    %39 = vector.load %arg1[%c0_34, %c0_35, %c36] : memref<1x32x362xf32, #tpu.memory_space<vmem>>, vector<1x32x324xf32>
    %40 = vector.shape_cast %39 : vector<1x32x324xf32> to vector<32x324xf32>
    %c6 = arith.constant 6 : index
    %c0_36 = arith.constant 0 : index
    %c0_37 = arith.constant 0 : index
    %41 = vector.load %arg2[%c6, %c0_36, %c0_37] : memref<9x8x32xf32, #tpu.memory_space<vmem>>, vector<1x8x32xf32>
    %42 = vector.shape_cast %41 : vector<1x8x32xf32> to vector<8x32xf32>
    %cst_38 = arith.constant dense<0.000000e+00> : vector<8x324xf32>
    %43 = tpu.matmul %42, %40, %cst_38 {dimension_numbers = #tpu.dot_dimension_numbers<[1], [0], [0], [1], [0, 0, 1, 1], [], []>} : vector<8x32xf32>, vector<32x324xf32>, vector<8x324xf32> -> vector<8x324xf32>
    %44 = arith.addf %38, %43 : vector<8x324xf32>
    %c0_39 = arith.constant 0 : index
    %c0_40 = arith.constant 0 : index
    %c37 = arith.constant 37 : index
    %45 = vector.load %arg1[%c0_39, %c0_40, %c37] : memref<1x32x362xf32, #tpu.memory_space<vmem>>, vector<1x32x324xf32>
    %46 = vector.shape_cast %45 : vector<1x32x324xf32> to vector<32x324xf32>
    %c7 = arith.constant 7 : index
    %c0_41 = arith.constant 0 : index
    %c0_42 = arith.constant 0 : index
    %47 = vector.load %arg2[%c7, %c0_41, %c0_42] : memref<9x8x32xf32, #tpu.memory_space<vmem>>, vector<1x8x32xf32>
    %48 = vector.shape_cast %47 : vector<1x8x32xf32> to vector<8x32xf32>
    %cst_43 = arith.constant dense<0.000000e+00> : vector<8x324xf32>
    %49 = tpu.matmul %48, %46, %cst_43 {dimension_numbers = #tpu.dot_dimension_numbers<[1], [0], [0], [1], [0, 0, 1, 1], [], []>} : vector<8x32xf32>, vector<32x324xf32>, vector<8x324xf32> -> vector<8x324xf32>
    %50 = arith.addf %44, %49 : vector<8x324xf32>
    %c0_44 = arith.constant 0 : index
    %c0_45 = arith.constant 0 : index
    %c38 = arith.constant 38 : index
    %51 = vector.load %arg1[%c0_44, %c0_45, %c38] : memref<1x32x362xf32, #tpu.memory_space<vmem>>, vector<1x32x324xf32>
    %52 = vector.shape_cast %51 : vector<1x32x324xf32> to vector<32x324xf32>
    %c8 = arith.constant 8 : index
    %c0_46 = arith.constant 0 : index
    %c0_47 = arith.constant 0 : index
    %53 = vector.load %arg2[%c8, %c0_46, %c0_47] : memref<9x8x32xf32, #tpu.memory_space<vmem>>, vector<1x8x32xf32>
    %54 = vector.shape_cast %53 : vector<1x8x32xf32> to vector<8x32xf32>
    %cst_48 = arith.constant dense<0.000000e+00> : vector<8x324xf32>
    %55 = tpu.matmul %54, %52, %cst_48 {dimension_numbers = #tpu.dot_dimension_numbers<[1], [0], [0], [1], [0, 0, 1, 1], [], []>} : vector<8x32xf32>, vector<32x324xf32>, vector<8x324xf32> -> vector<8x324xf32>
    %56 = arith.addf %50, %55 : vector<8x324xf32>
    %cst_49 = arith.constant 0.000000e+00 : f32
    %57 = vector.broadcast %cst_49 : f32 to vector<8x324xf32>
    %58 = arith.cmpf oge, %56, %57 : vector<8x324xf32>
    %cst_50 = arith.constant 2.000000e-01 : f32
    %59 = vector.broadcast %cst_50 : f32 to vector<8x324xf32>
    %60 = arith.mulf %59, %56 : vector<8x324xf32>
    %61 = arith.select %58, %56, %60 : vector<8x324xi1>, vector<8x324xf32>
    %c0_51 = arith.constant 0 : index
    %c0_52 = arith.constant 0 : index
    %62 = vector.load %arg4[%c0_51, %c0_52] : memref<1x324xf32, #tpu.memory_space<vmem>>, vector<1x324xf32>
    %63 = vector.broadcast %62 : vector<1x324xf32> to vector<8x324xf32>
    %64 = arith.mulf %61, %63 : vector<8x324xf32>
    %c0_53 = arith.constant 0 : index
    %c0_54 = arith.constant 0 : index
    %c0_55 = arith.constant 0 : index
    %65 = vector.load %arg5[%c0_53, %c0_54, %c0_55] : memref<1x8x324xf32, #tpu.memory_space<vmem>>, vector<1x8x324xf32>
    %66 = vector.shape_cast %65 : vector<1x8x324xf32> to vector<8x324xf32>
    %67 = vector.shape_cast %64 : vector<8x324xf32> to vector<1x8x324xf32>
    tpu.vector_store %arg5[%c0_53, %c0_54, %c0_55], %67 {strides = array<i32>} : memref<1x8x324xf32, #tpu.memory_space<vmem>>, vector<1x8x324xf32>,
    return
  }
  func.func @transform_0(%arg0: i32) -> (i32, i32, i32) {
    %c0_i32 = arith.constant 0 : i32
    %c0_i32_0 = arith.constant 0 : i32
    %c0_i32_1 = arith.constant 0 : i32
    return %arg0, %c0_i32, %c0_i32_0 : i32, i32, i32
  }
  func.func @transform_1(%arg0: i32) -> (i32, i32, i32) {
    %c0_i32 = arith.constant 0 : i32
    %c0_i32_0 = arith.constant 0 : i32
    %c0_i32_1 = arith.constant 0 : i32
    %c0_i32_2 = arith.constant 0 : i32
    return %c0_i32, %c0_i32_0, %c0_i32_1 : i32, i32, i32
  }
  func.func @transform_2(%arg0: i32) -> (i32, i32) {
    %c0_i32 = arith.constant 0 : i32
    %c0_i32_0 = arith.constant 0 : i32
    %c0_i32_1 = arith.constant 0 : i32
    return %c0_i32, %c0_i32_0 : i32, i32
  }
  func.func @transform_3(%arg0: i32) -> (i32, i32) {
    %c0_i32 = arith.constant 0 : i32
    %c0_i32_0 = arith.constant 0 : i32
    %c0_i32_1 = arith.constant 0 : i32
    return %c0_i32, %c0_i32_0 : i32, i32
  }
  func.func @transform_4(%arg0: i32) -> (i32, i32, i32) {
    %c0_i32 = arith.constant 0 : i32
    %c0_i32_0 = arith.constant 0 : i32
    %c0_i32_1 = arith.constant 0 : i32
    return %arg0, %c0_i32, %c0_i32_0 : i32, i32, i32
  }
}

module attributes {stable_mosaic.version = 11 : i64} {
  func.func @_conv_lrelu_kernel(%arg0: i32, %arg1: memref<1x10x1226xf32, #tpu.memory_space<vmem>>, %arg2: memref<9x8x10xf32, #tpu.memory_space<vmem>>, %arg3: memref<8x1xf32, #tpu.memory_space<vmem>>, %arg4: memref<1x1156xf32, #tpu.memory_space<vmem>>, %arg5: memref<1x8x1156xf32, #tpu.memory_space<vmem>>) attributes {dimension_semantics = [#tpu.dimension_semantics<parallel>], iteration_bounds = array<i64: 2>, scalar_prefetch = 0 : i64, scratch_operands = 0 : i64, tpu.core_type = #tpu.core_type<tc>, window_params = [{transform_indices = @transform_0, window_bounds = array<i64: 1, 10, 1226>}, {pipeline_mode = #tpu.pipeline_mode<synchronous>, transform_indices = @transform_1, window_bounds = array<i64: 9, 8, 10>}, {pipeline_mode = #tpu.pipeline_mode<synchronous>, transform_indices = @transform_2, window_bounds = array<i64: 8, 1>}, {pipeline_mode = #tpu.pipeline_mode<synchronous>, transform_indices = @transform_3, window_bounds = array<i64: 1, 1156>}, {transform_indices = @transform_4, window_bounds = array<i64: 1, 8, 1156>}]} {
    %c0 = arith.constant 0 : index
    %c0_0 = arith.constant 0 : index
    %0 = vector.load %arg3[%c0, %c0_0] : memref<8x1xf32, #tpu.memory_space<vmem>>, vector<8x1xf32>
    %1 = vector.shape_cast %0 : vector<8x1xf32> to vector<8x1xf32>
    %2 = vector.broadcast %1 : vector<8x1xf32> to vector<8x1156xf32>
    %c0_1 = arith.constant 0 : index
    %c0_2 = arith.constant 0 : index
    %c0_3 = arith.constant 0 : index
    %3 = vector.load %arg1[%c0_1, %c0_2, %c0_3] : memref<1x10x1226xf32, #tpu.memory_space<vmem>>, vector<1x10x1156xf32>
    %4 = vector.shape_cast %3 : vector<1x10x1156xf32> to vector<10x1156xf32>
    %c0_4 = arith.constant 0 : index
    %c0_5 = arith.constant 0 : index
    %c0_6 = arith.constant 0 : index
    %5 = vector.load %arg2[%c0_4, %c0_5, %c0_6] : memref<9x8x10xf32, #tpu.memory_space<vmem>>, vector<1x8x10xf32>
    %6 = vector.shape_cast %5 : vector<1x8x10xf32> to vector<8x10xf32>
    %cst = arith.constant dense<0.000000e+00> : vector<8x1156xf32>
    %7 = tpu.matmul %6, %4, %cst {dimension_numbers = #tpu.dot_dimension_numbers<[1], [0], [0], [1], [0, 0, 1, 1], [], []>} : vector<8x10xf32>, vector<10x1156xf32>, vector<8x1156xf32> -> vector<8x1156xf32>
    %8 = arith.addf %2, %7 : vector<8x1156xf32>
    %c0_7 = arith.constant 0 : index
    %c0_8 = arith.constant 0 : index
    %c1 = arith.constant 1 : index
    %9 = vector.load %arg1[%c0_7, %c0_8, %c1] : memref<1x10x1226xf32, #tpu.memory_space<vmem>>, vector<1x10x1156xf32>
    %10 = vector.shape_cast %9 : vector<1x10x1156xf32> to vector<10x1156xf32>
    %c1_9 = arith.constant 1 : index
    %c0_10 = arith.constant 0 : index
    %c0_11 = arith.constant 0 : index
    %11 = vector.load %arg2[%c1_9, %c0_10, %c0_11] : memref<9x8x10xf32, #tpu.memory_space<vmem>>, vector<1x8x10xf32>
    %12 = vector.shape_cast %11 : vector<1x8x10xf32> to vector<8x10xf32>
    %cst_12 = arith.constant dense<0.000000e+00> : vector<8x1156xf32>
    %13 = tpu.matmul %12, %10, %cst_12 {dimension_numbers = #tpu.dot_dimension_numbers<[1], [0], [0], [1], [0, 0, 1, 1], [], []>} : vector<8x10xf32>, vector<10x1156xf32>, vector<8x1156xf32> -> vector<8x1156xf32>
    %14 = arith.addf %8, %13 : vector<8x1156xf32>
    %c0_13 = arith.constant 0 : index
    %c0_14 = arith.constant 0 : index
    %c2 = arith.constant 2 : index
    %15 = vector.load %arg1[%c0_13, %c0_14, %c2] : memref<1x10x1226xf32, #tpu.memory_space<vmem>>, vector<1x10x1156xf32>
    %16 = vector.shape_cast %15 : vector<1x10x1156xf32> to vector<10x1156xf32>
    %c2_15 = arith.constant 2 : index
    %c0_16 = arith.constant 0 : index
    %c0_17 = arith.constant 0 : index
    %17 = vector.load %arg2[%c2_15, %c0_16, %c0_17] : memref<9x8x10xf32, #tpu.memory_space<vmem>>, vector<1x8x10xf32>
    %18 = vector.shape_cast %17 : vector<1x8x10xf32> to vector<8x10xf32>
    %cst_18 = arith.constant dense<0.000000e+00> : vector<8x1156xf32>
    %19 = tpu.matmul %18, %16, %cst_18 {dimension_numbers = #tpu.dot_dimension_numbers<[1], [0], [0], [1], [0, 0, 1, 1], [], []>} : vector<8x10xf32>, vector<10x1156xf32>, vector<8x1156xf32> -> vector<8x1156xf32>
    %20 = arith.addf %14, %19 : vector<8x1156xf32>
    %c0_19 = arith.constant 0 : index
    %c0_20 = arith.constant 0 : index
    %c34 = arith.constant 34 : index
    %21 = vector.load %arg1[%c0_19, %c0_20, %c34] : memref<1x10x1226xf32, #tpu.memory_space<vmem>>, vector<1x10x1156xf32>
    %22 = vector.shape_cast %21 : vector<1x10x1156xf32> to vector<10x1156xf32>
    %c3 = arith.constant 3 : index
    %c0_21 = arith.constant 0 : index
    %c0_22 = arith.constant 0 : index
    %23 = vector.load %arg2[%c3, %c0_21, %c0_22] : memref<9x8x10xf32, #tpu.memory_space<vmem>>, vector<1x8x10xf32>
    %24 = vector.shape_cast %23 : vector<1x8x10xf32> to vector<8x10xf32>
    %cst_23 = arith.constant dense<0.000000e+00> : vector<8x1156xf32>
    %25 = tpu.matmul %24, %22, %cst_23 {dimension_numbers = #tpu.dot_dimension_numbers<[1], [0], [0], [1], [0, 0, 1, 1], [], []>} : vector<8x10xf32>, vector<10x1156xf32>, vector<8x1156xf32> -> vector<8x1156xf32>
    %26 = arith.addf %20, %25 : vector<8x1156xf32>
    %c0_24 = arith.constant 0 : index
    %c0_25 = arith.constant 0 : index
    %c35 = arith.constant 35 : index
    %27 = vector.load %arg1[%c0_24, %c0_25, %c35] : memref<1x10x1226xf32, #tpu.memory_space<vmem>>, vector<1x10x1156xf32>
    %28 = vector.shape_cast %27 : vector<1x10x1156xf32> to vector<10x1156xf32>
    %c4 = arith.constant 4 : index
    %c0_26 = arith.constant 0 : index
    %c0_27 = arith.constant 0 : index
    %29 = vector.load %arg2[%c4, %c0_26, %c0_27] : memref<9x8x10xf32, #tpu.memory_space<vmem>>, vector<1x8x10xf32>
    %30 = vector.shape_cast %29 : vector<1x8x10xf32> to vector<8x10xf32>
    %cst_28 = arith.constant dense<0.000000e+00> : vector<8x1156xf32>
    %31 = tpu.matmul %30, %28, %cst_28 {dimension_numbers = #tpu.dot_dimension_numbers<[1], [0], [0], [1], [0, 0, 1, 1], [], []>} : vector<8x10xf32>, vector<10x1156xf32>, vector<8x1156xf32> -> vector<8x1156xf32>
    %32 = arith.addf %26, %31 : vector<8x1156xf32>
    %c0_29 = arith.constant 0 : index
    %c0_30 = arith.constant 0 : index
    %c36 = arith.constant 36 : index
    %33 = vector.load %arg1[%c0_29, %c0_30, %c36] : memref<1x10x1226xf32, #tpu.memory_space<vmem>>, vector<1x10x1156xf32>
    %34 = vector.shape_cast %33 : vector<1x10x1156xf32> to vector<10x1156xf32>
    %c5 = arith.constant 5 : index
    %c0_31 = arith.constant 0 : index
    %c0_32 = arith.constant 0 : index
    %35 = vector.load %arg2[%c5, %c0_31, %c0_32] : memref<9x8x10xf32, #tpu.memory_space<vmem>>, vector<1x8x10xf32>
    %36 = vector.shape_cast %35 : vector<1x8x10xf32> to vector<8x10xf32>
    %cst_33 = arith.constant dense<0.000000e+00> : vector<8x1156xf32>
    %37 = tpu.matmul %36, %34, %cst_33 {dimension_numbers = #tpu.dot_dimension_numbers<[1], [0], [0], [1], [0, 0, 1, 1], [], []>} : vector<8x10xf32>, vector<10x1156xf32>, vector<8x1156xf32> -> vector<8x1156xf32>
    %38 = arith.addf %32, %37 : vector<8x1156xf32>
    %c0_34 = arith.constant 0 : index
    %c0_35 = arith.constant 0 : index
    %c68 = arith.constant 68 : index
    %39 = vector.load %arg1[%c0_34, %c0_35, %c68] : memref<1x10x1226xf32, #tpu.memory_space<vmem>>, vector<1x10x1156xf32>
    %40 = vector.shape_cast %39 : vector<1x10x1156xf32> to vector<10x1156xf32>
    %c6 = arith.constant 6 : index
    %c0_36 = arith.constant 0 : index
    %c0_37 = arith.constant 0 : index
    %41 = vector.load %arg2[%c6, %c0_36, %c0_37] : memref<9x8x10xf32, #tpu.memory_space<vmem>>, vector<1x8x10xf32>
    %42 = vector.shape_cast %41 : vector<1x8x10xf32> to vector<8x10xf32>
    %cst_38 = arith.constant dense<0.000000e+00> : vector<8x1156xf32>
    %43 = tpu.matmul %42, %40, %cst_38 {dimension_numbers = #tpu.dot_dimension_numbers<[1], [0], [0], [1], [0, 0, 1, 1], [], []>} : vector<8x10xf32>, vector<10x1156xf32>, vector<8x1156xf32> -> vector<8x1156xf32>
    %44 = arith.addf %38, %43 : vector<8x1156xf32>
    %c0_39 = arith.constant 0 : index
    %c0_40 = arith.constant 0 : index
    %c69 = arith.constant 69 : index
    %45 = vector.load %arg1[%c0_39, %c0_40, %c69] : memref<1x10x1226xf32, #tpu.memory_space<vmem>>, vector<1x10x1156xf32>
    %46 = vector.shape_cast %45 : vector<1x10x1156xf32> to vector<10x1156xf32>
    %c7 = arith.constant 7 : index
    %c0_41 = arith.constant 0 : index
    %c0_42 = arith.constant 0 : index
    %47 = vector.load %arg2[%c7, %c0_41, %c0_42] : memref<9x8x10xf32, #tpu.memory_space<vmem>>, vector<1x8x10xf32>
    %48 = vector.shape_cast %47 : vector<1x8x10xf32> to vector<8x10xf32>
    %cst_43 = arith.constant dense<0.000000e+00> : vector<8x1156xf32>
    %49 = tpu.matmul %48, %46, %cst_43 {dimension_numbers = #tpu.dot_dimension_numbers<[1], [0], [0], [1], [0, 0, 1, 1], [], []>} : vector<8x10xf32>, vector<10x1156xf32>, vector<8x1156xf32> -> vector<8x1156xf32>
    %50 = arith.addf %44, %49 : vector<8x1156xf32>
    %c0_44 = arith.constant 0 : index
    %c0_45 = arith.constant 0 : index
    %c70 = arith.constant 70 : index
    %51 = vector.load %arg1[%c0_44, %c0_45, %c70] : memref<1x10x1226xf32, #tpu.memory_space<vmem>>, vector<1x10x1156xf32>
    %52 = vector.shape_cast %51 : vector<1x10x1156xf32> to vector<10x1156xf32>
    %c8 = arith.constant 8 : index
    %c0_46 = arith.constant 0 : index
    %c0_47 = arith.constant 0 : index
    %53 = vector.load %arg2[%c8, %c0_46, %c0_47] : memref<9x8x10xf32, #tpu.memory_space<vmem>>, vector<1x8x10xf32>
    %54 = vector.shape_cast %53 : vector<1x8x10xf32> to vector<8x10xf32>
    %cst_48 = arith.constant dense<0.000000e+00> : vector<8x1156xf32>
    %55 = tpu.matmul %54, %52, %cst_48 {dimension_numbers = #tpu.dot_dimension_numbers<[1], [0], [0], [1], [0, 0, 1, 1], [], []>} : vector<8x10xf32>, vector<10x1156xf32>, vector<8x1156xf32> -> vector<8x1156xf32>
    %56 = arith.addf %50, %55 : vector<8x1156xf32>
    %cst_49 = arith.constant 0.000000e+00 : f32
    %57 = vector.broadcast %cst_49 : f32 to vector<8x1156xf32>
    %58 = arith.cmpf oge, %56, %57 : vector<8x1156xf32>
    %cst_50 = arith.constant 2.000000e-01 : f32
    %59 = vector.broadcast %cst_50 : f32 to vector<8x1156xf32>
    %60 = arith.mulf %59, %56 : vector<8x1156xf32>
    %61 = arith.select %58, %56, %60 : vector<8x1156xi1>, vector<8x1156xf32>
    %c0_51 = arith.constant 0 : index
    %c0_52 = arith.constant 0 : index
    %62 = vector.load %arg4[%c0_51, %c0_52] : memref<1x1156xf32, #tpu.memory_space<vmem>>, vector<1x1156xf32>
    %63 = vector.broadcast %62 : vector<1x1156xf32> to vector<8x1156xf32>
    %64 = arith.mulf %61, %63 : vector<8x1156xf32>
    %c0_53 = arith.constant 0 : index
    %c0_54 = arith.constant 0 : index
    %c0_55 = arith.constant 0 : index
    %65 = vector.load %arg5[%c0_53, %c0_54, %c0_55] : memref<1x8x1156xf32, #tpu.memory_space<vmem>>, vector<1x8x1156xf32>
    %66 = vector.shape_cast %65 : vector<1x8x1156xf32> to vector<8x1156xf32>
    %67 = vector.shape_cast %64 : vector<8x1156xf32> to vector<1x8x1156xf32>
    tpu.vector_store %arg5[%c0_53, %c0_54, %c0_55], %67 {strides = array<i32>} : memref<1x8x1156xf32, #tpu.memory_space<vmem>>, vector<1x8x1156xf32>,
    return
  }
  func.func @transform_0(%arg0: i32) -> (i32, i32, i32) {
    %c0_i32 = arith.constant 0 : i32
    %c0_i32_0 = arith.constant 0 : i32
    %c0_i32_1 = arith.constant 0 : i32
    return %arg0, %c0_i32, %c0_i32_0 : i32, i32, i32
  }
  func.func @transform_1(%arg0: i32) -> (i32, i32, i32) {
    %c0_i32 = arith.constant 0 : i32
    %c0_i32_0 = arith.constant 0 : i32
    %c0_i32_1 = arith.constant 0 : i32
    %c0_i32_2 = arith.constant 0 : i32
    return %c0_i32, %c0_i32_0, %c0_i32_1 : i32, i32, i32
  }
  func.func @transform_2(%arg0: i32) -> (i32, i32) {
    %c0_i32 = arith.constant 0 : i32
    %c0_i32_0 = arith.constant 0 : i32
    %c0_i32_1 = arith.constant 0 : i32
    return %c0_i32, %c0_i32_0 : i32, i32
  }
  func.func @transform_3(%arg0: i32) -> (i32, i32) {
    %c0_i32 = arith.constant 0 : i32
    %c0_i32_0 = arith.constant 0 : i32
    %c0_i32_1 = arith.constant 0 : i32
    return %c0_i32, %c0_i32_0 : i32, i32
  }
  func.func @transform_4(%arg0: i32) -> (i32, i32, i32) {
    %c0_i32 = arith.constant 0 : i32
    %c0_i32_0 = arith.constant 0 : i32
    %c0_i32_1 = arith.constant 0 : i32
    return %arg0, %c0_i32, %c0_i32_0 : i32, i32, i32
  }
}

</mosaic_0001>

<bundles_post_ra>
// kernel: _lambda_.10
= control target key start
LH: loop header
LB: loop body
LE: loop exit
PB: predicated region body
PF: predicated region fallthrough
CT: control target
= control target key end

     0   :  { %s1165_s15 = smov 0   ;;  %s1245_s0 = inlined_call_operand.vmem [shape: f32[2,8,362], index: 0, kind: input, shape index: {}]   ;;  %s1246_s1 = inlined_call_operand.vmem [shape: f32[4,16,8], index: 1, kind: input, shape index: {}]   ;;  %s1247_s2 = inlined_call_operand.vmem [shape: f32[16,1], index: 2, kind: input, shape index: {}]   ;;  %s1248_s3 = inlined_call_operand.vmem [shape: f32[1,324], index: 3, kind: input, shape index: {}]   ;;  %s1249_s4 = inlined_call_operand.vmem [shape: f32[2,16,324], index: 4, kind: output, shape index: {}]  }
   0x1 LB: > { %s1023_s16 = sadd.s32 4294967295, %s1133_s15   ;;  %p1027_p0 = scmp.ge.s32.totalorder %s1133_s15, 1  ;;  %s1133_s15 = sphi %s1165_s15, %s14_s15  }
   0x2   : > { %p162_p1 = scmp.lt.s32.totalorder %s1133_s15, 3 }
   0x4   : > { %p163_p2 = pnand %p1027_p0, %p162_p1 }
   0x5   : > { %p188_p3 = scmp.lt.s32.totalorder (!%p163_p2), %s1023_s16, 1  ;;  %v1135_v0 = vmov (!%p163_p2), 0.0   ;;  %s1136_s21 = smov (!%p163_p2), 127   ;;  %v213_v3 = vld [vmem:[%s1246_s1] sm:$0xff] (!%p163_p2)  ;;  %vm215_vm0 = vcmask (!%p163_p2), 64512   ;;  %v214_v5 = vld [vmem:[%s1246_s1 + $0x8] sm:$0xff] (!%p163_p2)  ;;  %v940_v34 = vlaneseq (!%p163_p2) }
   0x6   : > { %166 = sbr.rel (%p163_p2) target bundleno = 381 (0x17d), region = 36  ;;  %286 = vmatprep.mubr.f32.mxu1 (!%p163_p2), %v1135_v0  ;;  %468 = vmatprep.mubr.f32.mxu0 (!%p163_p2), %v1135_v0  ;;  %s1137_s24 = smov (!%p163_p2), 110   ;;  %v1034_v6 = vld [vmem:[%s1246_s1 + $0x10] sm:$0xff] (!%p163_p2)  ;;  %v198_v7 = vld [vmem:[%s1247_s2] sm:$0xff] (!%p163_p2)  ;;  %v1139_v8 = vmov (!%p163_p2), 0   ;;  %v199_v9 = vld [vmem:[%s1247_s2 + $0x8] sm:$0xff] (!%p163_p2) }
   0x7   : > { %s1138_s29 = smov (!%p163_p2), 109   ;;  %1125 = vset.pattern.permute.xlu1 (!%p163_p2), %v1139_v8  ;;  %1126 = vset.pattern.permute.xlu0 (!%p163_p2), %v1139_v8  ;;  %vm392_vm1 = vcmask (!%p163_p2), 1039360   ;;  %v1035_v14 = vld [vmem:[%s1246_s1 + $0x18] sm:$0xff] (!%p163_p2)  ;;  %v1040_v16 = vld [vmem:[%s1246_s1 + $0x20] sm:$0xff] (!%p163_p2)  ;;  %vm571_vm2 = vcmask (!%p163_p2), 900096   ;;  %vm750_vm3 = vcmask (!%p163_p2), 891904  }
   0x8   : > { %v1041_v24 = vld [vmem:[%s1246_s1 + $0x28] sm:$0xff] (!%p163_p2)  ;;  %v1046_v26 = vld [vmem:[%s1246_s1 + $0x30] sm:$0xff] (!%p163_p2)  ;;  %v1047_v29 = vld [vmem:[%s1246_s1 + $0x38] sm:$0xff] (!%p163_p2)  ;;  %v941_v35 = vshrl.u32 (!%p163_p2), %v940_v34, 7  ;;  %vm963_vm7 = vcmask (!%p163_p2), 556032  }
   0x9   : > { %v938_v40 = vld [vmem:[%s1248_s3] sm:$0x7] (!%p163_p2) }
   0xa   : > { %v950_v38 = vsub.s32 (!%p163_p2), 2, %v941_v35  ;;  %v942_v39 = vsub.s32 (!%p163_p2), 0, %v941_v35  ;;  %v946_v41 = vsub.s32 (!%p163_p2), 1, %v941_v35 }
   0xc   : > { %v951_v50 = vrot.slane (!%p163_p2), %v938_v40, %v950_v38  ;;  %v943_v52 = vrot.slane (!%p163_p2), %v938_v40, %v942_v39  ;;  %v947_v57 = vrot.slane (!%p163_p2), %v938_v40, %v946_v41 }
   0xd   : > { %s1251_s16 = smov (!%p188_p3, %s1023_s16), 1 }
   0xe   : > { %s1110_s17 = smul.u32 24, %s1251_s16 }
   0xf   : > { %s1111_s22 = smul.u32 48, %s1251_s16 }
  0x10   : > { %s192_s20 = scalar_lea.vmem %s1245_s0, %s1110_s17 }
  0x11   : > { %v211_v1 = vld [vmem:[%s192_s20 + $0x8] sm:$0xff]  ;;  %v210_v2 = vld [vmem:[%s192_s20] sm:$0xff]  ;;  %v212_v4 = vld [vmem:[%s192_s20 + $0x10] sm:$0xff] }
  0x12   : > { %388 = vrot.lane.b32.xlu0 %v211_v1, %s1136_s21  ;;  %386 = vrot.lane.b32.xlu1 %v210_v2, %s1136_s21 }
  0x13   : > { %222 = vmatprep.subr.mxu1 %v211_v1 }
  0x14   : > { %223 = vmatpush1.msra.mxu1 %v210_v2 }
  0x15   : > { %1030 = vmatmul.mubr.msk.f32.vlgmr.msra.gmra.mrb[0].mxu1 %vm215_vm0, %v213_v3  ;;  %1066 = vmatprep.subr.mxu1 %v212_v4 }
  0x16   : > { %390 = vrot.lane.b32.xlu0 %v212_v4, %s1136_s21  ;;  %567 = vrot.lane.b32.xlu1 %v211_v1, %s1137_s24 }
  0x17   : > { %292 = vmatprep.mubr.f32.mxu1 %v1135_v0  ;;  %1067 = vmatpush3.msra.mxu1 %v212_v4 }
  0x19   : > { %1031 = vmatmul.mubr.msk.f32.gmra.mrb[2].mxu1 %vm215_vm0, %v214_v5 }
  0x1a   : > { %569 = vrot.lane.b32.xlu0 %v212_v4, %s1137_s24  ;;  %565 = vrot.lane.b32.xlu1 %v210_v2, %s1137_s24  ;;  %s197_s24 = scalar_lea.vmem %s1249_s4, %s1111_s22 }
  0x1b   : > { %1068 = vmatprep.mubr.msk.f32.mxu1 %vm215_vm0, %v213_v3 }
  0x1d   : > { %1069 = vmatmul.mubr.msk.f32.vlgmr.msra.gmra.mrb[4].mxu1 %vm215_vm0, %v214_v5 }
  0x1e   : > { %746 = vrot.lane.b32.xlu0 %v211_v1, %s1138_s29  ;;  %748 = vrot.lane.b32.xlu1 %v212_v4, %s1138_s29 }
  0x1f   : > { %1073 = vmatprep.mubr.msk.f32.mxu1 %vm215_vm0, %v1034_v6 }
  0x22   : > { %744 = vrot.lane.b32.xlu0 %v210_v2, %s1138_s29  ;;  %202 = vperm.xlu1 %1125, %v198_v7  }
  0x26   : > { %207 = vperm.xlu0 %1126, %v199_v9  }
  0x84   : > { %v389_v10 = vpop.permute.xlu0 %388  ;;  %v387_v11 = vpop.permute.xlu1 %386 }
  0x85   : > { %v393_v17 = vsel %vm392_vm1, %v387_v11, %v389_v10 }
  0x88   : > { %v391_v12 = vpop.permute.xlu0 %390  ;;  %v568_v13 = vpop.permute.xlu1 %567 }
  0x89   : > { %1071 = vmatprep.subr.mxu1 %v391_v12  ;;  %v394_v15 = vsel %vm392_vm1, %v389_v10, %v391_v12 }
  0x8a   : > { %404 = vmatprep.subr.mxu0 %v394_v15  ;;  %1072 = vmatpush3.msra.mxu1 %v391_v12 }
  0x8b   : > { %405 = vmatpush1.msra.mxu0 %v393_v17  ;;  %1074 = vmatmul.mubr.msk.f32.vlgmr.msra.gmra.mrb[4].mxu1 %vm215_vm0, %v1035_v14 }
  0x8c   : > { %v570_v18 = vpop.permute.xlu0 %569  ;;  %1036 = vmatmul.mubr.msk.f32.vlgmr.msra.gmra.mrb[0].mxu0 %vm215_vm0, %v1034_v6  ;;  %v566_v19 = vpop.permute.xlu1 %565  ;;  %1078 = vmatprep.mubr.msk.f32.mxu1 %vm215_vm0, %v1040_v16 }
  0x8d   : > { %v572_v20 = vsel %vm571_vm2, %v566_v19, %v568_v13  ;;  %1076 = vmatprep.subr.mxu1 %v570_v18  ;;  %v573_v21 = vsel %vm571_vm2, %v568_v13, %v570_v18  ;;  %474 = vmatprep.mubr.f32.mxu0 %v1135_v0 }
  0x8e   : > { %583 = vmatprep.subr.mxu0 %v573_v21  ;;  %1077 = vmatpush3.msra.mxu1 %v570_v18 }
  0x8f   : > { %584 = vmatpush1.msra.mxu0 %v572_v20 }
  0x90   : > { %v747_v22 = vpop.permute.xlu0 %746  ;;  %1037 = vmatmul.mubr.msk.f32.gmra.mrb[2].mxu0 %vm215_vm0, %v1035_v14  ;;  %v749_v23 = vpop.permute.xlu1 %748 }
  0x91   : > { %647 = vmatprep.mubr.f32.mxu0 %v1135_v0  ;;  %v752_v25 = vsel %vm750_vm3, %v747_v22, %v749_v23  ;;  %1081 = vmatprep.subr.mxu1 %v749_v23 }
  0x92   : > { %762 = vmatprep.subr.mxu0 %v752_v25 }
  0x93   : > { %1079 = vmatmul.mubr.msk.f32.vlgmr.msra.gmra.mrb[4].mxu1 %vm215_vm0, %v1041_v24 }
  0x94   : > { %v745_v27 = vpop.permute.xlu0 %744  ;;  %1042 = vmatmul.mubr.msk.f32.vlgmr.msra.gmra.mrb[0].mxu0 %vm215_vm0, %v1040_v16  ;;  %1082 = vmatpush3.msra.mxu1 %v749_v23 }
  0x95   : > { %v751_v28 = vsel %vm750_vm3, %v745_v27, %v747_v22  ;;  %653 = vmatprep.mubr.f32.mxu0 %v1135_v0  ;;  %1083 = vmatprep.mubr.msk.f32.mxu1 %vm215_vm0, %v1046_v26 }
  0x96   : > { %763 = vmatpush1.msra.mxu0 %v751_v28 }
  0x98   : > { %1043 = vmatmul.mubr.msk.f32.gmra.mrb[2].mxu0 %vm215_vm0, %v1041_v24 }
  0x99   : > { %826 = vmatprep.mubr.f32.mxu0 %v1135_v0 }
  0x9b   : > { %1084 = vmatmul.mubr.msk.f32.vlgmr.msra.gmra.mrb[4].mxu1 %vm215_vm0, %v1047_v29 }
  0x9c   : > { %1048 = vmatmul.mubr.msk.f32.vlgmr.msra.gmra.mrb[0].mxu0 %vm215_vm0, %v1046_v26 }
  0x9d   : > { %832 = vmatprep.mubr.f32.mxu0 %v1135_v0 }
  0xa0   : > { %1049 = vmatmul.mubr.msk.f32.gmra.mrb[2].mxu0 %vm215_vm0, %v1047_v29 }
  0xa1   : > { %v203_v36 = vpop.permute.xlu1 %202 }
  0xa5   : > { %v208_v37 = vpop.permute.xlu0 %207 }
  0xe8   : > { %v288_v30 = vpop.f32.mrb[0].mxu1 }
  0xe9   : > { %v290_v31 = vpop.f32.mrb[1].mxu1  ;;  %v374_v42 = vadd.f32 %v288_v30, %v203_v36 }
  0xea   : > { %v375_v44 = vadd.f32 %v290_v31, %v203_v36 }
  0xec   : > { %v294_v32 = vpop.f32.mrb[2].mxu1 }
  0xed   : > { %v296_v33 = vpop.f32.mrb[3].mxu1  ;;  %v377_v45 = vadd.f32 %v294_v32, %v208_v37 }
  0xee   : > { %v378_v46 = vadd.f32 %v296_v33, %v208_v37 }
 0x16e   : > { %v1085_v43 = vpop.f32.mrb[4].mxu1 }
 0x16f   : > { %v1094_v47 = vadd.f32 %v1085_v43, %v208_v37  ;;  %v828_v48 = vpop.f32.mrb[0].mxu0  ;;  %v905_v49 = vpop.f32.mrb[5].mxu1 }
 0x170   : > { %v1087_v51 = vadd.f32 %v828_v48, %v374_v42  ;;  %v1095_v53 = vadd.f32 %v905_v49, %v203_v36  ;;  %v830_v54 = vpop.f32.mrb[1].mxu0 }
 0x171   : > { %vm925_vm4 = vcmp.ge.f32.partialorder %v1094_v47, 0.0  ;;  %v931_v55 = vmul.f32 0.2, %v1094_v47  ;;  %v1089_v56 = vadd.f32 %v830_v54, %v375_v44 }
 0x172   : > { %vm920_vm5 = vcmp.ge.f32.partialorder %v1087_v51, 0.0  ;;  %v926_v58 = vmul.f32 0.2, %v1087_v51  ;;  %vm922_vm6 = vcmp.ge.f32.partialorder %v1095_v53, 0.0  ;;  %v928_v59 = vmul.f32 0.2, %v1095_v53 }
 0x173   : > { %v937_v60 = vsel %vm925_vm4, %v1094_v47, %v931_v55  ;;  %vm921_vm8 = vcmp.ge.f32.partialorder %v1089_v56, 0.0  ;;  %v927_v61 = vmul.f32 0.2, %v1089_v56  ;;  %v834_v62 = vpop.f32.mrb[2].mxu0 }
 0x174   : > { %v960_v63 = vmul.f32 %v951_v50, %v937_v60  ;;  %v932_v0 = vsel %vm920_vm5, %v1087_v51, %v926_v58  ;;  %v934_v1 = vsel %vm922_vm6, %v1095_v53, %v928_v59  ;;  %v1091_v2 = vadd.f32 %v834_v62, %v377_v45  ;;  %v836_v3 = vpop.f32.mrb[3].mxu0 }
 0x175   : > { %v955_v4 = vmul.f32 %v943_v52, %v932_v0  ;;  %v957_v5 = vmul.f32 %v951_v50, %v934_v1  ;;  %v933_v6 = vsel %vm921_vm8, %v1089_v56, %v927_v61  ;;  %v1093_v7 = vadd.f32 %v836_v3, %v378_v46 }
 0x176   : > { %967 = vst.msk [vmem:[%s197_s24 + $0x28] sm:$0xff] %vm963_vm7, %v960_v63  ;;  %v956_v8 = vmul.f32 %v947_v57, %v933_v6  ;;  %vm923_vm9 = vcmp.ge.f32.partialorder %v1091_v2, 0.0  ;;  %v929_v9 = vmul.f32 0.2, %v1091_v2 }
 0x177   : > { %961 = vst [vmem:[%s197_s24] sm:$0xff] %v955_v4  ;;  %964 = vst.msk [vmem:[%s197_s24 + $0x10] sm:$0xff] %vm963_vm7, %v957_v5  ;;  %vm924_vm10 = vcmp.ge.f32.partialorder %v1093_v7, 0.0  ;;  %v930_v10 = vmul.f32 0.2, %v1093_v7 }
 0x178   : > { %962 = vst [vmem:[%s197_s24 + $0x8] sm:$0xff] %v956_v8  ;;  %v935_v11 = vsel %vm923_vm9, %v1091_v2, %v929_v9 }
 0x179   : > { %v958_v12 = vmul.f32 %v943_v52, %v935_v11  ;;  %v936_v13 = vsel %vm924_vm10, %v1093_v7, %v930_v10 }
 0x17a   : > { %v959_v14 = vmul.f32 %v947_v57, %v936_v13 }
 0x17b   : > { %965 = vst [vmem:[%s197_s24 + $0x18] sm:$0xff] %v958_v12 }
 0x17c   : > { %966 = vst [vmem:[%s197_s24 + $0x20] sm:$0xff] %v959_v14 }
 0x17d PF: > { %s14_s15 = sadd.s32 1, %s1133_s15  }
 0x17e   : > { %p11_p4 = scmp.ge.s32.totalorder %s14_s15, 4  }
 0x180   :  { %13 = sbr.rel (!%p11_p4) target bundleno = 1 (0x1), region = 69 }

// kernel: _lambda_.11
= control target key start
LH: loop header
LB: loop body
LE: loop exit
PB: predicated region body
PF: predicated region fallthrough
CT: control target
= control target key end

     0   :  { %s1186_s15 = smov 0   ;;  %s1290_s0 = inlined_call_operand.vmem [shape: f32[2,64,122], index: 0, kind: input, shape index: {}]   ;;  %s1291_s1 = inlined_call_operand.vmem [shape: f32[4,32,64], index: 1, kind: input, shape index: {}]   ;;  %s1292_s2 = inlined_call_operand.vmem [shape: f32[32,1], index: 2, kind: input, shape index: {}]   ;;  %s1293_s3 = inlined_call_operand.vmem [shape: f32[1,100], index: 3, kind: input, shape index: {}]   ;;  %s1294_s4 = inlined_call_operand.vmem [shape: f32[2,32,100], index: 4, kind: output, shape index: {}]  }
   0x1 LB: > { %s817_s16 = sadd.s32 4294967295, %s1155_s15   ;;  %p821_p0 = scmp.ge.s32.totalorder %s1155_s15, 1  ;;  %s1155_s15 = sphi %s1186_s15, %s14_s15  }
   0x2   : > { %p162_p1 = scmp.lt.s32.totalorder %s1155_s15, 3 }
   0x4   : > { %p163_p2 = pnand %p821_p0, %p162_p1 }
   0x5   : > { %p188_p3 = scmp.lt.s32.totalorder (!%p163_p2), %s817_s16, 1  ;;  %v230_v11 = vld [vmem:[%s1291_s1] sm:$0xff] (!%p163_p2)  ;;  %s1157_s23 = smov (!%p163_p2), 118   ;;  %vm234_vm0 = vcmask (!%p163_p2), 523264   ;;  %v231_v18 = vld [vmem:[%s1291_s1 + $0x8] sm:$0xff] (!%p163_p2)  ;;  %v232_v19 = vld [vmem:[%s1291_s1 + $0x10] sm:$0xff] (!%p163_p2) }
   0x6   : > { %166 = sbr.rel (%p163_p2) target bundleno = 395 (0x18b), region = 36  ;;  %923 = vmatprep.mubr.msk.f32.mxu1 (!%p163_p2), %vm234_vm0, %v230_v11  ;;  %v838_v16 = vld [vmem:[%s1291_s1 + $0x40] sm:$0xff] (!%p163_p2)  ;;  %s1158_s26 = smov (!%p163_p2), 127   ;;  %v233_v20 = vld [vmem:[%s1291_s1 + $0x18] sm:$0xff] (!%p163_p2)  ;;  %v199_v22 = vld [vmem:[%s1292_s2 + $0x8] sm:$0xff] (!%p163_p2)  ;;  %v1160_v24 = vmov (!%p163_p2), 0  }
   0x7   : > { %967 = vmatprep.mubr.msk.f32.mxu0 (!%p163_p2), %vm234_vm0, %v838_v16  ;;  %s1159_s27 = smov (!%p163_p2), 117   ;;  %v830_v21 = vld [vmem:[%s1291_s1 + $0x20] sm:$0xff] (!%p163_p2)  ;;  %1148 = vset.pattern.permute.xlu1 (!%p163_p2), %v1160_v24  ;;  %v201_v25 = vld [vmem:[%s1292_s2 + $0x18] sm:$0xff] (!%p163_p2)  ;;  %v200_v26 = vld [vmem:[%s1292_s2 + $0x10] sm:$0xff] (!%p163_p2)  ;;  %vm757_vm3 = vcmask (!%p163_p2), 818176  }
   0x8   : > { %v198_v23 = vld [vmem:[%s1292_s2] sm:$0xff] (!%p163_p2)  ;;  %1147 = vset.pattern.permute.xlu0 (!%p163_p2), %v1160_v24  ;;  %v839_v62 = vld [vmem:[%s1291_s1 + $0x48] sm:$0xff] (!%p163_p2)  ;;  %v832_v16 = vld [vmem:[%s1291_s1 + $0x30] sm:$0xff] (!%p163_p2) }
   0xd   : > { %s1296_s16 = smov (!%p188_p3, %s817_s16), 1 }
   0xe   : > { %s857_s17 = sshll.u32 %s1296_s16, 6  ;;  %s858_s14 = sshll.u32 %s1296_s16, 5 }
   0xf   : > { %s192_s20 = scalar_lea.vmem %s1290_s0, %s857_s17  ;;  %s197_s21 = scalar_lea.vmem %s1294_s4, %s858_s14 }
  0x10   : > { %v222_v0 = vld [vmem:[%s192_s20] sm:$0xff]  ;;  %v223_v1 = vld [vmem:[%s192_s20 + $0x8] sm:$0xff]  ;;  %v224_v2 = vld [vmem:[%s192_s20 + $0x10] sm:$0xff] }
  0x11   : > { %v1087_v3 = vpack.i.bf16 %v223_v1, %v222_v0  ;;  %v225_v4 = vld [vmem:[%s192_s20 + $0x18] sm:$0xff]  ;;  %v226_v5 = vld [vmem:[%s192_s20 + $0x20] sm:$0xff]  ;;  %v227_v6 = vld [vmem:[%s192_s20 + $0x28] sm:$0xff]  ;;  %v995_v7 = vpack.c.bf16 %v223_v1, %v222_v0 }
  0x12   : > { %v1097_v8 = vpack.i.bf16 %v227_v6, %v226_v5  ;;  %v228_v9 = vld [vmem:[%s192_s20 + $0x30] sm:$0xff]  ;;  %v229_v10 = vld [vmem:[%s192_s20 + $0x38] sm:$0xff]  ;;  %v1092_v12 = vpack.i.bf16 %v225_v4, %v224_v2  ;;  %v999_v14 = vpack.c.bf16 %v225_v4, %v224_v2  ;;  %v1003_v15 = vpack.c.bf16 %v227_v6, %v226_v5 }
  0x13   : > { %1088 = vrot.lane.b32.xlu0 %v1087_v3, %s1157_s23  ;;  %v1102_v13 = vpack.i.bf16 %v229_v10, %v228_v9  ;;  %996 = vmatprep.subr.bf16.mxu1 %v995_v7  ;;  %v1007_v17 = vpack.c.bf16 %v229_v10, %v228_v9  ;;  %v840_v4 = vld [vmem:[%s1291_s1 + $0x50] sm:$0xff] }
  0x14   : > { %1098 = vrot.lane.b32.xlu1 %v1097_v8, %s1157_s23  ;;  %998 = vmatpush3.bf16.msra.mxu1 %v995_v7 }
  0x15   : > { %1000 = vmatprep.subr.bf16.mxu1 %v999_v14 }
  0x17   : > { %1093 = vrot.lane.b32.xlu0 %v1092_v12, %s1157_s23 }
  0x18   : > { %1103 = vrot.lane.b32.xlu1 %v1102_v13, %s1157_s23  ;;  %1002 = vmatpush3.bf16.msra.mxu1 %v999_v14  ;;  %v831_v14 = vld [vmem:[%s1291_s1 + $0x28] sm:$0xff] }
  0x19   : > { %1004 = vmatprep.subr.bf16.mxu1 %v1003_v15 }
  0x1b   : > { %1108 = vrot.lane.b32.xlu0 %v1087_v3, %s1158_s26 }
  0x1c   : > { %1113 = vrot.lane.b32.xlu1 %v1087_v3, %s1159_s27  ;;  %1006 = vmatpush3.bf16.msra.mxu1 %v1003_v15 }
  0x1d   : > { %1008 = vmatprep.subr.bf16.mxu1 %v1007_v17 }
  0x1f   : > { %1118 = vrot.lane.b32.xlu0 %v1092_v12, %s1158_s26 }
  0x20   : > { %1123 = vrot.lane.b32.xlu1 %v1092_v12, %s1159_s27  ;;  %1010 = vmatpush3.bf16.msra.mxu1 %v1007_v17  ;;  %v833_v17 = vld [vmem:[%s1291_s1 + $0x38] sm:$0xff] }
  0x23   : > { %1128 = vrot.lane.b32.xlu0 %v1097_v8, %s1158_s26  ;;  %924 = vmatmul.mubr.msk.f32.vlgmr.msra.gmra.mrb[0].mxu1 %vm234_vm0, %v231_v18  ;;  %v847_v18 = vld [vmem:[%s1291_s1 + $0x68] sm:$0xff] }
  0x24   : > { %1133 = vrot.lane.b32.xlu1 %v1097_v8, %s1159_s27  ;;  %926 = vmatprep.mubr.msk.f32.mxu1 %vm234_vm0, %v232_v19  ;;  %v841_v8 = vld [vmem:[%s1291_s1 + $0x58] sm:$0xff]  ;;  %v848_v19 = vld [vmem:[%s1291_s1 + $0x70] sm:$0xff] }
  0x27   : > { %1138 = vrot.lane.b32.xlu0 %v1102_v13, %s1158_s26  ;;  %927 = vmatmul.mubr.msk.f32.gmra.mrb[2].mxu1 %vm234_vm0, %v233_v20  ;;  %v849_v20 = vld [vmem:[%s1291_s1 + $0x78] sm:$0xff] }
  0x28   : > { %1143 = vrot.lane.b32.xlu1 %v1102_v13, %s1159_s27  ;;  %945 = vmatprep.mubr.msk.f32.mxu1 %vm234_vm0, %v830_v21  ;;  %v846_v13 = vld [vmem:[%s1291_s1 + $0x60] sm:$0xff] }
  0x2b   : > { %204 = vperm.xlu0 %1147, %v198_v23  }
  0x2c   : > { %209 = vperm.xlu1 %1148, %v199_v22  }
  0x2f   : > { %219 = vperm.xlu0 %1147, %v201_v25  }
  0x30   : > { %214 = vperm.xlu1 %1148, %v200_v26  }
  0x85   : > { %v1089_v27 = vpop.permute.xlu0 %1088 }
  0x86   : > { %v1091_v28 = vunpack.i.h.bf16 %v1089_v27  ;;  %v1090_v29 = vunpack.i.l.bf16 %v1089_v27  ;;  %v1099_v30 = vpop.permute.xlu1 %1098 }
  0x87   : > { %v1101_v32 = vunpack.i.h.bf16 %v1099_v30  ;;  %v1100_v33 = vunpack.i.l.bf16 %v1099_v30 }
  0x88   : > { %v1027_v31 = vpack.c.bf16 %v1091_v28, %v1090_v29 }
  0x89   : > { %v1094_v34 = vpop.permute.xlu0 %1093  ;;  %v1035_v39 = vpack.c.bf16 %v1101_v32, %v1100_v33 }
  0x8a   : > { %v1096_v35 = vunpack.i.h.bf16 %v1094_v34  ;;  %v1095_v36 = vunpack.i.l.bf16 %v1094_v34  ;;  %1028 = vmatprep.subr.bf16.mxu0 %v1027_v31  ;;  %v1104_v37 = vpop.permute.xlu1 %1103 }
  0x8b   : > { %1030 = vmatpush3.bf16.msra.mxu0 %v1027_v31  ;;  %v1106_v40 = vunpack.i.h.bf16 %v1104_v37  ;;  %v1105_v41 = vunpack.i.l.bf16 %v1104_v37  ;;  %v854_v37 = vld [vmem:[%s1293_s3] ss:$0 sm:$0xff] }
  0x8c   : > { %v1031_v38 = vpack.c.bf16 %v1096_v35, %v1095_v36 }
  0x8d   : > { %v1109_v42 = vpop.permute.xlu0 %1108  ;;  %v1039_v47 = vpack.c.bf16 %v1106_v40, %v1105_v41 }
  0x8e   : > { %v1111_v43 = vunpack.i.h.bf16 %v1109_v42  ;;  %v1110_v44 = vunpack.i.l.bf16 %v1109_v42  ;;  %1032 = vmatprep.subr.bf16.mxu0 %v1031_v38  ;;  %v1114_v45 = vpop.permute.xlu1 %1113 }
  0x8f   : > { %1034 = vmatpush3.bf16.msra.mxu0 %v1031_v38  ;;  %v1116_v48 = vunpack.i.h.bf16 %v1114_v45  ;;  %v1115_v49 = vunpack.i.l.bf16 %v1114_v45 }
  0x90   : > { %v1011_v46 = vpack.c.bf16 %v1111_v43, %v1110_v44  ;;  %1036 = vmatprep.subr.bf16.mxu0 %v1035_v39 }
  0x91   : > { %v1119_v50 = vpop.permute.xlu0 %1118  ;;  %v1043_v55 = vpack.c.bf16 %v1116_v48, %v1115_v49 }
  0x92   : > { %v1121_v51 = vunpack.i.h.bf16 %v1119_v50  ;;  %v1120_v52 = vunpack.i.l.bf16 %v1119_v50  ;;  %1012 = vmatprep.subr.bf16.mxu1 %v1011_v46  ;;  %v1124_v53 = vpop.permute.xlu1 %1123 }
  0x93   : > { %1014 = vmatpush3.bf16.msra.mxu1 %v1011_v46  ;;  %1038 = vmatpush3.bf16.msra.mxu0 %v1035_v39  ;;  %v1126_v56 = vunpack.i.h.bf16 %v1124_v53  ;;  %v1125_v57 = vunpack.i.l.bf16 %v1124_v53 }
  0x94   : > { %v1015_v54 = vpack.c.bf16 %v1121_v51, %v1120_v52  ;;  %1040 = vmatprep.subr.bf16.mxu0 %v1039_v47 }
  0x95   : > { %v1129_v58 = vpop.permute.xlu0 %1128  ;;  %v1047_v0 = vpack.c.bf16 %v1126_v56, %v1125_v57 }
  0x96   : > { %v1131_v59 = vunpack.i.h.bf16 %v1129_v58  ;;  %v1130_v60 = vunpack.i.l.bf16 %v1129_v58  ;;  %1016 = vmatprep.subr.bf16.mxu1 %v1015_v54  ;;  %v1134_v61 = vpop.permute.xlu1 %1133 }
  0x97   : > { %1018 = vmatpush3.bf16.msra.mxu1 %v1015_v54  ;;  %1042 = vmatpush3.bf16.msra.mxu0 %v1039_v47  ;;  %v1136_v1 = vunpack.i.h.bf16 %v1134_v61  ;;  %v1135_v2 = vunpack.i.l.bf16 %v1134_v61 }
  0x98   : > { %v1019_v63 = vpack.c.bf16 %v1131_v59, %v1130_v60  ;;  %1044 = vmatprep.subr.bf16.mxu0 %v1043_v55 }
  0x99   : > { %v1139_v3 = vpop.permute.xlu0 %1138  ;;  %v1051_v10 = vpack.c.bf16 %v1136_v1, %v1135_v2 }
  0x9a   : > { %v1141_v5 = vunpack.i.h.bf16 %v1139_v3  ;;  %v1140_v6 = vunpack.i.l.bf16 %v1139_v3  ;;  %1020 = vmatprep.subr.bf16.mxu1 %v1019_v63  ;;  %968 = vmatmul.mubr.msk.f32.vlgmr.msra.gmra.mrb[0].mxu0 %vm234_vm0, %v839_v62  ;;  %v1144_v7 = vpop.permute.xlu1 %1143 }
  0x9b   : > { %1022 = vmatpush3.bf16.msra.mxu1 %v1019_v63  ;;  %1046 = vmatpush3.bf16.msra.mxu0 %v1043_v55  ;;  %v1146_v11 = vunpack.i.h.bf16 %v1144_v7  ;;  %v1145_v12 = vunpack.i.l.bf16 %v1144_v7 }
  0x9c   : > { %v1023_v9 = vpack.c.bf16 %v1141_v5, %v1140_v6  ;;  %1048 = vmatprep.subr.bf16.mxu0 %v1047_v0  ;;  %970 = vmatprep.mubr.msk.f32.mxu0 %vm234_vm0, %v840_v4 }
  0x9d   : > { %v1055_v15 = vpack.c.bf16 %v1146_v11, %v1145_v12 }
  0x9e   : > { %1024 = vmatprep.subr.bf16.mxu1 %v1023_v9  ;;  %971 = vmatmul.mubr.msk.f32.gmra.mrb[2].mxu0 %vm234_vm0, %v841_v8 }
  0x9f   : > { %1026 = vmatpush3.bf16.msra.mxu1 %v1023_v9  ;;  %1050 = vmatpush3.bf16.msra.mxu0 %v1047_v0 }
  0xa0   : > { %1052 = vmatprep.subr.bf16.mxu0 %v1051_v10  ;;  %989 = vmatprep.mubr.msk.f32.mxu0 %vm234_vm0, %v846_v13 }
  0xa2   : > { %946 = vmatmul.mubr.msk.f32.vlgmr.msra.gmra.mrb[0].mxu1 %vm234_vm0, %v831_v14 }
  0xa3   : > { %1054 = vmatpush3.bf16.msra.mxu0 %v1051_v10  ;;  %948 = vmatprep.mubr.msk.f32.mxu1 %vm234_vm0, %v832_v16 }
  0xa4   : > { %1056 = vmatprep.subr.bf16.mxu0 %v1055_v15 }
  0xa6   : > { %949 = vmatmul.mubr.msk.f32.gmra.mrb[2].mxu1 %vm234_vm0, %v833_v17 }
  0xa7   : > { %1058 = vmatpush3.bf16.msra.mxu0 %v1055_v15 }
  0xaa   : > { %990 = vmatmul.mubr.msk.f32.vlgmr.msra.gmra.mrb[0].mxu0 %vm234_vm0, %v847_v18  ;;  %v205_v23 = vpop.permute.xlu0 %204 }
  0xab   : > { %992 = vmatprep.mubr.msk.f32.mxu0 %vm234_vm0, %v848_v19  ;;  %v210_v24 = vpop.permute.xlu1 %209 }
  0xae   : > { %993 = vmatmul.mubr.msk.f32.gmra.mrb[2].mxu0 %vm234_vm0, %v849_v20  ;;  %v220_v29 = vpop.permute.xlu0 %219 }
  0xaf   : > { %v215_v31 = vpop.permute.xlu1 %214 }
 0x175   : > { %v947_v21 = vpop.f32.mrb[0].mxu1 }
 0x176   : > { %v451_v22 = vpop.f32.mrb[1].mxu1  ;;  %v1059_v27 = vadd.f32 %v947_v21, %v210_v24 }
 0x177   : > { %v1061_v28 = vadd.f32 %v451_v22, %v205_v23 }
 0x179   : > { %v950_v25 = vpop.f32.mrb[2].mxu1 }
 0x17a   : > { %v461_v26 = vpop.f32.mrb[3].mxu1  ;;  %v1063_v35 = vadd.f32 %v950_v25, %v220_v29 }
 0x17b   : > { %v1065_v38 = vadd.f32 %v461_v26, %v215_v31 }
 0x17d   : > { %v991_v30 = vpop.f32.mrb[0].mxu0 }
 0x17e   : > { %v1060_v32 = vadd.f32 %v1059_v27, %v991_v30  ;;  %v711_v33 = vpop.f32.mrb[1].mxu0 }
 0x17f   : > { %v1062_v34 = vadd.f32 %v1061_v28, %v711_v33 }
 0x180   : > { %vm735_vm1 = vcmp.ge.f32.partialorder %v1060_v32, 0.0  ;;  %v739_v36 = vmul.f32 0.2, %v1060_v32 }
 0x181   : > { %vm734_vm2 = vcmp.ge.f32.partialorder %v1062_v34, 0.0  ;;  %v738_v39 = vmul.f32 0.2, %v1062_v34  ;;  %v994_v40 = vpop.f32.mrb[2].mxu0 }
 0x182   : > { %v743_v41 = vsel %vm735_vm1, %v1060_v32, %v739_v36  ;;  %v1064_v42 = vadd.f32 %v1063_v35, %v994_v40  ;;  %v721_v43 = vpop.f32.mrb[3].mxu0 }
 0x183   : > { %v754_v44 = vmul.f32 %v854_v37, %v743_v41  ;;  %v742_v45 = vsel %vm734_vm2, %v1062_v34, %v738_v39  ;;  %v1066_v46 = vadd.f32 %v1065_v38, %v721_v43 }
 0x184   : > { %v753_v47 = vmul.f32 %v854_v37, %v742_v45  ;;  %vm737_vm4 = vcmp.ge.f32.partialorder %v1064_v42, 0.0  ;;  %v741_v48 = vmul.f32 0.2, %v1064_v42 }
 0x185   : > { %759 = vst.msk [vmem:[%s197_s21 + $0x8] sm:$0xff] %vm757_vm3, %v754_v44  ;;  %vm736_vm5 = vcmp.ge.f32.partialorder %v1066_v46, 0.0  ;;  %v740_v49 = vmul.f32 0.2, %v1066_v46 }
 0x186   : > { %758 = vst.msk [vmem:[%s197_s21] sm:$0xff] %vm757_vm3, %v753_v47  ;;  %v745_v50 = vsel %vm737_vm4, %v1064_v42, %v741_v48 }
 0x187   : > { %v756_v51 = vmul.f32 %v854_v37, %v745_v50  ;;  %v744_v52 = vsel %vm736_vm5, %v1066_v46, %v740_v49 }
 0x188   : > { %v755_v53 = vmul.f32 %v854_v37, %v744_v52 }
 0x189   : > { %761 = vst.msk [vmem:[%s197_s21 + $0x18] sm:$0xff] %vm757_vm3, %v756_v51 }
 0x18a   : > { %760 = vst.msk [vmem:[%s197_s21 + $0x10] sm:$0xff] %vm757_vm3, %v755_v53 }
 0x18b PF: > { %s14_s15 = sadd.s32 1, %s1155_s15  }
 0x18c   : > { %p11_p4 = scmp.ge.s32.totalorder %s14_s15, 4  }
 0x18e   :  { %13 = sbr.rel (!%p11_p4) target bundleno = 1 (0x1), region = 69 }

// kernel: _lambda_.12
= control target key start
LH: loop header
LB: loop body
LE: loop exit
PB: predicated region body
PF: predicated region fallthrough
CT: control target
= control target key end

     0   :  { %s1429_s15 = smov 0   ;;  %s1559_s0 = inlined_call_operand.vmem [shape: f32[2,128,50], index: 0, kind: input, shape index: {}]   ;;  %s1560_s1 = inlined_call_operand.vmem [shape: f32[4,32,128], index: 1, kind: input, shape index: {}]   ;;  %s1561_s2 = inlined_call_operand.vmem [shape: f32[32,1], index: 2, kind: input, shape index: {}]   ;;  %s1562_s3 = inlined_call_operand.vmem [shape: f32[1,36], index: 3, kind: input, shape index: {}]   ;;  %s1563_s4 = inlined_call_operand.vmem [shape: f32[2,32,36], index: 4, kind: output, shape index: {}]  }
   0x1 LB: > { %s856_s16 = sadd.s32 4294967295, %s1398_s15   ;;  %p860_p0 = scmp.ge.s32.totalorder %s1398_s15, 1  ;;  %s1398_s15 = sphi %s1429_s15, %s14_s15  }
   0x2   : > { %p162_p1 = scmp.lt.s32.totalorder %s1398_s15, 3 }
   0x4   : > { %p163_p2 = pnand %p860_p0, %p162_p1 }
   0x5   : > { %p188_p3 = scmp.lt.s32.totalorder (!%p163_p2), %s856_s16, 1  ;;  %s1400_s21 = smov (!%p163_p2), 122   ;;  %v238_v25 = vld [vmem:[%s1560_s1] sm:$0xff] (!%p163_p2)  ;;  %v239_v34 = vld [vmem:[%s1560_s1 + $0x8] sm:$0xff] (!%p163_p2)  ;;  %v240_v35 = vld [vmem:[%s1560_s1 + $0x10] sm:$0xff] (!%p163_p2)  ;;  %v1403_v40 = vmov (!%p163_p2), 0  }
   0x6   : > { %166 = sbr.rel (%p163_p2) target bundleno = 427 (0x1ab), region = 36  ;;  %994 = vmatprep.mubr.f32.mxu1 (!%p163_p2), %v238_v25  ;;  %s1401_s24 = smov (!%p163_p2), 127   ;;  %v869_v32 = vld [vmem:[%s1560_s1 + $0x40] sm:$0xff] (!%p163_p2)  ;;  %v241_v36 = vld [vmem:[%s1560_s1 + $0x18] sm:$0xff] (!%p163_p2)  ;;  %v199_v38 = vld [vmem:[%s1561_s2 + $0x8] sm:$0xff] (!%p163_p2)  ;;  %1391 = vset.pattern.permute.xlu1 (!%p163_p2), %v1403_v40  ;;  %vm796_vm2 = vcmask (!%p163_p2), 293888  }
   0x7   : > { %s1402_s25 = smov (!%p163_p2), 121   ;;  %1070 = vmatprep.mubr.f32.mxu0 (!%p163_p2), %v869_v32  ;;  %v865_v37 = vld [vmem:[%s1560_s1 + $0x20] sm:$0xff] (!%p163_p2)  ;;  %1390 = vset.pattern.permute.xlu0 (!%p163_p2), %v1403_v40  ;;  %v200_v41 = vld [vmem:[%s1561_s2 + $0x10] sm:$0xff] (!%p163_p2)  ;;  %v201_v42 = vld [vmem:[%s1561_s2 + $0x18] sm:$0xff] (!%p163_p2) }
   0x8   : > { %v198_v39 = vld [vmem:[%s1561_s2] sm:$0xff] (!%p163_p2) }
   0xd   : > { %s1565_s16 = smov (!%p188_p3, %s856_s16), 1 }
   0xe   : > { %s880_s17 = sshll.u32 %s1565_s16, 7  ;;  %s881_s14 = sshll.u32 %s1565_s16, 5 }
   0xf   : > { %s1443_s20 = scalar_lea.vmem %s1559_s0, %s880_s17 }
  0x10   : > { %v222_v0 = vld [vmem:[%s1443_s20] sm:$0xff]  ;;  %v223_v1 = vld [vmem:[%s1443_s20 + $0x8] sm:$0xff]  ;;  %v224_v2 = vld [vmem:[%s1443_s20 + $0x10] sm:$0xff] }
  0x11   : > { %v1270_v3 = vpack.i.bf16 %v223_v1, %v222_v0  ;;  %v225_v4 = vld [vmem:[%s1443_s20 + $0x18] sm:$0xff]  ;;  %v226_v5 = vld [vmem:[%s1443_s20 + $0x20] sm:$0xff]  ;;  %v227_v6 = vld [vmem:[%s1443_s20 + $0x28] sm:$0xff]  ;;  %v1114_v7 = vpack.c.bf16 %v223_v1, %v222_v0 }
  0x12   : > { %v1280_v8 = vpack.i.bf16 %v227_v6, %v226_v5  ;;  %v228_v9 = vld [vmem:[%s1443_s20 + $0x30] sm:$0xff]  ;;  %v1275_v10 = vpack.i.bf16 %v225_v4, %v224_v2  ;;  %v229_v11 = vld [vmem:[%s1443_s20 + $0x38] sm:$0xff]  ;;  %v230_v12 = vld [vmem:[%s1443_s20 + $0x40] sm:$0xff]  ;;  %v1118_v18 = vpack.c.bf16 %v225_v4, %v224_v2  ;;  %v1122_v19 = vpack.c.bf16 %v227_v6, %v226_v5 }
  0x13   : > { %1271 = vrot.lane.b32.xlu0 %v1270_v3, %s1400_s21  ;;  %v231_v13 = vld [vmem:[%s1443_s20 + $0x48] sm:$0xff]  ;;  %v1285_v14 = vpack.i.bf16 %v229_v11, %v228_v9  ;;  %v232_v15 = vld [vmem:[%s1443_s20 + $0x50] sm:$0xff]  ;;  %v233_v16 = vld [vmem:[%s1443_s20 + $0x58] sm:$0xff]  ;;  %1115 = vmatprep.subr.bf16.mxu1 %v1114_v7  ;;  %v1126_v27 = vpack.c.bf16 %v229_v11, %v228_v9 }
  0x14   : > { %1281 = vrot.lane.b32.xlu1 %v1280_v8, %s1400_s21  ;;  %1117 = vmatpush3.bf16.msra.mxu1 %v1114_v7  ;;  %v1290_v17 = vpack.i.bf16 %v231_v13, %v230_v12  ;;  %v234_v20 = vld [vmem:[%s1443_s20 + $0x60] sm:$0xff]  ;;  %v235_v21 = vld [vmem:[%s1443_s20 + $0x68] sm:$0xff]  ;;  %v1295_v22 = vpack.i.bf16 %v233_v16, %v232_v15  ;;  %v236_v23 = vld [vmem:[%s1443_s20 + $0x70] sm:$0xff]  ;;  %v1130_v29 = vpack.c.bf16 %v231_v13, %v230_v12 }
  0x15   : > { %v237_v24 = vld [vmem:[%s1443_s20 + $0x78] sm:$0xff]  ;;  %1119 = vmatprep.subr.bf16.mxu1 %v1118_v18  ;;  %v1300_v26 = vpack.i.bf16 %v235_v21, %v234_v20  ;;  %v1134_v30 = vpack.c.bf16 %v233_v16, %v232_v15  ;;  %v1138_v31 = vpack.c.bf16 %v235_v21, %v234_v20 }
  0x16   : > { %v1305_v28 = vpack.i.bf16 %v237_v24, %v236_v23  ;;  %v1142_v33 = vpack.c.bf16 %v237_v24, %v236_v23 }
  0x17   : > { %1276 = vrot.lane.b32.xlu0 %v1275_v10, %s1400_s21 }
  0x18   : > { %1286 = vrot.lane.b32.xlu1 %v1285_v14, %s1400_s21  ;;  %1121 = vmatpush3.bf16.msra.mxu1 %v1118_v18 }
  0x19   : > { %1123 = vmatprep.subr.bf16.mxu1 %v1122_v19 }
  0x1b   : > { %1291 = vrot.lane.b32.xlu0 %v1290_v17, %s1400_s21 }
  0x1c   : > { %1296 = vrot.lane.b32.xlu1 %v1295_v22, %s1400_s21  ;;  %1125 = vmatpush3.bf16.msra.mxu1 %v1122_v19 }
  0x1d   : > { %1127 = vmatprep.subr.bf16.mxu1 %v1126_v27 }
  0x1f   : > { %1301 = vrot.lane.b32.xlu0 %v1300_v26, %s1400_s21 }
  0x20   : > { %1306 = vrot.lane.b32.xlu1 %v1305_v28, %s1400_s21  ;;  %1129 = vmatpush3.bf16.msra.mxu1 %v1126_v27  ;;  %s197_s21 = scalar_lea.vmem %s1563_s4, %s881_s14 }
  0x21   : > { %1131 = vmatprep.subr.bf16.mxu1 %v1130_v29 }
  0x23   : > { %1311 = vrot.lane.b32.xlu0 %v1270_v3, %s1401_s24 }
  0x24   : > { %1316 = vrot.lane.b32.xlu1 %v1270_v3, %s1402_s25  ;;  %1133 = vmatpush3.bf16.msra.mxu1 %v1130_v29 }
  0x25   : > { %1135 = vmatprep.subr.bf16.mxu1 %v1134_v30 }
  0x27   : > { %1321 = vrot.lane.b32.xlu0 %v1275_v10, %s1401_s24 }
  0x28   : > { %1326 = vrot.lane.b32.xlu1 %v1275_v10, %s1402_s25  ;;  %1137 = vmatpush3.bf16.msra.mxu1 %v1134_v30 }
  0x29   : > { %1139 = vmatprep.subr.bf16.mxu1 %v1138_v31 }
  0x2b   : > { %1331 = vrot.lane.b32.xlu0 %v1280_v8, %s1401_s24 }
  0x2c   : > { %1336 = vrot.lane.b32.xlu1 %v1280_v8, %s1402_s25  ;;  %1141 = vmatpush3.bf16.msra.mxu1 %v1138_v31 }
  0x2d   : > { %1143 = vmatprep.subr.bf16.mxu1 %v1142_v33 }
  0x2f   : > { %1341 = vrot.lane.b32.xlu0 %v1285_v14, %s1401_s24 }
  0x30   : > { %1346 = vrot.lane.b32.xlu1 %v1285_v14, %s1402_s25  ;;  %1145 = vmatpush3.bf16.msra.mxu1 %v1142_v33 }
  0x33   : > { %1351 = vrot.lane.b32.xlu0 %v1290_v17, %s1401_s24  ;;  %995 = vmatmul.mubr.f32.vlgmr.msra.gmra.mrb[0].mxu1 %v239_v34 }
  0x34   : > { %1356 = vrot.lane.b32.xlu1 %v1290_v17, %s1402_s25  ;;  %997 = vmatprep.mubr.f32.mxu1 %v240_v35 }
  0x37   : > { %1361 = vrot.lane.b32.xlu0 %v1295_v22, %s1401_s24  ;;  %998 = vmatmul.mubr.f32.gmra.mrb[2].mxu1 %v241_v36 }
  0x38   : > { %1366 = vrot.lane.b32.xlu1 %v1295_v22, %s1402_s25  ;;  %1032 = vmatprep.mubr.f32.mxu1 %v865_v37 }
  0x3b   : > { %1371 = vrot.lane.b32.xlu0 %v1300_v26, %s1401_s24 }
  0x3c   : > { %1376 = vrot.lane.b32.xlu1 %v1300_v26, %s1402_s25 }
  0x3f   : > { %1381 = vrot.lane.b32.xlu0 %v1305_v28, %s1401_s24 }
  0x40   : > { %1386 = vrot.lane.b32.xlu1 %v1305_v28, %s1402_s25 }
  0x43   : > { %204 = vperm.xlu0 %1390, %v198_v39   ;;  %v870_v39 = vld [vmem:[%s1560_s1 + $0x48] sm:$0xff] }
  0x44   : > { %209 = vperm.xlu1 %1391, %v199_v38  }
  0x47   : > { %219 = vperm.xlu0 %1390, %v201_v42  }
  0x48   : > { %214 = vperm.xlu1 %1391, %v200_v41  }
  0x85   : > { %v1272_v43 = vpop.permute.xlu0 %1271 }
  0x86   : > { %v1274_v44 = vunpack.i.h.bf16 %v1272_v43  ;;  %v1273_v45 = vunpack.i.l.bf16 %v1272_v43  ;;  %v1282_v46 = vpop.permute.xlu1 %1281 }
  0x87   : > { %v1284_v48 = vunpack.i.h.bf16 %v1282_v46  ;;  %v1283_v49 = vunpack.i.l.bf16 %v1282_v46  ;;  %v871_v46 = vld [vmem:[%s1560_s1 + $0x50] sm:$0xff] }
  0x88   : > { %v1178_v47 = vpack.c.bf16 %v1274_v44, %v1273_v45 }
  0x89   : > { %v1277_v50 = vpop.permute.xlu0 %1276  ;;  %v1186_v55 = vpack.c.bf16 %v1284_v48, %v1283_v49  ;;  %v872_v49 = vld [vmem:[%s1560_s1 + $0x58] sm:$0xff] }
  0x8a   : > { %v1279_v51 = vunpack.i.h.bf16 %v1277_v50  ;;  %v1278_v52 = vunpack.i.l.bf16 %v1277_v50  ;;  %1179 = vmatprep.subr.bf16.mxu0 %v1178_v47  ;;  %v1287_v53 = vpop.permute.xlu1 %1286 }
  0x8b   : > { %1181 = vmatpush3.bf16.msra.mxu0 %v1178_v47  ;;  %v1289_v56 = vunpack.i.h.bf16 %v1287_v53  ;;  %v1288_v57 = vunpack.i.l.bf16 %v1287_v53 }
  0x8c   : > { %v1182_v54 = vpack.c.bf16 %v1279_v51, %v1278_v52 }
  0x8d   : > { %v1292_v58 = vpop.permute.xlu0 %1291  ;;  %v1190_v62 = vpack.c.bf16 %v1289_v56, %v1288_v57  ;;  %v873_v56 = vld [vmem:[%s1560_s1 + $0x60] sm:$0xff] }
  0x8e   : > { %1183 = vmatprep.subr.bf16.mxu0 %v1182_v54  ;;  %v1297_v59 = vpop.permute.xlu1 %1296  ;;  %v1294_v60 = vunpack.i.h.bf16 %v1292_v58  ;;  %v1293_v61 = vunpack.i.l.bf16 %v1292_v58 }
  0x8f   : > { %1185 = vmatpush3.bf16.msra.mxu0 %v1182_v54  ;;  %v1299_v2 = vunpack.i.h.bf16 %v1297_v59  ;;  %v1298_v3 = vunpack.i.l.bf16 %v1297_v59 }
  0x90   : > { %1187 = vmatprep.subr.bf16.mxu0 %v1186_v55  ;;  %v1194_v1 = vpack.c.bf16 %v1294_v60, %v1293_v61 }
  0x91   : > { %v1302_v63 = vpop.permute.xlu0 %1301  ;;  %v1198_v11 = vpack.c.bf16 %v1299_v2, %v1298_v3 }
  0x92   : > { %v1307_v0 = vpop.permute.xlu1 %1306  ;;  %v1304_v8 = vunpack.i.h.bf16 %v1302_v63  ;;  %v1303_v9 = vunpack.i.l.bf16 %v1302_v63 }
  0x93   : > { %1189 = vmatpush3.bf16.msra.mxu0 %v1186_v55  ;;  %v1309_v18 = vunpack.i.h.bf16 %v1307_v0  ;;  %v1308_v19 = vunpack.i.l.bf16 %v1307_v0 }
  0x94   : > { %1191 = vmatprep.subr.bf16.mxu0 %v1190_v62  ;;  %v1202_v16 = vpack.c.bf16 %v1304_v8, %v1303_v9 }
  0x95   : > { %v1312_v4 = vpop.permute.xlu0 %1311  ;;  %v1206_v25 = vpack.c.bf16 %v1309_v18, %v1308_v19  ;;  %v874_v18 = vld [vmem:[%s1560_s1 + $0x68] sm:$0xff]  ;;  %v875_v19 = vld [vmem:[%s1560_s1 + $0x70] sm:$0xff] }
  0x96   : > { %v1314_v5 = vunpack.i.h.bf16 %v1312_v4  ;;  %v1313_v6 = vunpack.i.l.bf16 %v1312_v4  ;;  %v1317_v7 = vpop.permute.xlu1 %1316 }
  0x97   : > { %1193 = vmatpush3.bf16.msra.mxu0 %v1190_v62  ;;  %v1319_v26 = vunpack.i.h.bf16 %v1317_v7  ;;  %v1318_v27 = vunpack.i.l.bf16 %v1317_v7  ;;  %v866_v7 = vld [vmem:[%s1560_s1 + $0x28] sm:$0xff] }
  0x98   : > { %v1146_v10 = vpack.c.bf16 %v1314_v5, %v1313_v6  ;;  %1195 = vmatprep.subr.bf16.mxu0 %v1194_v1 }
  0x99   : > { %v1322_v12 = vpop.permute.xlu0 %1321  ;;  %v1210_v33 = vpack.c.bf16 %v1319_v26, %v1318_v27 }
  0x9a   : > { %v1324_v13 = vunpack.i.h.bf16 %v1322_v12  ;;  %v1323_v14 = vunpack.i.l.bf16 %v1322_v12  ;;  %1147 = vmatprep.subr.bf16.mxu1 %v1146_v10  ;;  %v1327_v15 = vpop.permute.xlu1 %1326 }
  0x9b   : > { %1149 = vmatpush3.bf16.msra.mxu1 %v1146_v10  ;;  %1197 = vmatpush3.bf16.msra.mxu0 %v1194_v1  ;;  %v1329_v34 = vunpack.i.h.bf16 %v1327_v15  ;;  %v1328_v35 = vunpack.i.l.bf16 %v1327_v15 }
  0x9c   : > { %v1150_v17 = vpack.c.bf16 %v1324_v13, %v1323_v14  ;;  %1199 = vmatprep.subr.bf16.mxu0 %v1198_v11  ;;  %v868_v13 = vld [vmem:[%s1560_s1 + $0x38] sm:$0xff] }
  0x9d   : > { %v1332_v20 = vpop.permute.xlu0 %1331  ;;  %v1214_v42 = vpack.c.bf16 %v1329_v34, %v1328_v35 }
  0x9e   : > { %v1334_v21 = vunpack.i.h.bf16 %v1332_v20  ;;  %v1333_v22 = vunpack.i.l.bf16 %v1332_v20  ;;  %1151 = vmatprep.subr.bf16.mxu1 %v1150_v17  ;;  %v1337_v23 = vpop.permute.xlu1 %1336  ;;  %v876_v20 = vld [vmem:[%s1560_s1 + $0x78] sm:$0xff] }
  0x9f   : > { %1153 = vmatpush3.bf16.msra.mxu1 %v1150_v17  ;;  %1201 = vmatpush3.bf16.msra.mxu0 %v1198_v11  ;;  %v1339_v43 = vunpack.i.h.bf16 %v1337_v23  ;;  %v1338_v44 = vunpack.i.l.bf16 %v1337_v23  ;;  %v867_v11 = vld [vmem:[%s1560_s1 + $0x30] sm:$0xff] }
  0xa0   : > { %v1154_v24 = vpack.c.bf16 %v1334_v21, %v1333_v22  ;;  %1203 = vmatprep.subr.bf16.mxu0 %v1202_v16 }
  0xa1   : > { %v1342_v28 = vpop.permute.xlu0 %1341  ;;  %v1218_v51 = vpack.c.bf16 %v1339_v43, %v1338_v44 }
  0xa2   : > { %v1344_v29 = vunpack.i.h.bf16 %v1342_v28  ;;  %v1343_v30 = vunpack.i.l.bf16 %v1342_v28  ;;  %1155 = vmatprep.subr.bf16.mxu1 %v1154_v24  ;;  %v1347_v31 = vpop.permute.xlu1 %1346 }
  0xa3   : > { %1157 = vmatpush3.bf16.msra.mxu1 %v1154_v24  ;;  %1205 = vmatpush3.bf16.msra.mxu0 %v1202_v16  ;;  %v1349_v52 = vunpack.i.h.bf16 %v1347_v31  ;;  %v1348_v53 = vunpack.i.l.bf16 %v1347_v31 }
  0xa4   : > { %v1158_v32 = vpack.c.bf16 %v1344_v29, %v1343_v30  ;;  %1207 = vmatprep.subr.bf16.mxu0 %v1206_v25 }
  0xa5   : > { %v1352_v36 = vpop.permute.xlu0 %1351  ;;  %v1222_v60 = vpack.c.bf16 %v1349_v52, %v1348_v53 }
  0xa6   : > { %v1354_v37 = vunpack.i.h.bf16 %v1352_v36  ;;  %v1353_v38 = vunpack.i.l.bf16 %v1352_v36  ;;  %1159 = vmatprep.subr.bf16.mxu1 %v1158_v32  ;;  %v1357_v40 = vpop.permute.xlu1 %1356 }
  0xa7   : > { %1161 = vmatpush3.bf16.msra.mxu1 %v1158_v32  ;;  %1209 = vmatpush3.bf16.msra.mxu0 %v1206_v25  ;;  %v1359_v61 = vunpack.i.h.bf16 %v1357_v40  ;;  %v1358_v62 = vunpack.i.l.bf16 %v1357_v40 }
  0xa8   : > { %v1162_v41 = vpack.c.bf16 %v1354_v37, %v1353_v38  ;;  %1211 = vmatprep.subr.bf16.mxu0 %v1210_v33  ;;  %v877_v37 = vld [vmem:[%s1562_s3] ss:$0 sm:$0xff] }
  0xa9   : > { %v1362_v45 = vpop.permute.xlu0 %1361  ;;  %v1226_v4 = vpack.c.bf16 %v1359_v61, %v1358_v62 }
  0xaa   : > { %v1364_v47 = vunpack.i.h.bf16 %v1362_v45  ;;  %v1363_v48 = vunpack.i.l.bf16 %v1362_v45  ;;  %1163 = vmatprep.subr.bf16.mxu1 %v1162_v41  ;;  %1071 = vmatmul.mubr.f32.vlgmr.msra.gmra.mrb[0].mxu0 %v870_v39  ;;  %v1367_v55 = vpop.permute.xlu1 %1366 }
  0xab   : > { %1165 = vmatpush3.bf16.msra.mxu1 %v1162_v41  ;;  %1213 = vmatpush3.bf16.msra.mxu0 %v1210_v33  ;;  %v1369_v5 = vunpack.i.h.bf16 %v1367_v55  ;;  %v1368_v6 = vunpack.i.l.bf16 %v1367_v55 }
  0xac   : > { %v1166_v50 = vpack.c.bf16 %v1364_v47, %v1363_v48  ;;  %1215 = vmatprep.subr.bf16.mxu0 %v1214_v42  ;;  %1073 = vmatprep.mubr.f32.mxu0 %v871_v46 }
  0xad   : > { %v1372_v54 = vpop.permute.xlu0 %1371  ;;  %v1230_v8 = vpack.c.bf16 %v1369_v5, %v1368_v6 }
  0xae   : > { %v1374_v57 = vunpack.i.h.bf16 %v1372_v54  ;;  %v1373_v58 = vunpack.i.l.bf16 %v1372_v54  ;;  %1167 = vmatprep.subr.bf16.mxu1 %v1166_v50  ;;  %1074 = vmatmul.mubr.f32.gmra.mrb[2].mxu0 %v872_v49  ;;  %v1377_v2 = vpop.permute.xlu1 %1376 }
  0xaf   : > { %1169 = vmatpush3.bf16.msra.mxu1 %v1166_v50  ;;  %1217 = vmatpush3.bf16.msra.mxu0 %v1214_v42  ;;  %v1379_v9 = vunpack.i.h.bf16 %v1377_v2  ;;  %v1378_v10 = vunpack.i.l.bf16 %v1377_v2 }
  0xb0   : > { %v1170_v59 = vpack.c.bf16 %v1374_v57, %v1373_v58  ;;  %1219 = vmatprep.subr.bf16.mxu0 %v1218_v51  ;;  %1108 = vmatprep.mubr.f32.mxu0 %v873_v56 }
  0xb1   : > { %v1382_v63 = vpop.permute.xlu0 %1381  ;;  %v1234_v14 = vpack.c.bf16 %v1379_v9, %v1378_v10 }
  0xb2   : > { %v1384_v0 = vunpack.i.h.bf16 %v1382_v63  ;;  %v1383_v1 = vunpack.i.l.bf16 %v1382_v63  ;;  %1171 = vmatprep.subr.bf16.mxu1 %v1170_v59  ;;  %v1387_v12 = vpop.permute.xlu1 %1386 }
  0xb3   : > { %1173 = vmatpush3.bf16.msra.mxu1 %v1170_v59  ;;  %1221 = vmatpush3.bf16.msra.mxu0 %v1218_v51  ;;  %v1389_v15 = vunpack.i.h.bf16 %v1387_v12  ;;  %v1388_v16 = vunpack.i.l.bf16 %v1387_v12 }
  0xb4   : > { %v1174_v3 = vpack.c.bf16 %v1384_v0, %v1383_v1  ;;  %1223 = vmatprep.subr.bf16.mxu0 %v1222_v60 }
  0xb5   : > { %v1238_v17 = vpack.c.bf16 %v1389_v15, %v1388_v16 }
  0xb6   : > { %1175 = vmatprep.subr.bf16.mxu1 %v1174_v3 }
  0xb7   : > { %1177 = vmatpush3.bf16.msra.mxu1 %v1174_v3  ;;  %1225 = vmatpush3.bf16.msra.mxu0 %v1222_v60 }
  0xb8   : > { %1227 = vmatprep.subr.bf16.mxu0 %v1226_v4 }
  0xba   : > { %1033 = vmatmul.mubr.f32.vlgmr.msra.gmra.mrb[0].mxu1 %v866_v7 }
  0xbb   : > { %1229 = vmatpush3.bf16.msra.mxu0 %v1226_v4  ;;  %1035 = vmatprep.mubr.f32.mxu1 %v867_v11 }
  0xbc   : > { %1231 = vmatprep.subr.bf16.mxu0 %v1230_v8 }
  0xbe   : > { %1036 = vmatmul.mubr.f32.gmra.mrb[2].mxu1 %v868_v13 }
  0xbf   : > { %1233 = vmatpush3.bf16.msra.mxu0 %v1230_v8 }
  0xc0   : > { %1235 = vmatprep.subr.bf16.mxu0 %v1234_v14 }
  0xc2   : > { %v205_v26 = vpop.permute.xlu0 %204 }
  0xc3   : > { %1237 = vmatpush3.bf16.msra.mxu0 %v1234_v14  ;;  %v210_v25 = vpop.permute.xlu1 %209 }
  0xc4   : > { %1239 = vmatprep.subr.bf16.mxu0 %v1238_v17 }
  0xc6   : > { %v220_v29 = vpop.permute.xlu0 %219 }
  0xc7   : > { %1241 = vmatpush3.bf16.msra.mxu0 %v1238_v17  ;;  %v215_v31 = vpop.permute.xlu1 %214 }
  0xca   : > { %1109 = vmatmul.mubr.f32.vlgmr.msra.gmra.mrb[0].mxu0 %v874_v18 }
  0xcb   : > { %1111 = vmatprep.mubr.f32.mxu0 %v875_v19 }
  0xce   : > { %1112 = vmatmul.mubr.f32.gmra.mrb[2].mxu0 %v876_v20 }
 0x18d   : > { %v1034_v21 = vpop.f32.mrb[0].mxu1 }
 0x18e   : > { %v466_v22 = vpop.f32.mrb[1].mxu1  ;;  %v1242_v27 = vadd.f32 %v1034_v21, %v210_v25 }
 0x18f   : > { %v1244_v28 = vadd.f32 %v466_v22, %v205_v26 }
 0x191   : > { %v1037_v23 = vpop.f32.mrb[2].mxu1 }
 0x192   : > { %v476_v24 = vpop.f32.mrb[3].mxu1  ;;  %v1246_v35 = vadd.f32 %v1037_v23, %v220_v29 }
 0x193   : > { %v1248_v38 = vadd.f32 %v476_v24, %v215_v31 }
 0x19d   : > { %v1110_v30 = vpop.f32.mrb[0].mxu0 }
 0x19e   : > { %v1243_v32 = vadd.f32 %v1242_v27, %v1110_v30  ;;  %v750_v33 = vpop.f32.mrb[1].mxu0 }
 0x19f   : > { %v1245_v34 = vadd.f32 %v1244_v28, %v750_v33 }
 0x1a0   : > { %vm774_vm0 = vcmp.ge.f32.partialorder %v1243_v32, 0.0  ;;  %v778_v36 = vmul.f32 0.2, %v1243_v32 }
 0x1a1   : > { %vm773_vm1 = vcmp.ge.f32.partialorder %v1245_v34, 0.0  ;;  %v777_v39 = vmul.f32 0.2, %v1245_v34  ;;  %v1113_v40 = vpop.f32.mrb[2].mxu0 }
 0x1a2   : > { %v782_v41 = vsel %vm774_vm0, %v1243_v32, %v778_v36  ;;  %v1247_v42 = vadd.f32 %v1246_v35, %v1113_v40  ;;  %v760_v43 = vpop.f32.mrb[3].mxu0 }
 0x1a3   : > { %v793_v44 = vmul.f32 %v877_v37, %v782_v41  ;;  %v781_v45 = vsel %vm773_vm1, %v1245_v34, %v777_v39  ;;  %v1249_v46 = vadd.f32 %v1248_v38, %v760_v43 }
 0x1a4   : > { %v792_v47 = vmul.f32 %v877_v37, %v781_v45  ;;  %vm776_vm3 = vcmp.ge.f32.partialorder %v1247_v42, 0.0  ;;  %v780_v48 = vmul.f32 0.2, %v1247_v42 }
 0x1a5   : > { %798 = vst.msk [vmem:[%s197_s21 + $0x8] sm:$0xff] %vm796_vm2, %v793_v44  ;;  %vm775_vm4 = vcmp.ge.f32.partialorder %v1249_v46, 0.0  ;;  %v779_v49 = vmul.f32 0.2, %v1249_v46 }
 0x1a6   : > { %797 = vst.msk [vmem:[%s197_s21] sm:$0xff] %vm796_vm2, %v792_v47  ;;  %v784_v50 = vsel %vm776_vm3, %v1247_v42, %v780_v48 }
 0x1a7   : > { %v795_v51 = vmul.f32 %v877_v37, %v784_v50  ;;  %v783_v52 = vsel %vm775_vm4, %v1249_v46, %v779_v49 }
 0x1a8   : > { %v794_v53 = vmul.f32 %v877_v37, %v783_v52 }
 0x1a9   : > { %800 = vst.msk [vmem:[%s197_s21 + $0x18] sm:$0xff] %vm796_vm2, %v795_v51 }
 0x1aa   : > { %799 = vst.msk [vmem:[%s197_s21 + $0x10] sm:$0xff] %vm796_vm2, %v794_v53 }
 0x1ab PF: > { %s14_s15 = sadd.s32 1, %s1398_s15  }
 0x1ac   : > { %p11_p4 = scmp.ge.s32.totalorder %s14_s15, 4  }
 0x1ae   :  { %13 = sbr.rel (!%p11_p4) target bundleno = 1 (0x1), region = 69 }

// kernel: _lambda_.13
= control target key start
LH: loop header
LB: loop body
LE: loop exit
PB: predicated region body
PF: predicated region fallthrough
CT: control target
= control target key end

     0   :  { %s1429_s15 = smov 0   ;;  %s1559_s0 = inlined_call_operand.vmem [shape: f32[2,128,26], index: 0, kind: input, shape index: {}]   ;;  %s1560_s1 = inlined_call_operand.vmem [shape: f32[4,32,128], index: 1, kind: input, shape index: {}]   ;;  %s1561_s2 = inlined_call_operand.vmem [shape: f32[32,1], index: 2, kind: input, shape index: {}]   ;;  %s1562_s3 = inlined_call_operand.vmem [shape: f32[1,16], index: 3, kind: input, shape index: {}]   ;;  %s1563_s4 = inlined_call_operand.vmem [shape: f32[2,32,16], index: 4, kind: output, shape index: {}]  }
   0x1 LB: > { %s856_s16 = sadd.s32 4294967295, %s1398_s15   ;;  %p860_p0 = scmp.ge.s32.totalorder %s1398_s15, 1  ;;  %s1398_s15 = sphi %s1429_s15, %s14_s15  }
   0x2   : > { %p162_p1 = scmp.lt.s32.totalorder %s1398_s15, 3 }
   0x4   : > { %p163_p2 = pnand %p860_p0, %p162_p1 }
   0x5   : > { %p188_p3 = scmp.lt.s32.totalorder (!%p163_p2), %s856_s16, 1  ;;  %s1400_s21 = smov (!%p163_p2), 124   ;;  %v238_v25 = vld [vmem:[%s1560_s1] sm:$0xff] (!%p163_p2)  ;;  %v239_v34 = vld [vmem:[%s1560_s1 + $0x8] sm:$0xff] (!%p163_p2)  ;;  %v240_v35 = vld [vmem:[%s1560_s1 + $0x10] sm:$0xff] (!%p163_p2)  ;;  %v1403_v40 = vmov (!%p163_p2), 0  }
   0x6   : > { %166 = sbr.rel (%p163_p2) target bundleno = 427 (0x1ab), region = 36  ;;  %994 = vmatprep.mubr.f32.mxu1 (!%p163_p2), %v238_v25  ;;  %s1401_s24 = smov (!%p163_p2), 127   ;;  %v869_v32 = vld [vmem:[%s1560_s1 + $0x40] sm:$0xff] (!%p163_p2)  ;;  %v241_v36 = vld [vmem:[%s1560_s1 + $0x18] sm:$0xff] (!%p163_p2)  ;;  %v199_v38 = vld [vmem:[%s1561_s2 + $0x8] sm:$0xff] (!%p163_p2)  ;;  %1391 = vset.pattern.permute.xlu1 (!%p163_p2), %v1403_v40  ;;  %vm796_vm2 = vcmask (!%p163_p2), 130048  }
   0x7   : > { %s1402_s25 = smov (!%p163_p2), 123   ;;  %1070 = vmatprep.mubr.f32.mxu0 (!%p163_p2), %v869_v32  ;;  %v865_v37 = vld [vmem:[%s1560_s1 + $0x20] sm:$0xff] (!%p163_p2)  ;;  %1390 = vset.pattern.permute.xlu0 (!%p163_p2), %v1403_v40  ;;  %v200_v41 = vld [vmem:[%s1561_s2 + $0x10] sm:$0xff] (!%p163_p2)  ;;  %v201_v42 = vld [vmem:[%s1561_s2 + $0x18] sm:$0xff] (!%p163_p2) }
   0x8   : > { %v198_v39 = vld [vmem:[%s1561_s2] sm:$0xff] (!%p163_p2) }
   0xd   : > { %s1565_s16 = smov (!%p188_p3, %s856_s16), 1 }
   0xe   : > { %s880_s17 = sshll.u32 %s1565_s16, 7  ;;  %s881_s14 = sshll.u32 %s1565_s16, 5 }
   0xf   : > { %s1443_s20 = scalar_lea.vmem %s1559_s0, %s880_s17 }
  0x10   : > { %v222_v0 = vld [vmem:[%s1443_s20] sm:$0xff]  ;;  %v223_v1 = vld [vmem:[%s1443_s20 + $0x8] sm:$0xff]  ;;  %v224_v2 = vld [vmem:[%s1443_s20 + $0x10] sm:$0xff] }
  0x11   : > { %v1270_v3 = vpack.i.bf16 %v223_v1, %v222_v0  ;;  %v225_v4 = vld [vmem:[%s1443_s20 + $0x18] sm:$0xff]  ;;  %v226_v5 = vld [vmem:[%s1443_s20 + $0x20] sm:$0xff]  ;;  %v227_v6 = vld [vmem:[%s1443_s20 + $0x28] sm:$0xff]  ;;  %v1114_v7 = vpack.c.bf16 %v223_v1, %v222_v0 }
  0x12   : > { %v1280_v8 = vpack.i.bf16 %v227_v6, %v226_v5  ;;  %v228_v9 = vld [vmem:[%s1443_s20 + $0x30] sm:$0xff]  ;;  %v1275_v10 = vpack.i.bf16 %v225_v4, %v224_v2  ;;  %v229_v11 = vld [vmem:[%s1443_s20 + $0x38] sm:$0xff]  ;;  %v230_v12 = vld [vmem:[%s1443_s20 + $0x40] sm:$0xff]  ;;  %v1118_v18 = vpack.c.bf16 %v225_v4, %v224_v2  ;;  %v1122_v19 = vpack.c.bf16 %v227_v6, %v226_v5 }
  0x13   : > { %1271 = vrot.lane.b32.xlu0 %v1270_v3, %s1400_s21  ;;  %v231_v13 = vld [vmem:[%s1443_s20 + $0x48] sm:$0xff]  ;;  %v1285_v14 = vpack.i.bf16 %v229_v11, %v228_v9  ;;  %v232_v15 = vld [vmem:[%s1443_s20 + $0x50] sm:$0xff]  ;;  %v233_v16 = vld [vmem:[%s1443_s20 + $0x58] sm:$0xff]  ;;  %1115 = vmatprep.subr.bf16.mxu1 %v1114_v7  ;;  %v1126_v27 = vpack.c.bf16 %v229_v11, %v228_v9 }
  0x14   : > { %1281 = vrot.lane.b32.xlu1 %v1280_v8, %s1400_s21  ;;  %1117 = vmatpush3.bf16.msra.mxu1 %v1114_v7  ;;  %v1290_v17 = vpack.i.bf16 %v231_v13, %v230_v12  ;;  %v234_v20 = vld [vmem:[%s1443_s20 + $0x60] sm:$0xff]  ;;  %v235_v21 = vld [vmem:[%s1443_s20 + $0x68] sm:$0xff]  ;;  %v1295_v22 = vpack.i.bf16 %v233_v16, %v232_v15  ;;  %v236_v23 = vld [vmem:[%s1443_s20 + $0x70] sm:$0xff]  ;;  %v1130_v29 = vpack.c.bf16 %v231_v13, %v230_v12 }
  0x15   : > { %v237_v24 = vld [vmem:[%s1443_s20 + $0x78] sm:$0xff]  ;;  %1119 = vmatprep.subr.bf16.mxu1 %v1118_v18  ;;  %v1300_v26 = vpack.i.bf16 %v235_v21, %v234_v20  ;;  %v1134_v30 = vpack.c.bf16 %v233_v16, %v232_v15  ;;  %v1138_v31 = vpack.c.bf16 %v235_v21, %v234_v20 }
  0x16   : > { %v1305_v28 = vpack.i.bf16 %v237_v24, %v236_v23  ;;  %v1142_v33 = vpack.c.bf16 %v237_v24, %v236_v23 }
  0x17   : > { %1276 = vrot.lane.b32.xlu0 %v1275_v10, %s1400_s21 }
  0x18   : > { %1286 = vrot.lane.b32.xlu1 %v1285_v14, %s1400_s21  ;;  %1121 = vmatpush3.bf16.msra.mxu1 %v1118_v18 }
  0x19   : > { %1123 = vmatprep.subr.bf16.mxu1 %v1122_v19 }
  0x1b   : > { %1291 = vrot.lane.b32.xlu0 %v1290_v17, %s1400_s21 }
  0x1c   : > { %1296 = vrot.lane.b32.xlu1 %v1295_v22, %s1400_s21  ;;  %1125 = vmatpush3.bf16.msra.mxu1 %v1122_v19 }
  0x1d   : > { %1127 = vmatprep.subr.bf16.mxu1 %v1126_v27 }
  0x1f   : > { %1301 = vrot.lane.b32.xlu0 %v1300_v26, %s1400_s21 }
  0x20   : > { %1306 = vrot.lane.b32.xlu1 %v1305_v28, %s1400_s21  ;;  %1129 = vmatpush3.bf16.msra.mxu1 %v1126_v27  ;;  %s197_s21 = scalar_lea.vmem %s1563_s4, %s881_s14 }
  0x21   : > { %1131 = vmatprep.subr.bf16.mxu1 %v1130_v29 }
  0x23   : > { %1311 = vrot.lane.b32.xlu0 %v1270_v3, %s1401_s24 }
  0x24   : > { %1316 = vrot.lane.b32.xlu1 %v1270_v3, %s1402_s25  ;;  %1133 = vmatpush3.bf16.msra.mxu1 %v1130_v29 }
  0x25   : > { %1135 = vmatprep.subr.bf16.mxu1 %v1134_v30 }
  0x27   : > { %1321 = vrot.lane.b32.xlu0 %v1275_v10, %s1401_s24 }
  0x28   : > { %1326 = vrot.lane.b32.xlu1 %v1275_v10, %s1402_s25  ;;  %1137 = vmatpush3.bf16.msra.mxu1 %v1134_v30 }
  0x29   : > { %1139 = vmatprep.subr.bf16.mxu1 %v1138_v31 }
  0x2b   : > { %1331 = vrot.lane.b32.xlu0 %v1280_v8, %s1401_s24 }
  0x2c   : > { %1336 = vrot.lane.b32.xlu1 %v1280_v8, %s1402_s25  ;;  %1141 = vmatpush3.bf16.msra.mxu1 %v1138_v31 }
  0x2d   : > { %1143 = vmatprep.subr.bf16.mxu1 %v1142_v33 }
  0x2f   : > { %1341 = vrot.lane.b32.xlu0 %v1285_v14, %s1401_s24 }
  0x30   : > { %1346 = vrot.lane.b32.xlu1 %v1285_v14, %s1402_s25  ;;  %1145 = vmatpush3.bf16.msra.mxu1 %v1142_v33 }
  0x33   : > { %1351 = vrot.lane.b32.xlu0 %v1290_v17, %s1401_s24  ;;  %995 = vmatmul.mubr.f32.vlgmr.msra.gmra.mrb[0].mxu1 %v239_v34 }
  0x34   : > { %1356 = vrot.lane.b32.xlu1 %v1290_v17, %s1402_s25  ;;  %997 = vmatprep.mubr.f32.mxu1 %v240_v35 }
  0x37   : > { %1361 = vrot.lane.b32.xlu0 %v1295_v22, %s1401_s24  ;;  %998 = vmatmul.mubr.f32.gmra.mrb[2].mxu1 %v241_v36 }
  0x38   : > { %1366 = vrot.lane.b32.xlu1 %v1295_v22, %s1402_s25  ;;  %1032 = vmatprep.mubr.f32.mxu1 %v865_v37 }
  0x3b   : > { %1371 = vrot.lane.b32.xlu0 %v1300_v26, %s1401_s24 }
  0x3c   : > { %1376 = vrot.lane.b32.xlu1 %v1300_v26, %s1402_s25 }
  0x3f   : > { %1381 = vrot.lane.b32.xlu0 %v1305_v28, %s1401_s24 }
  0x40   : > { %1386 = vrot.lane.b32.xlu1 %v1305_v28, %s1402_s25 }
  0x43   : > { %204 = vperm.xlu0 %1390, %v198_v39   ;;  %v870_v39 = vld [vmem:[%s1560_s1 + $0x48] sm:$0xff] }
  0x44   : > { %209 = vperm.xlu1 %1391, %v199_v38  }
  0x47   : > { %219 = vperm.xlu0 %1390, %v201_v42  }
  0x48   : > { %214 = vperm.xlu1 %1391, %v200_v41  }
  0x85   : > { %v1272_v43 = vpop.permute.xlu0 %1271 }
  0x86   : > { %v1274_v44 = vunpack.i.h.bf16 %v1272_v43  ;;  %v1273_v45 = vunpack.i.l.bf16 %v1272_v43  ;;  %v1282_v46 = vpop.permute.xlu1 %1281 }
  0x87   : > { %v1284_v48 = vunpack.i.h.bf16 %v1282_v46  ;;  %v1283_v49 = vunpack.i.l.bf16 %v1282_v46  ;;  %v871_v46 = vld [vmem:[%s1560_s1 + $0x50] sm:$0xff] }
  0x88   : > { %v1178_v47 = vpack.c.bf16 %v1274_v44, %v1273_v45 }
  0x89   : > { %v1277_v50 = vpop.permute.xlu0 %1276  ;;  %v1186_v55 = vpack.c.bf16 %v1284_v48, %v1283_v49  ;;  %v872_v49 = vld [vmem:[%s1560_s1 + $0x58] sm:$0xff] }
  0x8a   : > { %v1279_v51 = vunpack.i.h.bf16 %v1277_v50  ;;  %v1278_v52 = vunpack.i.l.bf16 %v1277_v50  ;;  %1179 = vmatprep.subr.bf16.mxu0 %v1178_v47  ;;  %v1287_v53 = vpop.permute.xlu1 %1286 }
  0x8b   : > { %1181 = vmatpush3.bf16.msra.mxu0 %v1178_v47  ;;  %v1289_v56 = vunpack.i.h.bf16 %v1287_v53  ;;  %v1288_v57 = vunpack.i.l.bf16 %v1287_v53 }
  0x8c   : > { %v1182_v54 = vpack.c.bf16 %v1279_v51, %v1278_v52 }
  0x8d   : > { %v1292_v58 = vpop.permute.xlu0 %1291  ;;  %v1190_v62 = vpack.c.bf16 %v1289_v56, %v1288_v57  ;;  %v873_v56 = vld [vmem:[%s1560_s1 + $0x60] sm:$0xff] }
  0x8e   : > { %1183 = vmatprep.subr.bf16.mxu0 %v1182_v54  ;;  %v1297_v59 = vpop.permute.xlu1 %1296  ;;  %v1294_v60 = vunpack.i.h.bf16 %v1292_v58  ;;  %v1293_v61 = vunpack.i.l.bf16 %v1292_v58 }
  0x8f   : > { %1185 = vmatpush3.bf16.msra.mxu0 %v1182_v54  ;;  %v1299_v2 = vunpack.i.h.bf16 %v1297_v59  ;;  %v1298_v3 = vunpack.i.l.bf16 %v1297_v59 }
  0x90   : > { %1187 = vmatprep.subr.bf16.mxu0 %v1186_v55  ;;  %v1194_v1 = vpack.c.bf16 %v1294_v60, %v1293_v61 }
  0x91   : > { %v1302_v63 = vpop.permute.xlu0 %1301  ;;  %v1198_v11 = vpack.c.bf16 %v1299_v2, %v1298_v3 }
  0x92   : > { %v1307_v0 = vpop.permute.xlu1 %1306  ;;  %v1304_v8 = vunpack.i.h.bf16 %v1302_v63  ;;  %v1303_v9 = vunpack.i.l.bf16 %v1302_v63 }
  0x93   : > { %1189 = vmatpush3.bf16.msra.mxu0 %v1186_v55  ;;  %v1309_v18 = vunpack.i.h.bf16 %v1307_v0  ;;  %v1308_v19 = vunpack.i.l.bf16 %v1307_v0 }
  0x94   : > { %1191 = vmatprep.subr.bf16.mxu0 %v1190_v62  ;;  %v1202_v16 = vpack.c.bf16 %v1304_v8, %v1303_v9 }
  0x95   : > { %v1312_v4 = vpop.permute.xlu0 %1311  ;;  %v1206_v25 = vpack.c.bf16 %v1309_v18, %v1308_v19  ;;  %v874_v18 = vld [vmem:[%s1560_s1 + $0x68] sm:$0xff]  ;;  %v875_v19 = vld [vmem:[%s1560_s1 + $0x70] sm:$0xff] }
  0x96   : > { %v1314_v5 = vunpack.i.h.bf16 %v1312_v4  ;;  %v1313_v6 = vunpack.i.l.bf16 %v1312_v4  ;;  %v1317_v7 = vpop.permute.xlu1 %1316 }
  0x97   : > { %1193 = vmatpush3.bf16.msra.mxu0 %v1190_v62  ;;  %v1319_v26 = vunpack.i.h.bf16 %v1317_v7  ;;  %v1318_v27 = vunpack.i.l.bf16 %v1317_v7  ;;  %v866_v7 = vld [vmem:[%s1560_s1 + $0x28] sm:$0xff] }
  0x98   : > { %v1146_v10 = vpack.c.bf16 %v1314_v5, %v1313_v6  ;;  %1195 = vmatprep.subr.bf16.mxu0 %v1194_v1 }
  0x99   : > { %v1322_v12 = vpop.permute.xlu0 %1321  ;;  %v1210_v33 = vpack.c.bf16 %v1319_v26, %v1318_v27 }
  0x9a   : > { %v1324_v13 = vunpack.i.h.bf16 %v1322_v12  ;;  %v1323_v14 = vunpack.i.l.bf16 %v1322_v12  ;;  %1147 = vmatprep.subr.bf16.mxu1 %v1146_v10  ;;  %v1327_v15 = vpop.permute.xlu1 %1326 }
  0x9b   : > { %1149 = vmatpush3.bf16.msra.mxu1 %v1146_v10  ;;  %1197 = vmatpush3.bf16.msra.mxu0 %v1194_v1  ;;  %v1329_v34 = vunpack.i.h.bf16 %v1327_v15  ;;  %v1328_v35 = vunpack.i.l.bf16 %v1327_v15 }
  0x9c   : > { %v1150_v17 = vpack.c.bf16 %v1324_v13, %v1323_v14  ;;  %1199 = vmatprep.subr.bf16.mxu0 %v1198_v11  ;;  %v868_v13 = vld [vmem:[%s1560_s1 + $0x38] sm:$0xff] }
  0x9d   : > { %v1332_v20 = vpop.permute.xlu0 %1331  ;;  %v1214_v42 = vpack.c.bf16 %v1329_v34, %v1328_v35 }
  0x9e   : > { %v1334_v21 = vunpack.i.h.bf16 %v1332_v20  ;;  %v1333_v22 = vunpack.i.l.bf16 %v1332_v20  ;;  %1151 = vmatprep.subr.bf16.mxu1 %v1150_v17  ;;  %v1337_v23 = vpop.permute.xlu1 %1336  ;;  %v876_v20 = vld [vmem:[%s1560_s1 + $0x78] sm:$0xff] }
  0x9f   : > { %1153 = vmatpush3.bf16.msra.mxu1 %v1150_v17  ;;  %1201 = vmatpush3.bf16.msra.mxu0 %v1198_v11  ;;  %v1339_v43 = vunpack.i.h.bf16 %v1337_v23  ;;  %v1338_v44 = vunpack.i.l.bf16 %v1337_v23  ;;  %v867_v11 = vld [vmem:[%s1560_s1 + $0x30] sm:$0xff] }
  0xa0   : > { %v1154_v24 = vpack.c.bf16 %v1334_v21, %v1333_v22  ;;  %1203 = vmatprep.subr.bf16.mxu0 %v1202_v16 }
  0xa1   : > { %v1342_v28 = vpop.permute.xlu0 %1341  ;;  %v1218_v51 = vpack.c.bf16 %v1339_v43, %v1338_v44 }
  0xa2   : > { %v1344_v29 = vunpack.i.h.bf16 %v1342_v28  ;;  %v1343_v30 = vunpack.i.l.bf16 %v1342_v28  ;;  %1155 = vmatprep.subr.bf16.mxu1 %v1154_v24  ;;  %v1347_v31 = vpop.permute.xlu1 %1346 }
  0xa3   : > { %1157 = vmatpush3.bf16.msra.mxu1 %v1154_v24  ;;  %1205 = vmatpush3.bf16.msra.mxu0 %v1202_v16  ;;  %v1349_v52 = vunpack.i.h.bf16 %v1347_v31  ;;  %v1348_v53 = vunpack.i.l.bf16 %v1347_v31 }
  0xa4   : > { %v1158_v32 = vpack.c.bf16 %v1344_v29, %v1343_v30  ;;  %1207 = vmatprep.subr.bf16.mxu0 %v1206_v25 }
  0xa5   : > { %v1352_v36 = vpop.permute.xlu0 %1351  ;;  %v1222_v60 = vpack.c.bf16 %v1349_v52, %v1348_v53 }
  0xa6   : > { %v1354_v37 = vunpack.i.h.bf16 %v1352_v36  ;;  %v1353_v38 = vunpack.i.l.bf16 %v1352_v36  ;;  %1159 = vmatprep.subr.bf16.mxu1 %v1158_v32  ;;  %v1357_v40 = vpop.permute.xlu1 %1356 }
  0xa7   : > { %1161 = vmatpush3.bf16.msra.mxu1 %v1158_v32  ;;  %1209 = vmatpush3.bf16.msra.mxu0 %v1206_v25  ;;  %v1359_v61 = vunpack.i.h.bf16 %v1357_v40  ;;  %v1358_v62 = vunpack.i.l.bf16 %v1357_v40 }
  0xa8   : > { %v1162_v41 = vpack.c.bf16 %v1354_v37, %v1353_v38  ;;  %1211 = vmatprep.subr.bf16.mxu0 %v1210_v33  ;;  %v877_v37 = vld [vmem:[%s1562_s3] ss:$0 sm:$0xff] }
  0xa9   : > { %v1362_v45 = vpop.permute.xlu0 %1361  ;;  %v1226_v4 = vpack.c.bf16 %v1359_v61, %v1358_v62 }
  0xaa   : > { %v1364_v47 = vunpack.i.h.bf16 %v1362_v45  ;;  %v1363_v48 = vunpack.i.l.bf16 %v1362_v45  ;;  %1163 = vmatprep.subr.bf16.mxu1 %v1162_v41  ;;  %1071 = vmatmul.mubr.f32.vlgmr.msra.gmra.mrb[0].mxu0 %v870_v39  ;;  %v1367_v55 = vpop.permute.xlu1 %1366 }
  0xab   : > { %1165 = vmatpush3.bf16.msra.mxu1 %v1162_v41  ;;  %1213 = vmatpush3.bf16.msra.mxu0 %v1210_v33  ;;  %v1369_v5 = vunpack.i.h.bf16 %v1367_v55  ;;  %v1368_v6 = vunpack.i.l.bf16 %v1367_v55 }
  0xac   : > { %v1166_v50 = vpack.c.bf16 %v1364_v47, %v1363_v48  ;;  %1215 = vmatprep.subr.bf16.mxu0 %v1214_v42  ;;  %1073 = vmatprep.mubr.f32.mxu0 %v871_v46 }
  0xad   : > { %v1372_v54 = vpop.permute.xlu0 %1371  ;;  %v1230_v8 = vpack.c.bf16 %v1369_v5, %v1368_v6 }
  0xae   : > { %v1374_v57 = vunpack.i.h.bf16 %v1372_v54  ;;  %v1373_v58 = vunpack.i.l.bf16 %v1372_v54  ;;  %1167 = vmatprep.subr.bf16.mxu1 %v1166_v50  ;;  %1074 = vmatmul.mubr.f32.gmra.mrb[2].mxu0 %v872_v49  ;;  %v1377_v2 = vpop.permute.xlu1 %1376 }
  0xaf   : > { %1169 = vmatpush3.bf16.msra.mxu1 %v1166_v50  ;;  %1217 = vmatpush3.bf16.msra.mxu0 %v1214_v42  ;;  %v1379_v9 = vunpack.i.h.bf16 %v1377_v2  ;;  %v1378_v10 = vunpack.i.l.bf16 %v1377_v2 }
  0xb0   : > { %v1170_v59 = vpack.c.bf16 %v1374_v57, %v1373_v58  ;;  %1219 = vmatprep.subr.bf16.mxu0 %v1218_v51  ;;  %1108 = vmatprep.mubr.f32.mxu0 %v873_v56 }
  0xb1   : > { %v1382_v63 = vpop.permute.xlu0 %1381  ;;  %v1234_v14 = vpack.c.bf16 %v1379_v9, %v1378_v10 }
  0xb2   : > { %v1384_v0 = vunpack.i.h.bf16 %v1382_v63  ;;  %v1383_v1 = vunpack.i.l.bf16 %v1382_v63  ;;  %1171 = vmatprep.subr.bf16.mxu1 %v1170_v59  ;;  %v1387_v12 = vpop.permute.xlu1 %1386 }
  0xb3   : > { %1173 = vmatpush3.bf16.msra.mxu1 %v1170_v59  ;;  %1221 = vmatpush3.bf16.msra.mxu0 %v1218_v51  ;;  %v1389_v15 = vunpack.i.h.bf16 %v1387_v12  ;;  %v1388_v16 = vunpack.i.l.bf16 %v1387_v12 }
  0xb4   : > { %v1174_v3 = vpack.c.bf16 %v1384_v0, %v1383_v1  ;;  %1223 = vmatprep.subr.bf16.mxu0 %v1222_v60 }
  0xb5   : > { %v1238_v17 = vpack.c.bf16 %v1389_v15, %v1388_v16 }
  0xb6   : > { %1175 = vmatprep.subr.bf16.mxu1 %v1174_v3 }
  0xb7   : > { %1177 = vmatpush3.bf16.msra.mxu1 %v1174_v3  ;;  %1225 = vmatpush3.bf16.msra.mxu0 %v1222_v60 }
  0xb8   : > { %1227 = vmatprep.subr.bf16.mxu0 %v1226_v4 }
  0xba   : > { %1033 = vmatmul.mubr.f32.vlgmr.msra.gmra.mrb[0].mxu1 %v866_v7 }
  0xbb   : > { %1229 = vmatpush3.bf16.msra.mxu0 %v1226_v4  ;;  %1035 = vmatprep.mubr.f32.mxu1 %v867_v11 }
  0xbc   : > { %1231 = vmatprep.subr.bf16.mxu0 %v1230_v8 }
  0xbe   : > { %1036 = vmatmul.mubr.f32.gmra.mrb[2].mxu1 %v868_v13 }
  0xbf   : > { %1233 = vmatpush3.bf16.msra.mxu0 %v1230_v8 }
  0xc0   : > { %1235 = vmatprep.subr.bf16.mxu0 %v1234_v14 }
  0xc2   : > { %v205_v26 = vpop.permute.xlu0 %204 }
  0xc3   : > { %1237 = vmatpush3.bf16.msra.mxu0 %v1234_v14  ;;  %v210_v25 = vpop.permute.xlu1 %209 }
  0xc4   : > { %1239 = vmatprep.subr.bf16.mxu0 %v1238_v17 }
  0xc6   : > { %v220_v29 = vpop.permute.xlu0 %219 }
  0xc7   : > { %1241 = vmatpush3.bf16.msra.mxu0 %v1238_v17  ;;  %v215_v31 = vpop.permute.xlu1 %214 }
  0xca   : > { %1109 = vmatmul.mubr.f32.vlgmr.msra.gmra.mrb[0].mxu0 %v874_v18 }
  0xcb   : > { %1111 = vmatprep.mubr.f32.mxu0 %v875_v19 }
  0xce   : > { %1112 = vmatmul.mubr.f32.gmra.mrb[2].mxu0 %v876_v20 }
 0x18d   : > { %v1034_v21 = vpop.f32.mrb[0].mxu1 }
 0x18e   : > { %v466_v22 = vpop.f32.mrb[1].mxu1  ;;  %v1242_v27 = vadd.f32 %v1034_v21, %v210_v25 }
 0x18f   : > { %v1244_v28 = vadd.f32 %v466_v22, %v205_v26 }
 0x191   : > { %v1037_v23 = vpop.f32.mrb[2].mxu1 }
 0x192   : > { %v476_v24 = vpop.f32.mrb[3].mxu1  ;;  %v1246_v35 = vadd.f32 %v1037_v23, %v220_v29 }
 0x193   : > { %v1248_v38 = vadd.f32 %v476_v24, %v215_v31 }
 0x19d   : > { %v1110_v30 = vpop.f32.mrb[0].mxu0 }
 0x19e   : > { %v1243_v32 = vadd.f32 %v1242_v27, %v1110_v30  ;;  %v750_v33 = vpop.f32.mrb[1].mxu0 }
 0x19f   : > { %v1245_v34 = vadd.f32 %v1244_v28, %v750_v33 }
 0x1a0   : > { %vm774_vm0 = vcmp.ge.f32.partialorder %v1243_v32, 0.0  ;;  %v778_v36 = vmul.f32 0.2, %v1243_v32 }
 0x1a1   : > { %vm773_vm1 = vcmp.ge.f32.partialorder %v1245_v34, 0.0  ;;  %v777_v39 = vmul.f32 0.2, %v1245_v34  ;;  %v1113_v40 = vpop.f32.mrb[2].mxu0 }
 0x1a2   : > { %v782_v41 = vsel %vm774_vm0, %v1243_v32, %v778_v36  ;;  %v1247_v42 = vadd.f32 %v1246_v35, %v1113_v40  ;;  %v760_v43 = vpop.f32.mrb[3].mxu0 }
 0x1a3   : > { %v793_v44 = vmul.f32 %v877_v37, %v782_v41  ;;  %v781_v45 = vsel %vm773_vm1, %v1245_v34, %v777_v39  ;;  %v1249_v46 = vadd.f32 %v1248_v38, %v760_v43 }
 0x1a4   : > { %v792_v47 = vmul.f32 %v877_v37, %v781_v45  ;;  %vm776_vm3 = vcmp.ge.f32.partialorder %v1247_v42, 0.0  ;;  %v780_v48 = vmul.f32 0.2, %v1247_v42 }
 0x1a5   : > { %798 = vst.msk [vmem:[%s197_s21 + $0x8] sm:$0xff] %vm796_vm2, %v793_v44  ;;  %vm775_vm4 = vcmp.ge.f32.partialorder %v1249_v46, 0.0  ;;  %v779_v49 = vmul.f32 0.2, %v1249_v46 }
 0x1a6   : > { %797 = vst.msk [vmem:[%s197_s21] sm:$0xff] %vm796_vm2, %v792_v47  ;;  %v784_v50 = vsel %vm776_vm3, %v1247_v42, %v780_v48 }
 0x1a7   : > { %v795_v51 = vmul.f32 %v877_v37, %v784_v50  ;;  %v783_v52 = vsel %vm775_vm4, %v1249_v46, %v779_v49 }
 0x1a8   : > { %v794_v53 = vmul.f32 %v877_v37, %v783_v52 }
 0x1a9   : > { %800 = vst.msk [vmem:[%s197_s21 + $0x18] sm:$0xff] %vm796_vm2, %v795_v51 }
 0x1aa   : > { %799 = vst.msk [vmem:[%s197_s21 + $0x10] sm:$0xff] %vm796_vm2, %v794_v53 }
 0x1ab PF: > { %s14_s15 = sadd.s32 1, %s1398_s15  }
 0x1ac   : > { %p11_p4 = scmp.ge.s32.totalorder %s14_s15, 4  }
 0x1ae   :  { %13 = sbr.rel (!%p11_p4) target bundleno = 1 (0x1), region = 69 }

// kernel: _lambda_.14
= control target key start
LH: loop header
LB: loop body
LE: loop exit
PB: predicated region body
PF: predicated region fallthrough
CT: control target
= control target key end

     0   :  { %s1896_s15 = smov 0   ;;  %s2079_s0 = inlined_call_operand.vmem [shape: f32[2,32,26], index: 0, kind: input, shape index: {}]   ;;  %s2080_s1 = inlined_call_operand.vmem [shape: f32[9,32,32], index: 1, kind: input, shape index: {}]   ;;  %s2081_s2 = inlined_call_operand.vmem [shape: f32[32,1], index: 2, kind: input, shape index: {}]   ;;  %s2082_s3 = inlined_call_operand.vmem [shape: f32[1,16], index: 3, kind: input, shape index: {}]   ;;  %s2083_s4 = inlined_call_operand.vmem [shape: f32[2,32,16], index: 4, kind: output, shape index: {}]  }
   0x1 LB: > { %s1363_s16 = sadd.s32 4294967295, %s1860_s15   ;;  %p1367_p0 = scmp.ge.s32.totalorder %s1860_s15, 1  ;;  %s1860_s15 = sphi %s1896_s15, %s14_s15  }
   0x2   : > { %p162_p1 = scmp.lt.s32.totalorder %s1860_s15, 3 }
   0x4   : > { %p163_p2 = pnand %p1367_p0, %p162_p1 }
   0x5   : > { %p188_p3 = scmp.lt.s32.totalorder (!%p163_p2), %s1363_s16, 1  ;;  %v226_v0 = vld [vmem:[%s2080_s1] sm:$0xff] (!%p163_p2)  ;;  %vm230_vm0 = vcmask (!%p163_p2), 261120   ;;  %s1862_s25 = smov (!%p163_p2), 123   ;;  %v227_v10 = vld [vmem:[%s2080_s1 + $0x8] sm:$0xff] (!%p163_p2)  ;;  %v228_v11 = vld [vmem:[%s2080_s1 + $0x10] sm:$0xff] (!%p163_p2) }
   0x6   : > { %166 = sbr.rel (%p163_p2) target bundleno = 400 (0x190), region = 36  ;;  %1525 = vmatprep.mubr.msk.f32.mxu1 (!%p163_p2), %vm230_vm0, %v226_v0  ;;  %v1400_v6 = vld [vmem:[%s2080_s1 + $0x80] sm:$0xff] (!%p163_p2)  ;;  %s1863_s26 = smov (!%p163_p2), 127   ;;  %v229_v12 = vld [vmem:[%s2080_s1 + $0x18] sm:$0xff] (!%p163_p2)  ;;  %v200_v14 = vld [vmem:[%s2081_s2 + $0x10] sm:$0xff] (!%p163_p2)  ;;  %v1870_v16 = vmov (!%p163_p2), 0  }
   0x7   : > { %1581 = vmatprep.mubr.msk.f32.mxu0 (!%p163_p2), %vm230_vm0, %v1400_v6  ;;  %s1864_s27 = smov (!%p163_p2), 122   ;;  %s1865_s6 = smov (!%p163_p2), 126   ;;  %v1376_v13 = vld [vmem:[%s2080_s1 + $0x20] sm:$0xff] (!%p163_p2)  ;;  %v201_v15 = vld [vmem:[%s2081_s2 + $0x18] sm:$0xff] (!%p163_p2)  ;;  %1852 = vset.pattern.permute.xlu0 (!%p163_p2), %v1870_v16  ;;  %v199_v17 = vld [vmem:[%s2081_s2 + $0x8] sm:$0xff] (!%p163_p2)  ;;  %vm1303_vm3 = vcmask (!%p163_p2), 130048  }
   0x8   : > { %s1866_s7 = smov (!%p163_p2), 120   ;;  %s1867_s12 = smov (!%p163_p2), 124   ;;  %1853 = vset.pattern.permute.xlu1 (!%p163_p2), %v1870_v16  ;;  %v198_v18 = vld [vmem:[%s2081_s2] sm:$0xff] (!%p163_p2)  ;;  %v1401_v41 = vld [vmem:[%s2080_s1 + $0x88] sm:$0xff] (!%p163_p2)  ;;  %v1402_v46 = vld [vmem:[%s2080_s1 + $0x90] sm:$0xff] (!%p163_p2) }
   0x9   : > { %s1868_s13 = smov (!%p163_p2), 119   ;;  %s1869_s14 = smov (!%p163_p2), 118   ;;  %v1377_v51 = vld [vmem:[%s2080_s1 + $0x28] sm:$0xff] (!%p163_p2)  ;;  %v1403_v53 = vld [vmem:[%s2080_s1 + $0x98] sm:$0xff] (!%p163_p2)  ;;  %v1378_v57 = vld [vmem:[%s2080_s1 + $0x30] sm:$0xff] (!%p163_p2) }
   0xa   : > { %v1408_v62 = vld [vmem:[%s2080_s1 + $0xa0] sm:$0xff] (!%p163_p2)  ;;  %v1379_v63 = vld [vmem:[%s2080_s1 + $0x38] sm:$0xff] (!%p163_p2) }
   0xd   : > { %s2085_s16 = smov (!%p188_p3, %s1363_s16), 1 }
   0xe   : > { %s1443_s19 = sshll.u32 %s2085_s16, 5 }
   0xf   : > { %s192_s22 = scalar_lea.vmem %s2079_s0, %s1443_s19  ;;  %s197_s21 = scalar_lea.vmem %s2083_s4, %s1443_s19 }
  0x10   : > { %v222_v1 = vld [vmem:[%s192_s22] sm:$0xff]  ;;  %v223_v2 = vld [vmem:[%s192_s22 + $0x8] sm:$0xff]  ;;  %v224_v3 = vld [vmem:[%s192_s22 + $0x10] sm:$0xff] }
  0x11   : > { %v1772_v4 = vpack.i.bf16 %v223_v2, %v222_v1  ;;  %v225_v5 = vld [vmem:[%s192_s22 + $0x18] sm:$0xff]  ;;  %v1643_v8 = vpack.c.bf16 %v223_v2, %v222_v1  ;;  %v1409_v1 = vld [vmem:[%s2080_s1 + $0xa8] sm:$0xff] }
  0x12   : > { %v1777_v7 = vpack.i.bf16 %v225_v5, %v224_v3  ;;  %v1647_v9 = vpack.c.bf16 %v225_v5, %v224_v3  ;;  %v1384_v5 = vld [vmem:[%s2080_s1 + $0x40] sm:$0xff] }
  0x13   : > { %1773 = vrot.lane.b32.xlu0 %v1772_v4, %s1862_s25  ;;  %1783 = vrot.lane.b32.xlu1 %v1772_v4, %s1863_s26 }
  0x14   : > { %1644 = vmatprep.subr.bf16.mxu1 %v1643_v8 }
  0x15   : > { %1646 = vmatpush3.bf16.msra.mxu1 %v1643_v8 }
  0x16   : > { %1648 = vmatprep.subr.bf16.mxu1 %v1647_v9 }
  0x17   : > { %1778 = vrot.lane.b32.xlu0 %v1777_v7, %s1862_s25  ;;  %1788 = vrot.lane.b32.xlu1 %v1772_v4, %s1864_s27 }
  0x19   : > { %1650 = vmatpush3.bf16.msra.mxu1 %v1647_v9 }
  0x1b   : > { %1793 = vrot.lane.b32.xlu0 %v1777_v7, %s1863_s26  ;;  %1798 = vrot.lane.b32.xlu1 %v1777_v7, %s1864_s27 }
  0x1c   : > { %1526 = vmatmul.mubr.msk.f32.vlgmr.msra.gmra.mrb[0].mxu1 %vm230_vm0, %v227_v10  ;;  %v1410_v10 = vld [vmem:[%s2080_s1 + $0xb0] sm:$0xff] }
  0x1d   : > { %1528 = vmatprep.mubr.msk.f32.mxu1 %vm230_vm0, %v228_v11  ;;  %v1385_v11 = vld [vmem:[%s2080_s1 + $0x48] sm:$0xff] }
  0x1f   : > { %1803 = vrot.lane.b32.xlu0 %v1772_v4, %s1865_s6  ;;  %1808 = vrot.lane.b32.xlu1 %v1772_v4, %s1866_s7 }
  0x20   : > { %1529 = vmatmul.mubr.msk.f32.gmra.mrb[2].mxu1 %vm230_vm0, %v229_v12 }
  0x21   : > { %1539 = vmatprep.mubr.msk.f32.mxu1 %vm230_vm0, %v1376_v13  ;;  %v1411_v13 = vld [vmem:[%s2080_s1 + $0xb8] sm:$0xff] }
  0x23   : > { %1813 = vrot.lane.b32.xlu0 %v1777_v7, %s1865_s6  ;;  %1818 = vrot.lane.b32.xlu1 %v1777_v7, %s1866_s7 }
  0x27   : > { %1823 = vrot.lane.b32.xlu0 %v1772_v4, %s1867_s12  ;;  %1828 = vrot.lane.b32.xlu1 %v1772_v4, %s1868_s13 }
  0x2b   : > { %1833 = vrot.lane.b32.xlu0 %v1777_v7, %s1867_s12  ;;  %1838 = vrot.lane.b32.xlu1 %v1777_v7, %s1868_s13 }
  0x2f   : > { %1843 = vrot.lane.b32.xlu0 %v1772_v4, %s1869_s14  ;;  %1848 = vrot.lane.b32.xlu1 %v1777_v7, %s1869_s14 }
  0x33   : > { %214 = vperm.xlu0 %1852, %v200_v14   ;;  %219 = vperm.xlu1 %1853, %v201_v15  }
  0x37   : > { %209 = vperm.xlu0 %1852, %v199_v17   ;;  %204 = vperm.xlu1 %1853, %v198_v18   ;;  %v1386_v17 = vld [vmem:[%s2080_s1 + $0x50] sm:$0xff] }
  0x85   : > { %v1774_v19 = vpop.permute.xlu0 %1773  ;;  %v1784_v20 = vpop.permute.xlu1 %1783 }
  0x86   : > { %v1776_v21 = vunpack.i.h.bf16 %v1774_v19  ;;  %v1775_v22 = vunpack.i.l.bf16 %v1774_v19  ;;  %v1786_v23 = vunpack.i.h.bf16 %v1784_v20  ;;  %v1785_v24 = vunpack.i.l.bf16 %v1784_v20 }
  0x88   : > { %v1651_v25 = vpack.c.bf16 %v1786_v23, %v1785_v24  ;;  %v1675_v26 = vpack.c.bf16 %v1776_v21, %v1775_v22  ;;  %v1416_v22 = vld [vmem:[%s2080_s1 + $0xc0] sm:$0xff]  ;;  %v1387_v23 = vld [vmem:[%s2080_s1 + $0x58] sm:$0xff] }
  0x89   : > { %v1779_v27 = vpop.permute.xlu0 %1778  ;;  %v1789_v28 = vpop.permute.xlu1 %1788 }
  0x8a   : > { %v1781_v29 = vunpack.i.h.bf16 %v1779_v27  ;;  %v1780_v30 = vunpack.i.l.bf16 %v1779_v27  ;;  %1676 = vmatprep.subr.bf16.mxu0 %v1675_v26  ;;  %v1791_v31 = vunpack.i.h.bf16 %v1789_v28  ;;  %v1790_v32 = vunpack.i.l.bf16 %v1789_v28  ;;  %1652 = vmatprep.subr.bf16.mxu1 %v1651_v25  ;;  %v1392_v28 = vld [vmem:[%s2080_s1 + $0x60] sm:$0xff] }
  0x8b   : > { %1678 = vmatpush3.bf16.msra.mxu0 %v1675_v26  ;;  %1654 = vmatpush3.bf16.msra.mxu1 %v1651_v25  ;;  %v1417_v25 = vld [vmem:[%s2080_s1 + $0xc8] sm:$0xff] }
  0x8c   : > { %v1679_v33 = vpack.c.bf16 %v1781_v29, %v1780_v30  ;;  %v1683_v34 = vpack.c.bf16 %v1791_v31, %v1790_v32  ;;  %v1418_v32 = vld [vmem:[%s2080_s1 + $0xd0] sm:$0xff] }
  0x8d   : > { %v1794_v35 = vpop.permute.xlu0 %1793  ;;  %v1799_v36 = vpop.permute.xlu1 %1798 }
  0x8e   : > { %v1796_v37 = vunpack.i.h.bf16 %v1794_v35  ;;  %v1795_v38 = vunpack.i.l.bf16 %v1794_v35  ;;  %1680 = vmatprep.subr.bf16.mxu0 %v1679_v33  ;;  %v1801_v39 = vunpack.i.h.bf16 %v1799_v36  ;;  %v1800_v40 = vunpack.i.l.bf16 %v1799_v36  ;;  %v1393_v35 = vld [vmem:[%s2080_s1 + $0x68] sm:$0xff] }
  0x8f   : > { %1682 = vmatpush3.bf16.msra.mxu0 %v1679_v33 }
  0x90   : > { %v1655_v42 = vpack.c.bf16 %v1796_v37, %v1795_v38  ;;  %v1687_v43 = vpack.c.bf16 %v1801_v39, %v1800_v40  ;;  %1684 = vmatprep.subr.bf16.mxu0 %v1683_v34  ;;  %v1419_v37 = vld [vmem:[%s2080_s1 + $0xd8] sm:$0xff]  ;;  %v1394_v38 = vld [vmem:[%s2080_s1 + $0x70] sm:$0xff]  ;;  %v1424_v39 = vld [vmem:[%s2080_s1 + $0xe0] sm:$0xff] }
  0x91   : > { %v1804_v44 = vpop.permute.xlu0 %1803  ;;  %v1809_v45 = vpop.permute.xlu1 %1808 }
  0x92   : > { %v1806_v47 = vunpack.i.h.bf16 %v1804_v44  ;;  %v1805_v48 = vunpack.i.l.bf16 %v1804_v44  ;;  %1656 = vmatprep.subr.bf16.mxu1 %v1655_v42  ;;  %1582 = vmatmul.mubr.msk.f32.vlgmr.msra.gmra.mrb[0].mxu0 %vm230_vm0, %v1401_v41  ;;  %v1811_v49 = vunpack.i.h.bf16 %v1809_v45  ;;  %v1810_v50 = vunpack.i.l.bf16 %v1809_v45  ;;  %v1395_v41 = vld [vmem:[%s2080_s1 + $0x78] sm:$0xff]  ;;  %v1426_v44 = vld [vmem:[%s2080_s1 + $0xf0] sm:$0xff] }
  0x93   : > { %1658 = vmatpush3.bf16.msra.mxu1 %v1655_v42  ;;  %1686 = vmatpush3.bf16.msra.mxu0 %v1683_v34  ;;  %v1425_v42 = vld [vmem:[%s2080_s1 + $0xe8] sm:$0xff]  ;;  %v1427_v45 = vld [vmem:[%s2080_s1 + $0xf8] sm:$0xff] }
  0x94   : > { %v1659_v52 = vpack.c.bf16 %v1806_v47, %v1805_v48  ;;  %1584 = vmatprep.mubr.msk.f32.mxu0 %vm230_vm0, %v1402_v46  ;;  %1688 = vmatprep.subr.bf16.mxu0 %v1687_v43  ;;  %v1691_v54 = vpack.c.bf16 %v1811_v49, %v1810_v50  ;;  %v1435_v46 = vld [vmem:[%s2080_s1 + $0x118] sm:$0xff]  ;;  %v1432_v47 = vld [vmem:[%s2080_s1 + $0x100] sm:$0xff]  ;;  %v1433_v48 = vld [vmem:[%s2080_s1 + $0x108] sm:$0xff] }
  0x95   : > { %v1814_v55 = vpop.permute.xlu0 %1813  ;;  %v1819_v56 = vpop.permute.xlu1 %1818 }
  0x96   : > { %v1816_v58 = vunpack.i.h.bf16 %v1814_v55  ;;  %v1815_v59 = vunpack.i.l.bf16 %v1814_v55  ;;  %1540 = vmatmul.mubr.msk.f32.vlgmr.msra.gmra.mrb[0].mxu1 %vm230_vm0, %v1377_v51  ;;  %1660 = vmatprep.subr.bf16.mxu1 %v1659_v52  ;;  %v1821_v60 = vunpack.i.h.bf16 %v1819_v56  ;;  %v1820_v61 = vunpack.i.l.bf16 %v1819_v56 }
  0x97   : > { %1585 = vmatmul.mubr.msk.f32.gmra.mrb[2].mxu0 %vm230_vm0, %v1403_v53  ;;  %1662 = vmatpush3.bf16.msra.mxu1 %v1659_v52 }
  0x98   : > { %v1663_v0 = vpack.c.bf16 %v1816_v58, %v1815_v59  ;;  %1690 = vmatpush3.bf16.msra.mxu0 %v1687_v43  ;;  %1542 = vmatprep.mubr.msk.f32.mxu1 %vm230_vm0, %v1378_v57  ;;  %v1695_v2 = vpack.c.bf16 %v1821_v60, %v1820_v61  ;;  %v1434_v43 = vld [vmem:[%s2080_s1 + $0x110] sm:$0xff] }
  0x99   : > { %v1824_v3 = vpop.permute.xlu0 %1823  ;;  %1595 = vmatprep.mubr.msk.f32.mxu0 %vm230_vm0, %v1408_v62  ;;  %1692 = vmatprep.subr.bf16.mxu0 %v1691_v54  ;;  %v1829_v4 = vpop.permute.xlu1 %1828 }
  0x9a   : > { %v1826_v6 = vunpack.i.h.bf16 %v1824_v3  ;;  %v1825_v7 = vunpack.i.l.bf16 %v1824_v3  ;;  %1543 = vmatmul.mubr.msk.f32.gmra.mrb[2].mxu1 %vm230_vm0, %v1379_v63  ;;  %1664 = vmatprep.subr.bf16.mxu1 %v1663_v0  ;;  %v1831_v8 = vunpack.i.h.bf16 %v1829_v4  ;;  %v1830_v9 = vunpack.i.l.bf16 %v1829_v4 }
  0x9b   : > { %1596 = vmatmul.mubr.msk.f32.vlgmr.msra.gmra.mrb[0].mxu0 %vm230_vm0, %v1409_v1  ;;  %1666 = vmatpush3.bf16.msra.mxu1 %v1663_v0 }
  0x9c   : > { %v1667_v12 = vpack.c.bf16 %v1826_v6, %v1825_v7  ;;  %1694 = vmatpush3.bf16.msra.mxu0 %v1691_v54  ;;  %1553 = vmatprep.mubr.msk.f32.mxu1 %vm230_vm0, %v1384_v5  ;;  %v1699_v14 = vpack.c.bf16 %v1831_v8, %v1830_v9  ;;  %v1440_v7 = vld [vmem:[%s2082_s3] ss:$0 sm:$0xff] }
  0x9d   : > { %v1834_v15 = vpop.permute.xlu0 %1833  ;;  %1598 = vmatprep.mubr.msk.f32.mxu0 %vm230_vm0, %v1410_v10  ;;  %1696 = vmatprep.subr.bf16.mxu0 %v1695_v2  ;;  %v1839_v16 = vpop.permute.xlu1 %1838 }
  0x9e   : > { %v1836_v18 = vunpack.i.h.bf16 %v1834_v15  ;;  %v1835_v19 = vunpack.i.l.bf16 %v1834_v15  ;;  %1554 = vmatmul.mubr.msk.f32.vlgmr.msra.gmra.mrb[0].mxu1 %vm230_vm0, %v1385_v11  ;;  %1668 = vmatprep.subr.bf16.mxu1 %v1667_v12  ;;  %v1841_v20 = vunpack.i.h.bf16 %v1839_v16  ;;  %v1840_v21 = vunpack.i.l.bf16 %v1839_v16 }
  0x9f   : > { %1599 = vmatmul.mubr.msk.f32.gmra.mrb[2].mxu0 %vm230_vm0, %v1411_v13  ;;  %1670 = vmatpush3.bf16.msra.mxu1 %v1667_v12 }
  0xa0   : > { %v1671_v24 = vpack.c.bf16 %v1836_v18, %v1835_v19  ;;  %1698 = vmatpush3.bf16.msra.mxu0 %v1695_v2  ;;  %1556 = vmatprep.mubr.msk.f32.mxu1 %vm230_vm0, %v1386_v17  ;;  %v1703_v26 = vpack.c.bf16 %v1841_v20, %v1840_v21 }
  0xa1   : > { %1609 = vmatprep.mubr.msk.f32.mxu0 %vm230_vm0, %v1416_v22  ;;  %1700 = vmatprep.subr.bf16.mxu0 %v1699_v14  ;;  %v1844_v27 = vpop.permute.xlu0 %1843  ;;  %v1849_v29 = vpop.permute.xlu1 %1848 }
  0xa2   : > { %1557 = vmatmul.mubr.msk.f32.gmra.mrb[2].mxu1 %vm230_vm0, %v1387_v23  ;;  %1672 = vmatprep.subr.bf16.mxu1 %v1671_v24  ;;  %v1846_v30 = vunpack.i.h.bf16 %v1844_v27  ;;  %v1845_v31 = vunpack.i.l.bf16 %v1844_v27  ;;  %v1851_v33 = vunpack.i.h.bf16 %v1849_v29  ;;  %v1850_v34 = vunpack.i.l.bf16 %v1849_v29 }
  0xa3   : > { %1610 = vmatmul.mubr.msk.f32.vlgmr.msra.gmra.mrb[0].mxu0 %vm230_vm0, %v1417_v25  ;;  %1674 = vmatpush3.bf16.msra.mxu1 %v1671_v24 }
  0xa4   : > { %v1707_v36 = vpack.c.bf16 %v1846_v30, %v1845_v31  ;;  %1702 = vmatpush3.bf16.msra.mxu0 %v1699_v14  ;;  %1567 = vmatprep.mubr.msk.f32.mxu1 %vm230_vm0, %v1392_v28  ;;  %v1711_v40 = vpack.c.bf16 %v1851_v33, %v1850_v34 }
  0xa5   : > { %1612 = vmatprep.mubr.msk.f32.mxu0 %vm230_vm0, %v1418_v32  ;;  %1704 = vmatprep.subr.bf16.mxu0 %v1703_v26 }
  0xa6   : > { %1568 = vmatmul.mubr.msk.f32.vlgmr.msra.gmra.mrb[0].mxu1 %vm230_vm0, %v1393_v35  ;;  %1715 = vmatprep.subr.bf16.mxu1 %v1707_v36 }
  0xa7   : > { %1613 = vmatmul.mubr.msk.f32.gmra.mrb[2].mxu0 %vm230_vm0, %v1419_v37  ;;  %1570 = vmatprep.mubr.msk.f32.mxu1 %vm230_vm0, %v1394_v38 }
  0xa8   : > { %1706 = vmatpush3.bf16.msra.mxu0 %v1703_v26  ;;  %1623 = vmatprep.mubr.msk.f32.mxu0 %vm230_vm0, %v1424_v39 }
  0xa9   : > { %1717 = vmatpush3.bf16.msra.mxu1 %v1707_v36  ;;  %1708 = vmatprep.subr.bf16.mxu0 %v1707_v36 }
  0xaa   : > { %1571 = vmatmul.mubr.msk.f32.gmra.mrb[2].mxu1 %vm230_vm0, %v1395_v41  ;;  %1716 = vmatprep.subr.bf16.mxu1 %v1711_v40 }
  0xab   : > { %1624 = vmatmul.mubr.msk.f32.vlgmr.msra.gmra.mrb[0].mxu0 %vm230_vm0, %v1425_v42  ;;  %1640 = vmatprep.mubr.msk.f32.mxu1 %vm230_vm0, %v1434_v43 }
  0xac   : > { %1710 = vmatpush3.bf16.msra.mxu0 %v1707_v36  ;;  %1626 = vmatprep.mubr.msk.f32.mxu0 %vm230_vm0, %v1426_v44 }
  0xad   : > { %1718 = vmatpush3.bf16.msra.mxu1 %v1711_v40  ;;  %1712 = vmatprep.subr.bf16.mxu0 %v1711_v40 }
  0xaf   : > { %1627 = vmatmul.mubr.msk.f32.gmra.mrb[2].mxu0 %vm230_vm0, %v1427_v45 }
  0xb0   : > { %1714 = vmatpush3.bf16.msra.mxu0 %v1711_v40  ;;  %1641 = vmatmul.mubr.msk.f32.vlgmr.msra.gmra.mrb[4].mxu1 %vm230_vm0, %v1435_v46 }
  0xb1   : > { %1637 = vmatprep.mubr.msk.f32.mxu0 %vm230_vm0, %v1432_v47 }
  0xb2   : > { %v215_v51 = vpop.permute.xlu0 %214  ;;  %v220_v52 = vpop.permute.xlu1 %219 }
  0xb3   : > { %1638 = vmatmul.mubr.msk.f32.vlgmr.msra.gmra.mrb[0].mxu0 %vm230_vm0, %v1433_v48 }
  0xb6   : > { %v210_v55 = vpop.permute.xlu0 %209  ;;  %v205_v57 = vpop.permute.xlu1 %204 }
 0x179   : > { %v1569_v49 = vpop.f32.mrb[0].mxu1 }
 0x17a   : > { %v667_v50 = vpop.f32.mrb[1].mxu1  ;;  %v1719_v1 = vadd.f32 %v1569_v49, %v210_v55 }
 0x17b   : > { %v1721_v3 = vadd.f32 %v667_v50, %v205_v57 }
 0x17d   : > { %v1572_v53 = vpop.f32.mrb[2].mxu1 }
 0x17e   : > { %v677_v54 = vpop.f32.mrb[3].mxu1  ;;  %v1723_v56 = vadd.f32 %v1572_v53, %v220_v52 }
 0x17f   : > { %v1726_v58 = vadd.f32 %v677_v54, %v215_v51 }
 0x182   : > { %v1628_v59 = vpop.f32.mrb[2].mxu0 }
 0x183   : > { %v1724_v60 = vadd.f32 %v1723_v56, %v1628_v59  ;;  %v1149_v61 = vpop.f32.mrb[3].mxu0  ;;  %v1642_v62 = vpop.f32.mrb[4].mxu1 }
 0x184   : > { %v1727_v63 = vadd.f32 %v1726_v58, %v1149_v61  ;;  %v1267_v0 = vpop.f32.mrb[5].mxu1 }
 0x185   : > { %v1725_v2 = vadd.f32 %v1724_v60, %v1642_v62 }
 0x186   : > { %v1728_v4 = vadd.f32 %v1727_v63, %v1267_v0  ;;  %v1639_v5 = vpop.f32.mrb[0].mxu0 }
 0x187   : > { %vm1283_vm1 = vcmp.ge.f32.partialorder %v1725_v2, 0.0  ;;  %v1287_v6 = vmul.f32 0.2, %v1725_v2  ;;  %v1720_v8 = vadd.f32 %v1719_v1, %v1639_v5  ;;  %v1257_v9 = vpop.f32.mrb[1].mxu0 }
 0x188   : > { %vm1282_vm2 = vcmp.ge.f32.partialorder %v1728_v4, 0.0  ;;  %v1286_v10 = vmul.f32 0.2, %v1728_v4  ;;  %v1722_v11 = vadd.f32 %v1721_v3, %v1257_v9 }
 0x189   : > { %v1291_v12 = vsel %vm1283_vm1, %v1725_v2, %v1287_v6  ;;  %vm1281_vm4 = vcmp.ge.f32.partialorder %v1720_v8, 0.0  ;;  %v1285_v13 = vmul.f32 0.2, %v1720_v8 }
 0x18a   : > { %v1302_v14 = vmul.f32 %v1440_v7, %v1291_v12  ;;  %v1290_v15 = vsel %vm1282_vm2, %v1728_v4, %v1286_v10  ;;  %vm1280_vm5 = vcmp.ge.f32.partialorder %v1722_v11, 0.0  ;;  %v1284_v16 = vmul.f32 0.2, %v1722_v11 }
 0x18b   : > { %v1301_v17 = vmul.f32 %v1440_v7, %v1290_v15  ;;  %v1289_v18 = vsel %vm1281_vm4, %v1720_v8, %v1285_v13 }
 0x18c   : > { %1307 = vst.msk [vmem:[%s197_s21 + $0x18] sm:$0xff] %vm1303_vm3, %v1302_v14  ;;  %v1300_v19 = vmul.f32 %v1440_v7, %v1289_v18  ;;  %v1288_v20 = vsel %vm1280_vm5, %v1722_v11, %v1284_v16 }
 0x18d   : > { %1306 = vst.msk [vmem:[%s197_s21 + $0x10] sm:$0xff] %vm1303_vm3, %v1301_v17  ;;  %v1299_v21 = vmul.f32 %v1440_v7, %v1288_v20 }
 0x18e   : > { %1305 = vst.msk [vmem:[%s197_s21 + $0x8] sm:$0xff] %vm1303_vm3, %v1300_v19 }
 0x18f   : > { %1304 = vst.msk [vmem:[%s197_s21] sm:$0xff] %vm1303_vm3, %v1299_v21 }
 0x190 PF: > { %s14_s15 = sadd.s32 1, %s1860_s15  }
 0x191   : > { %p11_p4 = scmp.ge.s32.totalorder %s14_s15, 4  }
 0x193   :  { %13 = sbr.rel (!%p11_p4) target bundleno = 1 (0x1), region = 74 }

// kernel: _lambda_.15
= control target key start
LH: loop header
LB: loop body
LE: loop exit
PB: predicated region body
PF: predicated region fallthrough
CT: control target
= control target key end

     0   :  { %s2264_s15 = smov 0   ;;  %s2468_s0 = inlined_call_operand.vmem [shape: f32[2,64,50], index: 0, kind: input, shape index: {}]   ;;  %s2469_s1 = inlined_call_operand.vmem [shape: f32[9,32,64], index: 1, kind: input, shape index: {}]   ;;  %s2470_s2 = inlined_call_operand.vmem [shape: f32[32,1], index: 2, kind: input, shape index: {}]   ;;  %s2471_s3 = inlined_call_operand.vmem [shape: f32[1,36], index: 3, kind: input, shape index: {}]   ;;  %s2472_s4 = inlined_call_operand.vmem [shape: f32[2,32,36], index: 4, kind: output, shape index: {}]  }
   0x1 LB: > { %s1467_s16 = sadd.s32 4294967295, %s2228_s15   ;;  %p1471_p0 = scmp.ge.s32.totalorder %s2228_s15, 1  ;;  %s2228_s15 = sphi %s2264_s15, %s14_s15  }
   0x2   : > { %p162_p1 = scmp.lt.s32.totalorder %s2228_s15, 3 }
   0x4   : > { %p163_p2 = pnand %p1471_p0, %p162_p1 }
   0x5   : > { %p188_p3 = scmp.lt.s32.totalorder (!%p163_p2), %s1467_s16, 1  ;;  %s2230_s21 = smov (!%p163_p2), 121   ;;  %v230_v14 = vld [vmem:[%s2469_s1] sm:$0xff] (!%p163_p2)  ;;  %vm234_vm0 = vcmask (!%p163_p2), 523264   ;;  %v231_v18 = vld [vmem:[%s2469_s1 + $0x8] sm:$0xff] (!%p163_p2)  ;;  %v232_v19 = vld [vmem:[%s2469_s1 + $0x10] sm:$0xff] (!%p163_p2) }
   0x6   : > { %166 = sbr.rel (%p163_p2) target bundleno = 439 (0x1b7), region = 36  ;;  %s2231_s24 = smov (!%p163_p2), 127   ;;  %v1504_v15 = vld [vmem:[%s2469_s1 + $0x80] sm:$0xff] (!%p163_p2)  ;;  %1673 = vmatprep.mubr.msk.f32.mxu1 (!%p163_p2), %vm234_vm0, %v230_v14  ;;  %v233_v20 = vld [vmem:[%s2469_s1 + $0x18] sm:$0xff] (!%p163_p2)  ;;  %v200_v22 = vld [vmem:[%s2470_s2 + $0x10] sm:$0xff] (!%p163_p2)  ;;  %v2238_v24 = vmov (!%p163_p2), 0  }
   0x7   : > { %s2232_s27 = smov (!%p163_p2), 120   ;;  %1761 = vmatprep.mubr.msk.f32.mxu0 (!%p163_p2), %vm234_vm0, %v1504_v15  ;;  %s2233_s6 = smov (!%p163_p2), 126   ;;  %v1480_v21 = vld [vmem:[%s2469_s1 + $0x20] sm:$0xff] (!%p163_p2)  ;;  %v201_v23 = vld [vmem:[%s2470_s2 + $0x18] sm:$0xff] (!%p163_p2)  ;;  %2220 = vset.pattern.permute.xlu0 (!%p163_p2), %v2238_v24  ;;  %v199_v25 = vld [vmem:[%s2470_s2 + $0x8] sm:$0xff] (!%p163_p2)  ;;  %vm1407_vm3 = vcmask (!%p163_p2), 293888  }
   0x8   : > { %s2234_s7 = smov (!%p163_p2), 116   ;;  %s2235_s12 = smov (!%p163_p2), 122   ;;  %2221 = vset.pattern.permute.xlu1 (!%p163_p2), %v2238_v24  ;;  %v198_v26 = vld [vmem:[%s2470_s2] sm:$0xff] (!%p163_p2)  ;;  %v1505_v62 = vld [vmem:[%s2469_s1 + $0x88] sm:$0xff] (!%p163_p2)  ;;  %v1482_v24 = vld [vmem:[%s2469_s1 + $0x30] sm:$0xff] (!%p163_p2) }
   0x9   : > { %s2236_s13 = smov (!%p163_p2), 115   ;;  %s2237_s14 = smov (!%p163_p2), 114   ;;  %v1512_v14 = vld [vmem:[%s2469_s1 + $0xa0] sm:$0xff] (!%p163_p2) }
   0xd   : > { %s2474_s16 = smov (!%p188_p3, %s1467_s16), 1 }
   0xe   : > { %s1547_s17 = sshll.u32 %s2474_s16, 6  ;;  %s1548_s11 = sshll.u32 %s2474_s16, 5 }
   0xf   : > { %s192_s20 = scalar_lea.vmem %s2468_s0, %s1547_s17  ;;  %s197_s18 = scalar_lea.vmem %s2472_s4, %s1548_s11 }
  0x10   : > { %v222_v0 = vld [vmem:[%s192_s20] sm:$0xff]  ;;  %v223_v1 = vld [vmem:[%s192_s20 + $0x8] sm:$0xff]  ;;  %v224_v5 = vld [vmem:[%s192_s20 + $0x10] sm:$0xff] }
  0x11   : > { %v226_v2 = vld [vmem:[%s192_s20 + $0x20] sm:$0xff]  ;;  %v2278_v3 = vpack.i.bf16 %v223_v1, %v222_v0  ;;  %v227_v4 = vld [vmem:[%s192_s20 + $0x28] sm:$0xff]  ;;  %v225_v6 = vld [vmem:[%s192_s20 + $0x18] sm:$0xff]  ;;  %v1855_v12 = vpack.c.bf16 %v223_v1, %v222_v0 }
  0x12   : > { %v2280_v7 = vpack.i.bf16 %v227_v4, %v226_v2  ;;  %v228_v8 = vld [vmem:[%s192_s20 + $0x30] sm:$0xff]  ;;  %v229_v9 = vld [vmem:[%s192_s20 + $0x38] sm:$0xff]  ;;  %v2065_v10 = vpack.i.bf16 %v225_v6, %v224_v5  ;;  %v1859_v13 = vpack.c.bf16 %v225_v6, %v224_v5  ;;  %v1863_v16 = vpack.c.bf16 %v227_v4, %v226_v2 }
  0x13   : > { %2061 = vrot.lane.b32.xlu0 %v2278_v3, %s2230_s21  ;;  %v2075_v11 = vpack.i.bf16 %v229_v9, %v228_v8  ;;  %1856 = vmatprep.subr.bf16.mxu1 %v1855_v12  ;;  %v1867_v17 = vpack.c.bf16 %v229_v9, %v228_v8  ;;  %v1506_v4 = vld [vmem:[%s2469_s1 + $0x90] sm:$0xff]  ;;  %v1507_v8 = vld [vmem:[%s2469_s1 + $0x98] sm:$0xff] }
  0x14   : > { %2071 = vrot.lane.b32.xlu1 %v2280_v7, %s2230_s21  ;;  %1858 = vmatpush3.bf16.msra.mxu1 %v1855_v12 }
  0x15   : > { %1860 = vmatprep.subr.bf16.mxu1 %v1859_v13 }
  0x17   : > { %2066 = vrot.lane.b32.xlu0 %v2065_v10, %s2230_s21 }
  0x18   : > { %2076 = vrot.lane.b32.xlu1 %v2075_v11, %s2230_s21  ;;  %1862 = vmatpush3.bf16.msra.mxu1 %v1859_v13 }
  0x19   : > { %1864 = vmatprep.subr.bf16.mxu1 %v1863_v16 }
  0x1b   : > { %2081 = vrot.lane.b32.xlu0 %v2278_v3, %s2231_s24 }
  0x1c   : > { %2086 = vrot.lane.b32.xlu1 %v2278_v3, %s2232_s27  ;;  %1866 = vmatpush3.bf16.msra.mxu1 %v1863_v16 }
  0x1d   : > { %1868 = vmatprep.subr.bf16.mxu1 %v1867_v17 }
  0x1f   : > { %2091 = vrot.lane.b32.xlu0 %v2065_v10, %s2231_s24 }
  0x20   : > { %2096 = vrot.lane.b32.xlu1 %v2065_v10, %s2232_s27  ;;  %1870 = vmatpush3.bf16.msra.mxu1 %v1867_v17 }
  0x23   : > { %2101 = vrot.lane.b32.xlu0 %v2280_v7, %s2231_s24  ;;  %1674 = vmatmul.mubr.msk.f32.vlgmr.msra.gmra.mrb[0].mxu1 %vm234_vm0, %v231_v18  ;;  %v1481_v18 = vld [vmem:[%s2469_s1 + $0x28] sm:$0xff] }
  0x24   : > { %2106 = vrot.lane.b32.xlu1 %v2280_v7, %s2232_s27  ;;  %1676 = vmatprep.mubr.msk.f32.mxu1 %vm234_vm0, %v232_v19 }
  0x27   : > { %2111 = vrot.lane.b32.xlu0 %v2075_v11, %s2231_s24  ;;  %1677 = vmatmul.mubr.msk.f32.gmra.mrb[2].mxu1 %vm234_vm0, %v233_v20 }
  0x28   : > { %2116 = vrot.lane.b32.xlu1 %v2075_v11, %s2232_s27  ;;  %1695 = vmatprep.mubr.msk.f32.mxu1 %vm234_vm0, %v1480_v21 }
  0x2b   : > { %2121 = vrot.lane.b32.xlu0 %v2278_v3, %s2233_s6 }
  0x2c   : > { %2126 = vrot.lane.b32.xlu1 %v2278_v3, %s2234_s7 }
  0x2f   : > { %2131 = vrot.lane.b32.xlu0 %v2065_v10, %s2233_s6 }
  0x30   : > { %2136 = vrot.lane.b32.xlu1 %v2065_v10, %s2234_s7 }
  0x33   : > { %2141 = vrot.lane.b32.xlu0 %v2280_v7, %s2233_s6 }
  0x34   : > { %2146 = vrot.lane.b32.xlu1 %v2280_v7, %s2234_s7 }
  0x37   : > { %2151 = vrot.lane.b32.xlu0 %v2075_v11, %s2233_s6 }
  0x38   : > { %2156 = vrot.lane.b32.xlu1 %v2075_v11, %s2234_s7 }
  0x3b   : > { %2161 = vrot.lane.b32.xlu0 %v2278_v3, %s2235_s12 }
  0x3c   : > { %2166 = vrot.lane.b32.xlu1 %v2278_v3, %s2236_s13 }
  0x3f   : > { %2171 = vrot.lane.b32.xlu0 %v2065_v10, %s2235_s12 }
  0x40   : > { %2176 = vrot.lane.b32.xlu1 %v2065_v10, %s2236_s13 }
  0x43   : > { %2181 = vrot.lane.b32.xlu0 %v2280_v7, %s2235_s12 }
  0x44   : > { %2186 = vrot.lane.b32.xlu1 %v2280_v7, %s2236_s13 }
  0x47   : > { %2191 = vrot.lane.b32.xlu0 %v2075_v11, %s2235_s12 }
  0x48   : > { %2196 = vrot.lane.b32.xlu1 %v2075_v11, %s2236_s13 }
  0x4b   : > { %2201 = vrot.lane.b32.xlu0 %v2278_v3, %s2237_s14 }
  0x4c   : > { %2206 = vrot.lane.b32.xlu1 %v2065_v10, %s2237_s14 }
  0x4f   : > { %2211 = vrot.lane.b32.xlu0 %v2280_v7, %s2237_s14 }
  0x50   : > { %2216 = vrot.lane.b32.xlu1 %v2075_v11, %s2237_s14 }
  0x53   : > { %214 = vperm.xlu0 %2220, %v200_v22  }
  0x54   : > { %219 = vperm.xlu1 %2221, %v201_v23  }
  0x57   : > { %209 = vperm.xlu0 %2220, %v199_v25  }
  0x58   : > { %204 = vperm.xlu1 %2221, %v198_v26  }
  0x85   : > { %v2062_v27 = vpop.permute.xlu0 %2061 }
  0x86   : > { %v2064_v28 = vunpack.i.h.bf16 %v2062_v27  ;;  %v2063_v29 = vunpack.i.l.bf16 %v2062_v27  ;;  %v2072_v30 = vpop.permute.xlu1 %2071 }
  0x87   : > { %v2074_v31 = vunpack.i.h.bf16 %v2072_v30  ;;  %v2073_v32 = vunpack.i.l.bf16 %v2072_v30 }
  0x88   : > { %v1919_v33 = vpack.c.bf16 %v2064_v28, %v2063_v29  ;;  %v1483_v28 = vld [vmem:[%s2469_s1 + $0x38] sm:$0xff] }
  0x89   : > { %v2067_v34 = vpop.permute.xlu0 %2066  ;;  %v1927_v38 = vpack.c.bf16 %v2074_v31, %v2073_v32 }
  0x8a   : > { %v2069_v35 = vunpack.i.h.bf16 %v2067_v34  ;;  %v2068_v36 = vunpack.i.l.bf16 %v2067_v34  ;;  %1920 = vmatprep.subr.bf16.mxu0 %v1919_v33  ;;  %v2077_v37 = vpop.permute.xlu1 %2076  ;;  %v1488_v34 = vld [vmem:[%s2469_s1 + $0x40] sm:$0xff] }
  0x8b   : > { %1922 = vmatpush3.bf16.msra.mxu0 %v1919_v33  ;;  %v2079_v40 = vunpack.i.h.bf16 %v2077_v37  ;;  %v2078_v41 = vunpack.i.l.bf16 %v2077_v37 }
  0x8c   : > { %v1923_v39 = vpack.c.bf16 %v2069_v35, %v2068_v36 }
  0x8d   : > { %v2082_v42 = vpop.permute.xlu0 %2081  ;;  %v1931_v46 = vpack.c.bf16 %v2079_v40, %v2078_v41 }
  0x8e   : > { %v2084_v43 = vunpack.i.h.bf16 %v2082_v42  ;;  %v2083_v44 = vunpack.i.l.bf16 %v2082_v42  ;;  %1924 = vmatprep.subr.bf16.mxu0 %v1923_v39  ;;  %v2087_v45 = vpop.permute.xlu1 %2086 }
  0x8f   : > { %1926 = vmatpush3.bf16.msra.mxu0 %v1923_v39  ;;  %v2089_v48 = vunpack.i.h.bf16 %v2087_v45  ;;  %v2088_v49 = vunpack.i.l.bf16 %v2087_v45 }
  0x90   : > { %v1871_v47 = vpack.c.bf16 %v2084_v43, %v2083_v44  ;;  %1928 = vmatprep.subr.bf16.mxu0 %v1927_v38  ;;  %v1514_v44 = vld [vmem:[%s2469_s1 + $0xb0] sm:$0xff] }
  0x91   : > { %v2092_v50 = vpop.permute.xlu0 %2091  ;;  %v1935_v54 = vpack.c.bf16 %v2089_v48, %v2088_v49  ;;  %v1515_v48 = vld [vmem:[%s2469_s1 + $0xb8] sm:$0xff] }
  0x92   : > { %v2094_v51 = vunpack.i.h.bf16 %v2092_v50  ;;  %v2093_v52 = vunpack.i.l.bf16 %v2092_v50  ;;  %1872 = vmatprep.subr.bf16.mxu1 %v1871_v47  ;;  %v2097_v53 = vpop.permute.xlu1 %2096 }
  0x93   : > { %1874 = vmatpush3.bf16.msra.mxu1 %v1871_v47  ;;  %1930 = vmatpush3.bf16.msra.mxu0 %v1927_v38  ;;  %v2099_v56 = vunpack.i.h.bf16 %v2097_v53  ;;  %v2098_v57 = vunpack.i.l.bf16 %v2097_v53  ;;  %v1513_v38 = vld [vmem:[%s2469_s1 + $0xa8] sm:$0xff] }
  0x94   : > { %v1875_v55 = vpack.c.bf16 %v2094_v51, %v2093_v52  ;;  %1932 = vmatprep.subr.bf16.mxu0 %v1931_v46 }
  0x95   : > { %v2102_v58 = vpop.permute.xlu0 %2101  ;;  %v1939_v63 = vpack.c.bf16 %v2099_v56, %v2098_v57 }
  0x96   : > { %v2104_v59 = vunpack.i.h.bf16 %v2102_v58  ;;  %v2103_v60 = vunpack.i.l.bf16 %v2102_v58  ;;  %1876 = vmatprep.subr.bf16.mxu1 %v1875_v55  ;;  %v2107_v61 = vpop.permute.xlu1 %2106  ;;  %v1489_v58 = vld [vmem:[%s2469_s1 + $0x48] sm:$0xff] }
  0x97   : > { %1878 = vmatpush3.bf16.msra.mxu1 %v1875_v55  ;;  %1934 = vmatpush3.bf16.msra.mxu0 %v1931_v46  ;;  %v2109_v1 = vunpack.i.h.bf16 %v2107_v61  ;;  %v2108_v2 = vunpack.i.l.bf16 %v2107_v61 }
  0x98   : > { %v1879_v0 = vpack.c.bf16 %v2104_v59, %v2103_v60  ;;  %1936 = vmatprep.subr.bf16.mxu0 %v1935_v54 }
  0x99   : > { %v2112_v3 = vpop.permute.xlu0 %2111  ;;  %v1943_v9 = vpack.c.bf16 %v2109_v1, %v2108_v2 }
  0x9a   : > { %v2114_v5 = vunpack.i.h.bf16 %v2112_v3  ;;  %v2113_v6 = vunpack.i.l.bf16 %v2112_v3  ;;  %1880 = vmatprep.subr.bf16.mxu1 %v1879_v0  ;;  %1762 = vmatmul.mubr.msk.f32.vlgmr.msra.gmra.mrb[0].mxu0 %vm234_vm0, %v1505_v62  ;;  %v2117_v7 = vpop.permute.xlu1 %2116 }
  0x9b   : > { %1882 = vmatpush3.bf16.msra.mxu1 %v1879_v0  ;;  %1938 = vmatpush3.bf16.msra.mxu0 %v1935_v54  ;;  %v2119_v11 = vunpack.i.h.bf16 %v2117_v7  ;;  %v2118_v12 = vunpack.i.l.bf16 %v2117_v7  ;;  %v1520_v54 = vld [vmem:[%s2469_s1 + $0xc0] sm:$0xff]  ;;  %v1490_v0 = vld [vmem:[%s2469_s1 + $0x50] sm:$0xff] }
  0x9c   : > { %v1883_v10 = vpack.c.bf16 %v2114_v5, %v2113_v6  ;;  %1940 = vmatprep.subr.bf16.mxu0 %v1939_v63  ;;  %1764 = vmatprep.mubr.msk.f32.mxu0 %vm234_vm0, %v1506_v4  ;;  %v1491_v4 = vld [vmem:[%s2469_s1 + $0x58] sm:$0xff] }
  0x9d   : > { %v2122_v13 = vpop.permute.xlu0 %2121  ;;  %v1947_v19 = vpack.c.bf16 %v2119_v11, %v2118_v12 }
  0x9e   : > { %v2124_v15 = vunpack.i.h.bf16 %v2122_v13  ;;  %v2123_v16 = vunpack.i.l.bf16 %v2122_v13  ;;  %1884 = vmatprep.subr.bf16.mxu1 %v1883_v10  ;;  %v2127_v17 = vpop.permute.xlu1 %2126  ;;  %1765 = vmatmul.mubr.msk.f32.gmra.mrb[2].mxu0 %vm234_vm0, %v1507_v8 }
  0x9f   : > { %1886 = vmatpush3.bf16.msra.mxu1 %v1883_v10  ;;  %1942 = vmatpush3.bf16.msra.mxu0 %v1939_v63  ;;  %v2129_v21 = vunpack.i.h.bf16 %v2127_v17  ;;  %v2128_v22 = vunpack.i.l.bf16 %v2127_v17  ;;  %v1496_v10 = vld [vmem:[%s2469_s1 + $0x60] sm:$0xff] }
  0xa0   : > { %v1887_v20 = vpack.c.bf16 %v2124_v15, %v2123_v16  ;;  %1944 = vmatprep.subr.bf16.mxu0 %v1943_v9  ;;  %1783 = vmatprep.mubr.msk.f32.mxu0 %vm234_vm0, %v1512_v14  ;;  %v1521_v14 = vld [vmem:[%s2469_s1 + $0xc8] sm:$0xff] }
  0xa1   : > { %v2132_v23 = vpop.permute.xlu0 %2131  ;;  %v1951_v29 = vpack.c.bf16 %v2129_v21, %v2128_v22 }
  0xa2   : > { %v2134_v25 = vunpack.i.h.bf16 %v2132_v23  ;;  %v2133_v26 = vunpack.i.l.bf16 %v2132_v23  ;;  %1888 = vmatprep.subr.bf16.mxu1 %v1887_v20  ;;  %1696 = vmatmul.mubr.msk.f32.vlgmr.msra.gmra.mrb[0].mxu1 %vm234_vm0, %v1481_v18  ;;  %v2137_v27 = vpop.permute.xlu1 %2136 }
  0xa3   : > { %1890 = vmatpush3.bf16.msra.mxu1 %v1887_v20  ;;  %1946 = vmatpush3.bf16.msra.mxu0 %v1943_v9  ;;  %v2139_v31 = vunpack.i.h.bf16 %v2137_v27  ;;  %v2138_v32 = vunpack.i.l.bf16 %v2137_v27  ;;  %v1522_v20 = vld [vmem:[%s2469_s1 + $0xd0] sm:$0xff] }
  0xa4   : > { %v1891_v30 = vpack.c.bf16 %v2134_v25, %v2133_v26  ;;  %1948 = vmatprep.subr.bf16.mxu0 %v1947_v19  ;;  %1698 = vmatprep.mubr.msk.f32.mxu1 %vm234_vm0, %v1482_v24  ;;  %v1523_v24 = vld [vmem:[%s2469_s1 + $0xd8] sm:$0xff] }
  0xa5   : > { %v2142_v33 = vpop.permute.xlu0 %2141  ;;  %v1955_v39 = vpack.c.bf16 %v2139_v31, %v2138_v32 }
  0xa6   : > { %v2144_v35 = vunpack.i.h.bf16 %v2142_v33  ;;  %v2143_v36 = vunpack.i.l.bf16 %v2142_v33  ;;  %1892 = vmatprep.subr.bf16.mxu1 %v1891_v30  ;;  %v2147_v37 = vpop.permute.xlu1 %2146  ;;  %1699 = vmatmul.mubr.msk.f32.gmra.mrb[2].mxu1 %vm234_vm0, %v1483_v28 }
  0xa7   : > { %1894 = vmatpush3.bf16.msra.mxu1 %v1891_v30  ;;  %1950 = vmatpush3.bf16.msra.mxu0 %v1947_v19  ;;  %v2149_v41 = vunpack.i.h.bf16 %v2147_v37  ;;  %v2148_v42 = vunpack.i.l.bf16 %v2147_v37  ;;  %v1528_v30 = vld [vmem:[%s2469_s1 + $0xe0] sm:$0xff] }
  0xa8   : > { %v1895_v40 = vpack.c.bf16 %v2144_v35, %v2143_v36  ;;  %1952 = vmatprep.subr.bf16.mxu0 %v1951_v29  ;;  %1717 = vmatprep.mubr.msk.f32.mxu1 %vm234_vm0, %v1488_v34  ;;  %v1497_v36 = vld [vmem:[%s2469_s1 + $0x68] sm:$0xff] }
  0xa9   : > { %v2152_v43 = vpop.permute.xlu0 %2151  ;;  %v1959_v49 = vpack.c.bf16 %v2149_v41, %v2148_v42  ;;  %v1498_v41 = vld [vmem:[%s2469_s1 + $0x70] sm:$0xff] }
  0xaa   : > { %v2154_v45 = vunpack.i.h.bf16 %v2152_v43  ;;  %v2153_v46 = vunpack.i.l.bf16 %v2152_v43  ;;  %1896 = vmatprep.subr.bf16.mxu1 %v1895_v40  ;;  %1784 = vmatmul.mubr.msk.f32.vlgmr.msra.gmra.mrb[0].mxu0 %vm234_vm0, %v1513_v38  ;;  %v2157_v47 = vpop.permute.xlu1 %2156 }
  0xab   : > { %1898 = vmatpush3.bf16.msra.mxu1 %v1895_v40  ;;  %1954 = vmatpush3.bf16.msra.mxu0 %v1951_v29  ;;  %v2159_v51 = vunpack.i.h.bf16 %v2157_v47  ;;  %v2158_v52 = vunpack.i.l.bf16 %v2157_v47 }
  0xac   : > { %v1899_v50 = vpack.c.bf16 %v2154_v45, %v2153_v46  ;;  %1956 = vmatprep.subr.bf16.mxu0 %v1955_v39  ;;  %1786 = vmatprep.mubr.msk.f32.mxu0 %vm234_vm0, %v1514_v44  ;;  %v1499_v45 = vld [vmem:[%s2469_s1 + $0x78] sm:$0xff] }
  0xad   : > { %v2162_v53 = vpop.permute.xlu0 %2161  ;;  %v1963_v59 = vpack.c.bf16 %v2159_v51, %v2158_v52  ;;  %v1530_v52 = vld [vmem:[%s2469_s1 + $0xf0] sm:$0xff] }
  0xae   : > { %v2164_v55 = vunpack.i.h.bf16 %v2162_v53  ;;  %v2163_v56 = vunpack.i.l.bf16 %v2162_v53  ;;  %1900 = vmatprep.subr.bf16.mxu1 %v1899_v50  ;;  %v2167_v57 = vpop.permute.xlu1 %2166  ;;  %1787 = vmatmul.mubr.msk.f32.gmra.mrb[2].mxu0 %vm234_vm0, %v1515_v48  ;;  %v1531_v53 = vld [vmem:[%s2469_s1 + $0xf8] sm:$0xff] }
  0xaf   : > { %1902 = vmatpush3.bf16.msra.mxu1 %v1899_v50  ;;  %1958 = vmatpush3.bf16.msra.mxu0 %v1955_v39  ;;  %v2169_v61 = vunpack.i.h.bf16 %v2167_v57  ;;  %v2168_v62 = vunpack.i.l.bf16 %v2167_v57  ;;  %v1529_v50 = vld [vmem:[%s2469_s1 + $0xe8] sm:$0xff] }
  0xb0   : > { %v1903_v60 = vpack.c.bf16 %v2164_v55, %v2163_v56  ;;  %1960 = vmatprep.subr.bf16.mxu0 %v1959_v49  ;;  %1805 = vmatprep.mubr.msk.f32.mxu0 %vm234_vm0, %v1520_v54  ;;  %v1536_v54 = vld [vmem:[%s2469_s1 + $0x100] sm:$0xff]  ;;  %v1539_v55 = vld [vmem:[%s2469_s1 + $0x118] sm:$0xff]  ;;  %v1537_v56 = vld [vmem:[%s2469_s1 + $0x108] sm:$0xff] }
  0xb1   : > { %v2172_v63 = vpop.permute.xlu0 %2171  ;;  %v1967_v5 = vpack.c.bf16 %v2169_v61, %v2168_v62 }
  0xb2   : > { %v2174_v1 = vunpack.i.h.bf16 %v2172_v63  ;;  %v2173_v2 = vunpack.i.l.bf16 %v2172_v63  ;;  %1904 = vmatprep.subr.bf16.mxu1 %v1903_v60  ;;  %1718 = vmatmul.mubr.msk.f32.vlgmr.msra.gmra.mrb[0].mxu1 %vm234_vm0, %v1489_v58  ;;  %v2177_v3 = vpop.permute.xlu1 %2176 }
  0xb3   : > { %1906 = vmatpush3.bf16.msra.mxu1 %v1903_v60  ;;  %1962 = vmatpush3.bf16.msra.mxu0 %v1959_v49  ;;  %v2179_v7 = vunpack.i.h.bf16 %v2177_v3  ;;  %v2178_v8 = vunpack.i.l.bf16 %v2177_v3  ;;  %v1538_v49 = vld [vmem:[%s2469_s1 + $0x110] sm:$0xff] }
  0xb4   : > { %v1907_v6 = vpack.c.bf16 %v2174_v1, %v2173_v2  ;;  %1964 = vmatprep.subr.bf16.mxu0 %v1963_v59  ;;  %1720 = vmatprep.mubr.msk.f32.mxu1 %vm234_vm0, %v1490_v0 }
  0xb5   : > { %v2182_v9 = vpop.permute.xlu0 %2181  ;;  %v1971_v15 = vpack.c.bf16 %v2179_v7, %v2178_v8 }
  0xb6   : > { %v2184_v11 = vunpack.i.h.bf16 %v2182_v9  ;;  %v2183_v12 = vunpack.i.l.bf16 %v2182_v9  ;;  %1908 = vmatprep.subr.bf16.mxu1 %v1907_v6  ;;  %v2187_v13 = vpop.permute.xlu1 %2186  ;;  %1721 = vmatmul.mubr.msk.f32.gmra.mrb[2].mxu1 %vm234_vm0, %v1491_v4 }
  0xb7   : > { %1910 = vmatpush3.bf16.msra.mxu1 %v1907_v6  ;;  %1966 = vmatpush3.bf16.msra.mxu0 %v1963_v59  ;;  %v2189_v17 = vunpack.i.h.bf16 %v2187_v13  ;;  %v2188_v18 = vunpack.i.l.bf16 %v2187_v13 }
  0xb8   : > { %v1911_v16 = vpack.c.bf16 %v2184_v11, %v2183_v12  ;;  %1968 = vmatprep.subr.bf16.mxu0 %v1967_v5  ;;  %1739 = vmatprep.mubr.msk.f32.mxu1 %vm234_vm0, %v1496_v10  ;;  %v1544_v10 = vld [vmem:[%s2471_s3] ss:$0 sm:$0xff] }
  0xb9   : > { %v2192_v19 = vpop.permute.xlu0 %2191  ;;  %v1975_v25 = vpack.c.bf16 %v2189_v17, %v2188_v18 }
  0xba   : > { %v2194_v21 = vunpack.i.h.bf16 %v2192_v19  ;;  %v2193_v22 = vunpack.i.l.bf16 %v2192_v19  ;;  %1912 = vmatprep.subr.bf16.mxu1 %v1911_v16  ;;  %1806 = vmatmul.mubr.msk.f32.vlgmr.msra.gmra.mrb[0].mxu0 %vm234_vm0, %v1521_v14  ;;  %v2197_v23 = vpop.permute.xlu1 %2196 }
  0xbb   : > { %1914 = vmatpush3.bf16.msra.mxu1 %v1911_v16  ;;  %1970 = vmatpush3.bf16.msra.mxu0 %v1967_v5  ;;  %v2199_v27 = vunpack.i.h.bf16 %v2197_v23  ;;  %v2198_v28 = vunpack.i.l.bf16 %v2197_v23 }
  0xbc   : > { %v1915_v26 = vpack.c.bf16 %v2194_v21, %v2193_v22  ;;  %1972 = vmatprep.subr.bf16.mxu0 %v1971_v15  ;;  %1808 = vmatprep.mubr.msk.f32.mxu0 %vm234_vm0, %v1522_v20 }
  0xbd   : > { %v2202_v29 = vpop.permute.xlu0 %2201  ;;  %v1979_v37 = vpack.c.bf16 %v2199_v27, %v2198_v28 }
  0xbe   : > { %v2204_v31 = vunpack.i.h.bf16 %v2202_v29  ;;  %v2203_v32 = vunpack.i.l.bf16 %v2202_v29  ;;  %1916 = vmatprep.subr.bf16.mxu1 %v1915_v26  ;;  %v2207_v33 = vpop.permute.xlu1 %2206  ;;  %1809 = vmatmul.mubr.msk.f32.gmra.mrb[2].mxu0 %vm234_vm0, %v1523_v24 }
  0xbf   : > { %1918 = vmatpush3.bf16.msra.mxu1 %v1915_v26  ;;  %1974 = vmatpush3.bf16.msra.mxu0 %v1971_v15  ;;  %v2209_v34 = vunpack.i.h.bf16 %v2207_v33  ;;  %v2208_v35 = vunpack.i.l.bf16 %v2207_v33 }
  0xc0   : > { %v1983_v38 = vpack.c.bf16 %v2204_v31, %v2203_v32  ;;  %1976 = vmatprep.subr.bf16.mxu0 %v1975_v25  ;;  %1827 = vmatprep.mubr.msk.f32.mxu0 %vm234_vm0, %v1528_v30 }
  0xc1   : > { %v1987_v39 = vpack.c.bf16 %v2209_v34, %v2208_v35  ;;  %v2212_v40 = vpop.permute.xlu0 %2211 }
  0xc2   : > { %1740 = vmatmul.mubr.msk.f32.vlgmr.msra.gmra.mrb[0].mxu1 %vm234_vm0, %v1497_v36  ;;  %1999 = vmatprep.subr.bf16.mxu1 %v1983_v38  ;;  %v2214_v42 = vunpack.i.h.bf16 %v2212_v40  ;;  %v2213_v43 = vunpack.i.l.bf16 %v2212_v40  ;;  %v2217_v44 = vpop.permute.xlu1 %2216 }
  0xc3   : > { %1978 = vmatpush3.bf16.msra.mxu0 %v1975_v25  ;;  %2003 = vmatpush3.bf16.msra.mxu1 %v1983_v38  ;;  %v2219_v47 = vunpack.i.h.bf16 %v2217_v44  ;;  %v2218_v48 = vunpack.i.l.bf16 %v2217_v44 }
  0xc4   : > { %v1991_v46 = vpack.c.bf16 %v2214_v42, %v2213_v43  ;;  %1742 = vmatprep.mubr.msk.f32.mxu1 %vm234_vm0, %v1498_v41  ;;  %1980 = vmatprep.subr.bf16.mxu0 %v1979_v37 }
  0xc5   : > { %2000 = vmatprep.subr.bf16.mxu1 %v1987_v39  ;;  %v1995_v51 = vpack.c.bf16 %v2219_v47, %v2218_v48 }
  0xc6   : > { %1743 = vmatmul.mubr.msk.f32.gmra.mrb[2].mxu1 %vm234_vm0, %v1499_v45 }
  0xc7   : > { %1982 = vmatpush3.bf16.msra.mxu0 %v1979_v37  ;;  %2004 = vmatpush3.bf16.msra.mxu1 %v1987_v39 }
  0xc8   : > { %1984 = vmatprep.subr.bf16.mxu0 %v1983_v38  ;;  %2001 = vmatprep.subr.bf16.mxu1 %v1991_v46 }
  0xc9   : > { %1852 = vmatprep.mubr.msk.f32.mxu1 %vm234_vm0, %v1538_v49 }
  0xca   : > { %1828 = vmatmul.mubr.msk.f32.vlgmr.msra.gmra.mrb[0].mxu0 %vm234_vm0, %v1529_v50 }
  0xcb   : > { %1986 = vmatpush3.bf16.msra.mxu0 %v1983_v38  ;;  %2005 = vmatpush3.bf16.msra.mxu1 %v1991_v46 }
  0xcc   : > { %1830 = vmatprep.mubr.msk.f32.mxu0 %vm234_vm0, %v1530_v52  ;;  %1988 = vmatprep.subr.bf16.mxu0 %v1987_v39 }
  0xcd   : > { %2002 = vmatprep.subr.bf16.mxu1 %v1995_v51 }
  0xce   : > { %1831 = vmatmul.mubr.msk.f32.gmra.mrb[2].mxu0 %vm234_vm0, %v1531_v53 }
  0xcf   : > { %1990 = vmatpush3.bf16.msra.mxu0 %v1987_v39  ;;  %2006 = vmatpush3.bf16.msra.mxu1 %v1995_v51 }
  0xd0   : > { %1992 = vmatprep.subr.bf16.mxu0 %v1991_v46  ;;  %1849 = vmatprep.mubr.msk.f32.mxu0 %vm234_vm0, %v1536_v54 }
  0xd2   : > { %1853 = vmatmul.mubr.msk.f32.vlgmr.msra.gmra.mrb[4].mxu1 %vm234_vm0, %v1539_v55  ;;  %v215_v62 = vpop.permute.xlu0 %214 }
  0xd3   : > { %1994 = vmatpush3.bf16.msra.mxu0 %v1991_v46  ;;  %v220_v61 = vpop.permute.xlu1 %219 }
  0xd4   : > { %1996 = vmatprep.subr.bf16.mxu0 %v1995_v51 }
  0xd6   : > { %v210_v11 = vpop.permute.xlu0 %209 }
  0xd7   : > { %1998 = vmatpush3.bf16.msra.mxu0 %v1995_v51  ;;  %v205_v13 = vpop.permute.xlu1 %204 }
  0xda   : > { %1850 = vmatmul.mubr.msk.f32.vlgmr.msra.gmra.mrb[0].mxu0 %vm234_vm0, %v1537_v56 }
 0x195   : > { %v1741_v57 = vpop.f32.mrb[0].mxu1 }
 0x196   : > { %v711_v58 = vpop.f32.mrb[1].mxu1  ;;  %v2007_v17 = vadd.f32 %v1741_v57, %v210_v11 }
 0x197   : > { %v2009_v19 = vadd.f32 %v711_v58, %v205_v13 }
 0x199   : > { %v1744_v59 = vpop.f32.mrb[2].mxu1 }
 0x19a   : > { %v721_v60 = vpop.f32.mrb[3].mxu1  ;;  %v2011_v63 = vadd.f32 %v1744_v59, %v220_v61 }
 0x19b   : > { %v2014_v0 = vadd.f32 %v721_v60, %v215_v62 }
 0x1a1   : > { %v1832_v1 = vpop.f32.mrb[2].mxu0 }
 0x1a2   : > { %v2012_v2 = vadd.f32 %v2011_v63, %v1832_v1  ;;  %v1241_v3 = vpop.f32.mrb[3].mxu0 }
 0x1a3   : > { %v2015_v4 = vadd.f32 %v2014_v0, %v1241_v3 }
 0x1a5   : > { %v1854_v5 = vpop.f32.mrb[4].mxu1 }
 0x1a6   : > { %v2013_v6 = vadd.f32 %v2012_v2, %v1854_v5  ;;  %v1371_v7 = vpop.f32.mrb[5].mxu1 }
 0x1a7   : > { %v2016_v8 = vadd.f32 %v2015_v4, %v1371_v7 }
 0x1a8   : > { %vm1387_vm1 = vcmp.ge.f32.partialorder %v2013_v6, 0.0  ;;  %v1391_v9 = vmul.f32 0.2, %v2013_v6 }
 0x1a9   : > { %vm1386_vm2 = vcmp.ge.f32.partialorder %v2016_v8, 0.0  ;;  %v1390_v12 = vmul.f32 0.2, %v2016_v8 }
 0x1aa   : > { %v1395_v14 = vsel %vm1387_vm1, %v2013_v6, %v1391_v9 }
 0x1ab   : > { %v1406_v15 = vmul.f32 %v1544_v10, %v1395_v14  ;;  %v1394_v16 = vsel %vm1386_vm2, %v2016_v8, %v1390_v12 }
 0x1ac   : > { %v1405_v18 = vmul.f32 %v1544_v10, %v1394_v16 }
 0x1ad   : > { %1411 = vst.msk [vmem:[%s197_s18 + $0x18] sm:$0xff] %vm1407_vm3, %v1406_v15  ;;  %v1851_v20 = vpop.f32.mrb[0].mxu0 }
 0x1ae   : > { %1410 = vst.msk [vmem:[%s197_s18 + $0x10] sm:$0xff] %vm1407_vm3, %v1405_v18  ;;  %v2008_v21 = vadd.f32 %v2007_v17, %v1851_v20  ;;  %v1361_v22 = vpop.f32.mrb[1].mxu0 }
 0x1af   : > { %v2010_v23 = vadd.f32 %v2009_v19, %v1361_v22 }
 0x1b0   : > { %vm1385_vm4 = vcmp.ge.f32.partialorder %v2008_v21, 0.0  ;;  %v1389_v24 = vmul.f32 0.2, %v2008_v21 }
 0x1b1   : > { %vm1384_vm5 = vcmp.ge.f32.partialorder %v2010_v23, 0.0  ;;  %v1388_v25 = vmul.f32 0.2, %v2010_v23 }
 0x1b2   : > { %v1393_v26 = vsel %vm1385_vm4, %v2008_v21, %v1389_v24 }
 0x1b3   : > { %v1404_v27 = vmul.f32 %v1544_v10, %v1393_v26  ;;  %v1392_v28 = vsel %vm1384_vm5, %v2010_v23, %v1388_v25 }
 0x1b4   : > { %v1403_v29 = vmul.f32 %v1544_v10, %v1392_v28 }
 0x1b5   : > { %1409 = vst.msk [vmem:[%s197_s18 + $0x8] sm:$0xff] %vm1407_vm3, %v1404_v27 }
 0x1b6   : > { %1408 = vst.msk [vmem:[%s197_s18] sm:$0xff] %vm1407_vm3, %v1403_v29 }
 0x1b7 PF: > { %s14_s15 = sadd.s32 1, %s2228_s15  }
 0x1b8   : > { %p11_p4 = scmp.ge.s32.totalorder %s14_s15, 4  }
 0x1ba   :  { %13 = sbr.rel (!%p11_p4) target bundleno = 1 (0x1), region = 74 }

// kernel: _lambda_.16
= control target key start
LH: loop header
LB: loop body
LE: loop exit
PB: predicated region body
PF: predicated region fallthrough
CT: control target
= control target key end

     0   :  { %s2264_s15 = smov 0   ;;  %s2468_s0 = inlined_call_operand.vmem [shape: f32[2,64,122], index: 0, kind: input, shape index: {}]   ;;  %s2469_s1 = inlined_call_operand.vmem [shape: f32[9,32,64], index: 1, kind: input, shape index: {}]   ;;  %s2470_s2 = inlined_call_operand.vmem [shape: f32[32,1], index: 2, kind: input, shape index: {}]   ;;  %s2471_s3 = inlined_call_operand.vmem [shape: f32[1,100], index: 3, kind: input, shape index: {}]   ;;  %s2472_s4 = inlined_call_operand.vmem [shape: f32[2,32,100], index: 4, kind: output, shape index: {}]  }
   0x1 LB: > { %s1467_s16 = sadd.s32 4294967295, %s2228_s15   ;;  %p1471_p0 = scmp.ge.s32.totalorder %s2228_s15, 1  ;;  %s2228_s15 = sphi %s2264_s15, %s14_s15  }
   0x2   : > { %p162_p1 = scmp.lt.s32.totalorder %s2228_s15, 3 }
   0x4   : > { %p163_p2 = pnand %p1471_p0, %p162_p1 }
   0x5   : > { %p188_p3 = scmp.lt.s32.totalorder (!%p163_p2), %s1467_s16, 1  ;;  %s2230_s21 = smov (!%p163_p2), 117   ;;  %v230_v14 = vld [vmem:[%s2469_s1] sm:$0xff] (!%p163_p2)  ;;  %vm234_vm0 = vcmask (!%p163_p2), 523264   ;;  %v231_v18 = vld [vmem:[%s2469_s1 + $0x8] sm:$0xff] (!%p163_p2)  ;;  %v232_v19 = vld [vmem:[%s2469_s1 + $0x10] sm:$0xff] (!%p163_p2) }
   0x6   : > { %166 = sbr.rel (%p163_p2) target bundleno = 439 (0x1b7), region = 36  ;;  %s2231_s24 = smov (!%p163_p2), 127   ;;  %v1504_v15 = vld [vmem:[%s2469_s1 + $0x80] sm:$0xff] (!%p163_p2)  ;;  %1673 = vmatprep.mubr.msk.f32.mxu1 (!%p163_p2), %vm234_vm0, %v230_v14  ;;  %v233_v20 = vld [vmem:[%s2469_s1 + $0x18] sm:$0xff] (!%p163_p2)  ;;  %v200_v22 = vld [vmem:[%s2470_s2 + $0x10] sm:$0xff] (!%p163_p2)  ;;  %v2238_v24 = vmov (!%p163_p2), 0  }
   0x7   : > { %s2232_s27 = smov (!%p163_p2), 116   ;;  %1761 = vmatprep.mubr.msk.f32.mxu0 (!%p163_p2), %vm234_vm0, %v1504_v15  ;;  %s2233_s6 = smov (!%p163_p2), 126   ;;  %v1480_v21 = vld [vmem:[%s2469_s1 + $0x20] sm:$0xff] (!%p163_p2)  ;;  %v201_v23 = vld [vmem:[%s2470_s2 + $0x18] sm:$0xff] (!%p163_p2)  ;;  %2220 = vset.pattern.permute.xlu0 (!%p163_p2), %v2238_v24  ;;  %v199_v25 = vld [vmem:[%s2470_s2 + $0x8] sm:$0xff] (!%p163_p2)  ;;  %vm1407_vm3 = vcmask (!%p163_p2), 818176  }
   0x8   : > { %s2234_s7 = smov (!%p163_p2), 108   ;;  %s2235_s12 = smov (!%p163_p2), 118   ;;  %2221 = vset.pattern.permute.xlu1 (!%p163_p2), %v2238_v24  ;;  %v198_v26 = vld [vmem:[%s2470_s2] sm:$0xff] (!%p163_p2)  ;;  %v1505_v62 = vld [vmem:[%s2469_s1 + $0x88] sm:$0xff] (!%p163_p2)  ;;  %v1482_v24 = vld [vmem:[%s2469_s1 + $0x30] sm:$0xff] (!%p163_p2) }
   0x9   : > { %s2236_s13 = smov (!%p163_p2), 107   ;;  %s2237_s14 = smov (!%p163_p2), 106   ;;  %v1512_v14 = vld [vmem:[%s2469_s1 + $0xa0] sm:$0xff] (!%p163_p2) }
   0xd   : > { %s2474_s16 = smov (!%p188_p3, %s1467_s16), 1 }
   0xe   : > { %s1547_s17 = sshll.u32 %s2474_s16, 6  ;;  %s1548_s11 = sshll.u32 %s2474_s16, 5 }
   0xf   : > { %s192_s20 = scalar_lea.vmem %s2468_s0, %s1547_s17  ;;  %s197_s18 = scalar_lea.vmem %s2472_s4, %s1548_s11 }
  0x10   : > { %v222_v0 = vld [vmem:[%s192_s20] sm:$0xff]  ;;  %v223_v1 = vld [vmem:[%s192_s20 + $0x8] sm:$0xff]  ;;  %v224_v5 = vld [vmem:[%s192_s20 + $0x10] sm:$0xff] }
  0x11   : > { %v226_v2 = vld [vmem:[%s192_s20 + $0x20] sm:$0xff]  ;;  %v2278_v3 = vpack.i.bf16 %v223_v1, %v222_v0  ;;  %v227_v4 = vld [vmem:[%s192_s20 + $0x28] sm:$0xff]  ;;  %v225_v6 = vld [vmem:[%s192_s20 + $0x18] sm:$0xff]  ;;  %v1855_v12 = vpack.c.bf16 %v223_v1, %v222_v0 }
  0x12   : > { %v2280_v7 = vpack.i.bf16 %v227_v4, %v226_v2  ;;  %v228_v8 = vld [vmem:[%s192_s20 + $0x30] sm:$0xff]  ;;  %v229_v9 = vld [vmem:[%s192_s20 + $0x38] sm:$0xff]  ;;  %v2065_v10 = vpack.i.bf16 %v225_v6, %v224_v5  ;;  %v1859_v13 = vpack.c.bf16 %v225_v6, %v224_v5  ;;  %v1863_v16 = vpack.c.bf16 %v227_v4, %v226_v2 }
  0x13   : > { %2061 = vrot.lane.b32.xlu0 %v2278_v3, %s2230_s21  ;;  %v2075_v11 = vpack.i.bf16 %v229_v9, %v228_v8  ;;  %1856 = vmatprep.subr.bf16.mxu1 %v1855_v12  ;;  %v1867_v17 = vpack.c.bf16 %v229_v9, %v228_v8  ;;  %v1506_v4 = vld [vmem:[%s2469_s1 + $0x90] sm:$0xff]  ;;  %v1507_v8 = vld [vmem:[%s2469_s1 + $0x98] sm:$0xff] }
  0x14   : > { %2071 = vrot.lane.b32.xlu1 %v2280_v7, %s2230_s21  ;;  %1858 = vmatpush3.bf16.msra.mxu1 %v1855_v12 }
  0x15   : > { %1860 = vmatprep.subr.bf16.mxu1 %v1859_v13 }
  0x17   : > { %2066 = vrot.lane.b32.xlu0 %v2065_v10, %s2230_s21 }
  0x18   : > { %2076 = vrot.lane.b32.xlu1 %v2075_v11, %s2230_s21  ;;  %1862 = vmatpush3.bf16.msra.mxu1 %v1859_v13 }
  0x19   : > { %1864 = vmatprep.subr.bf16.mxu1 %v1863_v16 }
  0x1b   : > { %2081 = vrot.lane.b32.xlu0 %v2278_v3, %s2231_s24 }
  0x1c   : > { %2086 = vrot.lane.b32.xlu1 %v2278_v3, %s2232_s27  ;;  %1866 = vmatpush3.bf16.msra.mxu1 %v1863_v16 }
  0x1d   : > { %1868 = vmatprep.subr.bf16.mxu1 %v1867_v17 }
  0x1f   : > { %2091 = vrot.lane.b32.xlu0 %v2065_v10, %s2231_s24 }
  0x20   : > { %2096 = vrot.lane.b32.xlu1 %v2065_v10, %s2232_s27  ;;  %1870 = vmatpush3.bf16.msra.mxu1 %v1867_v17 }
  0x23   : > { %2101 = vrot.lane.b32.xlu0 %v2280_v7, %s2231_s24  ;;  %1674 = vmatmul.mubr.msk.f32.vlgmr.msra.gmra.mrb[0].mxu1 %vm234_vm0, %v231_v18  ;;  %v1481_v18 = vld [vmem:[%s2469_s1 + $0x28] sm:$0xff] }
  0x24   : > { %2106 = vrot.lane.b32.xlu1 %v2280_v7, %s2232_s27  ;;  %1676 = vmatprep.mubr.msk.f32.mxu1 %vm234_vm0, %v232_v19 }
  0x27   : > { %2111 = vrot.lane.b32.xlu0 %v2075_v11, %s2231_s24  ;;  %1677 = vmatmul.mubr.msk.f32.gmra.mrb[2].mxu1 %vm234_vm0, %v233_v20 }
  0x28   : > { %2116 = vrot.lane.b32.xlu1 %v2075_v11, %s2232_s27  ;;  %1695 = vmatprep.mubr.msk.f32.mxu1 %vm234_vm0, %v1480_v21 }
  0x2b   : > { %2121 = vrot.lane.b32.xlu0 %v2278_v3, %s2233_s6 }
  0x2c   : > { %2126 = vrot.lane.b32.xlu1 %v2278_v3, %s2234_s7 }
  0x2f   : > { %2131 = vrot.lane.b32.xlu0 %v2065_v10, %s2233_s6 }
  0x30   : > { %2136 = vrot.lane.b32.xlu1 %v2065_v10, %s2234_s7 }
  0x33   : > { %2141 = vrot.lane.b32.xlu0 %v2280_v7, %s2233_s6 }
  0x34   : > { %2146 = vrot.lane.b32.xlu1 %v2280_v7, %s2234_s7 }
  0x37   : > { %2151 = vrot.lane.b32.xlu0 %v2075_v11, %s2233_s6 }
  0x38   : > { %2156 = vrot.lane.b32.xlu1 %v2075_v11, %s2234_s7 }
  0x3b   : > { %2161 = vrot.lane.b32.xlu0 %v2278_v3, %s2235_s12 }
  0x3c   : > { %2166 = vrot.lane.b32.xlu1 %v2278_v3, %s2236_s13 }
  0x3f   : > { %2171 = vrot.lane.b32.xlu0 %v2065_v10, %s2235_s12 }
  0x40   : > { %2176 = vrot.lane.b32.xlu1 %v2065_v10, %s2236_s13 }
  0x43   : > { %2181 = vrot.lane.b32.xlu0 %v2280_v7, %s2235_s12 }
  0x44   : > { %2186 = vrot.lane.b32.xlu1 %v2280_v7, %s2236_s13 }
  0x47   : > { %2191 = vrot.lane.b32.xlu0 %v2075_v11, %s2235_s12 }
  0x48   : > { %2196 = vrot.lane.b32.xlu1 %v2075_v11, %s2236_s13 }
  0x4b   : > { %2201 = vrot.lane.b32.xlu0 %v2278_v3, %s2237_s14 }
  0x4c   : > { %2206 = vrot.lane.b32.xlu1 %v2065_v10, %s2237_s14 }
  0x4f   : > { %2211 = vrot.lane.b32.xlu0 %v2280_v7, %s2237_s14 }
  0x50   : > { %2216 = vrot.lane.b32.xlu1 %v2075_v11, %s2237_s14 }
  0x53   : > { %214 = vperm.xlu0 %2220, %v200_v22  }
  0x54   : > { %219 = vperm.xlu1 %2221, %v201_v23  }
  0x57   : > { %209 = vperm.xlu0 %2220, %v199_v25  }
  0x58   : > { %204 = vperm.xlu1 %2221, %v198_v26  }
  0x85   : > { %v2062_v27 = vpop.permute.xlu0 %2061 }
  0x86   : > { %v2064_v28 = vunpack.i.h.bf16 %v2062_v27  ;;  %v2063_v29 = vunpack.i.l.bf16 %v2062_v27  ;;  %v2072_v30 = vpop.permute.xlu1 %2071 }
  0x87   : > { %v2074_v31 = vunpack.i.h.bf16 %v2072_v30  ;;  %v2073_v32 = vunpack.i.l.bf16 %v2072_v30 }
  0x88   : > { %v1919_v33 = vpack.c.bf16 %v2064_v28, %v2063_v29  ;;  %v1483_v28 = vld [vmem:[%s2469_s1 + $0x38] sm:$0xff] }
  0x89   : > { %v2067_v34 = vpop.permute.xlu0 %2066  ;;  %v1927_v38 = vpack.c.bf16 %v2074_v31, %v2073_v32 }
  0x8a   : > { %v2069_v35 = vunpack.i.h.bf16 %v2067_v34  ;;  %v2068_v36 = vunpack.i.l.bf16 %v2067_v34  ;;  %1920 = vmatprep.subr.bf16.mxu0 %v1919_v33  ;;  %v2077_v37 = vpop.permute.xlu1 %2076  ;;  %v1488_v34 = vld [vmem:[%s2469_s1 + $0x40] sm:$0xff] }
  0x8b   : > { %1922 = vmatpush3.bf16.msra.mxu0 %v1919_v33  ;;  %v2079_v40 = vunpack.i.h.bf16 %v2077_v37  ;;  %v2078_v41 = vunpack.i.l.bf16 %v2077_v37 }
  0x8c   : > { %v1923_v39 = vpack.c.bf16 %v2069_v35, %v2068_v36 }
  0x8d   : > { %v2082_v42 = vpop.permute.xlu0 %2081  ;;  %v1931_v46 = vpack.c.bf16 %v2079_v40, %v2078_v41 }
  0x8e   : > { %v2084_v43 = vunpack.i.h.bf16 %v2082_v42  ;;  %v2083_v44 = vunpack.i.l.bf16 %v2082_v42  ;;  %1924 = vmatprep.subr.bf16.mxu0 %v1923_v39  ;;  %v2087_v45 = vpop.permute.xlu1 %2086 }
  0x8f   : > { %1926 = vmatpush3.bf16.msra.mxu0 %v1923_v39  ;;  %v2089_v48 = vunpack.i.h.bf16 %v2087_v45  ;;  %v2088_v49 = vunpack.i.l.bf16 %v2087_v45 }
  0x90   : > { %v1871_v47 = vpack.c.bf16 %v2084_v43, %v2083_v44  ;;  %1928 = vmatprep.subr.bf16.mxu0 %v1927_v38  ;;  %v1514_v44 = vld [vmem:[%s2469_s1 + $0xb0] sm:$0xff] }
  0x91   : > { %v2092_v50 = vpop.permute.xlu0 %2091  ;;  %v1935_v54 = vpack.c.bf16 %v2089_v48, %v2088_v49  ;;  %v1515_v48 = vld [vmem:[%s2469_s1 + $0xb8] sm:$0xff] }
  0x92   : > { %v2094_v51 = vunpack.i.h.bf16 %v2092_v50  ;;  %v2093_v52 = vunpack.i.l.bf16 %v2092_v50  ;;  %1872 = vmatprep.subr.bf16.mxu1 %v1871_v47  ;;  %v2097_v53 = vpop.permute.xlu1 %2096 }
  0x93   : > { %1874 = vmatpush3.bf16.msra.mxu1 %v1871_v47  ;;  %1930 = vmatpush3.bf16.msra.mxu0 %v1927_v38  ;;  %v2099_v56 = vunpack.i.h.bf16 %v2097_v53  ;;  %v2098_v57 = vunpack.i.l.bf16 %v2097_v53  ;;  %v1513_v38 = vld [vmem:[%s2469_s1 + $0xa8] sm:$0xff] }
  0x94   : > { %v1875_v55 = vpack.c.bf16 %v2094_v51, %v2093_v52  ;;  %1932 = vmatprep.subr.bf16.mxu0 %v1931_v46 }
  0x95   : > { %v2102_v58 = vpop.permute.xlu0 %2101  ;;  %v1939_v63 = vpack.c.bf16 %v2099_v56, %v2098_v57 }
  0x96   : > { %v2104_v59 = vunpack.i.h.bf16 %v2102_v58  ;;  %v2103_v60 = vunpack.i.l.bf16 %v2102_v58  ;;  %1876 = vmatprep.subr.bf16.mxu1 %v1875_v55  ;;  %v2107_v61 = vpop.permute.xlu1 %2106  ;;  %v1489_v58 = vld [vmem:[%s2469_s1 + $0x48] sm:$0xff] }
  0x97   : > { %1878 = vmatpush3.bf16.msra.mxu1 %v1875_v55  ;;  %1934 = vmatpush3.bf16.msra.mxu0 %v1931_v46  ;;  %v2109_v1 = vunpack.i.h.bf16 %v2107_v61  ;;  %v2108_v2 = vunpack.i.l.bf16 %v2107_v61 }
  0x98   : > { %v1879_v0 = vpack.c.bf16 %v2104_v59, %v2103_v60  ;;  %1936 = vmatprep.subr.bf16.mxu0 %v1935_v54 }
  0x99   : > { %v2112_v3 = vpop.permute.xlu0 %2111  ;;  %v1943_v9 = vpack.c.bf16 %v2109_v1, %v2108_v2 }
  0x9a   : > { %v2114_v5 = vunpack.i.h.bf16 %v2112_v3  ;;  %v2113_v6 = vunpack.i.l.bf16 %v2112_v3  ;;  %1880 = vmatprep.subr.bf16.mxu1 %v1879_v0  ;;  %1762 = vmatmul.mubr.msk.f32.vlgmr.msra.gmra.mrb[0].mxu0 %vm234_vm0, %v1505_v62  ;;  %v2117_v7 = vpop.permute.xlu1 %2116 }
  0x9b   : > { %1882 = vmatpush3.bf16.msra.mxu1 %v1879_v0  ;;  %1938 = vmatpush3.bf16.msra.mxu0 %v1935_v54  ;;  %v2119_v11 = vunpack.i.h.bf16 %v2117_v7  ;;  %v2118_v12 = vunpack.i.l.bf16 %v2117_v7  ;;  %v1520_v54 = vld [vmem:[%s2469_s1 + $0xc0] sm:$0xff]  ;;  %v1490_v0 = vld [vmem:[%s2469_s1 + $0x50] sm:$0xff] }
  0x9c   : > { %v1883_v10 = vpack.c.bf16 %v2114_v5, %v2113_v6  ;;  %1940 = vmatprep.subr.bf16.mxu0 %v1939_v63  ;;  %1764 = vmatprep.mubr.msk.f32.mxu0 %vm234_vm0, %v1506_v4  ;;  %v1491_v4 = vld [vmem:[%s2469_s1 + $0x58] sm:$0xff] }
  0x9d   : > { %v2122_v13 = vpop.permute.xlu0 %2121  ;;  %v1947_v19 = vpack.c.bf16 %v2119_v11, %v2118_v12 }
  0x9e   : > { %v2124_v15 = vunpack.i.h.bf16 %v2122_v13  ;;  %v2123_v16 = vunpack.i.l.bf16 %v2122_v13  ;;  %1884 = vmatprep.subr.bf16.mxu1 %v1883_v10  ;;  %v2127_v17 = vpop.permute.xlu1 %2126  ;;  %1765 = vmatmul.mubr.msk.f32.gmra.mrb[2].mxu0 %vm234_vm0, %v1507_v8 }
  0x9f   : > { %1886 = vmatpush3.bf16.msra.mxu1 %v1883_v10  ;;  %1942 = vmatpush3.bf16.msra.mxu0 %v1939_v63  ;;  %v2129_v21 = vunpack.i.h.bf16 %v2127_v17  ;;  %v2128_v22 = vunpack.i.l.bf16 %v2127_v17  ;;  %v1496_v10 = vld [vmem:[%s2469_s1 + $0x60] sm:$0xff] }
  0xa0   : > { %v1887_v20 = vpack.c.bf16 %v2124_v15, %v2123_v16  ;;  %1944 = vmatprep.subr.bf16.mxu0 %v1943_v9  ;;  %1783 = vmatprep.mubr.msk.f32.mxu0 %vm234_vm0, %v1512_v14  ;;  %v1521_v14 = vld [vmem:[%s2469_s1 + $0xc8] sm:$0xff] }
  0xa1   : > { %v2132_v23 = vpop.permute.xlu0 %2131  ;;  %v1951_v29 = vpack.c.bf16 %v2129_v21, %v2128_v22 }
  0xa2   : > { %v2134_v25 = vunpack.i.h.bf16 %v2132_v23  ;;  %v2133_v26 = vunpack.i.l.bf16 %v2132_v23  ;;  %1888 = vmatprep.subr.bf16.mxu1 %v1887_v20  ;;  %1696 = vmatmul.mubr.msk.f32.vlgmr.msra.gmra.mrb[0].mxu1 %vm234_vm0, %v1481_v18  ;;  %v2137_v27 = vpop.permute.xlu1 %2136 }
  0xa3   : > { %1890 = vmatpush3.bf16.msra.mxu1 %v1887_v20  ;;  %1946 = vmatpush3.bf16.msra.mxu0 %v1943_v9  ;;  %v2139_v31 = vunpack.i.h.bf16 %v2137_v27  ;;  %v2138_v32 = vunpack.i.l.bf16 %v2137_v27  ;;  %v1522_v20 = vld [vmem:[%s2469_s1 + $0xd0] sm:$0xff] }
  0xa4   : > { %v1891_v30 = vpack.c.bf16 %v2134_v25, %v2133_v26  ;;  %1948 = vmatprep.subr.bf16.mxu0 %v1947_v19  ;;  %1698 = vmatprep.mubr.msk.f32.mxu1 %vm234_vm0, %v1482_v24  ;;  %v1523_v24 = vld [vmem:[%s2469_s1 + $0xd8] sm:$0xff] }
  0xa5   : > { %v2142_v33 = vpop.permute.xlu0 %2141  ;;  %v1955_v39 = vpack.c.bf16 %v2139_v31, %v2138_v32 }
  0xa6   : > { %v2144_v35 = vunpack.i.h.bf16 %v2142_v33  ;;  %v2143_v36 = vunpack.i.l.bf16 %v2142_v33  ;;  %1892 = vmatprep.subr.bf16.mxu1 %v1891_v30  ;;  %v2147_v37 = vpop.permute.xlu1 %2146  ;;  %1699 = vmatmul.mubr.msk.f32.gmra.mrb[2].mxu1 %vm234_vm0, %v1483_v28 }
  0xa7   : > { %1894 = vmatpush3.bf16.msra.mxu1 %v1891_v30  ;;  %1950 = vmatpush3.bf16.msra.mxu0 %v1947_v19  ;;  %v2149_v41 = vunpack.i.h.bf16 %v2147_v37  ;;  %v2148_v42 = vunpack.i.l.bf16 %v2147_v37  ;;  %v1528_v30 = vld [vmem:[%s2469_s1 + $0xe0] sm:$0xff] }
  0xa8   : > { %v1895_v40 = vpack.c.bf16 %v2144_v35, %v2143_v36  ;;  %1952 = vmatprep.subr.bf16.mxu0 %v1951_v29  ;;  %1717 = vmatprep.mubr.msk.f32.mxu1 %vm234_vm0, %v1488_v34  ;;  %v1497_v36 = vld [vmem:[%s2469_s1 + $0x68] sm:$0xff] }
  0xa9   : > { %v2152_v43 = vpop.permute.xlu0 %2151  ;;  %v1959_v49 = vpack.c.bf16 %v2149_v41, %v2148_v42  ;;  %v1498_v41 = vld [vmem:[%s2469_s1 + $0x70] sm:$0xff] }
  0xaa   : > { %v2154_v45 = vunpack.i.h.bf16 %v2152_v43  ;;  %v2153_v46 = vunpack.i.l.bf16 %v2152_v43  ;;  %1896 = vmatprep.subr.bf16.mxu1 %v1895_v40  ;;  %1784 = vmatmul.mubr.msk.f32.vlgmr.msra.gmra.mrb[0].mxu0 %vm234_vm0, %v1513_v38  ;;  %v2157_v47 = vpop.permute.xlu1 %2156 }
  0xab   : > { %1898 = vmatpush3.bf16.msra.mxu1 %v1895_v40  ;;  %1954 = vmatpush3.bf16.msra.mxu0 %v1951_v29  ;;  %v2159_v51 = vunpack.i.h.bf16 %v2157_v47  ;;  %v2158_v52 = vunpack.i.l.bf16 %v2157_v47 }
  0xac   : > { %v1899_v50 = vpack.c.bf16 %v2154_v45, %v2153_v46  ;;  %1956 = vmatprep.subr.bf16.mxu0 %v1955_v39  ;;  %1786 = vmatprep.mubr.msk.f32.mxu0 %vm234_vm0, %v1514_v44  ;;  %v1499_v45 = vld [vmem:[%s2469_s1 + $0x78] sm:$0xff] }
  0xad   : > { %v2162_v53 = vpop.permute.xlu0 %2161  ;;  %v1963_v59 = vpack.c.bf16 %v2159_v51, %v2158_v52  ;;  %v1530_v52 = vld [vmem:[%s2469_s1 + $0xf0] sm:$0xff] }
  0xae   : > { %v2164_v55 = vunpack.i.h.bf16 %v2162_v53  ;;  %v2163_v56 = vunpack.i.l.bf16 %v2162_v53  ;;  %1900 = vmatprep.subr.bf16.mxu1 %v1899_v50  ;;  %v2167_v57 = vpop.permute.xlu1 %2166  ;;  %1787 = vmatmul.mubr.msk.f32.gmra.mrb[2].mxu0 %vm234_vm0, %v1515_v48  ;;  %v1531_v53 = vld [vmem:[%s2469_s1 + $0xf8] sm:$0xff] }
  0xaf   : > { %1902 = vmatpush3.bf16.msra.mxu1 %v1899_v50  ;;  %1958 = vmatpush3.bf16.msra.mxu0 %v1955_v39  ;;  %v2169_v61 = vunpack.i.h.bf16 %v2167_v57  ;;  %v2168_v62 = vunpack.i.l.bf16 %v2167_v57  ;;  %v1529_v50 = vld [vmem:[%s2469_s1 + $0xe8] sm:$0xff] }
  0xb0   : > { %v1903_v60 = vpack.c.bf16 %v2164_v55, %v2163_v56  ;;  %1960 = vmatprep.subr.bf16.mxu0 %v1959_v49  ;;  %1805 = vmatprep.mubr.msk.f32.mxu0 %vm234_vm0, %v1520_v54  ;;  %v1536_v54 = vld [vmem:[%s2469_s1 + $0x100] sm:$0xff]  ;;  %v1539_v55 = vld [vmem:[%s2469_s1 + $0x118] sm:$0xff]  ;;  %v1537_v56 = vld [vmem:[%s2469_s1 + $0x108] sm:$0xff] }
  0xb1   : > { %v2172_v63 = vpop.permute.xlu0 %2171  ;;  %v1967_v5 = vpack.c.bf16 %v2169_v61, %v2168_v62 }
  0xb2   : > { %v2174_v1 = vunpack.i.h.bf16 %v2172_v63  ;;  %v2173_v2 = vunpack.i.l.bf16 %v2172_v63  ;;  %1904 = vmatprep.subr.bf16.mxu1 %v1903_v60  ;;  %1718 = vmatmul.mubr.msk.f32.vlgmr.msra.gmra.mrb[0].mxu1 %vm234_vm0, %v1489_v58  ;;  %v2177_v3 = vpop.permute.xlu1 %2176 }
  0xb3   : > { %1906 = vmatpush3.bf16.msra.mxu1 %v1903_v60  ;;  %1962 = vmatpush3.bf16.msra.mxu0 %v1959_v49  ;;  %v2179_v7 = vunpack.i.h.bf16 %v2177_v3  ;;  %v2178_v8 = vunpack.i.l.bf16 %v2177_v3  ;;  %v1538_v49 = vld [vmem:[%s2469_s1 + $0x110] sm:$0xff] }
  0xb4   : > { %v1907_v6 = vpack.c.bf16 %v2174_v1, %v2173_v2  ;;  %1964 = vmatprep.subr.bf16.mxu0 %v1963_v59  ;;  %1720 = vmatprep.mubr.msk.f32.mxu1 %vm234_vm0, %v1490_v0 }
  0xb5   : > { %v2182_v9 = vpop.permute.xlu0 %2181  ;;  %v1971_v15 = vpack.c.bf16 %v2179_v7, %v2178_v8 }
  0xb6   : > { %v2184_v11 = vunpack.i.h.bf16 %v2182_v9  ;;  %v2183_v12 = vunpack.i.l.bf16 %v2182_v9  ;;  %1908 = vmatprep.subr.bf16.mxu1 %v1907_v6  ;;  %v2187_v13 = vpop.permute.xlu1 %2186  ;;  %1721 = vmatmul.mubr.msk.f32.gmra.mrb[2].mxu1 %vm234_vm0, %v1491_v4 }
  0xb7   : > { %1910 = vmatpush3.bf16.msra.mxu1 %v1907_v6  ;;  %1966 = vmatpush3.bf16.msra.mxu0 %v1963_v59  ;;  %v2189_v17 = vunpack.i.h.bf16 %v2187_v13  ;;  %v2188_v18 = vunpack.i.l.bf16 %v2187_v13 }
  0xb8   : > { %v1911_v16 = vpack.c.bf16 %v2184_v11, %v2183_v12  ;;  %1968 = vmatprep.subr.bf16.mxu0 %v1967_v5  ;;  %1739 = vmatprep.mubr.msk.f32.mxu1 %vm234_vm0, %v1496_v10  ;;  %v1544_v10 = vld [vmem:[%s2471_s3] ss:$0 sm:$0xff] }
  0xb9   : > { %v2192_v19 = vpop.permute.xlu0 %2191  ;;  %v1975_v25 = vpack.c.bf16 %v2189_v17, %v2188_v18 }
  0xba   : > { %v2194_v21 = vunpack.i.h.bf16 %v2192_v19  ;;  %v2193_v22 = vunpack.i.l.bf16 %v2192_v19  ;;  %1912 = vmatprep.subr.bf16.mxu1 %v1911_v16  ;;  %1806 = vmatmul.mubr.msk.f32.vlgmr.msra.gmra.mrb[0].mxu0 %vm234_vm0, %v1521_v14  ;;  %v2197_v23 = vpop.permute.xlu1 %2196 }
  0xbb   : > { %1914 = vmatpush3.bf16.msra.mxu1 %v1911_v16  ;;  %1970 = vmatpush3.bf16.msra.mxu0 %v1967_v5  ;;  %v2199_v27 = vunpack.i.h.bf16 %v2197_v23  ;;  %v2198_v28 = vunpack.i.l.bf16 %v2197_v23 }
  0xbc   : > { %v1915_v26 = vpack.c.bf16 %v2194_v21, %v2193_v22  ;;  %1972 = vmatprep.subr.bf16.mxu0 %v1971_v15  ;;  %1808 = vmatprep.mubr.msk.f32.mxu0 %vm234_vm0, %v1522_v20 }
  0xbd   : > { %v2202_v29 = vpop.permute.xlu0 %2201  ;;  %v1979_v37 = vpack.c.bf16 %v2199_v27, %v2198_v28 }
  0xbe   : > { %v2204_v31 = vunpack.i.h.bf16 %v2202_v29  ;;  %v2203_v32 = vunpack.i.l.bf16 %v2202_v29  ;;  %1916 = vmatprep.subr.bf16.mxu1 %v1915_v26  ;;  %v2207_v33 = vpop.permute.xlu1 %2206  ;;  %1809 = vmatmul.mubr.msk.f32.gmra.mrb[2].mxu0 %vm234_vm0, %v1523_v24 }
  0xbf   : > { %1918 = vmatpush3.bf16.msra.mxu1 %v1915_v26  ;;  %1974 = vmatpush3.bf16.msra.mxu0 %v1971_v15  ;;  %v2209_v34 = vunpack.i.h.bf16 %v2207_v33  ;;  %v2208_v35 = vunpack.i.l.bf16 %v2207_v33 }
  0xc0   : > { %v1983_v38 = vpack.c.bf16 %v2204_v31, %v2203_v32  ;;  %1976 = vmatprep.subr.bf16.mxu0 %v1975_v25  ;;  %1827 = vmatprep.mubr.msk.f32.mxu0 %vm234_vm0, %v1528_v30 }
  0xc1   : > { %v1987_v39 = vpack.c.bf16 %v2209_v34, %v2208_v35  ;;  %v2212_v40 = vpop.permute.xlu0 %2211 }
  0xc2   : > { %1740 = vmatmul.mubr.msk.f32.vlgmr.msra.gmra.mrb[0].mxu1 %vm234_vm0, %v1497_v36  ;;  %1999 = vmatprep.subr.bf16.mxu1 %v1983_v38  ;;  %v2214_v42 = vunpack.i.h.bf16 %v2212_v40  ;;  %v2213_v43 = vunpack.i.l.bf16 %v2212_v40  ;;  %v2217_v44 = vpop.permute.xlu1 %2216 }
  0xc3   : > { %1978 = vmatpush3.bf16.msra.mxu0 %v1975_v25  ;;  %2003 = vmatpush3.bf16.msra.mxu1 %v1983_v38  ;;  %v2219_v47 = vunpack.i.h.bf16 %v2217_v44  ;;  %v2218_v48 = vunpack.i.l.bf16 %v2217_v44 }
  0xc4   : > { %v1991_v46 = vpack.c.bf16 %v2214_v42, %v2213_v43  ;;  %1742 = vmatprep.mubr.msk.f32.mxu1 %vm234_vm0, %v1498_v41  ;;  %1980 = vmatprep.subr.bf16.mxu0 %v1979_v37 }
  0xc5   : > { %2000 = vmatprep.subr.bf16.mxu1 %v1987_v39  ;;  %v1995_v51 = vpack.c.bf16 %v2219_v47, %v2218_v48 }
  0xc6   : > { %1743 = vmatmul.mubr.msk.f32.gmra.mrb[2].mxu1 %vm234_vm0, %v1499_v45 }
  0xc7   : > { %1982 = vmatpush3.bf16.msra.mxu0 %v1979_v37  ;;  %2004 = vmatpush3.bf16.msra.mxu1 %v1987_v39 }
  0xc8   : > { %1984 = vmatprep.subr.bf16.mxu0 %v1983_v38  ;;  %2001 = vmatprep.subr.bf16.mxu1 %v1991_v46 }
  0xc9   : > { %1852 = vmatprep.mubr.msk.f32.mxu1 %vm234_vm0, %v1538_v49 }
  0xca   : > { %1828 = vmatmul.mubr.msk.f32.vlgmr.msra.gmra.mrb[0].mxu0 %vm234_vm0, %v1529_v50 }
  0xcb   : > { %1986 = vmatpush3.bf16.msra.mxu0 %v1983_v38  ;;  %2005 = vmatpush3.bf16.msra.mxu1 %v1991_v46 }
  0xcc   : > { %1830 = vmatprep.mubr.msk.f32.mxu0 %vm234_vm0, %v1530_v52  ;;  %1988 = vmatprep.subr.bf16.mxu0 %v1987_v39 }
  0xcd   : > { %2002 = vmatprep.subr.bf16.mxu1 %v1995_v51 }
  0xce   : > { %1831 = vmatmul.mubr.msk.f32.gmra.mrb[2].mxu0 %vm234_vm0, %v1531_v53 }
  0xcf   : > { %1990 = vmatpush3.bf16.msra.mxu0 %v1987_v39  ;;  %2006 = vmatpush3.bf16.msra.mxu1 %v1995_v51 }
  0xd0   : > { %1992 = vmatprep.subr.bf16.mxu0 %v1991_v46  ;;  %1849 = vmatprep.mubr.msk.f32.mxu0 %vm234_vm0, %v1536_v54 }
  0xd2   : > { %1853 = vmatmul.mubr.msk.f32.vlgmr.msra.gmra.mrb[4].mxu1 %vm234_vm0, %v1539_v55  ;;  %v215_v62 = vpop.permute.xlu0 %214 }
  0xd3   : > { %1994 = vmatpush3.bf16.msra.mxu0 %v1991_v46  ;;  %v220_v61 = vpop.permute.xlu1 %219 }
  0xd4   : > { %1996 = vmatprep.subr.bf16.mxu0 %v1995_v51 }
  0xd6   : > { %v210_v11 = vpop.permute.xlu0 %209 }
  0xd7   : > { %1998 = vmatpush3.bf16.msra.mxu0 %v1995_v51  ;;  %v205_v13 = vpop.permute.xlu1 %204 }
  0xda   : > { %1850 = vmatmul.mubr.msk.f32.vlgmr.msra.gmra.mrb[0].mxu0 %vm234_vm0, %v1537_v56 }
 0x195   : > { %v1741_v57 = vpop.f32.mrb[0].mxu1 }
 0x196   : > { %v711_v58 = vpop.f32.mrb[1].mxu1  ;;  %v2007_v17 = vadd.f32 %v1741_v57, %v210_v11 }
 0x197   : > { %v2009_v19 = vadd.f32 %v711_v58, %v205_v13 }
 0x199   : > { %v1744_v59 = vpop.f32.mrb[2].mxu1 }
 0x19a   : > { %v721_v60 = vpop.f32.mrb[3].mxu1  ;;  %v2011_v63 = vadd.f32 %v1744_v59, %v220_v61 }
 0x19b   : > { %v2014_v0 = vadd.f32 %v721_v60, %v215_v62 }
 0x1a1   : > { %v1832_v1 = vpop.f32.mrb[2].mxu0 }
 0x1a2   : > { %v2012_v2 = vadd.f32 %v2011_v63, %v1832_v1  ;;  %v1241_v3 = vpop.f32.mrb[3].mxu0 }
 0x1a3   : > { %v2015_v4 = vadd.f32 %v2014_v0, %v1241_v3 }
 0x1a5   : > { %v1854_v5 = vpop.f32.mrb[4].mxu1 }
 0x1a6   : > { %v2013_v6 = vadd.f32 %v2012_v2, %v1854_v5  ;;  %v1371_v7 = vpop.f32.mrb[5].mxu1 }
 0x1a7   : > { %v2016_v8 = vadd.f32 %v2015_v4, %v1371_v7 }
 0x1a8   : > { %vm1387_vm1 = vcmp.ge.f32.partialorder %v2013_v6, 0.0  ;;  %v1391_v9 = vmul.f32 0.2, %v2013_v6 }
 0x1a9   : > { %vm1386_vm2 = vcmp.ge.f32.partialorder %v2016_v8, 0.0  ;;  %v1390_v12 = vmul.f32 0.2, %v2016_v8 }
 0x1aa   : > { %v1395_v14 = vsel %vm1387_vm1, %v2013_v6, %v1391_v9 }
 0x1ab   : > { %v1406_v15 = vmul.f32 %v1544_v10, %v1395_v14  ;;  %v1394_v16 = vsel %vm1386_vm2, %v2016_v8, %v1390_v12 }
 0x1ac   : > { %v1405_v18 = vmul.f32 %v1544_v10, %v1394_v16 }
 0x1ad   : > { %1411 = vst.msk [vmem:[%s197_s18 + $0x18] sm:$0xff] %vm1407_vm3, %v1406_v15  ;;  %v1851_v20 = vpop.f32.mrb[0].mxu0 }
 0x1ae   : > { %1410 = vst.msk [vmem:[%s197_s18 + $0x10] sm:$0xff] %vm1407_vm3, %v1405_v18  ;;  %v2008_v21 = vadd.f32 %v2007_v17, %v1851_v20  ;;  %v1361_v22 = vpop.f32.mrb[1].mxu0 }
 0x1af   : > { %v2010_v23 = vadd.f32 %v2009_v19, %v1361_v22 }
 0x1b0   : > { %vm1385_vm4 = vcmp.ge.f32.partialorder %v2008_v21, 0.0  ;;  %v1389_v24 = vmul.f32 0.2, %v2008_v21 }
 0x1b1   : > { %vm1384_vm5 = vcmp.ge.f32.partialorder %v2010_v23, 0.0  ;;  %v1388_v25 = vmul.f32 0.2, %v2010_v23 }
 0x1b2   : > { %v1393_v26 = vsel %vm1385_vm4, %v2008_v21, %v1389_v24 }
 0x1b3   : > { %v1404_v27 = vmul.f32 %v1544_v10, %v1393_v26  ;;  %v1392_v28 = vsel %vm1384_vm5, %v2010_v23, %v1388_v25 }
 0x1b4   : > { %v1403_v29 = vmul.f32 %v1544_v10, %v1392_v28 }
 0x1b5   : > { %1409 = vst.msk [vmem:[%s197_s18 + $0x8] sm:$0xff] %vm1407_vm3, %v1404_v27 }
 0x1b6   : > { %1408 = vst.msk [vmem:[%s197_s18] sm:$0xff] %vm1407_vm3, %v1403_v29 }
 0x1b7 PF: > { %s14_s15 = sadd.s32 1, %s2228_s15  }
 0x1b8   : > { %p11_p4 = scmp.ge.s32.totalorder %s14_s15, 4  }
 0x1ba   :  { %13 = sbr.rel (!%p11_p4) target bundleno = 1 (0x1), region = 74 }

// kernel: _lambda_.18
= control target key start
LH: loop header
LB: loop body
LE: loop exit
PB: predicated region body
PF: predicated region fallthrough
CT: control target
= control target key end

     0   :  { %s2665_s15 = smov 0   ;;  %s2906_s0 = inlined_call_operand.vmem [shape: f32[2,32,362], index: 0, kind: input, shape index: {}]   ;;  %s2907_s1 = inlined_call_operand.vmem [shape: f32[9,8,32], index: 1, kind: input, shape index: {}]   ;;  %s2908_s2 = inlined_call_operand.vmem [shape: f32[8,1], index: 2, kind: input, shape index: {}]   ;;  %s2909_s3 = inlined_call_operand.vmem [shape: f32[1,324], index: 3, kind: input, shape index: {}]   ;;  %s2910_s4 = inlined_call_operand.vmem [shape: f32[2,8,324], index: 4, kind: output, shape index: {}]  }
   0x1 LB: > { %s2017_s16 = sadd.s32 4294967295, %s2626_s15   ;;  %p2021_p0 = scmp.ge.s32.totalorder %s2626_s15, 1  ;;  %s2626_s15 = sphi %s2665_s15, %s14_s15  }
   0x2   : > { %p162_p1 = scmp.lt.s32.totalorder %s2626_s15, 3 }
   0x4   : > { %p163_p2 = pnand %p2021_p0, %p162_p1 }
   0x5   : > { %p188_p3 = scmp.lt.s32.totalorder (!%p163_p2), %s2017_s16, 1  ;;  %v2628_v0 = vmov (!%p163_p2), 0.0|0.0   ;;  %vm2629_vm0 = vmmov (!%p163_p2), 0   ;;  %v2630_v1 = vmov (!%p163_p2), 0.0   ;;  %s2631_s21 = smov (!%p163_p2), 127   ;;  %v216_v26 = vld [vmem:[%s2907_s1] sm:$0xff] (!%p163_p2) }
   0x6   : > { %166 = sbr.rel (%p163_p2) target bundleno = 457 (0x1c9), region = 36  ;;  %2204 = vmatprep.subr.bf16.mxu1 (!%p163_p2), %v2628_v0  ;;  %2105 = vmatprep.mubr.msk.f32.mxu1 (!%p163_p2), %vm2629_vm0, %v2630_v1  ;;  %s2632_s22 = smov (!%p163_p2), 126   ;;  %vm217_vm1 = vcmask (!%p163_p2), 261120   ;;  %v2639_v27 = vmov (!%p163_p2), 0   ;;  %v198_v28 = vld [vmem:[%s2908_s2] sm:$0xff] (!%p163_p2)  ;;  %vm403_vm2 = vcmask (!%p163_p2), 1039360  }
   0x7   : > { %285 = vmatprep.mubr.f32.mxu0 (!%p163_p2), %v2630_v1  ;;  %s2633_s25 = smov (!%p163_p2), 110   ;;  %s2634_s26 = smov (!%p163_p2), 109   ;;  %2619 = vset.pattern.permute.xlu0 (!%p163_p2), %v2639_v27  ;;  %vm597_vm3 = vcmask (!%p163_p2), 1031168   ;;  %vm791_vm4 = vcmask (!%p163_p2), 900096   ;;  %vm985_vm5 = vcmask (!%p163_p2), 891904   ;;  %vm1179_vm6 = vcmask (!%p163_p2), 883712  }
   0x8   : > { %s2635_s27 = smov (!%p163_p2), 108   ;;  %s2636_s28 = smov (!%p163_p2), 92   ;;  %vm1373_vm7 = vcmask (!%p163_p2), 752640   ;;  %vm1567_vm8 = vcmask (!%p163_p2), 744448   ;;  %vm1761_vm9 = vcmask (!%p163_p2), 736256   ;;  %vm1960_vm11 = vcmask (!%p163_p2), 556032  }
   0x9   : > { %s2637_s29 = smov (!%p163_p2), 91   ;;  %s2638_s30 = smov (!%p163_p2), 90  }
   0xd   : > { %s2912_s16 = smov (!%p188_p3, %s2017_s16), 1 }
   0xe   : > { %s2357_s17 = smul.u32 96, %s2912_s16 }
  0x10   : > { %s192_s20 = scalar_lea.vmem %s2906_s0, %s2357_s17 }
  0x11   : > { %v205_v2 = vld [vmem:[%s192_s20 + $0x8] sm:$0xff]  ;;  %v206_v3 = vld [vmem:[%s192_s20 + $0x10] sm:$0xff]  ;;  %v204_v4 = vld [vmem:[%s192_s20] sm:$0xff] }
  0x12   : > { %v2683_v5 = vpack.i.bf16 %v206_v3, %v205_v2  ;;  %v207_v6 = vld [vmem:[%s192_s20 + $0x18] sm:$0xff]  ;;  %v208_v7 = vld [vmem:[%s192_s20 + $0x20] sm:$0xff]  ;;  %v209_v8 = vld [vmem:[%s192_s20 + $0x28] sm:$0xff] }
  0x13   : > { %v2685_v9 = vpack.i.bf16 %v207_v6, %v204_v4  ;;  %v211_v10 = vld [vmem:[%s192_s20 + $0x38] sm:$0xff]  ;;  %v212_v11 = vld [vmem:[%s192_s20 + $0x40] sm:$0xff]  ;;  %v2688_v12 = vpack.i.bf16 %v209_v8, %v208_v7  ;;  %v214_v14 = vld [vmem:[%s192_s20 + $0x50] sm:$0xff]  ;;  %v2205_v20 = vpack.c.bf16 %v209_v8, %v206_v3  ;;  %v2196_v21 = vpack.c.bf16 %v208_v7, %v205_v2 }
  0x14   : > { %2380 = vrot.lane.b32.xlu0 %v2683_v5, %s2631_s21  ;;  %v2691_v13 = vpack.i.bf16 %v212_v11, %v211_v10  ;;  %v215_v15 = vld [vmem:[%s192_s20 + $0x58] sm:$0xff]  ;;  %v210_v16 = vld [vmem:[%s192_s20 + $0x30] sm:$0xff]  ;;  %v213_v17 = vld [vmem:[%s192_s20 + $0x48] sm:$0xff]  ;;  %v2198_v22 = vpack.c.bf16 %v207_v6, %v204_v4  ;;  %v2200_v23 = vpack.c.bf16 %v214_v14, %v211_v10 }
  0x15   : > { %2390 = vrot.lane.b32.xlu1 %v2685_v9, %s2631_s21  ;;  %v2694_v18 = vpack.i.bf16 %v215_v15, %v214_v14  ;;  %v2697_v19 = vpack.i.bf16 %v213_v17, %v210_v16  ;;  %2206 = vmatpush3.bf16.msra.mxu1 %v2205_v20  ;;  %v2208_v24 = vpack.c.bf16 %v215_v15, %v212_v11  ;;  %v2026_v3 = vld [vmem:[%s2907_s1 + $0x8] sm:$0xff] }
  0x16   : > { %2197 = vmatprep.subr.bf16.mxu0 %v2196_v21  ;;  %2207 = vmatprep.subr.bf16.mxu1 %v2628_v0  ;;  %v2202_v25 = vpack.c.bf16 %v213_v17, %v210_v16 }
  0x17   : > { %2199 = vmatpush1.bf16.msra.mxu0 %v2198_v22 }
  0x18   : > { %2385 = vrot.lane.b32.xlu0 %v2688_v12, %s2631_s21  ;;  %2201 = vmatprep.subr.bf16.mxu0 %v2200_v23 }
  0x19   : > { %2395 = vrot.lane.b32.xlu1 %v2691_v13, %s2631_s21  ;;  %2209 = vmatpush3.bf16.msra.mxu1 %v2208_v24 }
  0x1a   : > { %2218 = vmatprep.subr.bf16.mxu1 %v2628_v0 }
  0x1b   : > { %2203 = vmatpush1.bf16.msra.mxu0 %v2202_v25 }
  0x1c   : > { %2400 = vrot.lane.b32.xlu0 %v2694_v18, %s2631_s21  ;;  %2106 = vmatmul.mubr.msk.f32.vlgmr.msra.gmra.mrb[0].mxu1 %vm217_vm1, %v216_v26 }
  0x1d   : > { %2405 = vrot.lane.b32.xlu1 %v2697_v19, %s2631_s21  ;;  %2116 = vmatprep.mubr.msk.f32.mxu1 %vm2629_vm0, %v2630_v1 }
  0x1e   : > { %2024 = vmatmul.mubr.msk.f32.vlgmr.msra.gmra.mrb[0].mxu0 %vm217_vm1, %v216_v26 }
  0x1f   : > { %491 = vmatprep.mubr.f32.mxu0 %v2630_v1 }
  0x20   : > { %2410 = vrot.lane.b32.xlu0 %v2683_v5, %s2632_s22 }
  0x21   : > { %2415 = vrot.lane.b32.xlu1 %v2688_v12, %s2632_s22 }
  0x24   : > { %2420 = vrot.lane.b32.xlu0 %v2685_v9, %s2632_s22 }
  0x25   : > { %2425 = vrot.lane.b32.xlu1 %v2691_v13, %s2632_s22 }
  0x28   : > { %2430 = vrot.lane.b32.xlu0 %v2694_v18, %s2632_s22 }
  0x29   : > { %2435 = vrot.lane.b32.xlu1 %v2697_v19, %s2632_s22 }
  0x2c   : > { %2440 = vrot.lane.b32.xlu0 %v2683_v5, %s2633_s25 }
  0x2d   : > { %2445 = vrot.lane.b32.xlu1 %v2688_v12, %s2633_s25 }
  0x30   : > { %2450 = vrot.lane.b32.xlu0 %v2685_v9, %s2633_s25 }
  0x31   : > { %2455 = vrot.lane.b32.xlu1 %v2691_v13, %s2633_s25 }
  0x34   : > { %2460 = vrot.lane.b32.xlu0 %v2694_v18, %s2633_s25 }
  0x35   : > { %2465 = vrot.lane.b32.xlu1 %v2697_v19, %s2633_s25 }
  0x38   : > { %2470 = vrot.lane.b32.xlu0 %v2683_v5, %s2634_s26 }
  0x39   : > { %2475 = vrot.lane.b32.xlu1 %v2688_v12, %s2634_s26 }
  0x3c   : > { %2480 = vrot.lane.b32.xlu0 %v2685_v9, %s2634_s26 }
  0x3d   : > { %2485 = vrot.lane.b32.xlu1 %v2691_v13, %s2634_s26 }
  0x40   : > { %2490 = vrot.lane.b32.xlu0 %v2694_v18, %s2634_s26 }
  0x41   : > { %2495 = vrot.lane.b32.xlu1 %v2697_v19, %s2634_s26 }
  0x44   : > { %2500 = vrot.lane.b32.xlu0 %v2683_v5, %s2635_s27 }
  0x45   : > { %2505 = vrot.lane.b32.xlu1 %v2688_v12, %s2635_s27 }
  0x48   : > { %2510 = vrot.lane.b32.xlu0 %v2685_v9, %s2635_s27 }
  0x49   : > { %2515 = vrot.lane.b32.xlu1 %v2691_v13, %s2635_s27 }
  0x4c   : > { %2520 = vrot.lane.b32.xlu0 %v2694_v18, %s2635_s27 }
  0x4d   : > { %2525 = vrot.lane.b32.xlu1 %v2697_v19, %s2635_s27  ;;  %s2358_s27 = smul.u32 24, %s2912_s16 }
  0x50   : > { %2530 = vrot.lane.b32.xlu0 %v2683_v5, %s2636_s28 }
  0x51   : > { %2535 = vrot.lane.b32.xlu1 %v2688_v12, %s2636_s28 }
  0x54   : > { %2540 = vrot.lane.b32.xlu0 %v2685_v9, %s2636_s28 }
  0x55   : > { %2545 = vrot.lane.b32.xlu1 %v2691_v13, %s2636_s28 }
  0x58   : > { %2550 = vrot.lane.b32.xlu0 %v2694_v18, %s2636_s28 }
  0x59   : > { %2555 = vrot.lane.b32.xlu1 %v2697_v19, %s2636_s28 }
  0x5c   : > { %2560 = vrot.lane.b32.xlu0 %v2683_v5, %s2637_s29 }
  0x5d   : > { %2565 = vrot.lane.b32.xlu1 %v2688_v12, %s2637_s29 }
  0x60   : > { %2570 = vrot.lane.b32.xlu0 %v2685_v9, %s2637_s29 }
  0x61   : > { %2575 = vrot.lane.b32.xlu1 %v2691_v13, %s2637_s29 }
  0x64   : > { %2580 = vrot.lane.b32.xlu0 %v2694_v18, %s2637_s29 }
  0x65   : > { %2585 = vrot.lane.b32.xlu1 %v2697_v19, %s2637_s29 }
  0x68   : > { %2590 = vrot.lane.b32.xlu0 %v2683_v5, %s2638_s30 }
  0x69   : > { %2595 = vrot.lane.b32.xlu1 %v2688_v12, %s2638_s30 }
  0x6c   : > { %2600 = vrot.lane.b32.xlu0 %v2685_v9, %s2638_s30 }
  0x6d   : > { %2605 = vrot.lane.b32.xlu1 %v2691_v13, %s2638_s30 }
  0x70   : > { %2610 = vrot.lane.b32.xlu0 %v2694_v18, %s2638_s30 }
  0x71   : > { %2615 = vrot.lane.b32.xlu1 %v2697_v19, %s2638_s30  ;;  %s197_s30 = scalar_lea.vmem %s2910_s4, %s2358_s27 }
  0x74   : > { %201 = vperm.xlu0 %2619, %v198_v28  }
  0x86   : > { %v2381_v29 = vpop.permute.xlu0 %2380 }
  0x87   : > { %v2391_v30 = vpop.permute.xlu1 %2390  ;;  %v2383_v31 = vunpack.i.h.bf16 %v2381_v29  ;;  %v2382_v32 = vunpack.i.l.bf16 %v2381_v29 }
  0x88   : > { %v2392_v33 = vunpack.i.l.bf16 %v2391_v30  ;;  %v2393_v35 = vunpack.i.h.bf16 %v2391_v30 }
  0x89   : > { %v405_v41 = vsel %vm403_vm2, %v2382_v32, %v2383_v31 }
  0x8a   : > { %v2386_v34 = vpop.permute.xlu0 %2385  ;;  %v404_v39 = vsel %vm403_vm2, %v2392_v33, %v2382_v32 }
  0x8b   : > { %v2388_v36 = vunpack.i.h.bf16 %v2386_v34  ;;  %v2387_v37 = vunpack.i.l.bf16 %v2386_v34  ;;  %v2396_v38 = vpop.permute.xlu1 %2395 }
  0x8c   : > { %v2398_v40 = vunpack.i.h.bf16 %v2396_v38  ;;  %v2397_v44 = vunpack.i.l.bf16 %v2396_v38 }
  0x8d   : > { %v406_v42 = vsel %vm403_vm2, %v2393_v35, %v2387_v37  ;;  %v2219_v43 = vpack.c.bf16 %v2388_v36, %v2383_v31  ;;  %v407_v45 = vsel %vm403_vm2, %v2387_v37, %v2388_v36  ;;  %v2029_v36 = vld [vmem:[%s2907_s1 + $0x10] sm:$0xff] }
  0x8e   : > { %v2212_v46 = vpack.c.bf16 %v406_v42, %v404_v39  ;;  %v2401_v47 = vpop.permute.xlu0 %2400  ;;  %v2210_v48 = vpack.c.bf16 %v407_v45, %v405_v41  ;;  %v409_v55 = vsel %vm403_vm2, %v2397_v44, %v2398_v40 }
  0x8f   : > { %v2403_v49 = vunpack.i.h.bf16 %v2401_v47  ;;  %v2402_v50 = vunpack.i.l.bf16 %v2401_v47  ;;  %v2406_v51 = vpop.permute.xlu1 %2405  ;;  %2220 = vmatpush3.bf16.msra.mxu1 %v2219_v43 }
  0x90   : > { %v2408_v52 = vunpack.i.h.bf16 %v2406_v51  ;;  %v2407_v53 = vunpack.i.l.bf16 %v2406_v51  ;;  %2211 = vmatprep.subr.bf16.mxu0 %v2210_v48  ;;  %2221 = vmatprep.subr.bf16.mxu1 %v2628_v0 }
  0x91   : > { %v2222_v54 = vpack.c.bf16 %v2403_v49, %v2398_v40  ;;  %2213 = vmatpush1.bf16.msra.mxu0 %v2212_v46  ;;  %v411_v56 = vsel %vm403_vm2, %v2402_v50, %v2403_v49 }
  0x92   : > { %v410_v57 = vsel %vm403_vm2, %v2408_v52, %v2402_v50  ;;  %v408_v58 = vsel %vm403_vm2, %v2407_v53, %v2397_v44  ;;  %v2411_v59 = vpop.permute.xlu0 %2410  ;;  %v2214_v60 = vpack.c.bf16 %v411_v56, %v409_v55 }
  0x93   : > { %v2216_v61 = vpack.c.bf16 %v410_v57, %v408_v58  ;;  %v2413_v62 = vunpack.i.h.bf16 %v2411_v59  ;;  %v2412_v63 = vunpack.i.l.bf16 %v2411_v59  ;;  %v2416_v2 = vpop.permute.xlu1 %2415  ;;  %2223 = vmatpush3.bf16.msra.mxu1 %v2222_v54 }
  0x94   : > { %v2418_v4 = vunpack.i.h.bf16 %v2416_v2  ;;  %v2417_v5 = vunpack.i.l.bf16 %v2416_v2  ;;  %2215 = vmatprep.subr.bf16.mxu0 %v2214_v60  ;;  %2232 = vmatprep.subr.bf16.mxu1 %v2628_v0 }
  0x95   : > { %2217 = vmatpush1.bf16.msra.mxu0 %v2216_v61  ;;  %v599_v6 = vsel %vm597_vm3, %v2412_v63, %v2413_v62 }
  0x96   : > { %v2233_v7 = vpack.c.bf16 %v2418_v4, %v2413_v62  ;;  %v2421_v8 = vpop.permute.xlu0 %2420  ;;  %2117 = vmatmul.mubr.msk.f32.vlgmr.msra.gmra.mrb[0].mxu1 %vm217_vm1, %v2026_v3  ;;  %v601_v9 = vsel %vm597_vm3, %v2417_v5, %v2418_v4 }
  0x97   : > { %v2423_v10 = vunpack.i.h.bf16 %v2421_v8  ;;  %v2422_v11 = vunpack.i.l.bf16 %v2421_v8  ;;  %v2426_v12 = vpop.permute.xlu1 %2425  ;;  %v2224_v13 = vpack.c.bf16 %v601_v9, %v599_v6  ;;  %2127 = vmatprep.mubr.msk.f32.mxu1 %vm2629_vm0, %v2630_v1 }
  0x98   : > { %2234 = vmatpush3.bf16.msra.mxu1 %v2233_v7  ;;  %2027 = vmatmul.mubr.msk.f32.vlgmr.msra.gmra.mrb[0].mxu0 %vm217_vm1, %v2026_v3  ;;  %v2428_v16 = vunpack.i.h.bf16 %v2426_v12  ;;  %v2427_v17 = vunpack.i.l.bf16 %v2426_v12  ;;  %v2032_v7 = vld [vmem:[%s2907_s1 + $0x18] sm:$0xff] }
  0x99   : > { %v598_v14 = vsel %vm597_vm3, %v2422_v11, %v2412_v63  ;;  %v600_v15 = vsel %vm597_vm3, %v2423_v10, %v2417_v5  ;;  %2225 = vmatprep.subr.bf16.mxu0 %v2224_v13  ;;  %2235 = vmatprep.subr.bf16.mxu1 %v2628_v0 }
  0x9a   : > { %v2226_v18 = vpack.c.bf16 %v600_v15, %v598_v14  ;;  %v2431_v19 = vpop.permute.xlu0 %2430  ;;  %685 = vmatprep.mubr.f32.mxu0 %v2630_v1  ;;  %v603_v26 = vsel %vm597_vm3, %v2427_v17, %v2428_v16 }
  0x9b   : > { %v2433_v20 = vunpack.i.h.bf16 %v2431_v19  ;;  %v2432_v21 = vunpack.i.l.bf16 %v2431_v19  ;;  %v2436_v22 = vpop.permute.xlu1 %2435 }
  0x9c   : > { %v2438_v23 = vunpack.i.h.bf16 %v2436_v22  ;;  %v2437_v24 = vunpack.i.l.bf16 %v2436_v22  ;;  %2227 = vmatpush1.bf16.msra.mxu0 %v2226_v18 }
  0x9d   : > { %v2236_v25 = vpack.c.bf16 %v2433_v20, %v2428_v16  ;;  %v605_v27 = vsel %vm597_vm3, %v2432_v21, %v2433_v20 }
  0x9e   : > { %v604_v28 = vsel %vm597_vm3, %v2438_v23, %v2432_v21  ;;  %v602_v29 = vsel %vm597_vm3, %v2437_v24, %v2427_v17  ;;  %v2441_v30 = vpop.permute.xlu0 %2440  ;;  %v2228_v31 = vpack.c.bf16 %v605_v27, %v603_v26 }
  0x9f   : > { %v2230_v32 = vpack.c.bf16 %v604_v28, %v602_v29  ;;  %v2443_v33 = vunpack.i.h.bf16 %v2441_v30  ;;  %v2442_v34 = vunpack.i.l.bf16 %v2441_v30  ;;  %v2446_v35 = vpop.permute.xlu1 %2445  ;;  %2237 = vmatpush3.bf16.msra.mxu1 %v2236_v25 }
  0xa0   : > { %v2448_v37 = vunpack.i.h.bf16 %v2446_v35  ;;  %v2447_v38 = vunpack.i.l.bf16 %v2446_v35  ;;  %2229 = vmatprep.subr.bf16.mxu0 %v2228_v31  ;;  %2246 = vmatprep.subr.bf16.mxu1 %v2628_v0 }
  0xa1   : > { %2231 = vmatpush1.bf16.msra.mxu0 %v2230_v32  ;;  %v793_v39 = vsel %vm791_vm4, %v2442_v34, %v2443_v33 }
  0xa2   : > { %v2247_v40 = vpack.c.bf16 %v2448_v37, %v2443_v33  ;;  %v2451_v41 = vpop.permute.xlu0 %2450  ;;  %2128 = vmatmul.mubr.msk.f32.vlgmr.msra.gmra.mrb[0].mxu1 %vm217_vm1, %v2029_v36  ;;  %v795_v42 = vsel %vm791_vm4, %v2447_v38, %v2448_v37 }
  0xa3   : > { %v2453_v43 = vunpack.i.h.bf16 %v2451_v41  ;;  %v2452_v44 = vunpack.i.l.bf16 %v2451_v41  ;;  %v2456_v45 = vpop.permute.xlu1 %2455  ;;  %v2238_v46 = vpack.c.bf16 %v795_v42, %v793_v39  ;;  %2138 = vmatprep.mubr.msk.f32.mxu1 %vm2629_vm0, %v2630_v1 }
  0xa4   : > { %2248 = vmatpush3.bf16.msra.mxu1 %v2247_v40  ;;  %2030 = vmatmul.mubr.msk.f32.vlgmr.msra.gmra.mrb[0].mxu0 %vm217_vm1, %v2029_v36  ;;  %v2458_v49 = vunpack.i.h.bf16 %v2456_v45  ;;  %v2457_v50 = vunpack.i.l.bf16 %v2456_v45  ;;  %v2035_v40 = vld [vmem:[%s2907_s1 + $0x20] sm:$0xff] }
  0xa5   : > { %v792_v47 = vsel %vm791_vm4, %v2452_v44, %v2442_v34  ;;  %v794_v48 = vsel %vm791_vm4, %v2453_v43, %v2447_v38  ;;  %2239 = vmatprep.subr.bf16.mxu0 %v2238_v46  ;;  %2249 = vmatprep.subr.bf16.mxu1 %v2628_v0 }
  0xa6   : > { %v2240_v51 = vpack.c.bf16 %v794_v48, %v792_v47  ;;  %v2461_v52 = vpop.permute.xlu0 %2460  ;;  %879 = vmatprep.mubr.f32.mxu0 %v2630_v1  ;;  %v797_v59 = vsel %vm791_vm4, %v2457_v50, %v2458_v49 }
  0xa7   : > { %v2463_v53 = vunpack.i.h.bf16 %v2461_v52  ;;  %v2462_v54 = vunpack.i.l.bf16 %v2461_v52  ;;  %v2466_v55 = vpop.permute.xlu1 %2465 }
  0xa8   : > { %v2468_v56 = vunpack.i.h.bf16 %v2466_v55  ;;  %v2467_v57 = vunpack.i.l.bf16 %v2466_v55  ;;  %2241 = vmatpush1.bf16.msra.mxu0 %v2240_v51 }
  0xa9   : > { %v2250_v58 = vpack.c.bf16 %v2463_v53, %v2458_v49  ;;  %v799_v60 = vsel %vm791_vm4, %v2462_v54, %v2463_v53 }
  0xaa   : > { %v798_v61 = vsel %vm791_vm4, %v2468_v56, %v2462_v54  ;;  %v796_v62 = vsel %vm791_vm4, %v2467_v57, %v2457_v50  ;;  %v2471_v63 = vpop.permute.xlu0 %2470  ;;  %v2242_v2 = vpack.c.bf16 %v799_v60, %v797_v59 }
  0xab   : > { %v2244_v3 = vpack.c.bf16 %v798_v61, %v796_v62  ;;  %v2473_v4 = vunpack.i.h.bf16 %v2471_v63  ;;  %v2472_v5 = vunpack.i.l.bf16 %v2471_v63  ;;  %v2476_v6 = vpop.permute.xlu1 %2475  ;;  %2251 = vmatpush3.bf16.msra.mxu1 %v2250_v58 }
  0xac   : > { %v2478_v8 = vunpack.i.h.bf16 %v2476_v6  ;;  %v2477_v9 = vunpack.i.l.bf16 %v2476_v6  ;;  %2243 = vmatprep.subr.bf16.mxu0 %v2242_v2  ;;  %2260 = vmatprep.subr.bf16.mxu1 %v2628_v0 }
  0xad   : > { %2245 = vmatpush1.bf16.msra.mxu0 %v2244_v3  ;;  %v987_v10 = vsel %vm985_vm5, %v2472_v5, %v2473_v4 }
  0xae   : > { %v2261_v11 = vpack.c.bf16 %v2478_v8, %v2473_v4  ;;  %v2481_v12 = vpop.permute.xlu0 %2480  ;;  %2139 = vmatmul.mubr.msk.f32.vlgmr.msra.gmra.mrb[0].mxu1 %vm217_vm1, %v2032_v7  ;;  %v989_v13 = vsel %vm985_vm5, %v2477_v9, %v2478_v8 }
  0xaf   : > { %v2483_v14 = vunpack.i.h.bf16 %v2481_v12  ;;  %v2482_v15 = vunpack.i.l.bf16 %v2481_v12  ;;  %v2486_v16 = vpop.permute.xlu1 %2485  ;;  %v2252_v17 = vpack.c.bf16 %v989_v13, %v987_v10  ;;  %2149 = vmatprep.mubr.msk.f32.mxu1 %vm2629_vm0, %v2630_v1 }
  0xb0   : > { %2262 = vmatpush3.bf16.msra.mxu1 %v2261_v11  ;;  %2033 = vmatmul.mubr.msk.f32.vlgmr.msra.gmra.mrb[0].mxu0 %vm217_vm1, %v2032_v7  ;;  %v2488_v20 = vunpack.i.h.bf16 %v2486_v16  ;;  %v2487_v21 = vunpack.i.l.bf16 %v2486_v16  ;;  %v2038_v11 = vld [vmem:[%s2907_s1 + $0x28] sm:$0xff] }
  0xb1   : > { %v986_v18 = vsel %vm985_vm5, %v2482_v15, %v2472_v5  ;;  %v988_v19 = vsel %vm985_vm5, %v2483_v14, %v2477_v9  ;;  %2253 = vmatprep.subr.bf16.mxu0 %v2252_v17  ;;  %2263 = vmatprep.subr.bf16.mxu1 %v2628_v0 }
  0xb2   : > { %v2254_v22 = vpack.c.bf16 %v988_v19, %v986_v18  ;;  %v2491_v23 = vpop.permute.xlu0 %2490  ;;  %1073 = vmatprep.mubr.f32.mxu0 %v2630_v1  ;;  %v991_v30 = vsel %vm985_vm5, %v2487_v21, %v2488_v20 }
  0xb3   : > { %v2493_v24 = vunpack.i.h.bf16 %v2491_v23  ;;  %v2492_v25 = vunpack.i.l.bf16 %v2491_v23  ;;  %v2496_v26 = vpop.permute.xlu1 %2495 }
  0xb4   : > { %v2498_v27 = vunpack.i.h.bf16 %v2496_v26  ;;  %v2497_v28 = vunpack.i.l.bf16 %v2496_v26  ;;  %2255 = vmatpush1.bf16.msra.mxu0 %v2254_v22 }
  0xb5   : > { %v2264_v29 = vpack.c.bf16 %v2493_v24, %v2488_v20  ;;  %v993_v31 = vsel %vm985_vm5, %v2492_v25, %v2493_v24 }
  0xb6   : > { %v992_v32 = vsel %vm985_vm5, %v2498_v27, %v2492_v25  ;;  %v990_v33 = vsel %vm985_vm5, %v2497_v28, %v2487_v21  ;;  %v2501_v34 = vpop.permute.xlu0 %2500  ;;  %v2256_v35 = vpack.c.bf16 %v993_v31, %v991_v30 }
  0xb7   : > { %v2258_v36 = vpack.c.bf16 %v992_v32, %v990_v33  ;;  %v2503_v37 = vunpack.i.h.bf16 %v2501_v34  ;;  %v2502_v38 = vunpack.i.l.bf16 %v2501_v34  ;;  %v2506_v39 = vpop.permute.xlu1 %2505  ;;  %2265 = vmatpush3.bf16.msra.mxu1 %v2264_v29 }
  0xb8   : > { %v2508_v41 = vunpack.i.h.bf16 %v2506_v39  ;;  %v2507_v42 = vunpack.i.l.bf16 %v2506_v39  ;;  %2257 = vmatprep.subr.bf16.mxu0 %v2256_v35  ;;  %2274 = vmatprep.subr.bf16.mxu1 %v2628_v0 }
  0xb9   : > { %2259 = vmatpush1.bf16.msra.mxu0 %v2258_v36  ;;  %v1181_v43 = vsel %vm1179_vm6, %v2502_v38, %v2503_v37 }
  0xba   : > { %v2275_v44 = vpack.c.bf16 %v2508_v41, %v2503_v37  ;;  %v2511_v45 = vpop.permute.xlu0 %2510  ;;  %2150 = vmatmul.mubr.msk.f32.vlgmr.msra.gmra.mrb[0].mxu1 %vm217_vm1, %v2035_v40  ;;  %v1183_v46 = vsel %vm1179_vm6, %v2507_v42, %v2508_v41 }
  0xbb   : > { %v2513_v47 = vunpack.i.h.bf16 %v2511_v45  ;;  %v2512_v48 = vunpack.i.l.bf16 %v2511_v45  ;;  %v2516_v49 = vpop.permute.xlu1 %2515  ;;  %v2266_v50 = vpack.c.bf16 %v1183_v46, %v1181_v43  ;;  %2160 = vmatprep.mubr.msk.f32.mxu1 %vm2629_vm0, %v2630_v1 }
  0xbc   : > { %2276 = vmatpush3.bf16.msra.mxu1 %v2275_v44  ;;  %2036 = vmatmul.mubr.msk.f32.vlgmr.msra.gmra.mrb[0].mxu0 %vm217_vm1, %v2035_v40  ;;  %v2518_v53 = vunpack.i.h.bf16 %v2516_v49  ;;  %v2517_v54 = vunpack.i.l.bf16 %v2516_v49  ;;  %v2041_v44 = vld [vmem:[%s2907_s1 + $0x30] sm:$0xff] }
  0xbd   : > { %v1180_v51 = vsel %vm1179_vm6, %v2512_v48, %v2502_v38  ;;  %v1182_v52 = vsel %vm1179_vm6, %v2513_v47, %v2507_v42  ;;  %2267 = vmatprep.subr.bf16.mxu0 %v2266_v50  ;;  %2277 = vmatprep.subr.bf16.mxu1 %v2628_v0 }
  0xbe   : > { %v2268_v55 = vpack.c.bf16 %v1182_v52, %v1180_v51  ;;  %v2521_v56 = vpop.permute.xlu0 %2520  ;;  %1267 = vmatprep.mubr.f32.mxu0 %v2630_v1  ;;  %v1185_v63 = vsel %vm1179_vm6, %v2517_v54, %v2518_v53 }
  0xbf   : > { %v2523_v57 = vunpack.i.h.bf16 %v2521_v56  ;;  %v2522_v58 = vunpack.i.l.bf16 %v2521_v56  ;;  %v2526_v59 = vpop.permute.xlu1 %2525 }
  0xc0   : > { %v2528_v60 = vunpack.i.h.bf16 %v2526_v59  ;;  %v2527_v61 = vunpack.i.l.bf16 %v2526_v59  ;;  %2269 = vmatpush1.bf16.msra.mxu0 %v2268_v55 }
  0xc1   : > { %v2278_v62 = vpack.c.bf16 %v2523_v57, %v2518_v53  ;;  %v1187_v2 = vsel %vm1179_vm6, %v2522_v58, %v2523_v57 }
  0xc2   : > { %v1186_v3 = vsel %vm1179_vm6, %v2528_v60, %v2522_v58  ;;  %v1184_v4 = vsel %vm1179_vm6, %v2527_v61, %v2517_v54  ;;  %v2531_v5 = vpop.permute.xlu0 %2530  ;;  %v2270_v6 = vpack.c.bf16 %v1187_v2, %v1185_v63 }
  0xc3   : > { %v2272_v7 = vpack.c.bf16 %v1186_v3, %v1184_v4  ;;  %v2533_v8 = vunpack.i.h.bf16 %v2531_v5  ;;  %v2532_v9 = vunpack.i.l.bf16 %v2531_v5  ;;  %v2536_v10 = vpop.permute.xlu1 %2535  ;;  %2279 = vmatpush3.bf16.msra.mxu1 %v2278_v62 }
  0xc4   : > { %v2538_v12 = vunpack.i.h.bf16 %v2536_v10  ;;  %v2537_v13 = vunpack.i.l.bf16 %v2536_v10  ;;  %2271 = vmatprep.subr.bf16.mxu0 %v2270_v6  ;;  %2288 = vmatprep.subr.bf16.mxu1 %v2628_v0 }
  0xc5   : > { %2273 = vmatpush1.bf16.msra.mxu0 %v2272_v7  ;;  %v1375_v14 = vsel %vm1373_vm7, %v2532_v9, %v2533_v8 }
  0xc6   : > { %v2289_v15 = vpack.c.bf16 %v2538_v12, %v2533_v8  ;;  %v2541_v16 = vpop.permute.xlu0 %2540  ;;  %2161 = vmatmul.mubr.msk.f32.vlgmr.msra.gmra.mrb[0].mxu1 %vm217_vm1, %v2038_v11  ;;  %v1377_v17 = vsel %vm1373_vm7, %v2537_v13, %v2538_v12 }
  0xc7   : > { %v2543_v18 = vunpack.i.h.bf16 %v2541_v16  ;;  %v2542_v19 = vunpack.i.l.bf16 %v2541_v16  ;;  %v2546_v20 = vpop.permute.xlu1 %2545  ;;  %v2280_v21 = vpack.c.bf16 %v1377_v17, %v1375_v14  ;;  %2171 = vmatprep.mubr.msk.f32.mxu1 %vm2629_vm0, %v2630_v1 }
  0xc8   : > { %2290 = vmatpush3.bf16.msra.mxu1 %v2289_v15  ;;  %2039 = vmatmul.mubr.msk.f32.vlgmr.msra.gmra.mrb[0].mxu0 %vm217_vm1, %v2038_v11  ;;  %v2548_v24 = vunpack.i.h.bf16 %v2546_v20  ;;  %v2547_v25 = vunpack.i.l.bf16 %v2546_v20  ;;  %v2044_v15 = vld [vmem:[%s2907_s1 + $0x38] sm:$0xff] }
  0xc9   : > { %v1374_v22 = vsel %vm1373_vm7, %v2542_v19, %v2532_v9  ;;  %v1376_v23 = vsel %vm1373_vm7, %v2543_v18, %v2537_v13  ;;  %2281 = vmatprep.subr.bf16.mxu0 %v2280_v21  ;;  %2291 = vmatprep.subr.bf16.mxu1 %v2628_v0 }
  0xca   : > { %v2282_v26 = vpack.c.bf16 %v1376_v23, %v1374_v22  ;;  %v2551_v27 = vpop.permute.xlu0 %2550  ;;  %1461 = vmatprep.mubr.f32.mxu0 %v2630_v1  ;;  %v1379_v34 = vsel %vm1373_vm7, %v2547_v25, %v2548_v24 }
  0xcb   : > { %v2553_v28 = vunpack.i.h.bf16 %v2551_v27  ;;  %v2552_v29 = vunpack.i.l.bf16 %v2551_v27  ;;  %v2556_v30 = vpop.permute.xlu1 %2555 }
  0xcc   : > { %v2558_v31 = vunpack.i.h.bf16 %v2556_v30  ;;  %v2557_v32 = vunpack.i.l.bf16 %v2556_v30  ;;  %2283 = vmatpush1.bf16.msra.mxu0 %v2282_v26 }
  0xcd   : > { %v2292_v33 = vpack.c.bf16 %v2553_v28, %v2548_v24  ;;  %v1381_v35 = vsel %vm1373_vm7, %v2552_v29, %v2553_v28 }
  0xce   : > { %v1380_v36 = vsel %vm1373_vm7, %v2558_v31, %v2552_v29  ;;  %v1378_v37 = vsel %vm1373_vm7, %v2557_v32, %v2547_v25  ;;  %v2561_v38 = vpop.permute.xlu0 %2560  ;;  %v2284_v39 = vpack.c.bf16 %v1381_v35, %v1379_v34 }
  0xcf   : > { %v2286_v40 = vpack.c.bf16 %v1380_v36, %v1378_v37  ;;  %v2563_v41 = vunpack.i.h.bf16 %v2561_v38  ;;  %v2562_v42 = vunpack.i.l.bf16 %v2561_v38  ;;  %v2566_v43 = vpop.permute.xlu1 %2565  ;;  %2293 = vmatpush3.bf16.msra.mxu1 %v2292_v33 }
  0xd0   : > { %v2568_v45 = vunpack.i.h.bf16 %v2566_v43  ;;  %v2567_v46 = vunpack.i.l.bf16 %v2566_v43  ;;  %2285 = vmatprep.subr.bf16.mxu0 %v2284_v39  ;;  %2302 = vmatprep.subr.bf16.mxu1 %v2628_v0  ;;  %v1940_v43 = vlaneseq }
  0xd1   : > { %2287 = vmatpush1.bf16.msra.mxu0 %v2286_v40  ;;  %v1569_v47 = vsel %vm1567_vm8, %v2562_v42, %v2563_v41 }
  0xd2   : > { %v2303_v48 = vpack.c.bf16 %v2568_v45, %v2563_v41  ;;  %v2571_v49 = vpop.permute.xlu0 %2570  ;;  %2172 = vmatmul.mubr.msk.f32.vlgmr.msra.gmra.mrb[0].mxu1 %vm217_vm1, %v2041_v44  ;;  %v1571_v50 = vsel %vm1567_vm8, %v2567_v46, %v2568_v45 }
  0xd3   : > { %v2573_v51 = vunpack.i.h.bf16 %v2571_v49  ;;  %v2572_v52 = vunpack.i.l.bf16 %v2571_v49  ;;  %v2576_v53 = vpop.permute.xlu1 %2575  ;;  %v2294_v54 = vpack.c.bf16 %v1571_v50, %v1569_v47  ;;  %2182 = vmatprep.mubr.msk.f32.mxu1 %vm2629_vm0, %v2630_v1  ;;  %v1938_v47 = vld [vmem:[%s2909_s3] sm:$0x7] }
  0xd4   : > { %2304 = vmatpush3.bf16.msra.mxu1 %v2303_v48  ;;  %2042 = vmatmul.mubr.msk.f32.vlgmr.msra.gmra.mrb[0].mxu0 %vm217_vm1, %v2041_v44  ;;  %v2578_v57 = vunpack.i.h.bf16 %v2576_v53  ;;  %v2577_v58 = vunpack.i.l.bf16 %v2576_v53  ;;  %v1941_v44 = vshrl.u32 %v1940_v43, 7 }
  0xd5   : > { %v1568_v55 = vsel %vm1567_vm8, %v2572_v52, %v2562_v42  ;;  %v1570_v56 = vsel %vm1567_vm8, %v2573_v51, %v2567_v46  ;;  %2295 = vmatprep.subr.bf16.mxu0 %v2294_v54  ;;  %2305 = vmatprep.subr.bf16.mxu1 %v2628_v0 }
  0xd6   : > { %v2296_v59 = vpack.c.bf16 %v1570_v56, %v1568_v55  ;;  %v2581_v60 = vpop.permute.xlu0 %2580  ;;  %1655 = vmatprep.mubr.f32.mxu0 %v2630_v1  ;;  %v1573_v5 = vsel %vm1567_vm8, %v2577_v58, %v2578_v57  ;;  %v1950_v46 = vsub.s32 2, %v1941_v44  ;;  %v1942_v49 = vsub.s32 0, %v1941_v44 }
  0xd7   : > { %v2583_v61 = vunpack.i.h.bf16 %v2581_v60  ;;  %v2582_v62 = vunpack.i.l.bf16 %v2581_v60  ;;  %v2586_v63 = vpop.permute.xlu1 %2585  ;;  %v1946_v52 = vsub.s32 1, %v1941_v44 }
  0xd8   : > { %v2588_v2 = vunpack.i.h.bf16 %v2586_v63  ;;  %v2587_v3 = vunpack.i.l.bf16 %v2586_v63  ;;  %2297 = vmatpush1.bf16.msra.mxu0 %v2296_v59  ;;  %v1951_v53 = vrot.slane %v1938_v47, %v1950_v46 }
  0xd9   : > { %v2306_v4 = vpack.c.bf16 %v2583_v61, %v2578_v57  ;;  %v1575_v6 = vsel %vm1567_vm8, %v2582_v62, %v2583_v61 }
  0xda   : > { %v1574_v7 = vsel %vm1567_vm8, %v2588_v2, %v2582_v62  ;;  %v1572_v8 = vsel %vm1567_vm8, %v2587_v3, %v2577_v58  ;;  %v2591_v9 = vpop.permute.xlu0 %2590  ;;  %v2298_v10 = vpack.c.bf16 %v1575_v6, %v1573_v5  ;;  %v1943_v58 = vrot.slane %v1938_v47, %v1942_v49 }
  0xdb   : > { %v2300_v11 = vpack.c.bf16 %v1574_v7, %v1572_v8  ;;  %v2593_v12 = vunpack.i.h.bf16 %v2591_v9  ;;  %v2592_v13 = vunpack.i.l.bf16 %v2591_v9  ;;  %v2596_v14 = vpop.permute.xlu1 %2595  ;;  %2307 = vmatpush3.bf16.msra.mxu1 %v2306_v4  ;;  %v1947_v62 = vrot.slane %v1938_v47, %v1946_v52 }
  0xdc   : > { %v2598_v16 = vunpack.i.h.bf16 %v2596_v14  ;;  %v2597_v17 = vunpack.i.l.bf16 %v2596_v14  ;;  %2299 = vmatprep.subr.bf16.mxu0 %v2298_v10  ;;  %2316 = vmatprep.subr.bf16.mxu1 %v2628_v0 }
  0xdd   : > { %2301 = vmatpush1.bf16.msra.mxu0 %v2300_v11  ;;  %v1763_v18 = vsel %vm1761_vm9, %v2592_v13, %v2593_v12 }
  0xde   : > { %v2317_v19 = vpack.c.bf16 %v2598_v16, %v2593_v12  ;;  %v2601_v20 = vpop.permute.xlu0 %2600  ;;  %2183 = vmatmul.mubr.msk.f32.vlgmr.msra.gmra.mrb[0].mxu1 %vm217_vm1, %v2044_v15  ;;  %v1765_v21 = vsel %vm1761_vm9, %v2597_v17, %v2598_v16 }
  0xdf   : > { %v2603_v22 = vunpack.i.h.bf16 %v2601_v20  ;;  %v2602_v23 = vunpack.i.l.bf16 %v2601_v20  ;;  %v2606_v24 = vpop.permute.xlu1 %2605  ;;  %v2308_v25 = vpack.c.bf16 %v1765_v21, %v1763_v18  ;;  %2193 = vmatprep.mubr.msk.f32.mxu1 %vm2629_vm0, %v2630_v1 }
  0xe0   : > { %2318 = vmatpush3.bf16.msra.mxu1 %v2317_v19  ;;  %2045 = vmatmul.mubr.msk.f32.vlgmr.msra.gmra.mrb[0].mxu0 %vm217_vm1, %v2044_v15  ;;  %v2608_v28 = vunpack.i.h.bf16 %v2606_v24  ;;  %v2607_v29 = vunpack.i.l.bf16 %v2606_v24 }
  0xe1   : > { %v1762_v26 = vsel %vm1761_vm9, %v2602_v23, %v2592_v13  ;;  %v1764_v27 = vsel %vm1761_vm9, %v2603_v22, %v2597_v17  ;;  %2309 = vmatprep.subr.bf16.mxu0 %v2308_v25  ;;  %2319 = vmatprep.subr.bf16.mxu1 %v2628_v0 }
  0xe2   : > { %v2310_v30 = vpack.c.bf16 %v1764_v27, %v1762_v26  ;;  %v2611_v31 = vpop.permute.xlu0 %2610  ;;  %1849 = vmatprep.mubr.f32.mxu0 %v2630_v1  ;;  %v1767_v38 = vsel %vm1761_vm9, %v2607_v29, %v2608_v28  ;;  %v2047_v1 = vld [vmem:[%s2907_s1 + $0x40] sm:$0xff] }
  0xe3   : > { %v2613_v32 = vunpack.i.h.bf16 %v2611_v31  ;;  %v2612_v33 = vunpack.i.l.bf16 %v2611_v31  ;;  %v2616_v34 = vpop.permute.xlu1 %2615 }
  0xe4   : > { %v2618_v35 = vunpack.i.h.bf16 %v2616_v34  ;;  %v2617_v36 = vunpack.i.l.bf16 %v2616_v34  ;;  %2311 = vmatpush1.bf16.msra.mxu0 %v2310_v30 }
  0xe5   : > { %v2320_v37 = vpack.c.bf16 %v2613_v32, %v2608_v28  ;;  %v1769_v39 = vsel %vm1761_vm9, %v2612_v33, %v2613_v32 }
  0xe6   : > { %v1768_v40 = vsel %vm1761_vm9, %v2618_v35, %v2612_v33  ;;  %v1766_v41 = vsel %vm1761_vm9, %v2617_v36, %v2607_v29  ;;  %v2312_v0 = vpack.c.bf16 %v1769_v39, %v1767_v38 }
  0xe7   : > { %v2314_v42 = vpack.c.bf16 %v1768_v40, %v1766_v41  ;;  %2321 = vmatpush3.bf16.msra.mxu1 %v2320_v37 }
  0xe8   : > { %2313 = vmatprep.subr.bf16.mxu0 %v2312_v0 }
  0xe9   : > { %2315 = vmatpush1.bf16.msra.mxu0 %v2314_v42 }
  0xea   : > { %2194 = vmatmul.mubr.msk.f32.vlgmr.msra.gmra.mrb[0].mxu1 %vm217_vm1, %v2047_v1 }
  0xec   : > { %2048 = vmatmul.mubr.msk.f32.vlgmr.msra.gmra.mrb[0].mxu0 %vm217_vm1, %v2047_v1 }
  0xf3   : > { %v202_v45 = vpop.permute.xlu0 %201 }
 0x1bd   : > { %v1922_v48 = vpop.f32.mrb[0].mxu1 }
 0x1be   : > { %v2324_v50 = vadd.f32 %v1922_v48, %v202_v45  ;;  %v2195_v51 = vpop.f32.mrb[1].mxu1 }
 0x1bf   : > { %v1851_v54 = vpop.f32.mrb[0].mxu0 }
 0x1c0   : > { %vm1931_vm10 = vcmp.ge.f32.partialorder %v2324_v50, 0.0  ;;  %v1934_v55 = vmul.f32 0.2, %v2324_v50  ;;  %v2322_v56 = vadd.f32 %v1851_v54, %v202_v45  ;;  %v1853_v57 = vpop.f32.mrb[1].mxu0 }
 0x1c1   : > { %v2323_v59 = vadd.f32 %v1853_v57, %v202_v45 }
 0x1c2   : > { %v1937_v60 = vsel %vm1931_vm10, %v2324_v50, %v1934_v55  ;;  %vm1929_vm12 = vcmp.ge.f32.partialorder %v2322_v56, 0.0  ;;  %v1932_v61 = vmul.f32 0.2, %v2322_v56 }
 0x1c3   : > { %v1957_v63 = vmul.f32 %v1951_v53, %v1937_v60  ;;  %vm1930_vm13 = vcmp.ge.f32.partialorder %v2323_v59, 0.0  ;;  %v1933_v2 = vmul.f32 0.2, %v2323_v59 }
 0x1c4   : > { %v1935_v3 = vsel %vm1929_vm12, %v2322_v56, %v1932_v61 }
 0x1c5   : > { %v1955_v4 = vmul.f32 %v1943_v58, %v1935_v3  ;;  %1961 = vst.msk [vmem:[%s197_s30 + $0x10] sm:$0xff] %vm1960_vm11, %v1957_v63  ;;  %v1936_v5 = vsel %vm1930_vm13, %v2323_v59, %v1933_v2 }
 0x1c6   : > { %v1956_v6 = vmul.f32 %v1947_v62, %v1936_v5 }
 0x1c7   : > { %1958 = vst [vmem:[%s197_s30] sm:$0xff] %v1955_v4 }
 0x1c8   : > { %1959 = vst [vmem:[%s197_s30 + $0x8] sm:$0xff] %v1956_v6 }
 0x1c9 PF: > { %s14_s15 = sadd.s32 1, %s2626_s15  }
 0x1ca   : > { %p11_p4 = scmp.ge.s32.totalorder %s14_s15, 4  }
 0x1cc   :  { %13 = sbr.rel (!%p11_p4) target bundleno = 1 (0x1), region = 74 }

// kernel: _lambda_.17
= control target key start
LH: loop header
LB: loop body
LE: loop exit
PB: predicated region body
PF: predicated region fallthrough
CT: control target
= control target key end

     0   :  { %s3868_s15 = smov 0   ;;  %s4443_s0 = inlined_call_operand.vmem [shape: f32[2,48,362], index: 0, kind: input, shape index: {}]   ;;  %s4444_s1 = inlined_call_operand.vmem [shape: f32[9,32,48], index: 1, kind: input, shape index: {}]   ;;  %s4445_s2 = inlined_call_operand.vmem [shape: f32[32,1], index: 2, kind: input, shape index: {}]   ;;  %s4446_s3 = inlined_call_operand.vmem [shape: f32[1,324], index: 3, kind: input, shape index: {}]   ;;  %s4447_s4 = inlined_call_operand.vmem [shape: f32[2,32,324], index: 4, kind: output, shape index: {}]  }
   0x1 LB: > { %s2754_s16 = sadd.s32 4294967295, %s3831_s15   ;;  %p2758_p0 = scmp.ge.s32.totalorder %s3831_s15, 1  ;;  %s3831_s15 = sphi %s3868_s15, %s14_s15  }
   0x2   : > { %p162_p1 = scmp.lt.s32.totalorder %s3831_s15, 3 }
   0x4   : > { %p163_p2 = pnand %p2758_p0, %p162_p1 }
   0x5   : > { %p188_p3 = scmp.lt.s32.totalorder (!%p163_p2), %s2754_s16, 1  ;;  %v3833_v0 = vmov (!%p163_p2), 0.0   ;;  %s3834_s21 = smov (!%p163_p2), 127   ;;  %v240_v35 = vld [vmem:[%s4444_s1] sm:$0xff] (!%p163_p2)  ;;  %vm244_vm0 = vcmask (!%p163_p2), 392192   ;;  %v241_v37 = vld [vmem:[%s4444_s1 + $0x8] sm:$0xff] (!%p163_p2) }
   0x6   : > { %166 = sbr.rel (%p163_p2) target bundleno = 517 (0x205), region = 36  ;;  %321 = vmatprep.mubr.f32.mxu1 (!%p163_p2), %v3833_v0  ;;  %609 = vmatprep.mubr.f32.mxu0 (!%p163_p2), %v3833_v0  ;;  %s3835_s22 = smov (!%p163_p2), 126   ;;  %v242_v39 = vld [vmem:[%s4444_s1 + $0x10] sm:$0xff] (!%p163_p2)  ;;  %v243_v40 = vld [vmem:[%s4444_s1 + $0x18] sm:$0xff] (!%p163_p2)  ;;  %v3978_v41 = vld [vmem:[%s4444_s1 + $0x20] sm:$0xff] (!%p163_p2)  ;;  %vm502_vm1 = vcmask (!%p163_p2), 1039360  }
   0x7   : > { %s3836_s5 = smov (!%p163_p2), 110   ;;  %s3837_s8 = smov (!%p163_p2), 109   ;;  %v3841_v48 = vmov (!%p163_p2), 0   ;;  %vm772_vm2 = vcmask (!%p163_p2), 1031168   ;;  %vm1042_vm3 = vcmask (!%p163_p2), 900096   ;;  %vm1312_vm4 = vcmask (!%p163_p2), 891904  }
   0x8   : > { %s3838_s9 = smov (!%p163_p2), 108   ;;  %s3839_s10 = smov (!%p163_p2), 92   ;;  %3823 = vset.pattern.permute.xlu0 (!%p163_p2), %v3841_v48  ;;  %3824 = vset.pattern.permute.xlu1 (!%p163_p2), %v3841_v48  ;;  %vm1582_vm5 = vcmask (!%p163_p2), 883712   ;;  %vm1852_vm6 = vcmask (!%p163_p2), 752640   ;;  %vm2122_vm7 = vcmask (!%p163_p2), 744448   ;;  %vm2392_vm8 = vcmask (!%p163_p2), 736256  }
   0x9   : > { %s3840_s11 = smov (!%p163_p2), 91   ;;  %s3842_s12 = smov (!%p163_p2), 90   ;;  %vm2688_vm12 = vcmask (!%p163_p2), 556032  }
   0xd   : > { %s4449_s16 = smov (!%p188_p3, %s2754_s16), 1 }
   0xe   : > { %s3443_s17 = smul.u32 144, %s4449_s16 }
   0xf   : > { %s3444_s13 = smul.u32 96, %s4449_s16 }
  0x10   : > { %s3884_s20 = scalar_lea.vmem %s4443_s0, %s3443_s17 }
  0x11   : > { %v223_v1 = vld [vmem:[%s3884_s20 + $0x8] sm:$0xff]  ;;  %v224_v2 = vld [vmem:[%s3884_s20 + $0x10] sm:$0xff]  ;;  %v222_v3 = vld [vmem:[%s3884_s20] sm:$0xff]  ;;  %s4409_s17 = scalar_lea.vmem %s4447_s4, %s3444_s13 }
  0x12   : > { %v3889_v4 = vpack.i.bf16 %v224_v2, %v223_v1  ;;  %v225_v5 = vld [vmem:[%s3884_s20 + $0x18] sm:$0xff]  ;;  %v226_v6 = vld [vmem:[%s3884_s20 + $0x20] sm:$0xff]  ;;  %v227_v7 = vld [vmem:[%s3884_s20 + $0x28] sm:$0xff] }
  0x13   : > { %v3894_v8 = vpack.i.bf16 %v225_v5, %v222_v3  ;;  %v229_v9 = vld [vmem:[%s3884_s20 + $0x38] sm:$0xff]  ;;  %v230_v10 = vld [vmem:[%s3884_s20 + $0x40] sm:$0xff]  ;;  %v3900_v11 = vpack.i.bf16 %v227_v7, %v226_v6  ;;  %v232_v13 = vld [vmem:[%s3884_s20 + $0x50] sm:$0xff]  ;;  %v3119_v28 = vpack.c.bf16 %v226_v6, %v223_v1  ;;  %v3121_v29 = vpack.c.bf16 %v225_v5, %v222_v3 }
  0x14   : > { %3464 = vrot.lane.b32.xlu0 %v3889_v4, %s3834_s21  ;;  %v3904_v12 = vpack.i.bf16 %v230_v10, %v229_v9  ;;  %v233_v14 = vld [vmem:[%s3884_s20 + $0x58] sm:$0xff]  ;;  %v228_v15 = vld [vmem:[%s3884_s20 + $0x30] sm:$0xff]  ;;  %v231_v16 = vld [vmem:[%s3884_s20 + $0x48] sm:$0xff]  ;;  %v3123_v30 = vpack.c.bf16 %v232_v13, %v229_v9  ;;  %v3131_v34 = vpack.c.bf16 %v227_v7, %v224_v2 }
  0x15   : > { %3474 = vrot.lane.b32.xlu1 %v3894_v8, %s3834_s21  ;;  %v235_v17 = vld [vmem:[%s3884_s20 + $0x68] sm:$0xff]  ;;  %v236_v18 = vld [vmem:[%s3884_s20 + $0x70] sm:$0xff]  ;;  %v238_v19 = vld [vmem:[%s3884_s20 + $0x80] sm:$0xff]  ;;  %v3916_v21 = vpack.i.bf16 %v233_v14, %v232_v13  ;;  %v3920_v22 = vpack.i.bf16 %v231_v16, %v228_v15  ;;  %3120 = vmatprep.subr.bf16.mxu1 %v3119_v28  ;;  %v3125_v31 = vpack.c.bf16 %v231_v16, %v228_v15 }
  0x16   : > { %v239_v20 = vld [vmem:[%s3884_s20 + $0x88] sm:$0xff]  ;;  %v3922_v23 = vpack.i.bf16 %v236_v18, %v235_v17  ;;  %v234_v25 = vld [vmem:[%s3884_s20 + $0x60] sm:$0xff]  ;;  %v237_v26 = vld [vmem:[%s3884_s20 + $0x78] sm:$0xff]  ;;  %3122 = vmatpush1.bf16.msra.mxu1 %v3121_v29  ;;  %v3127_v32 = vpack.c.bf16 %v238_v19, %v235_v17  ;;  %v3135_v36 = vpack.c.bf16 %v233_v14, %v230_v10 }
  0x17   : > { %v3924_v24 = vpack.i.bf16 %v239_v20, %v238_v19  ;;  %v3932_v27 = vpack.i.bf16 %v237_v26, %v234_v25  ;;  %3124 = vmatprep.subr.bf16.mxu1 %v3123_v30  ;;  %v3129_v33 = vpack.c.bf16 %v237_v26, %v234_v25  ;;  %v3139_v38 = vpack.c.bf16 %v239_v20, %v236_v18 }
  0x18   : > { %3469 = vrot.lane.b32.xlu0 %v3900_v11, %s3834_s21 }
  0x19   : > { %3479 = vrot.lane.b32.xlu1 %v3904_v12, %s3834_s21 }
  0x1a   : > { %3126 = vmatpush1.bf16.msra.mxu1 %v3125_v31 }
  0x1b   : > { %3128 = vmatprep.subr.bf16.mxu1 %v3127_v32 }
  0x1c   : > { %3484 = vrot.lane.b32.xlu0 %v3916_v21, %s3834_s21 }
  0x1d   : > { %3489 = vrot.lane.b32.xlu1 %v3920_v22, %s3834_s21 }
  0x1e   : > { %3130 = vmatpush1.bf16.msra.mxu1 %v3129_v33 }
  0x1f   : > { %3132 = vmatprep.subr.bf16.mxu1 %v3131_v34 }
  0x20   : > { %3494 = vrot.lane.b32.xlu0 %v3922_v23, %s3834_s21 }
  0x21   : > { %3499 = vrot.lane.b32.xlu1 %v3924_v24, %s3834_s21  ;;  %2761 = vmatmul.mubr.msk.f32.vlgmr.msra.gmra.mrb[0].mxu1 %vm244_vm0, %v240_v35 }
  0x22   : > { %327 = vmatprep.mubr.f32.mxu1 %v3833_v0  ;;  %3134 = vmatpush3.bf16.msra.mxu1 %v3131_v34 }
  0x23   : > { %3136 = vmatprep.subr.bf16.mxu1 %v3135_v36 }
  0x24   : > { %3504 = vrot.lane.b32.xlu0 %v3932_v27, %s3834_s21 }
  0x25   : > { %3509 = vrot.lane.b32.xlu1 %v3889_v4, %s3835_s22  ;;  %2762 = vmatmul.mubr.msk.f32.gmra.mrb[2].mxu1 %vm244_vm0, %v241_v37 }
  0x26   : > { %333 = vmatprep.mubr.f32.mxu1 %v3833_v0  ;;  %3138 = vmatpush3.bf16.msra.mxu1 %v3135_v36 }
  0x27   : > { %3140 = vmatprep.subr.bf16.mxu1 %v3139_v38 }
  0x28   : > { %3514 = vrot.lane.b32.xlu0 %v3900_v11, %s3835_s22 }
  0x29   : > { %3519 = vrot.lane.b32.xlu1 %v3894_v8, %s3835_s22  ;;  %2763 = vmatmul.mubr.msk.f32.gmra.mrb[4].mxu1 %vm244_vm0, %v242_v39 }
  0x2a   : > { %339 = vmatprep.mubr.f32.mxu1 %v3833_v0  ;;  %3142 = vmatpush3.bf16.msra.mxu1 %v3139_v38  ;;  %v2770_v38 = vld [vmem:[%s4444_s1 + $0x28] sm:$0xff] }
  0x2c   : > { %3524 = vrot.lane.b32.xlu0 %v3904_v12, %s3835_s22 }
  0x2d   : > { %3529 = vrot.lane.b32.xlu1 %v3916_v21, %s3835_s22  ;;  %2764 = vmatmul.mubr.msk.f32.gmra.mrb[6].mxu1 %vm244_vm0, %v243_v40 }
  0x2e   : > { %2969 = vmatprep.mubr.msk.f32.mxu1 %vm244_vm0, %v240_v35 }
  0x30   : > { %3534 = vrot.lane.b32.xlu0 %v3920_v22, %s3835_s22 }
  0x31   : > { %3539 = vrot.lane.b32.xlu1 %v3922_v23, %s3835_s22  ;;  %2970 = vmatmul.mubr.msk.f32.vlgmr.msra.gmra.mrb[8].mxu1 %vm244_vm0, %v241_v37 }
  0x32   : > { %2972 = vmatprep.mubr.msk.f32.mxu1 %vm244_vm0, %v242_v39 }
  0x34   : > { %3544 = vrot.lane.b32.xlu0 %v3924_v24, %s3835_s22 }
  0x35   : > { %3549 = vrot.lane.b32.xlu1 %v3932_v27, %s3835_s22  ;;  %2973 = vmatmul.mubr.msk.f32.gmra.mrb[10].mxu1 %vm244_vm0, %v243_v40 }
  0x36   : > { %2987 = vmatprep.mubr.msk.f32.mxu1 %vm244_vm0, %v3978_v41 }
  0x38   : > { %3554 = vrot.lane.b32.xlu0 %v3889_v4, %s3836_s5 }
  0x39   : > { %3559 = vrot.lane.b32.xlu1 %v3900_v11, %s3836_s5 }
  0x3c   : > { %3564 = vrot.lane.b32.xlu0 %v3894_v8, %s3836_s5 }
  0x3d   : > { %3569 = vrot.lane.b32.xlu1 %v3904_v12, %s3836_s5 }
  0x40   : > { %3574 = vrot.lane.b32.xlu0 %v3916_v21, %s3836_s5 }
  0x41   : > { %3579 = vrot.lane.b32.xlu1 %v3920_v22, %s3836_s5 }
  0x44   : > { %3584 = vrot.lane.b32.xlu0 %v3922_v23, %s3836_s5 }
  0x45   : > { %3589 = vrot.lane.b32.xlu1 %v3924_v24, %s3836_s5 }
  0x48   : > { %3594 = vrot.lane.b32.xlu0 %v3932_v27, %s3836_s5 }
  0x49   : > { %3599 = vrot.lane.b32.xlu1 %v3889_v4, %s3837_s8 }
  0x4c   : > { %3604 = vrot.lane.b32.xlu0 %v3900_v11, %s3837_s8 }
  0x4d   : > { %3609 = vrot.lane.b32.xlu1 %v3894_v8, %s3837_s8 }
  0x50   : > { %3614 = vrot.lane.b32.xlu0 %v3904_v12, %s3837_s8 }
  0x51   : > { %3619 = vrot.lane.b32.xlu1 %v3916_v21, %s3837_s8 }
  0x54   : > { %3624 = vrot.lane.b32.xlu0 %v3920_v22, %s3837_s8 }
  0x55   : > { %3629 = vrot.lane.b32.xlu1 %v3922_v23, %s3837_s8 }
  0x58   : > { %3634 = vrot.lane.b32.xlu0 %v3924_v24, %s3837_s8 }
  0x59   : > { %3639 = vrot.lane.b32.xlu1 %v3932_v27, %s3837_s8 }
  0x5c   : > { %3644 = vrot.lane.b32.xlu0 %v3889_v4, %s3838_s9 }
  0x5d   : > { %3649 = vrot.lane.b32.xlu1 %v3900_v11, %s3838_s9 }
  0x60   : > { %3654 = vrot.lane.b32.xlu0 %v3894_v8, %s3838_s9 }
  0x61   : > { %3659 = vrot.lane.b32.xlu1 %v3904_v12, %s3838_s9 }
  0x64   : > { %3664 = vrot.lane.b32.xlu0 %v3916_v21, %s3838_s9 }
  0x65   : > { %3669 = vrot.lane.b32.xlu1 %v3920_v22, %s3838_s9 }
  0x68   : > { %3674 = vrot.lane.b32.xlu0 %v3922_v23, %s3838_s9 }
  0x69   : > { %3679 = vrot.lane.b32.xlu1 %v3924_v24, %s3838_s9 }
  0x6c   : > { %3684 = vrot.lane.b32.xlu0 %v3932_v27, %s3838_s9 }
  0x6d   : > { %3689 = vrot.lane.b32.xlu1 %v3889_v4, %s3839_s10 }
  0x70   : > { %3694 = vrot.lane.b32.xlu0 %v3900_v11, %s3839_s10 }
  0x71   : > { %3699 = vrot.lane.b32.xlu1 %v3894_v8, %s3839_s10 }
  0x74   : > { %3704 = vrot.lane.b32.xlu0 %v3904_v12, %s3839_s10 }
  0x75   : > { %3709 = vrot.lane.b32.xlu1 %v3916_v21, %s3839_s10 }
  0x78   : > { %3714 = vrot.lane.b32.xlu0 %v3920_v22, %s3839_s10 }
  0x79   : > { %3719 = vrot.lane.b32.xlu1 %v3922_v23, %s3839_s10 }
  0x7c   : > { %3724 = vrot.lane.b32.xlu0 %v3924_v24, %s3839_s10 }
  0x7d   : > { %3729 = vrot.lane.b32.xlu1 %v3932_v27, %s3839_s10 }
  0x80   : > { %3734 = vrot.lane.b32.xlu0 %v3889_v4, %s3840_s11 }
  0x81   : > { %3739 = vrot.lane.b32.xlu1 %v3900_v11, %s3840_s11 }
  0x84   : > { %3744 = vrot.lane.b32.xlu0 %v3894_v8, %s3840_s11 }
  0x85   : > { %3749 = vrot.lane.b32.xlu1 %v3904_v12, %s3840_s11 }
  0x86   : > { %v3465_v42 = vpop.permute.xlu0 %3464 }
  0x87   : > { %v3475_v43 = vpop.permute.xlu1 %3474  ;;  %v3467_v44 = vunpack.i.h.bf16 %v3465_v42  ;;  %v3466_v45 = vunpack.i.l.bf16 %v3465_v42 }
  0x88   : > { %v3476_v46 = vunpack.i.l.bf16 %v3475_v43  ;;  %3754 = vrot.lane.b32.xlu0 %v3916_v21, %s3840_s11  ;;  %v3477_v49 = vunpack.i.h.bf16 %v3475_v43 }
  0x89   : > { %3759 = vrot.lane.b32.xlu1 %v3920_v22, %s3840_s11  ;;  %v504_v54 = vsel %vm502_vm1, %v3466_v45, %v3467_v44 }
  0x8a   : > { %v3470_v47 = vpop.permute.xlu0 %3469  ;;  %v503_v55 = vsel %vm502_vm1, %v3476_v46, %v3466_v45 }
  0x8b   : > { %v3472_v50 = vunpack.i.h.bf16 %v3470_v47  ;;  %v3471_v51 = vunpack.i.l.bf16 %v3470_v47  ;;  %v3480_v52 = vpop.permute.xlu1 %3479 }
  0x8c   : > { %v3482_v53 = vunpack.i.h.bf16 %v3480_v52  ;;  %3764 = vrot.lane.b32.xlu0 %v3922_v23, %s3840_s11  ;;  %v3481_v57 = vunpack.i.l.bf16 %v3480_v52 }
  0x8d   : > { %v3155_v56 = vpack.c.bf16 %v3472_v50, %v3467_v44  ;;  %3769 = vrot.lane.b32.xlu1 %v3924_v24, %s3840_s11  ;;  %v506_v58 = vsel %vm502_vm1, %v3471_v51, %v3472_v50  ;;  %v505_v59 = vsel %vm502_vm1, %v3477_v49, %v3471_v51 }
  0x8e   : > { %v3485_v60 = vpop.permute.xlu0 %3484  ;;  %v3143_v61 = vpack.c.bf16 %v506_v58, %v504_v54  ;;  %v3145_v62 = vpack.c.bf16 %v505_v59, %v503_v55  ;;  %v508_v7 = vsel %vm502_vm1, %v3481_v57, %v3482_v53  ;;  %v2772_v55 = vld [vmem:[%s4444_s1 + $0x38] sm:$0xff] }
  0x8f   : > { %v3487_v63 = vunpack.i.h.bf16 %v3485_v60  ;;  %v3486_v1 = vunpack.i.l.bf16 %v3485_v60  ;;  %v3490_v2 = vpop.permute.xlu1 %3489  ;;  %3156 = vmatprep.subr.bf16.mxu1 %v3155_v56 }
  0x90   : > { %v3492_v3 = vunpack.i.h.bf16 %v3490_v2  ;;  %v3491_v5 = vunpack.i.l.bf16 %v3490_v2  ;;  %3144 = vmatprep.subr.bf16.mxu0 %v3143_v61  ;;  %3774 = vrot.lane.b32.xlu0 %v3932_v27, %s3840_s11 }
  0x91   : > { %v3159_v6 = vpack.c.bf16 %v3487_v63, %v3482_v53  ;;  %3779 = vrot.lane.b32.xlu1 %v3889_v4, %s3842_s12  ;;  %3158 = vmatpush3.bf16.msra.mxu1 %v3155_v56  ;;  %v510_v9 = vsel %vm502_vm1, %v3486_v1, %v3487_v63  ;;  %v199_v63 = vld [vmem:[%s4445_s2 + $0x8] sm:$0xff] }
  0x92   : > { %3146 = vmatpush1.bf16.msra.mxu0 %v3145_v62  ;;  %v3495_v10 = vpop.permute.xlu0 %3494  ;;  %v3147_v13 = vpack.c.bf16 %v510_v9, %v508_v7  ;;  %v507_v14 = vsel %vm502_vm1, %v3491_v5, %v3481_v57  ;;  %v509_v15 = vsel %vm502_vm1, %v3492_v3, %v3486_v1  ;;  %v198_v62 = vld [vmem:[%s4445_s2] sm:$0xff] }
  0x93   : > { %v3497_v16 = vunpack.i.h.bf16 %v3495_v10  ;;  %v3496_v17 = vunpack.i.l.bf16 %v3495_v10  ;;  %v3500_v18 = vpop.permute.xlu1 %3499  ;;  %3160 = vmatprep.subr.bf16.mxu1 %v3159_v6  ;;  %v3149_v19 = vpack.c.bf16 %v509_v15, %v507_v14  ;;  %v201_v14 = vld [vmem:[%s4445_s2 + $0x18] sm:$0xff] }
  0x94   : > { %v3502_v20 = vunpack.i.h.bf16 %v3500_v18  ;;  %v3501_v25 = vunpack.i.l.bf16 %v3500_v18  ;;  %3784 = vrot.lane.b32.xlu0 %v3900_v11, %s3842_s12  ;;  %3148 = vmatprep.subr.bf16.mxu0 %v3147_v13 }
  0x95   : > { %3789 = vrot.lane.b32.xlu1 %v3894_v8, %s3842_s12  ;;  %3162 = vmatpush3.bf16.msra.mxu1 %v3159_v6  ;;  %v512_v4 = vsel %vm502_vm1, %v3496_v17, %v3497_v16 }
  0x96   : > { %v3163_v26 = vpack.c.bf16 %v3502_v20, %v3497_v16  ;;  %3150 = vmatpush1.bf16.msra.mxu0 %v3149_v19  ;;  %v3505_v28 = vpop.permute.xlu0 %3504  ;;  %v514_v29 = vsel %vm502_vm1, %v3501_v25, %v3502_v20 }
  0x97   : > { %v3507_v30 = vunpack.i.h.bf16 %v3505_v28  ;;  %v3506_v31 = vunpack.i.l.bf16 %v3505_v28  ;;  %v3510_v32 = vpop.permute.xlu1 %3509  ;;  %v3151_v33 = vpack.c.bf16 %v514_v29, %v512_v4 }
  0x98   : > { %3164 = vmatprep.subr.bf16.mxu1 %v3163_v26  ;;  %3794 = vrot.lane.b32.xlu0 %v3904_v12, %s3842_s12  ;;  %v3512_v11 = vunpack.i.h.bf16 %v3510_v32  ;;  %v3511_v34 = vunpack.i.l.bf16 %v3510_v32  ;;  %v200_v32 = vld [vmem:[%s4445_s2 + $0x10] sm:$0xff] }
  0x99   : > { %3799 = vrot.lane.b32.xlu1 %v3916_v21, %s3842_s12  ;;  %3152 = vmatprep.subr.bf16.mxu0 %v3151_v33  ;;  %v511_v8 = vsel %vm502_vm1, %v3506_v31, %v3496_v17  ;;  %v513_v35 = vsel %vm502_vm1, %v3507_v30, %v3501_v25  ;;  %v2771_v21 = vld [vmem:[%s4444_s1 + $0x30] sm:$0xff] }
  0x9a   : > { %3166 = vmatpush3.bf16.msra.mxu1 %v3163_v26  ;;  %v3515_v36 = vpop.permute.xlu0 %3514  ;;  %v3153_v37 = vpack.c.bf16 %v513_v35, %v511_v8  ;;  %v774_v45 = vsel %vm772_vm2, %v3511_v34, %v3512_v11 }
  0x9b   : > { %v3517_v39 = vunpack.i.h.bf16 %v3515_v36  ;;  %v3516_v12 = vunpack.i.l.bf16 %v3515_v36  ;;  %v3520_v40 = vpop.permute.xlu1 %3519 }
  0x9c   : > { %v3522_v42 = vunpack.i.h.bf16 %v3520_v40  ;;  %v3521_v43 = vunpack.i.l.bf16 %v3520_v40  ;;  %3804 = vrot.lane.b32.xlu0 %v3920_v22, %s3842_s12  ;;  %3154 = vmatpush1.bf16.msra.mxu0 %v3153_v37 }
  0x9d   : > { %v3179_v44 = vpack.c.bf16 %v3517_v39, %v3512_v11  ;;  %3809 = vrot.lane.b32.xlu1 %v3922_v23, %s3842_s12  ;;  %2988 = vmatmul.mubr.msk.f32.vlgmr.msra.gmra.mrb[8].mxu1 %vm244_vm0, %v2770_v38  ;;  %v776_v46 = vsel %vm772_vm2, %v3516_v12, %v3517_v39 }
  0x9e   : > { %v775_v47 = vsel %vm772_vm2, %v3522_v42, %v3516_v12  ;;  %v773_v48 = vsel %vm772_vm2, %v3521_v43, %v3511_v34  ;;  %v3525_v49 = vpop.permute.xlu0 %3524  ;;  %v3167_v50 = vpack.c.bf16 %v776_v46, %v774_v45  ;;  %2990 = vmatprep.mubr.msk.f32.mxu1 %vm244_vm0, %v2771_v21  ;;  %v2782_v34 = vld [vmem:[%s4444_s1 + $0x48] sm:$0xff]  ;;  %v2783_v46 = vld [vmem:[%s4444_s1 + $0x50] sm:$0xff] }
  0x9f   : > { %v3169_v22 = vpack.c.bf16 %v775_v47, %v773_v48  ;;  %v3527_v51 = vunpack.i.h.bf16 %v3525_v49  ;;  %v3526_v52 = vunpack.i.l.bf16 %v3525_v49  ;;  %v3530_v53 = vpop.permute.xlu1 %3529  ;;  %3180 = vmatprep.subr.bf16.mxu1 %v3179_v44  ;;  %2773 = vmatmul.mubr.msk.f32.vlgmr.msra.gmra.mrb[0].mxu0 %vm244_vm0, %v3978_v41  ;;  %v4130_v47 = vld [vmem:[%s4444_s1 + $0x60] sm:$0xff] }
  0xa0   : > { %v3532_v23 = vunpack.i.h.bf16 %v3530_v53  ;;  %v3531_v54 = vunpack.i.l.bf16 %v3530_v53  ;;  %3814 = vrot.lane.b32.xlu0 %v3924_v24, %s3842_s12  ;;  %3168 = vmatprep.subr.bf16.mxu0 %v3167_v50 }
  0xa1   : > { %3819 = vrot.lane.b32.xlu1 %v3932_v27, %s3842_s12  ;;  %3182 = vmatpush3.bf16.msra.mxu1 %v3179_v44  ;;  %v778_v56 = vsel %vm772_vm2, %v3526_v52, %v3527_v51  ;;  %v2781_v27 = vld [vmem:[%s4444_s1 + $0x40] sm:$0xff] }
  0xa2   : > { %v3183_v57 = vpack.c.bf16 %v3532_v23, %v3527_v51  ;;  %3170 = vmatpush1.bf16.msra.mxu0 %v3169_v22  ;;  %v3535_v58 = vpop.permute.xlu0 %3534  ;;  %v780_v41 = vsel %vm772_vm2, %v3531_v54, %v3532_v23  ;;  %615 = vmatprep.mubr.f32.mxu0 %v3833_v0 }
  0xa3   : > { %v3537_v59 = vunpack.i.h.bf16 %v3535_v58  ;;  %v3536_v24 = vunpack.i.l.bf16 %v3535_v58  ;;  %v3540_v60 = vpop.permute.xlu1 %3539  ;;  %v3171_v61 = vpack.c.bf16 %v780_v41, %v778_v56  ;;  %2774 = vmatmul.mubr.msk.f32.gmra.mrb[2].mxu0 %vm244_vm0, %v2770_v38  ;;  %2991 = vmatmul.mubr.msk.f32.gmra.mrb[10].mxu1 %vm244_vm0, %v2772_v55 }
  0xa4   : > { %3184 = vmatprep.subr.bf16.mxu1 %v3183_v57  ;;  %621 = vmatprep.mubr.f32.mxu0 %v3833_v0  ;;  %v3542_v3 = vunpack.i.h.bf16 %v3540_v60  ;;  %v3541_v5 = vunpack.i.l.bf16 %v3540_v60 }
  0xa5   : > { %v777_v1 = vsel %vm772_vm2, %v3536_v24, %v3526_v52  ;;  %v779_v2 = vsel %vm772_vm2, %v3537_v59, %v3531_v54  ;;  %3172 = vmatprep.subr.bf16.mxu0 %v3171_v61  ;;  %3186 = vmatpush3.bf16.msra.mxu1 %v3183_v57 }
  0xa6   : > { %v3173_v6 = vpack.c.bf16 %v779_v2, %v777_v1  ;;  %v3545_v7 = vpop.permute.xlu0 %3544  ;;  %3005 = vmatprep.mubr.msk.f32.mxu1 %vm244_vm0, %v2781_v27  ;;  %204 = vperm.xlu0 %3823, %v198_v62   ;;  %v782_v18 = vsel %vm772_vm2, %v3541_v5, %v3542_v3 }
  0xa7   : > { %v3547_v9 = vunpack.i.h.bf16 %v3545_v7  ;;  %v3546_v10 = vunpack.i.l.bf16 %v3545_v7  ;;  %v3550_v13 = vpop.permute.xlu1 %3549  ;;  %2775 = vmatmul.mubr.msk.f32.gmra.mrb[4].mxu0 %vm244_vm0, %v2771_v21  ;;  %209 = vperm.xlu1 %3824, %v199_v63   ;;  %v2784_v21 = vld [vmem:[%s4444_s1 + $0x58] sm:$0xff] }
  0xa8   : > { %v3552_v15 = vunpack.i.h.bf16 %v3550_v13  ;;  %v3551_v16 = vunpack.i.l.bf16 %v3550_v13  ;;  %3174 = vmatpush1.bf16.msra.mxu0 %v3173_v6  ;;  %627 = vmatprep.mubr.f32.mxu0 %v3833_v0 }
  0xa9   : > { %v3187_v17 = vpack.c.bf16 %v3547_v9, %v3542_v3  ;;  %v784_v19 = vsel %vm772_vm2, %v3546_v10, %v3547_v9 }
  0xaa   : > { %v783_v20 = vsel %vm772_vm2, %v3552_v15, %v3546_v10  ;;  %v781_v25 = vsel %vm772_vm2, %v3551_v16, %v3541_v5  ;;  %v3555_v4 = vpop.permute.xlu0 %3554  ;;  %v3175_v26 = vpack.c.bf16 %v784_v19, %v782_v18  ;;  %219 = vperm.xlu0 %3823, %v201_v14   ;;  %v2794_v16 = vld [vmem:[%s4444_s1 + $0x68] sm:$0xff]  ;;  %v2795_v19 = vld [vmem:[%s4444_s1 + $0x70] sm:$0xff] }
  0xab   : > { %v3177_v28 = vpack.c.bf16 %v783_v20, %v781_v25  ;;  %v3557_v29 = vunpack.i.h.bf16 %v3555_v4  ;;  %v3556_v30 = vunpack.i.l.bf16 %v3555_v4  ;;  %v3560_v31 = vpop.permute.xlu1 %3559  ;;  %3188 = vmatprep.subr.bf16.mxu1 %v3187_v17  ;;  %2776 = vmatmul.mubr.msk.f32.gmra.mrb[6].mxu0 %vm244_vm0, %v2772_v55 }
  0xac   : > { %v3562_v33 = vunpack.i.h.bf16 %v3560_v31  ;;  %v3561_v11 = vunpack.i.l.bf16 %v3560_v31  ;;  %3176 = vmatprep.subr.bf16.mxu0 %v3175_v26  ;;  %3190 = vmatpush3.bf16.msra.mxu1 %v3187_v17 }
  0xad   : > { %3178 = vmatpush1.bf16.msra.mxu0 %v3177_v28  ;;  %v1044_v8 = vsel %vm1042_vm3, %v3556_v30, %v3557_v29  ;;  %879 = vmatprep.mubr.f32.mxu0 %v3833_v0 }
  0xae   : > { %v3203_v35 = vpack.c.bf16 %v3562_v33, %v3557_v29  ;;  %v3565_v36 = vpop.permute.xlu0 %3564  ;;  %v1046_v37 = vsel %vm1042_vm3, %v3561_v11, %v3562_v33  ;;  %214 = vperm.xlu1 %3824, %v200_v32  }
  0xaf   : > { %v3567_v38 = vunpack.i.h.bf16 %v3565_v36  ;;  %v3566_v39 = vunpack.i.l.bf16 %v3565_v36  ;;  %v3570_v12 = vpop.permute.xlu1 %3569  ;;  %3006 = vmatmul.mubr.msk.f32.vlgmr.msra.gmra.mrb[8].mxu1 %vm244_vm0, %v2782_v34  ;;  %v3191_v40 = vpack.c.bf16 %v1046_v37, %v1044_v8 }
  0xb0   : > { %3204 = vmatprep.subr.bf16.mxu1 %v3203_v35  ;;  %2785 = vmatmul.mubr.msk.f32.vlgmr.msra.gmra.mrb[0].mxu0 %vm244_vm0, %v2781_v27  ;;  %v3572_v44 = vunpack.i.h.bf16 %v3570_v12  ;;  %v3571_v45 = vunpack.i.l.bf16 %v3570_v12 }
  0xb1   : > { %v1043_v42 = vsel %vm1042_vm3, %v3566_v39, %v3556_v30  ;;  %v1045_v43 = vsel %vm1042_vm3, %v3567_v38, %v3561_v11  ;;  %3192 = vmatprep.subr.bf16.mxu0 %v3191_v40  ;;  %3206 = vmatpush3.bf16.msra.mxu1 %v3203_v35  ;;  %v2796_v38 = vld [vmem:[%s4444_s1 + $0x78] sm:$0xff]  ;;  %v4171_v40 = vld [vmem:[%s4444_s1 + $0x80] sm:$0xff] }
  0xb2   : > { %v3193_v48 = vpack.c.bf16 %v1045_v43, %v1043_v42  ;;  %v3575_v49 = vpop.permute.xlu0 %3574  ;;  %885 = vmatprep.mubr.f32.mxu0 %v3833_v0  ;;  %3008 = vmatprep.mubr.msk.f32.mxu1 %vm244_vm0, %v2783_v46  ;;  %v1048_v54 = vsel %vm1042_vm3, %v3571_v45, %v3572_v44 }
  0xb3   : > { %v3577_v50 = vunpack.i.h.bf16 %v3575_v49  ;;  %v3576_v22 = vunpack.i.l.bf16 %v3575_v49  ;;  %v3580_v51 = vpop.permute.xlu1 %3579  ;;  %3009 = vmatmul.mubr.msk.f32.gmra.mrb[10].mxu1 %vm244_vm0, %v2784_v21 }
  0xb4   : > { %v3582_v52 = vunpack.i.h.bf16 %v3580_v51  ;;  %v3581_v53 = vunpack.i.l.bf16 %v3580_v51  ;;  %3194 = vmatpush1.bf16.msra.mxu0 %v3193_v48  ;;  %3023 = vmatprep.mubr.msk.f32.mxu1 %vm244_vm0, %v4130_v47 }
  0xb5   : > { %v3207_v23 = vpack.c.bf16 %v3577_v50, %v3572_v44  ;;  %v1050_v55 = vsel %vm1042_vm3, %v3576_v22, %v3577_v50  ;;  %2786 = vmatmul.mubr.msk.f32.gmra.mrb[2].mxu0 %vm244_vm0, %v2782_v34 }
  0xb6   : > { %v1049_v56 = vsel %vm1042_vm3, %v3582_v52, %v3576_v22  ;;  %v1047_v57 = vsel %vm1042_vm3, %v3581_v53, %v3571_v45  ;;  %v3585_v58 = vpop.permute.xlu0 %3584  ;;  %v3195_v41 = vpack.c.bf16 %v1050_v55, %v1048_v54  ;;  %891 = vmatprep.mubr.f32.mxu0 %v3833_v0 }
  0xb7   : > { %v3197_v59 = vpack.c.bf16 %v1049_v56, %v1047_v57  ;;  %v3587_v24 = vunpack.i.h.bf16 %v3585_v58  ;;  %v3586_v60 = vunpack.i.l.bf16 %v3585_v58  ;;  %v3590_v61 = vpop.permute.xlu1 %3589  ;;  %3208 = vmatprep.subr.bf16.mxu1 %v3207_v23 }
  0xb8   : > { %v3592_v27 = vunpack.i.h.bf16 %v3590_v61  ;;  %v3591_v62 = vunpack.i.l.bf16 %v3590_v61  ;;  %3196 = vmatprep.subr.bf16.mxu0 %v3195_v41  ;;  %3210 = vmatpush3.bf16.msra.mxu1 %v3207_v23 }
  0xb9   : > { %3198 = vmatpush1.bf16.msra.mxu0 %v3197_v59  ;;  %v1052_v63 = vsel %vm1042_vm3, %v3586_v60, %v3587_v24 }
  0xba   : > { %v3211_v1 = vpack.c.bf16 %v3592_v27, %v3587_v24  ;;  %v3595_v2 = vpop.permute.xlu0 %3594  ;;  %v1054_v3 = vsel %vm1042_vm3, %v3591_v62, %v3592_v27  ;;  %2787 = vmatmul.mubr.msk.f32.gmra.mrb[4].mxu0 %vm244_vm0, %v2783_v46 }
  0xbb   : > { %v3597_v5 = vunpack.i.h.bf16 %v3595_v2  ;;  %v3596_v6 = vunpack.i.l.bf16 %v3595_v2  ;;  %v3600_v7 = vpop.permute.xlu1 %3599  ;;  %v3199_v9 = vpack.c.bf16 %v1054_v3, %v1052_v63  ;;  %897 = vmatprep.mubr.f32.mxu0 %v3833_v0 }
  0xbc   : > { %3212 = vmatprep.subr.bf16.mxu1 %v3211_v1  ;;  %v3602_v14 = vunpack.i.h.bf16 %v3600_v7  ;;  %v3601_v15 = vunpack.i.l.bf16 %v3600_v7 }
  0xbd   : > { %v1051_v10 = vsel %vm1042_vm3, %v3596_v6, %v3586_v60  ;;  %v1053_v13 = vsel %vm1042_vm3, %v3597_v5, %v3591_v62  ;;  %3200 = vmatprep.subr.bf16.mxu0 %v3199_v9  ;;  %3214 = vmatpush3.bf16.msra.mxu1 %v3211_v1  ;;  %v2806_v6 = vld [vmem:[%s4444_s1 + $0x88] sm:$0xff] }
  0xbe   : > { %v3201_v17 = vpack.c.bf16 %v1053_v13, %v1051_v10  ;;  %v3605_v18 = vpop.permute.xlu0 %3604  ;;  %2788 = vmatmul.mubr.msk.f32.gmra.mrb[6].mxu0 %vm244_vm0, %v2784_v21  ;;  %v1314_v30 = vsel %vm1312_vm4, %v3601_v15, %v3602_v14 }
  0xbf   : > { %v3607_v20 = vunpack.i.h.bf16 %v3605_v18  ;;  %v3606_v25 = vunpack.i.l.bf16 %v3605_v18  ;;  %v3610_v4 = vpop.permute.xlu1 %3609  ;;  %1149 = vmatprep.mubr.f32.mxu0 %v3833_v0  ;;  %v2808_v18 = vld [vmem:[%s4444_s1 + $0x98] sm:$0xff] }
  0xc0   : > { %v3612_v26 = vunpack.i.h.bf16 %v3610_v4  ;;  %v3611_v28 = vunpack.i.l.bf16 %v3610_v4  ;;  %3202 = vmatpush1.bf16.msra.mxu0 %v3201_v17  ;;  %3024 = vmatmul.mubr.msk.f32.vlgmr.msra.gmra.mrb[8].mxu1 %vm244_vm0, %v2794_v16 }
  0xc1   : > { %v3227_v29 = vpack.c.bf16 %v3607_v20, %v3602_v14  ;;  %v1316_v31 = vsel %vm1312_vm4, %v3606_v25, %v3607_v20  ;;  %3026 = vmatprep.mubr.msk.f32.mxu1 %vm244_vm0, %v2795_v19 }
  0xc2   : > { %v1315_v32 = vsel %vm1312_vm4, %v3612_v26, %v3606_v25  ;;  %v1313_v33 = vsel %vm1312_vm4, %v3611_v28, %v3601_v15  ;;  %v3615_v11 = vpop.permute.xlu0 %3614  ;;  %v3215_v34 = vpack.c.bf16 %v1316_v31, %v1314_v30  ;;  %v2807_v26 = vld [vmem:[%s4444_s1 + $0x90] sm:$0xff]  ;;  %v4210_v28 = vld [vmem:[%s4444_s1 + $0xa0] sm:$0xff] }
  0xc3   : > { %v3217_v8 = vpack.c.bf16 %v1315_v32, %v1313_v33  ;;  %v3617_v35 = vunpack.i.h.bf16 %v3615_v11  ;;  %v3616_v36 = vunpack.i.l.bf16 %v3615_v11  ;;  %v3620_v37 = vpop.permute.xlu1 %3619  ;;  %3228 = vmatprep.subr.bf16.mxu1 %v3227_v29  ;;  %2797 = vmatmul.mubr.msk.f32.vlgmr.msra.gmra.mrb[0].mxu0 %vm244_vm0, %v4130_v47 }
  0xc4   : > { %v3622_v39 = vunpack.i.h.bf16 %v3620_v37  ;;  %v3621_v12 = vunpack.i.l.bf16 %v3620_v37  ;;  %3216 = vmatprep.subr.bf16.mxu0 %v3215_v34  ;;  %3230 = vmatpush3.bf16.msra.mxu1 %v3227_v29 }
  0xc5   : > { %3218 = vmatpush1.bf16.msra.mxu0 %v3217_v8  ;;  %v1318_v21 = vsel %vm1312_vm4, %v3616_v36, %v3617_v35  ;;  %1155 = vmatprep.mubr.f32.mxu0 %v3833_v0 }
  0xc6   : > { %v3231_v42 = vpack.c.bf16 %v3622_v39, %v3617_v35  ;;  %v3625_v43 = vpop.permute.xlu0 %3624  ;;  %v1320_v44 = vsel %vm1312_vm4, %v3621_v12, %v3622_v39  ;;  %3027 = vmatmul.mubr.msk.f32.gmra.mrb[10].mxu1 %vm244_vm0, %v2796_v38 }
  0xc7   : > { %v3627_v45 = vunpack.i.h.bf16 %v3625_v43  ;;  %v3626_v46 = vunpack.i.l.bf16 %v3625_v43  ;;  %v3630_v47 = vpop.permute.xlu1 %3629  ;;  %v3219_v48 = vpack.c.bf16 %v1320_v44, %v1318_v21  ;;  %2798 = vmatmul.mubr.msk.f32.gmra.mrb[2].mxu0 %vm244_vm0, %v2794_v16  ;;  %3041 = vmatprep.mubr.msk.f32.mxu1 %vm244_vm0, %v4171_v40 }
  0xc8   : > { %3232 = vmatprep.subr.bf16.mxu1 %v3231_v42  ;;  %1161 = vmatprep.mubr.f32.mxu0 %v3833_v0  ;;  %v3632_v22 = vunpack.i.h.bf16 %v3630_v47  ;;  %v3631_v51 = vunpack.i.l.bf16 %v3630_v47 }
  0xc9   : > { %v1317_v49 = vsel %vm1312_vm4, %v3626_v46, %v3616_v36  ;;  %v1319_v50 = vsel %vm1312_vm4, %v3627_v45, %v3621_v12  ;;  %3220 = vmatprep.subr.bf16.mxu0 %v3219_v48  ;;  %3234 = vmatpush3.bf16.msra.mxu1 %v3231_v42 }
  0xca   : > { %v3221_v52 = vpack.c.bf16 %v1319_v50, %v1317_v49  ;;  %v3635_v53 = vpop.permute.xlu0 %3634  ;;  %v1322_v41 = vsel %vm1312_vm4, %v3631_v51, %v3632_v22 }
  0xcb   : > { %v3637_v23 = vunpack.i.h.bf16 %v3635_v53  ;;  %v3636_v54 = vunpack.i.l.bf16 %v3635_v53  ;;  %v3640_v55 = vpop.permute.xlu1 %3639  ;;  %2799 = vmatmul.mubr.msk.f32.gmra.mrb[4].mxu0 %vm244_vm0, %v2795_v19 }
  0xcc   : > { %v3642_v56 = vunpack.i.h.bf16 %v3640_v55  ;;  %v3641_v57 = vunpack.i.l.bf16 %v3640_v55  ;;  %3222 = vmatpush1.bf16.msra.mxu0 %v3221_v52  ;;  %1167 = vmatprep.mubr.f32.mxu0 %v3833_v0 }
  0xcd   : > { %v3235_v58 = vpack.c.bf16 %v3637_v23, %v3632_v22  ;;  %v1324_v59 = vsel %vm1312_vm4, %v3636_v54, %v3637_v23 }
  0xce   : > { %v1323_v24 = vsel %vm1312_vm4, %v3642_v56, %v3636_v54  ;;  %v1321_v60 = vsel %vm1312_vm4, %v3641_v57, %v3631_v51  ;;  %v3645_v61 = vpop.permute.xlu0 %3644  ;;  %v3223_v27 = vpack.c.bf16 %v1324_v59, %v1322_v41  ;;  %v2818_v56 = vld [vmem:[%s4444_s1 + $0xa8] sm:$0xff]  ;;  %v2819_v41 = vld [vmem:[%s4444_s1 + $0xb0] sm:$0xff] }
  0xcf   : > { %v3225_v62 = vpack.c.bf16 %v1323_v24, %v1321_v60  ;;  %v3647_v63 = vunpack.i.h.bf16 %v3645_v61  ;;  %v3646_v1 = vunpack.i.l.bf16 %v3645_v61  ;;  %v3650_v2 = vpop.permute.xlu1 %3649  ;;  %3236 = vmatprep.subr.bf16.mxu1 %v3235_v58  ;;  %2800 = vmatmul.mubr.msk.f32.gmra.mrb[6].mxu0 %vm244_vm0, %v2796_v38 }
  0xd0   : > { %v3652_v3 = vunpack.i.h.bf16 %v3650_v2  ;;  %v3651_v5 = vunpack.i.l.bf16 %v3650_v2  ;;  %3224 = vmatprep.subr.bf16.mxu0 %v3223_v27  ;;  %3238 = vmatpush3.bf16.msra.mxu1 %v3235_v58 }
  0xd1   : > { %3226 = vmatpush1.bf16.msra.mxu0 %v3225_v62  ;;  %v1584_v7 = vsel %vm1582_vm5, %v3646_v1, %v3647_v63  ;;  %1419 = vmatprep.mubr.f32.mxu0 %v3833_v0 }
  0xd2   : > { %v3251_v9 = vpack.c.bf16 %v3652_v3, %v3647_v63  ;;  %v3655_v10 = vpop.permute.xlu0 %3654  ;;  %v1586_v13 = vsel %vm1582_vm5, %v3651_v5, %v3652_v3 }
  0xd3   : > { %v3657_v14 = vunpack.i.h.bf16 %v3655_v10  ;;  %v3656_v15 = vunpack.i.l.bf16 %v3655_v10  ;;  %v3660_v16 = vpop.permute.xlu1 %3659  ;;  %3042 = vmatmul.mubr.msk.f32.vlgmr.msra.gmra.mrb[8].mxu1 %vm244_vm0, %v2806_v6  ;;  %v3239_v17 = vpack.c.bf16 %v1586_v13, %v1584_v7 }
  0xd4   : > { %3252 = vmatprep.subr.bf16.mxu1 %v3251_v9  ;;  %2809 = vmatmul.mubr.msk.f32.vlgmr.msra.gmra.mrb[0].mxu0 %vm244_vm0, %v4171_v40  ;;  %v3662_v25 = vunpack.i.h.bf16 %v3660_v16  ;;  %v3661_v4 = vunpack.i.l.bf16 %v3660_v16 }
  0xd5   : > { %v1583_v19 = vsel %vm1582_vm5, %v3656_v15, %v3646_v1  ;;  %v1585_v20 = vsel %vm1582_vm5, %v3657_v14, %v3651_v5  ;;  %3240 = vmatprep.subr.bf16.mxu0 %v3239_v17  ;;  %3254 = vmatpush3.bf16.msra.mxu1 %v3251_v9  ;;  %v2820_v14 = vld [vmem:[%s4444_s1 + $0xb8] sm:$0xff]  ;;  %v4251_v17 = vld [vmem:[%s4444_s1 + $0xc0] sm:$0xff] }
  0xd6   : > { %v3241_v29 = vpack.c.bf16 %v1585_v20, %v1583_v19  ;;  %v3665_v30 = vpop.permute.xlu0 %3664  ;;  %1425 = vmatprep.mubr.f32.mxu0 %v3833_v0  ;;  %3044 = vmatprep.mubr.msk.f32.mxu1 %vm244_vm0, %v2807_v26  ;;  %v1588_v35 = vsel %vm1582_vm5, %v3661_v4, %v3662_v25 }
  0xd7   : > { %v3667_v31 = vunpack.i.h.bf16 %v3665_v30  ;;  %v3666_v32 = vunpack.i.l.bf16 %v3665_v30  ;;  %v3670_v33 = vpop.permute.xlu1 %3669  ;;  %3045 = vmatmul.mubr.msk.f32.gmra.mrb[10].mxu1 %vm244_vm0, %v2808_v18 }
  0xd8   : > { %v3672_v11 = vunpack.i.h.bf16 %v3670_v33  ;;  %v3671_v34 = vunpack.i.l.bf16 %v3670_v33  ;;  %3242 = vmatpush1.bf16.msra.mxu0 %v3241_v29  ;;  %3059 = vmatprep.mubr.msk.f32.mxu1 %vm244_vm0, %v4210_v28 }
  0xd9   : > { %v3255_v8 = vpack.c.bf16 %v3667_v31, %v3662_v25  ;;  %v1590_v36 = vsel %vm1582_vm5, %v3666_v32, %v3667_v31  ;;  %2810 = vmatmul.mubr.msk.f32.gmra.mrb[2].mxu0 %vm244_vm0, %v2806_v6 }
  0xda   : > { %v1589_v37 = vsel %vm1582_vm5, %v3672_v11, %v3666_v32  ;;  %v1587_v38 = vsel %vm1582_vm5, %v3671_v34, %v3661_v4  ;;  %v3675_v39 = vpop.permute.xlu0 %3674  ;;  %v3243_v12 = vpack.c.bf16 %v1590_v36, %v1588_v35  ;;  %1431 = vmatprep.mubr.f32.mxu0 %v3833_v0 }
  0xdb   : > { %v3245_v40 = vpack.c.bf16 %v1589_v37, %v1587_v38  ;;  %v3677_v21 = vunpack.i.h.bf16 %v3675_v39  ;;  %v3676_v42 = vunpack.i.l.bf16 %v3675_v39  ;;  %v3680_v43 = vpop.permute.xlu1 %3679  ;;  %3256 = vmatprep.subr.bf16.mxu1 %v3255_v8 }
  0xdc   : > { %v3682_v44 = vunpack.i.h.bf16 %v3680_v43  ;;  %v3681_v45 = vunpack.i.l.bf16 %v3680_v43  ;;  %3244 = vmatprep.subr.bf16.mxu0 %v3243_v12  ;;  %3258 = vmatpush3.bf16.msra.mxu1 %v3255_v8 }
  0xdd   : > { %3246 = vmatpush1.bf16.msra.mxu0 %v3245_v40  ;;  %v1592_v46 = vsel %vm1582_vm5, %v3676_v42, %v3677_v21 }
  0xde   : > { %v3259_v47 = vpack.c.bf16 %v3682_v44, %v3677_v21  ;;  %v3685_v48 = vpop.permute.xlu0 %3684  ;;  %v1594_v49 = vsel %vm1582_vm5, %v3681_v45, %v3682_v44  ;;  %2811 = vmatmul.mubr.msk.f32.gmra.mrb[4].mxu0 %vm244_vm0, %v2807_v26 }
  0xdf   : > { %v3687_v50 = vunpack.i.h.bf16 %v3685_v48  ;;  %v3686_v22 = vunpack.i.l.bf16 %v3685_v48  ;;  %v3690_v51 = vpop.permute.xlu1 %3689  ;;  %v3247_v52 = vpack.c.bf16 %v1594_v49, %v1592_v46  ;;  %1437 = vmatprep.mubr.f32.mxu0 %v3833_v0 }
  0xe0   : > { %3260 = vmatprep.subr.bf16.mxu1 %v3259_v47  ;;  %v3692_v54 = vunpack.i.h.bf16 %v3690_v51  ;;  %v3691_v55 = vunpack.i.l.bf16 %v3690_v51 }
  0xe1   : > { %v1591_v53 = vsel %vm1582_vm5, %v3686_v22, %v3676_v42  ;;  %v1593_v23 = vsel %vm1582_vm5, %v3687_v50, %v3681_v45  ;;  %3248 = vmatprep.subr.bf16.mxu0 %v3247_v52  ;;  %3262 = vmatpush3.bf16.msra.mxu1 %v3259_v47  ;;  %v2830_v22 = vld [vmem:[%s4444_s1 + $0xc8] sm:$0xff] }
  0xe2   : > { %v3249_v57 = vpack.c.bf16 %v1593_v23, %v1591_v53  ;;  %v3695_v58 = vpop.permute.xlu0 %3694  ;;  %2812 = vmatmul.mubr.msk.f32.gmra.mrb[6].mxu0 %vm244_vm0, %v2808_v18  ;;  %v1854_v63 = vsel %vm1852_vm6, %v3691_v55, %v3692_v54 }
  0xe3   : > { %v3697_v59 = vunpack.i.h.bf16 %v3695_v58  ;;  %v3696_v24 = vunpack.i.l.bf16 %v3695_v58  ;;  %v3700_v60 = vpop.permute.xlu1 %3699  ;;  %1689 = vmatprep.mubr.f32.mxu0 %v3833_v0  ;;  %v4282_v58 = vld [vmem:[%s4444_s1 + $0xd8] sm:$0xff] }
  0xe4   : > { %v3702_v61 = vunpack.i.h.bf16 %v3700_v60  ;;  %v3701_v27 = vunpack.i.l.bf16 %v3700_v60  ;;  %3250 = vmatpush1.bf16.msra.mxu0 %v3249_v57  ;;  %3060 = vmatmul.mubr.msk.f32.vlgmr.msra.gmra.mrb[8].mxu1 %vm244_vm0, %v2818_v56 }
  0xe5   : > { %v3275_v62 = vpack.c.bf16 %v3697_v59, %v3692_v54  ;;  %v1856_v1 = vsel %vm1852_vm6, %v3696_v24, %v3697_v59  ;;  %3062 = vmatprep.mubr.msk.f32.mxu1 %vm244_vm0, %v2819_v41 }
  0xe6   : > { %v1855_v2 = vsel %vm1852_vm6, %v3702_v61, %v3696_v24  ;;  %v1853_v3 = vsel %vm1852_vm6, %v3701_v27, %v3691_v55  ;;  %v3705_v5 = vpop.permute.xlu0 %3704  ;;  %v3263_v6 = vpack.c.bf16 %v1856_v1, %v1854_v63  ;;  %v2831_v61 = vld [vmem:[%s4444_s1 + $0xd0] sm:$0xff]  ;;  %v4292_v27 = vld [vmem:[%s4444_s1 + $0xe0] sm:$0xff] }
  0xe7   : > { %v3265_v7 = vpack.c.bf16 %v1855_v2, %v1853_v3  ;;  %v3707_v9 = vunpack.i.h.bf16 %v3705_v5  ;;  %v3706_v10 = vunpack.i.l.bf16 %v3705_v5  ;;  %v3710_v13 = vpop.permute.xlu1 %3709  ;;  %3276 = vmatprep.subr.bf16.mxu1 %v3275_v62  ;;  %2821 = vmatmul.mubr.msk.f32.vlgmr.msra.gmra.mrb[0].mxu0 %vm244_vm0, %v4210_v28 }
  0xe8   : > { %v3712_v15 = vunpack.i.h.bf16 %v3710_v13  ;;  %v3711_v16 = vunpack.i.l.bf16 %v3710_v13  ;;  %3264 = vmatprep.subr.bf16.mxu0 %v3263_v6  ;;  %3278 = vmatpush3.bf16.msra.mxu1 %v3275_v62 }
  0xe9   : > { %3266 = vmatpush1.bf16.msra.mxu0 %v3265_v7  ;;  %v1858_v18 = vsel %vm1852_vm6, %v3706_v10, %v3707_v9  ;;  %1695 = vmatprep.mubr.f32.mxu0 %v3833_v0 }
  0xea   : > { %v3279_v19 = vpack.c.bf16 %v3712_v15, %v3707_v9  ;;  %v3715_v20 = vpop.permute.xlu0 %3714  ;;  %v1860_v25 = vsel %vm1852_vm6, %v3711_v16, %v3712_v15  ;;  %3063 = vmatmul.mubr.msk.f32.gmra.mrb[10].mxu1 %vm244_vm0, %v2820_v14 }
  0xeb   : > { %v3717_v4 = vunpack.i.h.bf16 %v3715_v20  ;;  %v3716_v26 = vunpack.i.l.bf16 %v3715_v20  ;;  %v3720_v28 = vpop.permute.xlu1 %3719  ;;  %v3267_v29 = vpack.c.bf16 %v1860_v25, %v1858_v18  ;;  %2822 = vmatmul.mubr.msk.f32.gmra.mrb[2].mxu0 %vm244_vm0, %v2818_v56  ;;  %3077 = vmatprep.mubr.msk.f32.mxu1 %vm244_vm0, %v4251_v17 }
  0xec   : > { %3280 = vmatprep.subr.bf16.mxu1 %v3279_v19  ;;  %1701 = vmatprep.mubr.f32.mxu0 %v3833_v0  ;;  %v3722_v32 = vunpack.i.h.bf16 %v3720_v28  ;;  %v3721_v33 = vunpack.i.l.bf16 %v3720_v28 }
  0xed   : > { %v1857_v30 = vsel %vm1852_vm6, %v3716_v26, %v3706_v10  ;;  %v1859_v31 = vsel %vm1852_vm6, %v3717_v4, %v3711_v16  ;;  %3268 = vmatprep.subr.bf16.mxu0 %v3267_v29  ;;  %3282 = vmatpush3.bf16.msra.mxu1 %v3279_v19 }
  0xee   : > { %v3269_v11 = vpack.c.bf16 %v1859_v31, %v1857_v30  ;;  %v3725_v34 = vpop.permute.xlu0 %3724  ;;  %v1862_v12 = vsel %vm1852_vm6, %v3721_v33, %v3722_v32 }
  0xef   : > { %v3727_v8 = vunpack.i.h.bf16 %v3725_v34  ;;  %v3726_v35 = vunpack.i.l.bf16 %v3725_v34  ;;  %v3730_v36 = vpop.permute.xlu1 %3729  ;;  %2823 = vmatmul.mubr.msk.f32.gmra.mrb[4].mxu0 %vm244_vm0, %v2819_v41 }
  0xf0   : > { %v3732_v37 = vunpack.i.h.bf16 %v3730_v36  ;;  %v3731_v38 = vunpack.i.l.bf16 %v3730_v36  ;;  %3270 = vmatpush1.bf16.msra.mxu0 %v3269_v11  ;;  %1707 = vmatprep.mubr.f32.mxu0 %v3833_v0 }
  0xf1   : > { %v3283_v39 = vpack.c.bf16 %v3727_v8, %v3722_v32  ;;  %v1864_v40 = vsel %vm1852_vm6, %v3726_v35, %v3727_v8 }
  0xf2   : > { %v1863_v21 = vsel %vm1852_vm6, %v3732_v37, %v3726_v35  ;;  %v1861_v42 = vsel %vm1852_vm6, %v3731_v38, %v3721_v33  ;;  %v3735_v43 = vpop.permute.xlu0 %3734  ;;  %v3271_v44 = vpack.c.bf16 %v1864_v40, %v1862_v12  ;;  %v2842_v40 = vld [vmem:[%s4444_s1 + $0xe8] sm:$0xff] }
  0xf3   : > { %v3273_v45 = vpack.c.bf16 %v1863_v21, %v1861_v42  ;;  %v3737_v46 = vunpack.i.h.bf16 %v3735_v43  ;;  %v3736_v47 = vunpack.i.l.bf16 %v3735_v43  ;;  %v3740_v48 = vpop.permute.xlu1 %3739  ;;  %3284 = vmatprep.subr.bf16.mxu1 %v3283_v39  ;;  %2824 = vmatmul.mubr.msk.f32.gmra.mrb[6].mxu0 %vm244_vm0, %v2820_v14 }
  0xf4   : > { %v3742_v49 = vunpack.i.h.bf16 %v3740_v48  ;;  %v3741_v50 = vunpack.i.l.bf16 %v3740_v48  ;;  %3272 = vmatprep.subr.bf16.mxu0 %v3271_v44  ;;  %3286 = vmatpush3.bf16.msra.mxu1 %v3283_v39  ;;  %v4306_v25 = vpop.f32.mrb[0].mxu1 }
  0xf5   : > { %3274 = vmatpush1.bf16.msra.mxu0 %v3273_v45  ;;  %v2124_v51 = vsel %vm2122_vm7, %v3736_v47, %v3737_v46  ;;  %1959 = vmatprep.mubr.f32.mxu0 %v3833_v0  ;;  %v4308_v28 = vpop.f32.mrb[1].mxu1 }
  0xf6   : > { %v3299_v52 = vpack.c.bf16 %v3742_v49, %v3737_v46  ;;  %v3745_v53 = vpop.permute.xlu0 %3744  ;;  %v2126_v23 = vsel %vm2122_vm7, %v3741_v50, %v3742_v49  ;;  %v2843_v49 = vld [vmem:[%s4444_s1 + $0xf0] sm:$0xff] }
  0xf7   : > { %v3747_v54 = vunpack.i.h.bf16 %v3745_v53  ;;  %v3746_v55 = vunpack.i.l.bf16 %v3745_v53  ;;  %v3750_v56 = vpop.permute.xlu1 %3749  ;;  %3078 = vmatmul.mubr.msk.f32.vlgmr.msra.gmra.mrb[8].mxu1 %vm244_vm0, %v2830_v22  ;;  %v3287_v57 = vpack.c.bf16 %v2126_v23, %v2124_v51 }
  0xf8   : > { %3300 = vmatprep.subr.bf16.mxu1 %v3299_v52  ;;  %2833 = vmatmul.mubr.msk.f32.vlgmr.msra.gmra.mrb[0].mxu0 %vm244_vm0, %v4251_v17  ;;  %v3752_v24 = vunpack.i.h.bf16 %v3750_v56  ;;  %v3751_v60 = vunpack.i.l.bf16 %v3750_v56  ;;  %v4314_v35 = vpop.f32.mrb[2].mxu1 }
  0xf9   : > { %v2123_v41 = vsel %vm2122_vm7, %v3746_v55, %v3736_v47  ;;  %v2125_v59 = vsel %vm2122_vm7, %v3747_v54, %v3741_v50  ;;  %3288 = vmatprep.subr.bf16.mxu0 %v3287_v57  ;;  %3302 = vmatpush3.bf16.msra.mxu1 %v3299_v52  ;;  %v4316_v36 = vpop.f32.mrb[3].mxu1 }
  0xfa   : > { %v3289_v62 = vpack.c.bf16 %v2125_v59, %v2123_v41  ;;  %v3755_v63 = vpop.permute.xlu0 %3754  ;;  %1965 = vmatprep.mubr.f32.mxu0 %v3833_v0  ;;  %3080 = vmatprep.mubr.msk.f32.mxu1 %vm244_vm0, %v2831_v61  ;;  %v2128_v9 = vsel %vm2122_vm7, %v3751_v60, %v3752_v24  ;;  %v2844_v59 = vld [vmem:[%s4444_s1 + $0xf8] sm:$0xff] }
  0xfb   : > { %v3757_v1 = vunpack.i.h.bf16 %v3755_v63  ;;  %v3756_v2 = vunpack.i.l.bf16 %v3755_v63  ;;  %v3760_v3 = vpop.permute.xlu1 %3759  ;;  %3081 = vmatmul.mubr.msk.f32.gmra.mrb[10].mxu1 %vm244_vm0, %v4282_v58 }
  0xfc   : > { %v3762_v5 = vunpack.i.h.bf16 %v3760_v3  ;;  %v3761_v6 = vunpack.i.l.bf16 %v3760_v3  ;;  %3290 = vmatpush1.bf16.msra.mxu0 %v3289_v62  ;;  %3095 = vmatprep.mubr.msk.f32.mxu1 %vm244_vm0, %v4292_v27  ;;  %v4326_v46 = vpop.f32.mrb[4].mxu1  ;;  %v2853_v62 = vld [vmem:[%s4444_s1 + $0x100] sm:$0xff] }
  0xfd   : > { %v3303_v7 = vpack.c.bf16 %v3757_v1, %v3752_v24  ;;  %2834 = vmatmul.mubr.msk.f32.gmra.mrb[2].mxu0 %vm244_vm0, %v2830_v22  ;;  %v2130_v10 = vsel %vm2122_vm7, %v3756_v2, %v3757_v1  ;;  %v4332_v50 = vpop.f32.mrb[5].mxu1 }
  0xfe   : > { %v2129_v13 = vsel %vm2122_vm7, %v3762_v5, %v3756_v2  ;;  %v2127_v14 = vsel %vm2122_vm7, %v3761_v6, %v3751_v60  ;;  %v3765_v15 = vpop.permute.xlu0 %3764  ;;  %v3291_v16 = vpack.c.bf16 %v2130_v10, %v2128_v9  ;;  %1971 = vmatprep.mubr.f32.mxu0 %v3833_v0 }
  0xff   : > { %v3293_v17 = vpack.c.bf16 %v2129_v13, %v2127_v14  ;;  %v3767_v18 = vunpack.i.h.bf16 %v3765_v15  ;;  %v3766_v19 = vunpack.i.l.bf16 %v3765_v15  ;;  %v3770_v20 = vpop.permute.xlu1 %3769  ;;  %3304 = vmatprep.subr.bf16.mxu1 %v3303_v7 }
 0x100   : > { %v3772_v4 = vunpack.i.h.bf16 %v3770_v20  ;;  %v3771_v26 = vunpack.i.l.bf16 %v3770_v20  ;;  %3292 = vmatprep.subr.bf16.mxu0 %v3291_v16  ;;  %3306 = vmatpush3.bf16.msra.mxu1 %v3303_v7  ;;  %v4344_v24 = vpop.f32.mrb[6].mxu1 }
 0x101   : > { %3294 = vmatpush1.bf16.msra.mxu0 %v3293_v17  ;;  %v2132_v29 = vsel %vm2122_vm7, %v3766_v19, %v3767_v18  ;;  %v4349_v63 = vpop.f32.mrb[7].mxu1 }
 0x102   : > { %v3307_v30 = vpack.c.bf16 %v3772_v4, %v3767_v18  ;;  %v3775_v31 = vpop.permute.xlu0 %3774  ;;  %2835 = vmatmul.mubr.msk.f32.gmra.mrb[4].mxu0 %vm244_vm0, %v2831_v61  ;;  %v2134_v32 = vsel %vm2122_vm7, %v3771_v26, %v3772_v4 }
 0x103   : > { %v3777_v33 = vunpack.i.h.bf16 %v3775_v31  ;;  %v3776_v11 = vunpack.i.l.bf16 %v3775_v31  ;;  %v3780_v34 = vpop.permute.xlu1 %3779  ;;  %v3295_v8 = vpack.c.bf16 %v2134_v32, %v2132_v29  ;;  %1977 = vmatprep.mubr.f32.mxu0 %v3833_v0 }
 0x104   : > { %3308 = vmatprep.subr.bf16.mxu1 %v3307_v30  ;;  %v3782_v39 = vunpack.i.h.bf16 %v3780_v34  ;;  %v3781_v12 = vunpack.i.l.bf16 %v3780_v34 }
 0x105   : > { %v2131_v37 = vsel %vm2122_vm7, %v3776_v11, %v3766_v19  ;;  %v2133_v38 = vsel %vm2122_vm7, %v3777_v33, %v3771_v26  ;;  %3296 = vmatprep.subr.bf16.mxu0 %v3295_v8  ;;  %3310 = vmatpush3.bf16.msra.mxu1 %v3307_v30  ;;  %v2854_v8 = vld [vmem:[%s4444_s1 + $0x108] sm:$0xff] }
 0x106   : > { %v3297_v21 = vpack.c.bf16 %v2133_v38, %v2131_v37  ;;  %v3785_v42 = vpop.permute.xlu0 %3784  ;;  %2836 = vmatmul.mubr.msk.f32.gmra.mrb[6].mxu0 %vm244_vm0, %v4282_v58  ;;  %v2394_v51 = vsel %vm2392_vm8, %v3781_v12, %v3782_v39  ;;  %v2855_v37 = vld [vmem:[%s4444_s1 + $0x110] sm:$0xff]  ;;  %v2856_v38 = vld [vmem:[%s4444_s1 + $0x118] sm:$0xff] }
 0x107   : > { %v3787_v43 = vunpack.i.h.bf16 %v3785_v42  ;;  %v3786_v44 = vunpack.i.l.bf16 %v3785_v42  ;;  %v3790_v45 = vpop.permute.xlu1 %3789  ;;  %2229 = vmatprep.mubr.f32.mxu0 %v3833_v0 }
 0x108   : > { %v3792_v47 = vunpack.i.h.bf16 %v3790_v45  ;;  %v3791_v48 = vunpack.i.l.bf16 %v3790_v45  ;;  %3298 = vmatpush1.bf16.msra.mxu0 %v3297_v21  ;;  %3096 = vmatmul.mubr.msk.f32.vlgmr.msra.gmra.mrb[8].mxu1 %vm244_vm0, %v2842_v40 }
 0x109   : > { %v3323_v22 = vpack.c.bf16 %v3787_v43, %v3782_v39  ;;  %v2396_v52 = vsel %vm2392_vm8, %v3786_v44, %v3787_v43  ;;  %3098 = vmatprep.mubr.msk.f32.mxu1 %vm244_vm0, %v2843_v49  ;;  %v2659_v39 = vlaneseq }
 0x10a   : > { %v2395_v53 = vsel %vm2392_vm8, %v3792_v47, %v3786_v44  ;;  %v2393_v23 = vsel %vm2392_vm8, %v3791_v48, %v3781_v12  ;;  %v3795_v54 = vpop.permute.xlu0 %3794  ;;  %v3311_v55 = vpack.c.bf16 %v2396_v52, %v2394_v51  ;;  %v2657_v47 = vld [vmem:[%s4446_s3] sm:$0x7] }
 0x10b   : > { %v3313_v56 = vpack.c.bf16 %v2395_v53, %v2393_v23  ;;  %v3797_v57 = vunpack.i.h.bf16 %v3795_v54  ;;  %v3796_v58 = vunpack.i.l.bf16 %v3795_v54  ;;  %v3800_v41 = vpop.permute.xlu1 %3799  ;;  %3324 = vmatprep.subr.bf16.mxu1 %v3323_v22  ;;  %2845 = vmatmul.mubr.msk.f32.vlgmr.msra.gmra.mrb[0].mxu0 %vm244_vm0, %v4292_v27  ;;  %v2660_v21 = vshrl.u32 %v2659_v39, 7 }
 0x10c   : > { %v3802_v60 = vunpack.i.h.bf16 %v3800_v41  ;;  %v3801_v61 = vunpack.i.l.bf16 %v3800_v41  ;;  %3312 = vmatprep.subr.bf16.mxu0 %v3311_v55  ;;  %3326 = vmatpush3.bf16.msra.mxu1 %v3323_v22 }
 0x10d   : > { %3314 = vmatpush1.bf16.msra.mxu0 %v3313_v56  ;;  %2235 = vmatprep.mubr.f32.mxu0 %v3833_v0  ;;  %v2398_v27 = vsel %vm2392_vm8, %v3796_v58, %v3797_v57  ;;  %v2669_v44 = vsub.s32 2, %v2660_v21  ;;  %v2661_v45 = vsub.s32 0, %v2660_v21  ;;  %v2665_v48 = vsub.s32 1, %v2660_v21 }
 0x10e   : > { %v3327_v1 = vpack.c.bf16 %v3802_v60, %v3797_v57  ;;  %v3805_v2 = vpop.permute.xlu0 %3804  ;;  %v2400_v3 = vsel %vm2392_vm8, %v3801_v61, %v3802_v60  ;;  %3099 = vmatmul.mubr.msk.f32.gmra.mrb[10].mxu1 %vm244_vm0, %v2844_v59 }
 0x10f   : > { %v3807_v5 = vunpack.i.h.bf16 %v3805_v2  ;;  %v3806_v6 = vunpack.i.l.bf16 %v3805_v2  ;;  %v3810_v7 = vpop.permute.xlu1 %3809  ;;  %2846 = vmatmul.mubr.msk.f32.gmra.mrb[2].mxu0 %vm244_vm0, %v2842_v40  ;;  %v3315_v9 = vpack.c.bf16 %v2400_v3, %v2398_v27  ;;  %3113 = vmatprep.mubr.msk.f32.mxu1 %vm244_vm0, %v2853_v62  ;;  %v2670_v57 = vrot.slane %v2657_v47, %v2669_v44 }
 0x110   : > { %3328 = vmatprep.subr.bf16.mxu1 %v3327_v1  ;;  %2241 = vmatprep.mubr.f32.mxu0 %v3833_v0  ;;  %v3812_v14 = vunpack.i.h.bf16 %v3810_v7  ;;  %v3811_v15 = vunpack.i.l.bf16 %v3810_v7 }
 0x111   : > { %v2397_v10 = vsel %vm2392_vm8, %v3806_v6, %v3796_v58  ;;  %v2399_v13 = vsel %vm2392_vm8, %v3807_v5, %v3801_v61  ;;  %3316 = vmatprep.subr.bf16.mxu0 %v3315_v9  ;;  %3330 = vmatpush3.bf16.msra.mxu1 %v3327_v1 }
 0x112   : > { %v3317_v16 = vpack.c.bf16 %v2399_v13, %v2397_v10  ;;  %v3815_v17 = vpop.permute.xlu0 %3814  ;;  %v2402_v30 = vsel %vm2392_vm8, %v3811_v15, %v3812_v14 }
 0x113   : > { %v3817_v18 = vunpack.i.h.bf16 %v3815_v17  ;;  %v3816_v19 = vunpack.i.l.bf16 %v3815_v17  ;;  %v3820_v20 = vpop.permute.xlu1 %3819  ;;  %2847 = vmatmul.mubr.msk.f32.gmra.mrb[4].mxu0 %vm244_vm0, %v2843_v49 }
 0x114   : > { %v3822_v4 = vunpack.i.h.bf16 %v3820_v20  ;;  %v3821_v26 = vunpack.i.l.bf16 %v3820_v20  ;;  %3318 = vmatpush1.bf16.msra.mxu0 %v3317_v16  ;;  %2247 = vmatprep.mubr.f32.mxu0 %v3833_v0 }
 0x115   : > { %v3331_v29 = vpack.c.bf16 %v3817_v18, %v3812_v14  ;;  %v2404_v31 = vsel %vm2392_vm8, %v3816_v19, %v3817_v18 }
 0x116   : > { %v2403_v32 = vsel %vm2392_vm8, %v3822_v4, %v3816_v19  ;;  %v2401_v33 = vsel %vm2392_vm8, %v3821_v26, %v3811_v15  ;;  %v3319_v11 = vpack.c.bf16 %v2404_v31, %v2402_v30 }
 0x117   : > { %v3321_v34 = vpack.c.bf16 %v2403_v32, %v2401_v33  ;;  %3332 = vmatprep.subr.bf16.mxu1 %v3331_v29  ;;  %2848 = vmatmul.mubr.msk.f32.gmra.mrb[6].mxu0 %vm244_vm0, %v2844_v59 }
 0x118   : > { %3320 = vmatprep.subr.bf16.mxu0 %v3319_v11  ;;  %3334 = vmatpush3.bf16.msra.mxu1 %v3331_v29 }
 0x119   : > { %3322 = vmatpush1.bf16.msra.mxu0 %v3321_v34  ;;  %2499 = vmatprep.mubr.f32.mxu0 %v3833_v0 }
 0x11b   : > { %3114 = vmatmul.mubr.msk.f32.vlgmr.msra.gmra.mrb[8].mxu1 %vm244_vm0, %v2854_v8 }
 0x11c   : > { %2857 = vmatmul.mubr.msk.f32.vlgmr.msra.gmra.mrb[0].mxu0 %vm244_vm0, %v2853_v62  ;;  %3116 = vmatprep.mubr.msk.f32.mxu1 %vm244_vm0, %v2855_v37 }
 0x11d   : > { %2505 = vmatprep.mubr.f32.mxu0 %v3833_v0 }
 0x11f   : > { %3117 = vmatmul.mubr.msk.f32.gmra.mrb[10].mxu1 %vm244_vm0, %v2856_v38 }
 0x120   : > { %2858 = vmatmul.mubr.msk.f32.gmra.mrb[2].mxu0 %vm244_vm0, %v2854_v8 }
 0x121   : > { %2511 = vmatprep.mubr.f32.mxu0 %v3833_v0 }
 0x124   : > { %2859 = vmatmul.mubr.msk.f32.gmra.mrb[4].mxu0 %vm244_vm0, %v2855_v37 }
 0x125   : > { %2517 = vmatprep.mubr.f32.mxu0 %v3833_v0  ;;  %v205_v40 = vpop.permute.xlu0 %204 }
 0x126   : > { %v210_v12 = vpop.permute.xlu1 %209  ;;  %v432_v49 = vadd.f32 %v4308_v28, %v205_v40  ;;  %v431_v51 = vadd.f32 %v4306_v25, %v205_v40  ;;  %v4402_v28 = vrot.slane %v2657_v47, %v2661_v45 }
 0x127   : > { %v435_v0 = vadd.f32 %v4316_v36, %v210_v12  ;;  %v434_v56 = vadd.f32 %v4314_v35, %v210_v12 }
 0x128   : > { %2860 = vmatmul.mubr.msk.f32.gmra.mrb[6].mxu0 %vm244_vm0, %v2856_v38 }
 0x129   : > { %v4387_v43 = vpop.permute.xlu0 %219 }
 0x12a   : > { %v4398_v53 = vadd.f32 %v4344_v24, %v4387_v43  ;;  %v441_v37 = vadd.f32 %v4349_v63, %v4387_v43 }
 0x12d   : > { %v215_v42 = vpop.permute.xlu1 %214 }
 0x12e   : > { %v437_v52 = vadd.f32 %v4326_v46, %v215_v42  ;;  %v4404_v46 = vrot.slane %v2657_v47, %v2665_v48  ;;  %v438_v18 = vadd.f32 %v4332_v50, %v215_v42 }
 0x1ee   : > { %v3115_v22 = vpop.f32.mrb[8].mxu1 }
 0x1ef   : > { %v3351_v23 = vadd.f32 %v3115_v22, %v210_v12  ;;  %v2501_v54 = vpop.f32.mrb[0].mxu0  ;;  %v2590_v55 = vpop.f32.mrb[9].mxu1 }
 0x1f0   : > { %v3336_v58 = vadd.f32 %v2501_v54, %v431_v51  ;;  %v3352_v36 = vadd.f32 %v2590_v55, %v205_v40  ;;  %v2503_v41 = vpop.f32.mrb[1].mxu0 }
 0x1f1   : > { %vm2626_vm9 = vcmp.ge.f32.partialorder %v3351_v23, 0.0  ;;  %v2638_v25 = vmul.f32 0.2, %v3351_v23  ;;  %v3338_v59 = vadd.f32 %v2503_v41, %v432_v49 }
 0x1f2   : > { %vm2621_vm10 = vcmp.ge.f32.partialorder %v3336_v58, 0.0  ;;  %v2633_v24 = vmul.f32 0.2, %v3336_v58  ;;  %vm2623_vm11 = vcmp.ge.f32.partialorder %v3352_v36, 0.0  ;;  %v2635_v60 = vmul.f32 0.2, %v3352_v36 }
 0x1f3   : > { %v2650_v35 = vsel %vm2626_vm9, %v3351_v23, %v2638_v25  ;;  %vm2622_vm13 = vcmp.ge.f32.partialorder %v3338_v59, 0.0  ;;  %v2634_v61 = vmul.f32 0.2, %v3338_v59  ;;  %v3118_v62 = vpop.f32.mrb[10].mxu1  ;;  %v2507_v27 = vpop.f32.mrb[2].mxu0 }
 0x1f4   : > { %v2679_v1 = vmul.f32 %v2670_v57, %v2650_v35  ;;  %v2645_v2 = vsel %vm2621_vm10, %v3336_v58, %v2633_v24  ;;  %v2647_v3 = vsel %vm2623_vm11, %v3352_v36, %v2635_v60  ;;  %v3353_v5 = vadd.f32 %v3118_v62, %v4387_v43  ;;  %v2600_v6 = vpop.f32.mrb[11].mxu1  ;;  %v2509_v7 = vpop.f32.mrb[3].mxu0 }
 0x1f5   : > { %v2674_v9 = vmul.f32 %v4402_v28, %v2645_v2  ;;  %v2676_v10 = vmul.f32 %v2670_v57, %v2647_v3  ;;  %v2646_v13 = vsel %vm2622_vm13, %v3338_v59, %v2634_v61  ;;  %v3340_v14 = vadd.f32 %v2507_v27, %v434_v56 }
 0x1f6   : > { %2692 = vst.msk [vmem:[%s4409_s17 + $0x28] sm:$0xff] %vm2688_vm12, %v2679_v1  ;;  %v2675_v15 = vmul.f32 %v4404_v46, %v2646_v13  ;;  %vm2632_vm14 = vcmp.ge.f32.partialorder %v3353_v5, 0.0  ;;  %v2644_v16 = vmul.f32 0.2, %v3353_v5  ;;  %v3354_v17 = vadd.f32 %v2600_v6, %v215_v42 }
 0x1f7   : > { %2686 = vst [vmem:[%s4409_s17] sm:$0xff] %v2674_v9  ;;  %2689 = vst.msk [vmem:[%s4409_s17 + $0x10] sm:$0xff] %vm2688_vm12, %v2676_v10  ;;  %vm2624_vm15 = vcmp.ge.f32.partialorder %v3340_v14, 0.0  ;;  %v2636_v19 = vmul.f32 0.2, %v3340_v14  ;;  %v3342_v20 = vadd.f32 %v2509_v7, %v435_v0  ;;  %v2513_v4 = vpop.f32.mrb[4].mxu0 }
 0x1f8   : > { %2687 = vst [vmem:[%s4409_s17 + $0x8] sm:$0xff] %v2675_v15  ;;  %v2656_v26 = vsel %vm2632_vm14, %v3353_v5, %v2644_v16  ;;  %vm2629_vm0 = vcmp.ge.f32.partialorder %v3354_v17, 0.0  ;;  %v2641_v29 = vmul.f32 0.2, %v3354_v17  ;;  %v3344_v30 = vadd.f32 %v2513_v4, %v437_v52  ;;  %v2515_v31 = vpop.f32.mrb[5].mxu0 }
 0x1f9   : > { %v2685_v32 = vmul.f32 %v2670_v57, %v2656_v26  ;;  %v2648_v33 = vsel %vm2624_vm15, %v3340_v14, %v2636_v19  ;;  %vm2625_vm1 = vcmp.ge.f32.partialorder %v3342_v20, 0.0  ;;  %v2637_v11 = vmul.f32 0.2, %v3342_v20 }
 0x1fa   : > { %v2677_v50 = vmul.f32 %v4402_v28, %v2648_v33  ;;  %v2653_v34 = vsel %vm2629_vm0, %v3354_v17, %v2641_v29  ;;  %vm2627_vm2 = vcmp.ge.f32.partialorder %v3344_v30, 0.0  ;;  %v2639_v8 = vmul.f32 0.2, %v3344_v30 }
 0x1fb   : > { %2698 = vst.msk [vmem:[%s4409_s17 + $0x58] sm:$0xff] %vm2688_vm12, %v2685_v32  ;;  %v2682_v38 = vmul.f32 %v2670_v57, %v2653_v34  ;;  %v2649_v39 = vsel %vm2625_vm1, %v3342_v20, %v2637_v11  ;;  %v3346_v12 = vadd.f32 %v2515_v31, %v438_v18  ;;  %v2519_v40 = vpop.f32.mrb[6].mxu0 }
 0x1fc   : > { %2690 = vst [vmem:[%s4409_s17 + $0x18] sm:$0xff] %v2677_v50  ;;  %v2678_v21 = vmul.f32 %v4404_v46, %v2649_v39  ;;  %v2651_v42 = vsel %vm2627_vm2, %v3344_v30, %v2639_v8  ;;  %v3348_v44 = vadd.f32 %v2519_v40, %v4398_v53  ;;  %v2521_v45 = vpop.f32.mrb[7].mxu0 }
 0x1fd   : > { %2695 = vst.msk [vmem:[%s4409_s17 + $0x40] sm:$0xff] %vm2688_vm12, %v2682_v38  ;;  %v2680_v63 = vmul.f32 %v4402_v28, %v2651_v42  ;;  %vm2628_vm3 = vcmp.ge.f32.partialorder %v3346_v12, 0.0  ;;  %v2640_v43 = vmul.f32 0.2, %v3346_v12  ;;  %v3350_v47 = vadd.f32 %v2521_v45, %v441_v37 }
 0x1fe   : > { %2691 = vst [vmem:[%s4409_s17 + $0x20] sm:$0xff] %v2678_v21  ;;  %vm2630_vm4 = vcmp.ge.f32.partialorder %v3348_v44, 0.0  ;;  %v2642_v48 = vmul.f32 0.2, %v3348_v44 }
 0x1ff   : > { %2693 = vst [vmem:[%s4409_s17 + $0x30] sm:$0xff] %v2680_v63  ;;  %v2652_v49 = vsel %vm2628_vm3, %v3346_v12, %v2640_v43  ;;  %vm2631_vm5 = vcmp.ge.f32.partialorder %v3350_v47, 0.0  ;;  %v2643_v0 = vmul.f32 0.2, %v3350_v47 }
 0x200   : > { %v2681_v22 = vmul.f32 %v4404_v46, %v2652_v49  ;;  %v2654_v51 = vsel %vm2630_vm4, %v3348_v44, %v2642_v48 }
 0x201   : > { %v2683_v52 = vmul.f32 %v4402_v28, %v2654_v51  ;;  %v2655_v53 = vsel %vm2631_vm5, %v3350_v47, %v2643_v0 }
 0x202   : > { %2694 = vst [vmem:[%s4409_s17 + $0x38] sm:$0xff] %v2681_v22  ;;  %v2684_v23 = vmul.f32 %v4404_v46, %v2655_v53 }
 0x203   : > { %2696 = vst [vmem:[%s4409_s17 + $0x48] sm:$0xff] %v2683_v52 }
 0x204   : > { %2697 = vst [vmem:[%s4409_s17 + $0x50] sm:$0xff] %v2684_v23 }
 0x205 PF: > { %s14_s15 = sadd.s32 1, %s3831_s15  }
 0x206   : > { %p11_p4 = scmp.ge.s32.totalorder %s14_s15, 4  }
 0x208   :  { %13 = sbr.rel (!%p11_p4) target bundleno = 1 (0x1), region = 74 }

// kernel: _lambda_.19
= control target key start
LH: loop header
LB: loop body
LE: loop exit
PB: predicated region body
PF: predicated region fallthrough
CT: control target
= control target key end

     0   :  { %s5445_s15 = smov 0   ;;  %s6628_s0 = inlined_call_operand.vmem [shape: f32[2,10,1226], index: 0, kind: input, shape index: {}]   ;;  %s6629_s1 = inlined_call_operand.vmem [shape: f32[9,8,10], index: 1, kind: input, shape index: {}]   ;;  %s6630_s2 = inlined_call_operand.vmem [shape: f32[8,1], index: 2, kind: input, shape index: {}]   ;;  %s6631_s3 = inlined_call_operand.vmem [shape: f32[1,1156], index: 3, kind: input, shape index: {}]   ;;  %s6632_s4 = inlined_call_operand.vmem [shape: f32[2,8,1156], index: 4, kind: output, shape index: {}]  }
   0x1 LB: > { %s4467_s16 = sadd.s32 4294967295, %s5407_s15   ;;  %p4471_p0 = scmp.ge.s32.totalorder %s5407_s15, 1  ;;  %s5407_s15 = sphi %s5445_s15, %s14_s15  }
   0x2   : > { %p162_p1 = scmp.lt.s32.totalorder %s5407_s15, 3 }
   0x4   : > { %p163_p2 = pnand %p4471_p0, %p162_p1 }
   0x5   : > { %p188_p3 = scmp.lt.s32.totalorder (!%p163_p2), %s4467_s16, 1  ;;  %s5409_s21 = smov (!%p163_p2), 127   ;;  %vm229_vm0 = vcmask (!%p163_p2), 1041408   ;;  %v5411_v30 = vmov (!%p163_p2), 0.0   ;;  %vm5412_vm1 = vmmov (!%p163_p2), 1   ;;  %v224_v35 = vld [vmem:[%s6629_s1] sm:$0xff] (!%p163_p2) }
   0x6   : > { %166 = sbr.rel (%p163_p2) target bundleno = 522 (0x20a), region = 36  ;;  %s5410_s22 = smov (!%p163_p2), 126   ;;  %935 = vmatprep.mubr.f32.mxu0 (!%p163_p2), %v5411_v30  ;;  %324 = vmatprep.mubr.f32.mxu1 (!%p163_p2), %v5411_v30  ;;  %vm5561_vm2 = vmpackc.low (!%p163_p2), %vm229_vm0, %vm5412_vm1  ;;  %vm225_vm3 = vcmask (!%p163_p2), 80896   ;;  %vm677_vm4 = vcmask (!%p163_p2), 1039360   ;;  %vm1136_vm5 = vcmask (!%p163_p2), 1031168   ;;  %vm1595_vm6 = vcmask (!%p163_p2), 769024  }
   0x7   : > { %s5413_s25 = smov (!%p163_p2), 94   ;;  %s5414_s26 = smov (!%p163_p2), 93   ;;  %vm2054_vm7 = vcmask (!%p163_p2), 760832   ;;  %vm2513_vm8 = vcmask (!%p163_p2), 752640   ;;  %vm2972_vm9 = vcmask (!%p163_p2), 490496   ;;  %vm3431_vm10 = vcmask (!%p163_p2), 482304  }
   0x8   : > { %s5415_s27 = smov (!%p163_p2), 92   ;;  %s5416_s28 = smov (!%p163_p2), 60   ;;  %vm3890_vm11 = vcmask (!%p163_p2), 474112   ;;  %v6572_v32 = vld [vmem:[%s6631_s3] sm:$0xff] (!%p163_p2) }
   0x9   : > { %s5417_s29 = smov (!%p163_p2), 59   ;;  %s5418_s8 = smov (!%p163_p2), 58  }
   0xd   : > { %s6642_s16 = smov (!%p188_p3, %s4467_s16), 1 }
   0xe   : > { %s4979_s17 = smul.u32 160, %s6642_s16 }
  0x10   : > { %s5459_s20 = scalar_lea.vmem %s6628_s0, %s4979_s17 }
  0x11   : > { %v5462_v0 = vld [vmem:[%s5459_s20 + $0x28] sm:$0xff]  ;;  %v5465_v1 = vld [vmem:[%s5459_s20 + $0x30] sm:$0xff]  ;;  %v5468_v2 = vld [vmem:[%s5459_s20 + $0x20] sm:$0xff] }
  0x12   : > { %v5472_v3 = vpack.i.bf16 %v5465_v1, %v5462_v0  ;;  %v5475_v4 = vld [vmem:[%s5459_s20 + $0x70] sm:$0x3]  ;;  %v219_v5 = vld [vmem:[%s5459_s20 + $0x78] sm:$0x3]  ;;  %v5479_v6 = vld [vmem:[%s5459_s20 + $0x80] sm:$0x3] }
  0x13   : > { %v5483_v7 = vpack.i.bf16 %v5475_v4, %v5468_v2  ;;  %v5486_v8 = vld [vmem:[%s5459_s20 + $0x40] sm:$0xff]  ;;  %v5489_v9 = vld [vmem:[%s5459_s20 + $0x48] sm:$0xff]  ;;  %v5494_v10 = vpack.i.bf16 %v5479_v6, %v219_v5  ;;  %v5503_v12 = vld [vmem:[%s5459_s20 + $0x90] sm:$0x3]  ;;  %v4631_v37 = vpack.c.bf16 %v219_v5, %v5462_v0  ;;  %v4634_v40 = vpack.c.bf16 %v5475_v4, %v5468_v2 }
  0x14   : > { %5001 = vrot.lane.b32.xlu0 %v5472_v3, %s5409_s21  ;;  %v5500_v11 = vpack.i.bf16 %v5489_v9, %v5486_v8  ;;  %v5506_v13 = vld [vmem:[%s5459_s20 + $0x98] sm:$0x3]  ;;  %v205_v14 = vld [vmem:[%s5459_s20 + $0x8] sm:$0xff]  ;;  %v206_v15 = vld [vmem:[%s5459_s20 + $0x10] sm:$0xff]  ;;  %v4640_v43 = vpack.c.bf16 %v5479_v6, %v5465_v1  ;;  %v4646_v47 = vpack.c.bf16 %v5503_v12, %v5486_v8 }
  0x15   : > { %5011 = vrot.lane.b32.xlu1 %v5483_v7, %s5409_s21  ;;  %v5514_v16 = vpack.i.bf16 %v5506_v13, %v5503_v12  ;;  %v215_v17 = vld [vmem:[%s5459_s20 + $0x58] sm:$0x3]  ;;  %v216_v18 = vld [vmem:[%s5459_s20 + $0x60] sm:$0x3]  ;;  %v5520_v19 = vpack.i.bf16 %v206_v15, %v205_v14  ;;  %v214_v21 = vld [vmem:[%s5459_s20 + $0x50] sm:$0x3]  ;;  %v4643_v44 = vpack.c.bf16 %v5506_v13, %v5489_v9  ;;  %v5395_v46 = vpack.i.bf16 %v5506_v13, %v5489_v9 }
  0x16   : > { %v204_v20 = vld [vmem:[%s5459_s20] sm:$0xff]  ;;  %v5524_v22 = vpack.i.bf16 %v216_v18, %v215_v17  ;;  %v5527_v23 = vld [vmem:[%s5459_s20 + $0x18] sm:$0xff]  ;;  %v5534_v25 = vld [vmem:[%s5459_s20 + $0x68] sm:$0x3]  ;;  %v4619_v31 = vpack.c.bf16 %v215_v17, %v205_v14  ;;  %v4628_v36 = vpack.c.bf16 %v216_v18, %v206_v15 }
  0x17   : > { %v5529_v24 = vpack.i.bf16 %v214_v21, %v204_v20  ;;  %v5537_v26 = vld [vmem:[%s5459_s20 + $0x38] sm:$0xff]  ;;  %v5540_v27 = vld [vmem:[%s5459_s20 + $0x88] sm:$0x3]  ;;  %v5546_v28 = vpack.i.bf16 %v5534_v25, %v5527_v23  ;;  %v4622_v33 = vpack.c.bf16 %v214_v21, %v204_v20  ;;  %v4625_v34 = vpack.c.bf16 %v5534_v25, %v5527_v23 }
  0x18   : > { %5006 = vrot.lane.b32.xlu0 %v5494_v10, %s5409_s21  ;;  %v5550_v29 = vpack.i.bf16 %v5540_v27, %v5537_v26  ;;  %4621 = vmatprep.subr.msk.bf16.mxu1 %vm5561_vm2, %v4619_v31  ;;  %v5365_v38 = vpack.i.bf16 %v5468_v2, %v5527_v23  ;;  %v5375_v39 = vpack.i.bf16 %v5475_v4, %v5534_v25  ;;  %v5899_v23 = vld [vmem:[%s6629_s1 + $0x18] sm:$0xff] }
  0x19   : > { %5016 = vrot.lane.b32.xlu1 %v5500_v11, %s5409_s21  ;;  %4624 = vmatpush1.bf16.msk.msra.mxu1 %vm5561_vm2, %v4622_v33  ;;  %v4637_v41 = vpack.c.bf16 %v5540_v27, %v5537_v26  ;;  %v5385_v42 = vpack.i.bf16 %v5486_v8, %v5537_v26  ;;  %v5390_v45 = vpack.i.bf16 %v5503_v12, %v5540_v27  ;;  %v5760_v33 = vld [vmem:[%s6629_s1 + $0x8] sm:$0xff] }
  0x1a   : > { %4627 = vmatprep.subr.msk.bf16.mxu1 %vm5561_vm2, %v4625_v34 }
  0x1c   : > { %5021 = vrot.lane.b32.xlu0 %v5514_v16, %s5409_s21  ;;  %4476 = vmatmul.mubr.msk.f32.vlgmr.msra.gmra.mrb[0].mxu1 %vm225_vm3, %v224_v35 }
  0x1d   : > { %5026 = vrot.lane.b32.xlu1 %v5520_v19, %s5410_s22  ;;  %4630 = vmatpush1.bf16.msk.msra.mxu1 %vm5561_vm2, %v4628_v36 }
  0x1e   : > { %395 = vmatprep.mubr.f32.mxu1 %v5411_v30  ;;  %4633 = vmatprep.subr.msk.bf16.mxu1 %vm5561_vm2, %v4631_v37 }
  0x20   : > { %5031 = vrot.lane.b32.xlu0 %v5524_v22, %s5410_s22  ;;  %4479 = vmatmul.mubr.msk.f32.vlgmr.msra.gmra.mrb[2].mxu1 %vm225_vm3, %v224_v35 }
  0x21   : > { %5036 = vrot.lane.b32.xlu1 %v5529_v24, %s5410_s22  ;;  %4636 = vmatpush1.bf16.msk.msra.mxu1 %vm5561_vm2, %v4634_v40 }
  0x22   : > { %466 = vmatprep.mubr.f32.mxu1 %v5411_v30  ;;  %4639 = vmatprep.subr.msk.bf16.mxu1 %vm5561_vm2, %v4637_v41 }
  0x24   : > { %5041 = vrot.lane.b32.xlu0 %v5472_v3, %s5410_s22  ;;  %4482 = vmatmul.mubr.msk.f32.vlgmr.msra.gmra.mrb[4].mxu1 %vm225_vm3, %v224_v35 }
  0x25   : > { %5046 = vrot.lane.b32.xlu1 %v5494_v10, %s5410_s22  ;;  %4642 = vmatpush1.bf16.msk.msra.mxu1 %vm5561_vm2, %v4640_v43 }
  0x26   : > { %537 = vmatprep.mubr.f32.mxu1 %v5411_v30  ;;  %4645 = vmatprep.subr.msk.bf16.mxu1 %vm5561_vm2, %v4643_v44 }
  0x28   : > { %5051 = vrot.lane.b32.xlu0 %v5483_v7, %s5410_s22  ;;  %4485 = vmatmul.mubr.msk.f32.vlgmr.msra.gmra.mrb[6].mxu1 %vm225_vm3, %v224_v35 }
  0x29   : > { %5056 = vrot.lane.b32.xlu1 %v5500_v11, %s5410_s22  ;;  %4648 = vmatpush1.bf16.msk.msra.mxu1 %vm5561_vm2, %v4646_v47 }
  0x2a   : > { %608 = vmatprep.mubr.f32.mxu1 %v5411_v30 }
  0x2c   : > { %5061 = vrot.lane.b32.xlu0 %v5514_v16, %s5410_s22  ;;  %4488 = vmatmul.mubr.msk.f32.vlgmr.msra.gmra.mrb[8].mxu1 %vm225_vm3, %v224_v35 }
  0x2d   : > { %5066 = vrot.lane.b32.xlu1 %v5520_v19, %s5413_s25  ;;  %793 = vmatprep.mubr.f32.mxu1 %v5411_v30 }
  0x30   : > { %5071 = vrot.lane.b32.xlu0 %v5524_v22, %s5413_s25 }
  0x31   : > { %5076 = vrot.lane.b32.xlu1 %v5529_v24, %s5413_s25 }
  0x34   : > { %5081 = vrot.lane.b32.xlu0 %v5520_v19, %s5409_s21 }
  0x35   : > { %5086 = vrot.lane.b32.xlu1 %v5524_v22, %s5409_s21 }
  0x38   : > { %5091 = vrot.lane.b32.xlu0 %v5472_v3, %s5413_s25 }
  0x39   : > { %5096 = vrot.lane.b32.xlu1 %v5494_v10, %s5413_s25 }
  0x3c   : > { %5101 = vrot.lane.b32.xlu0 %v5529_v24, %s5409_s21 }
  0x3d   : > { %5106 = vrot.lane.b32.xlu1 %v5483_v7, %s5413_s25 }
  0x40   : > { %5111 = vrot.lane.b32.xlu0 %v5546_v28, %s5409_s21 }
  0x41   : > { %5116 = vrot.lane.b32.xlu1 %v5500_v11, %s5413_s25 }
  0x44   : > { %5121 = vrot.lane.b32.xlu0 %v5514_v16, %s5413_s25 }
  0x45   : > { %5126 = vrot.lane.b32.xlu1 %v5550_v29, %s5409_s21 }
  0x48   : > { %5131 = vrot.lane.b32.xlu0 %v5520_v19, %s5414_s26 }
  0x49   : > { %5136 = vrot.lane.b32.xlu1 %v5524_v22, %s5414_s26 }
  0x4c   : > { %5141 = vrot.lane.b32.xlu0 %v5529_v24, %s5414_s26 }
  0x4d   : > { %5146 = vrot.lane.b32.xlu1 %v5546_v28, %s5410_s22 }
  0x50   : > { %5151 = vrot.lane.b32.xlu0 %v5472_v3, %s5414_s26 }
  0x51   : > { %5156 = vrot.lane.b32.xlu1 %v5494_v10, %s5414_s26 }
  0x54   : > { %5161 = vrot.lane.b32.xlu0 %v5483_v7, %s5414_s26 }
  0x55   : > { %5166 = vrot.lane.b32.xlu1 %v5550_v29, %s5410_s22 }
  0x58   : > { %5171 = vrot.lane.b32.xlu0 %v5500_v11, %s5414_s26 }
  0x59   : > { %5176 = vrot.lane.b32.xlu1 %v5514_v16, %s5414_s26 }
  0x5c   : > { %5181 = vrot.lane.b32.xlu0 %v5546_v28, %s5413_s25 }
  0x5d   : > { %5186 = vrot.lane.b32.xlu1 %v5520_v19, %s5415_s27 }
  0x60   : > { %5191 = vrot.lane.b32.xlu0 %v5524_v22, %s5415_s27 }
  0x61   : > { %5196 = vrot.lane.b32.xlu1 %v5529_v24, %s5415_s27 }
  0x64   : > { %5201 = vrot.lane.b32.xlu0 %v5550_v29, %s5413_s25 }
  0x65   : > { %5206 = vrot.lane.b32.xlu1 %v5472_v3, %s5415_s27 }
  0x68   : > { %5211 = vrot.lane.b32.xlu0 %v5494_v10, %s5415_s27 }
  0x69   : > { %5216 = vrot.lane.b32.xlu1 %v5483_v7, %s5415_s27 }
  0x6c   : > { %5221 = vrot.lane.b32.xlu0 %v5546_v28, %s5414_s26 }
  0x6d   : > { %5226 = vrot.lane.b32.xlu1 %v5500_v11, %s5415_s27 }
  0x70   : > { %5231 = vrot.lane.b32.xlu0 %v5514_v16, %s5415_s27 }
  0x71   : > { %5236 = vrot.lane.b32.xlu1 %v5550_v29, %s5414_s26 }
  0x74   : > { %5241 = vrot.lane.b32.xlu0 %v5520_v19, %s5416_s28 }
  0x75   : > { %5246 = vrot.lane.b32.xlu1 %v5524_v22, %s5416_s28 }
  0x78   : > { %5251 = vrot.lane.b32.xlu0 %v5529_v24, %s5416_s28 }
  0x79   : > { %5256 = vrot.lane.b32.xlu1 %v5546_v28, %s5415_s27 }
  0x7c   : > { %5261 = vrot.lane.b32.xlu0 %v5472_v3, %s5416_s28 }
  0x7d   : > { %5266 = vrot.lane.b32.xlu1 %v5494_v10, %s5416_s28 }
  0x80   : > { %5271 = vrot.lane.b32.xlu0 %v5483_v7, %s5416_s28 }
  0x81   : > { %5276 = vrot.lane.b32.xlu1 %v5550_v29, %s5415_s27  ;;  %s4980_s27 = smul.u32 80, %s6642_s16 }
  0x83   : > { %s6585_s30 = scalar_lea.vmem %s6632_s4, %s4980_s27 }
  0x84   : > { %5281 = vrot.lane.b32.xlu0 %v5500_v11, %s5416_s28 }
  0x85   : > { %5286 = vrot.lane.b32.xlu1 %v5514_v16, %s5416_s28 }
  0x86   : > { %v5699_v48 = vpop.permute.xlu0 %5001 }
  0x87   : > { %v5701_v49 = vpop.permute.xlu1 %5011  ;;  %v5004_v50 = vunpack.i.h.bf16 %v5699_v48  ;;  %v5003_v51 = vunpack.i.l.bf16 %v5699_v48 }
  0x88   : > { %5291 = vrot.lane.b32.xlu0 %v5546_v28, %s5416_s28  ;;  %v5013_v52 = vunpack.i.l.bf16 %v5701_v49  ;;  %v5014_v54 = vunpack.i.h.bf16 %v5701_v49 }
  0x89   : > { %5296 = vrot.lane.b32.xlu1 %v5520_v19, %s5417_s29  ;;  %v683_v60 = vsel %vm677_vm4, %v5003_v51, %v5004_v50 }
  0x8a   : > { %v5710_v53 = vpop.permute.xlu0 %5006  ;;  %v682_v62 = vsel %vm677_vm4, %v5013_v52, %v5003_v51 }
  0x8b   : > { %v5009_v55 = vunpack.i.h.bf16 %v5710_v53  ;;  %v5008_v56 = vunpack.i.l.bf16 %v5710_v53  ;;  %v5715_v57 = vpop.permute.xlu1 %5016 }
  0x8c   : > { %v5019_v58 = vunpack.i.h.bf16 %v5715_v57  ;;  %v5018_v59 = vunpack.i.l.bf16 %v5715_v57  ;;  %5301 = vrot.lane.b32.xlu0 %v5524_v22, %s5417_s29 }
  0x8d   : > { %5306 = vrot.lane.b32.xlu1 %v5529_v24, %s5417_s29  ;;  %v692_v61 = vsel %vm677_vm4, %v5008_v56, %v5009_v55  ;;  %v691_v63 = vsel %vm677_vm4, %v5014_v54, %v5008_v56 }
  0x8e   : > { %v5735_v0 = vpop.permute.xlu0 %5021  ;;  %v4661_v1 = vpack.c.bf16 %v692_v61, %v683_v60  ;;  %v4664_v5 = vpack.c.bf16 %v691_v63, %v682_v62  ;;  %v686_v17 = vsel %vm677_vm4, %v5018_v59, %v5019_v58 }
  0x8f   : > { %v5024_v6 = vunpack.i.h.bf16 %v5735_v0  ;;  %v5023_v14 = vunpack.i.l.bf16 %v5735_v0  ;;  %v5739_v15 = vpop.permute.xlu1 %5026 }
  0x90   : > { %4663 = vmatprep.subr.msk.bf16.mxu0 %vm5561_vm2, %v4661_v1  ;;  %5311 = vrot.lane.b32.xlu0 %v5550_v29, %s5416_s28  ;;  %v5029_v21 = vunpack.i.h.bf16 %v5739_v15  ;;  %v5028_v31 = vunpack.i.l.bf16 %v5739_v15 }
  0x91   : > { %v695_v18 = vsel %vm677_vm4, %v5023_v14, %v5024_v6  ;;  %v4673_v20 = vpack.c.bf16 %v5024_v6, %v5019_v58  ;;  %5316 = vrot.lane.b32.xlu1 %v5472_v3, %s5417_s29  ;;  %4666 = vmatpush1.bf16.msk.msra.mxu0 %vm5561_vm2, %v4664_v5 }
  0x92   : > { %v4676_v34 = vpack.c.bf16 %v695_v18, %v686_v17  ;;  %v5762_v35 = vpop.permute.xlu0 %5031  ;;  %v1138_v44 = vsel %vm1136_vm5, %v5028_v31, %v5029_v21 }
  0x93   : > { %v5034_v36 = vunpack.i.h.bf16 %v5762_v35  ;;  %v5033_v37 = vunpack.i.l.bf16 %v5762_v35  ;;  %v5037_v40 = vpop.permute.xlu1 %5036  ;;  %4675 = vmatprep.subr.msk.bf16.mxu0 %vm5561_vm2, %v4673_v20 }
  0x94   : > { %v5039_v41 = vunpack.i.h.bf16 %v5037_v40  ;;  %v5038_v43 = vunpack.i.l.bf16 %v5037_v40  ;;  %5321 = vrot.lane.b32.xlu0 %v5494_v10, %s5417_s29  ;;  %4498 = vmatmul.mubr.msk.f32.vlgmr.msra.gmra.mrb[0].mxu0 %vm225_vm3, %v5760_v33 }
  0x95   : > { %v1147_v47 = vsel %vm1136_vm5, %v5033_v37, %v5034_v36  ;;  %5326 = vrot.lane.b32.xlu1 %v5483_v7, %s5417_s29  ;;  %4678 = vmatpush1.bf16.msk.msra.mxu0 %vm5561_vm2, %v4676_v34  ;;  %v5819_v34 = vld [vmem:[%s6629_s1 + $0x10] sm:$0xff] }
  0x96   : > { %v4679_v51 = vpack.c.bf16 %v1147_v47, %v1138_v44  ;;  %v1146_v56 = vsel %vm1136_vm5, %v5039_v41, %v5033_v37  ;;  %v1137_v58 = vsel %vm1136_vm5, %v5038_v43, %v5028_v31  ;;  %v5784_v60 = vpop.permute.xlu0 %5041  ;;  %1077 = vmatprep.mubr.f32.mxu0 %v5411_v30 }
  0x97   : > { %v4682_v61 = vpack.c.bf16 %v1146_v56, %v1137_v58  ;;  %v5044_v62 = vunpack.i.h.bf16 %v5784_v60  ;;  %v5043_v63 = vunpack.i.l.bf16 %v5784_v60  ;;  %v5789_v1 = vpop.permute.xlu1 %5046 }
  0x98   : > { %v6635_v7 = vunpack.i.h.bf16 %v5789_v1  ;;  %v5048_v5 = vunpack.i.l.bf16 %v5789_v1  ;;  %4681 = vmatprep.subr.msk.bf16.mxu0 %vm5561_vm2, %v4679_v51  ;;  %5331 = vrot.lane.b32.xlu0 %v5546_v28, %s5417_s29 }
  0x99   : > { %v1142_v6 = vsel %vm1136_vm5, %v5043_v63, %v5044_v62  ;;  %5336 = vrot.lane.b32.xlu1 %v5500_v11, %s5417_s29  ;;  %4504 = vmatmul.mubr.msk.f32.vlgmr.msra.gmra.mrb[2].mxu0 %vm225_vm3, %v5760_v33 }
  0x9a   : > { %v1151_v17 = vsel %vm1136_vm5, %v5048_v5, %v6635_v7  ;;  %4684 = vmatpush1.bf16.msk.msra.mxu0 %vm5561_vm2, %v4682_v61  ;;  %v5809_v18 = vpop.permute.xlu0 %5051  ;;  %1252 = vmatprep.mubr.f32.mxu0 %v5411_v30 }
  0x9b   : > { %v4691_v28 = vpack.c.bf16 %v1151_v17, %v1142_v6  ;;  %v5054_v20 = vunpack.i.h.bf16 %v5809_v18  ;;  %v5053_v31 = vunpack.i.l.bf16 %v5809_v18  ;;  %v5814_v11 = vpop.permute.xlu1 %5056 }
  0x9c   : > { %v5059_v37 = vunpack.i.h.bf16 %v5814_v11  ;;  %v5058_v40 = vunpack.i.l.bf16 %v5814_v11  ;;  %5341 = vrot.lane.b32.xlu0 %v5514_v16, %s5417_s29 }
  0x9d   : > { %v1141_v41 = vsel %vm1136_vm5, %v5053_v31, %v5043_v63  ;;  %v1150_v43 = vsel %vm1136_vm5, %v5054_v20, %v5048_v5  ;;  %5346 = vrot.lane.b32.xlu1 %v5550_v29, %s5417_s29  ;;  %4693 = vmatprep.subr.msk.bf16.mxu0 %vm5561_vm2, %v4691_v28 }
  0x9e   : > { %v4694_v44 = vpack.c.bf16 %v1150_v43, %v1141_v41  ;;  %v5835_v47 = vpop.permute.xlu0 %5061  ;;  %4508 = vmatmul.mubr.msk.f32.vlgmr.msra.gmra.mrb[4].mxu0 %vm225_vm3, %v5819_v34  ;;  %v1145_v29 = vsel %vm1136_vm5, %v5058_v40, %v5059_v37 }
  0x9f   : > { %v5064_v16 = vunpack.i.h.bf16 %v5835_v47  ;;  %v5063_v51 = vunpack.i.l.bf16 %v5835_v47  ;;  %v5841_v56 = vpop.permute.xlu1 %5066  ;;  %1394 = vmatprep.mubr.f32.mxu0 %v5411_v30 }
  0xa0   : > { %5351 = vrot.lane.b32.xlu0 %v5520_v19, %s5418_s8  ;;  %4696 = vmatpush1.bf16.msk.msra.mxu0 %vm5561_vm2, %v4694_v44  ;;  %v6633_v63 = vunpack.i.h.bf16 %v5841_v56  ;;  %v5068_v5 = vunpack.i.l.bf16 %v5841_v56 }
  0xa1   : > { %v1154_v58 = vsel %vm1136_vm5, %v5063_v51, %v5064_v16  ;;  %v4703_v61 = vpack.c.bf16 %v5064_v16, %v5059_v37  ;;  %5356 = vrot.lane.b32.xlu1 %v5524_v22, %s5418_s8 }
  0xa2   : > { %v4706_v6 = vpack.c.bf16 %v1154_v58, %v1145_v29  ;;  %v5858_v17 = vpop.permute.xlu0 %5071  ;;  %v1597_v22 = vsel %vm1595_vm6, %v5068_v5, %v6633_v63 }
  0xa3   : > { %v6634_v19 = vunpack.i.h.bf16 %v5858_v17  ;;  %v5073_v28 = vunpack.i.l.bf16 %v5858_v17  ;;  %v5077_v41 = vpop.permute.xlu1 %5076  ;;  %4705 = vmatprep.subr.msk.bf16.mxu0 %vm5561_vm2, %v4703_v61  ;;  %4514 = vmatmul.mubr.msk.f32.vlgmr.msra.gmra.mrb[0].mxu0 %vm225_vm3, %v5819_v34 }
  0xa4   : > { %v5079_v37 = vunpack.i.h.bf16 %v5077_v41  ;;  %v5078_v43 = vunpack.i.l.bf16 %v5077_v41  ;;  %5361 = vrot.lane.b32.xlu0 %v5529_v24, %s5418_s8  ;;  %4708 = vmatpush1.bf16.msk.msra.mxu0 %vm5561_vm2, %v4706_v6 }
  0xa5   : > { %v1606_v44 = vsel %vm1595_vm6, %v5073_v28, %v6634_v19  ;;  %5366 = vrot.lane.b32.xlu1 %v5365_v38, %s5418_s8  ;;  %1536 = vmatprep.mubr.f32.mxu0 %v5411_v30 }
  0xa6   : > { %v4709_v16 = vpack.c.bf16 %v1606_v44, %v1597_v22  ;;  %v1605_v24 = vsel %vm1595_vm6, %v5079_v37, %v5073_v28  ;;  %v1596_v29 = vsel %vm1595_vm6, %v5078_v43, %v5068_v5  ;;  %v5082_v58 = vpop.permute.xlu0 %5081 }
  0xa7   : > { %v4712_v61 = vpack.c.bf16 %v1605_v24, %v1596_v29  ;;  %v5084_v6 = vunpack.i.h.bf16 %v5082_v58  ;;  %v5083_v41 = vunpack.i.l.bf16 %v5082_v58  ;;  %v5087_v63 = vpop.permute.xlu1 %5086  ;;  %4520 = vmatmul.mubr.msk.f32.vlgmr.msra.gmra.mrb[2].mxu0 %vm225_vm3, %v5819_v34 }
  0xa8   : > { %v5089_v19 = vunpack.i.h.bf16 %v5087_v63  ;;  %v5088_v7 = vunpack.i.l.bf16 %v5087_v63  ;;  %5371 = vrot.lane.b32.xlu0 %v5472_v3, %s5418_s8  ;;  %4711 = vmatprep.subr.msk.bf16.mxu0 %vm5561_vm2, %v4709_v16 }
  0xa9   : > { %v679_v2 = vsel %vm677_vm4, %v5083_v41, %v5084_v6  ;;  %5376 = vrot.lane.b32.xlu1 %v5375_v39, %s5418_s8  ;;  %4714 = vmatpush1.bf16.msk.msra.mxu0 %vm5561_vm2, %v4712_v61  ;;  %v5419_v39 = vmov 0   ;;  %v198_v61 = vld [vmem:[%s6630_s2] sm:$0xff] }
  0xaa   : > { %v688_v3 = vsel %vm677_vm4, %v5088_v7, %v5089_v19  ;;  %v5902_v38 = vpop.permute.xlu0 %5091  ;;  %1711 = vmatprep.mubr.f32.mxu0 %v5411_v30  ;;  %5400 = vset.pattern.permute.xlu0 %v5419_v39 }
  0xab   : > { %v4649_v63 = vpack.c.bf16 %v688_v3, %v679_v2  ;;  %v5094_v5 = vunpack.i.h.bf16 %v5902_v38  ;;  %v5093_v4 = vunpack.i.l.bf16 %v5902_v38  ;;  %v5907_v25 = vpop.permute.xlu1 %5096  ;;  %v6193_v38 = vld [vmem:[%s6629_s1 + $0x28] sm:$0xff] }
  0xac   : > { %v5099_v28 = vunpack.i.h.bf16 %v5907_v25  ;;  %v5098_v37 = vunpack.i.l.bf16 %v5907_v25  ;;  %5381 = vrot.lane.b32.xlu0 %v5494_v10, %s5418_s8  ;;  %4524 = vmatmul.mubr.msk.f32.vlgmr.msra.gmra.mrb[4].mxu0 %vm225_vm3, %v5899_v23 }
  0xad   : > { %v1601_v43 = vsel %vm1595_vm6, %v5093_v4, %v5094_v5  ;;  %5386 = vrot.lane.b32.xlu1 %v5385_v42, %s5418_s8  ;;  %4651 = vmatprep.subr.msk.bf16.mxu1 %vm5561_vm2, %v4649_v63 }
  0xae   : > { %v1610_v22 = vsel %vm1595_vm6, %v5098_v37, %v5099_v28  ;;  %v5102_v10 = vpop.permute.xlu0 %5101  ;;  %1853 = vmatprep.mubr.f32.mxu0 %v5411_v30 }
  0xaf   : > { %v4721_v44 = vpack.c.bf16 %v1610_v22, %v1601_v43  ;;  %v5104_v16 = vunpack.i.h.bf16 %v5102_v10  ;;  %v5103_v24 = vunpack.i.l.bf16 %v5102_v10  ;;  %v5928_v29 = vpop.permute.xlu1 %5106 }
  0xb0   : > { %v5109_v58 = vunpack.i.h.bf16 %v5928_v29  ;;  %v5108_v8 = vunpack.i.l.bf16 %v5928_v29  ;;  %5391 = vrot.lane.b32.xlu0 %v5390_v45, %s5418_s8 }
  0xb1   : > { %v678_v26 = vsel %vm677_vm4, %v5103_v24, %v5083_v41  ;;  %v687_v42 = vsel %vm677_vm4, %v5104_v16, %v5088_v7  ;;  %5396 = vrot.lane.b32.xlu1 %v5395_v46, %s5418_s8  ;;  %4723 = vmatprep.subr.msk.bf16.mxu0 %vm5561_vm2, %v4721_v44 }
  0xb2   : > { %v4652_v2 = vpack.c.bf16 %v687_v42, %v678_v26  ;;  %v1600_v12 = vsel %vm1595_vm6, %v5108_v8, %v5093_v4  ;;  %v1609_v27 = vsel %vm1595_vm6, %v5109_v58, %v5098_v37  ;;  %v5112_v45 = vpop.permute.xlu0 %5111 }
  0xb3   : > { %v4724_v7 = vpack.c.bf16 %v1609_v27, %v1600_v12  ;;  %v5114_v9 = vunpack.i.h.bf16 %v5112_v45  ;;  %v5113_v13 = vunpack.i.l.bf16 %v5112_v45  ;;  %v5953_v46 = vpop.permute.xlu1 %5116 }
  0xb4   : > { %v5119_v41 = vunpack.i.h.bf16 %v5953_v46  ;;  %v5118_v3 = vunpack.i.l.bf16 %v5953_v46  ;;  %4654 = vmatpush1.bf16.msk.msra.mxu1 %vm5561_vm2, %v4652_v2  ;;  %201 = vperm.xlu0 %5400, %v198_v61  }
  0xb5   : > { %v690_v63 = vsel %vm677_vm4, %v5114_v9, %v5014_v54  ;;  %v680_v4 = vsel %vm677_vm4, %v5084_v6, %v5113_v13  ;;  %v681_v39 = vsel %vm677_vm4, %v5113_v13, %v5013_v52  ;;  %v689_v37 = vsel %vm677_vm4, %v5089_v19, %v5114_v9  ;;  %4726 = vmatpush1.bf16.msk.msra.mxu0 %vm5561_vm2, %v4724_v7 }
  0xb6   : > { %v4655_v43 = vpack.c.bf16 %v690_v63, %v681_v39  ;;  %v4658_v22 = vpack.c.bf16 %v689_v37, %v680_v4  ;;  %v5969_v10 = vpop.permute.xlu0 %5121  ;;  %v1604_v52 = vsel %vm1595_vm6, %v5118_v3, %v5119_v41 }
  0xb7   : > { %v5124_v44 = vunpack.i.h.bf16 %v5969_v10  ;;  %v5123_v16 = vunpack.i.l.bf16 %v5969_v10  ;;  %v5127_v54 = vpop.permute.xlu1 %5126  ;;  %4492 = vmatmul.mubr.msk.f32.vlgmr.msra.gmra.mrb[0].mxu1 %vm225_vm3, %v5760_v33 }
  0xb8   : > { %v5129_v49 = vunpack.i.h.bf16 %v5127_v54  ;;  %v5128_v6 = vunpack.i.l.bf16 %v5127_v54  ;;  %4657 = vmatprep.subr.msk.bf16.mxu1 %vm5561_vm2, %v4655_v43  ;;  %864 = vmatprep.mubr.f32.mxu1 %v5411_v30 }
  0xb9   : > { %v1613_v19 = vsel %vm1595_vm6, %v5123_v16, %v5124_v44  ;;  %v4733_v24 = vpack.c.bf16 %v5124_v44, %v5119_v41  ;;  %4660 = vmatpush1.bf16.msk.msra.mxu1 %vm5561_vm2, %v4658_v22  ;;  %4530 = vmatmul.mubr.msk.f32.vlgmr.msra.gmra.mrb[0].mxu0 %vm225_vm3, %v5899_v23 }
  0xba   : > { %v4736_v26 = vpack.c.bf16 %v1613_v19, %v1604_v52  ;;  %v693_v42 = vsel %vm677_vm4, %v5009_v55, %v5129_v49  ;;  %v694_v61 = vsel %vm677_vm4, %v5129_v49, %v5023_v14  ;;  %v684_v2 = vsel %vm677_vm4, %v5004_v50, %v5128_v6  ;;  %v5997_v12 = vpop.permute.xlu0 %5131  ;;  %1995 = vmatprep.mubr.f32.mxu0 %v5411_v30 }
  0xbb   : > { %v685_v27 = vsel %vm677_vm4, %v5128_v6, %v5018_v59  ;;  %v4670_v45 = vpack.c.bf16 %v693_v42, %v684_v2  ;;  %v5134_v53 = vunpack.i.h.bf16 %v5997_v12  ;;  %v5133_v55 = vunpack.i.l.bf16 %v5997_v12  ;;  %v6005_v0 = vpop.permute.xlu1 %5136  ;;  %4735 = vmatprep.subr.msk.bf16.mxu0 %vm5561_vm2, %v4733_v24 }
  0xbc   : > { %v4667_v48 = vpack.c.bf16 %v694_v61, %v685_v27  ;;  %v5139_v50 = vunpack.i.h.bf16 %v6005_v0  ;;  %v5138_v14 = vunpack.i.l.bf16 %v6005_v0  ;;  %4738 = vmatpush1.bf16.msk.msra.mxu0 %vm5561_vm2, %v4736_v26  ;;  %4495 = vmatmul.mubr.msk.f32.vlgmr.msra.gmra.mrb[2].mxu1 %vm225_vm3, %v5760_v33 }
  0xbd   : > { %v2056_v57 = vsel %vm2054_vm7, %v5133_v55, %v5134_v53  ;;  %1006 = vmatprep.mubr.f32.mxu1 %v5411_v30 }
  0xbe   : > { %v2065_v59 = vsel %vm2054_vm7, %v5138_v14, %v5139_v50  ;;  %4669 = vmatprep.subr.msk.bf16.mxu1 %vm5561_vm2, %v4667_v48  ;;  %v5142_v7 = vpop.permute.xlu0 %5141 }
  0xbf   : > { %v4739_v9 = vpack.c.bf16 %v2065_v59, %v2056_v57  ;;  %4672 = vmatpush1.bf16.msk.msra.mxu1 %vm5561_vm2, %v4670_v45  ;;  %v5144_v13 = vunpack.i.h.bf16 %v5142_v7  ;;  %v5143_v41 = vunpack.i.l.bf16 %v5142_v7  ;;  %v5147_v63 = vpop.permute.xlu1 %5146  ;;  %4536 = vmatmul.mubr.msk.f32.vlgmr.msra.gmra.mrb[2].mxu0 %vm225_vm3, %v5899_v23 }
  0xc0   : > { %v5149_v4 = vunpack.i.h.bf16 %v5147_v63  ;;  %v5148_v39 = vunpack.i.l.bf16 %v5147_v63  ;;  %2170 = vmatprep.mubr.f32.mxu0 %v5411_v30 }
  0xc1   : > { %v2055_v37 = vsel %vm2054_vm7, %v5143_v41, %v5133_v55  ;;  %v2064_v43 = vsel %vm2054_vm7, %v5144_v13, %v5138_v14  ;;  %4741 = vmatprep.subr.msk.bf16.mxu0 %vm5561_vm2, %v4739_v9  ;;  %v6638_v41 = vunpack.i.h.bf16 %v5789_v1 }
  0xc2   : > { %v4742_v22 = vpack.c.bf16 %v2064_v43, %v2055_v37  ;;  %v1148_v44 = vsel %vm1136_vm5, %v5034_v36, %v5149_v4  ;;  %v1149_v54 = vsel %vm1136_vm5, %v5149_v4, %v5054_v20  ;;  %v1139_v49 = vsel %vm1136_vm5, %v5029_v21, %v5148_v39  ;;  %v6042_v6 = vpop.permute.xlu0 %5151  ;;  %4501 = vmatmul.mubr.msk.f32.vlgmr.msra.gmra.mrb[6].mxu1 %vm225_vm3, %v5760_v33  ;;  %v6061_v33 = vld [vmem:[%s6629_s1 + $0x20] sm:$0xff] }
  0xc3   : > { %v1140_v52 = vsel %vm1136_vm5, %v5148_v39, %v5053_v31  ;;  %v4688_v35 = vpack.c.bf16 %v1148_v44, %v1139_v49  ;;  %v5154_v36 = vunpack.i.h.bf16 %v6042_v6  ;;  %v5153_v19 = vunpack.i.l.bf16 %v6042_v6  ;;  %v6051_v24 = vpop.permute.xlu1 %5156  ;;  %1323 = vmatprep.mubr.f32.mxu1 %v5411_v30 }
  0xc4   : > { %v4685_v15 = vpack.c.bf16 %v1149_v54, %v1140_v52  ;;  %v5159_v21 = vunpack.i.h.bf16 %v6051_v24  ;;  %v5158_v20 = vunpack.i.l.bf16 %v6051_v24  ;;  %4744 = vmatpush1.bf16.msk.msra.mxu0 %vm5561_vm2, %v4742_v22 }
  0xc5   : > { %v2060_v18 = vsel %vm2054_vm7, %v5153_v19, %v5154_v36 }
  0xc6   : > { %v2069_v31 = vsel %vm2054_vm7, %v5158_v20, %v5159_v21  ;;  %4687 = vmatprep.subr.msk.bf16.mxu1 %vm5561_vm2, %v4685_v15  ;;  %v6071_v26 = vpop.permute.xlu0 %5161 }
  0xc7   : > { %v4751_v42 = vpack.c.bf16 %v2069_v31, %v2060_v18  ;;  %4690 = vmatpush1.bf16.msk.msra.mxu1 %vm5561_vm2, %v4688_v35  ;;  %v5164_v61 = vunpack.i.h.bf16 %v6071_v26  ;;  %v5163_v2 = vunpack.i.l.bf16 %v6071_v26  ;;  %v5167_v27 = vpop.permute.xlu1 %5166  ;;  %4540 = vmatmul.mubr.msk.f32.vlgmr.msra.gmra.mrb[4].mxu0 %vm225_vm3, %v6061_v33 }
  0xc8   : > { %v5169_v45 = vunpack.i.h.bf16 %v5167_v27  ;;  %v5168_v55 = vunpack.i.l.bf16 %v5167_v27  ;;  %2312 = vmatprep.mubr.f32.mxu0 %v5411_v30 }
  0xc9   : > { %v2059_v48 = vsel %vm2054_vm7, %v5163_v2, %v5153_v19  ;;  %v2068_v14 = vsel %vm2054_vm7, %v5164_v61, %v5158_v20  ;;  %4753 = vmatprep.subr.msk.bf16.mxu0 %vm5561_vm2, %v4751_v42  ;;  %v6639_v19 = vunpack.i.h.bf16 %v5858_v17  ;;  %v6640_v20 = vunpack.i.h.bf16 %v5841_v56 }
  0xca   : > { %v4754_v57 = vpack.c.bf16 %v2068_v14, %v2059_v48  ;;  %v1153_v59 = vsel %vm1136_vm5, %v5169_v45, %v5063_v51  ;;  %v1143_v7 = vsel %vm1136_vm5, %v5044_v62, %v5168_v55  ;;  %v1144_v9 = vsel %vm1136_vm5, %v5168_v55, %v5058_v40  ;;  %v6097_v13 = vpop.permute.xlu0 %5171  ;;  %4511 = vmatmul.mubr.msk.f32.vlgmr.msra.gmra.mrb[2].mxu1 %vm225_vm3, %v5819_v34 }
  0xcb   : > { %v1152_v63 = vsel %vm1136_vm5, %v6638_v41, %v5169_v45  ;;  %v4697_v47 = vpack.c.bf16 %v1153_v59, %v1144_v9  ;;  %v5174_v51 = vunpack.i.h.bf16 %v6097_v13  ;;  %v5173_v60 = vunpack.i.l.bf16 %v6097_v13  ;;  %v6106_v4 = vpop.permute.xlu1 %5176  ;;  %1465 = vmatprep.mubr.f32.mxu1 %v5411_v30 }
  0xcc   : > { %v4700_v62 = vpack.c.bf16 %v1152_v63, %v1143_v7  ;;  %v5179_v11 = vunpack.i.h.bf16 %v6106_v4  ;;  %v5178_v40 = vunpack.i.l.bf16 %v6106_v4  ;;  %4756 = vmatpush1.bf16.msk.msra.mxu0 %vm5561_vm2, %v4754_v57 }
  0xcd   : > { %v2063_v1 = vsel %vm2054_vm7, %v5173_v60, %v5174_v51  ;;  %4699 = vmatprep.subr.msk.bf16.mxu1 %vm5561_vm2, %v4697_v47 }
  0xce   : > { %v4763_v39 = vpack.c.bf16 %v5179_v11, %v5174_v51  ;;  %v2072_v37 = vsel %vm2054_vm7, %v5178_v40, %v5179_v11  ;;  %4702 = vmatpush1.bf16.msk.msra.mxu1 %vm5561_vm2, %v4700_v62  ;;  %v5182_v43 = vpop.permute.xlu0 %5181 }
  0xcf   : > { %v4766_v22 = vpack.c.bf16 %v2072_v37, %v2063_v1  ;;  %v5184_v44 = vunpack.i.h.bf16 %v5182_v43  ;;  %v5183_v54 = vunpack.i.l.bf16 %v5182_v43  ;;  %v6123_v49 = vpop.permute.xlu1 %5186  ;;  %4546 = vmatmul.mubr.msk.f32.vlgmr.msra.gmra.mrb[0].mxu0 %vm225_vm3, %v6061_v33 }
  0xd0   : > { %v5189_v52 = vunpack.i.h.bf16 %v6123_v49  ;;  %v5188_v35 = vunpack.i.l.bf16 %v6123_v49  ;;  %4765 = vmatprep.subr.msk.bf16.mxu0 %vm5561_vm2, %v4763_v39  ;;  %2454 = vmatprep.mubr.f32.mxu0 %v5411_v30 }
  0xd1   : > { %v1607_v15 = vsel %vm1595_vm6, %v6639_v19, %v5184_v44  ;;  %v1598_v18 = vsel %vm1595_vm6, %v6640_v20, %v5183_v54  ;;  %v1599_v31 = vsel %vm1595_vm6, %v5183_v54, %v5108_v8  ;;  %v1608_v42 = vsel %vm1595_vm6, %v5184_v44, %v5109_v58  ;;  %4768 = vmatpush1.bf16.msk.msra.mxu0 %vm5561_vm2, %v4766_v22 }
  0xd2   : > { %v4715_v27 = vpack.c.bf16 %v1608_v42, %v1599_v31  ;;  %v4718_v45 = vpack.c.bf16 %v1607_v15, %v1598_v18  ;;  %v6146_v17 = vpop.permute.xlu0 %5191  ;;  %4517 = vmatmul.mubr.msk.f32.vlgmr.msra.gmra.mrb[6].mxu1 %vm225_vm3, %v5819_v34  ;;  %v2515_v48 = vsel %vm2513_vm8, %v5188_v35, %v5189_v52 }
  0xd3   : > { %v5194_v56 = vunpack.i.h.bf16 %v6146_v17  ;;  %v5193_v55 = vunpack.i.l.bf16 %v6146_v17  ;;  %v5197_v8 = vpop.permute.xlu1 %5196  ;;  %1782 = vmatprep.mubr.f32.mxu1 %v5411_v30 }
  0xd4   : > { %v5199_v29 = vunpack.i.h.bf16 %v5197_v8  ;;  %v5198_v58 = vunpack.i.l.bf16 %v5197_v8  ;;  %4717 = vmatprep.subr.msk.bf16.mxu1 %vm5561_vm2, %v4715_v27  ;;  %4552 = vmatmul.mubr.msk.f32.vlgmr.msra.gmra.mrb[2].mxu0 %vm225_vm3, %v6061_v33 }
  0xd5   : > { %v2524_v34 = vsel %vm2513_vm8, %v5193_v55, %v5194_v56  ;;  %4720 = vmatpush1.bf16.msk.msra.mxu1 %vm5561_vm2, %v4718_v45  ;;  %2629 = vmatprep.mubr.f32.mxu0 %v5411_v30 }
  0xd6   : > { %v4769_v14 = vpack.c.bf16 %v2524_v34, %v2515_v48  ;;  %v2523_v57 = vsel %vm2513_vm8, %v5199_v29, %v5193_v55  ;;  %v2514_v59 = vsel %vm2513_vm8, %v5198_v58, %v5188_v35  ;;  %v5202_v7 = vpop.permute.xlu0 %5201 }
  0xd7   : > { %v4772_v9 = vpack.c.bf16 %v2523_v57, %v2514_v59  ;;  %v5204_v41 = vunpack.i.h.bf16 %v5202_v7  ;;  %v5203_v63 = vunpack.i.l.bf16 %v5202_v7  ;;  %v6168_v47 = vpop.permute.xlu1 %5206 }
  0xd8   : > { %v5209_v51 = vunpack.i.h.bf16 %v6168_v47  ;;  %v5208_v62 = vunpack.i.l.bf16 %v6168_v47  ;;  %4771 = vmatprep.subr.msk.bf16.mxu0 %vm5561_vm2, %v4769_v14  ;;  %4527 = vmatmul.mubr.msk.f32.vlgmr.msra.gmra.mrb[2].mxu1 %vm225_vm3, %v5899_v23 }
  0xd9   : > { %v1602_v11 = vsel %vm1595_vm6, %v5094_v5, %v5203_v63  ;;  %v1603_v1 = vsel %vm1595_vm6, %v5203_v63, %v5118_v3  ;;  %v1611_v39 = vsel %vm1595_vm6, %v5099_v28, %v5204_v41  ;;  %v1612_v37 = vsel %vm1595_vm6, %v5204_v41, %v5123_v16  ;;  %4774 = vmatpush1.bf16.msk.msra.mxu0 %vm5561_vm2, %v4772_v9 }
  0xda   : > { %v4727_v5 = vpack.c.bf16 %v1612_v37, %v1603_v1  ;;  %v4730_v46 = vpack.c.bf16 %v1611_v39, %v1602_v11  ;;  %v6195_v43 = vpop.permute.xlu0 %5211  ;;  %1924 = vmatprep.mubr.f32.mxu1 %v5411_v30  ;;  %v2519_v22 = vsel %vm2513_vm8, %v5208_v62, %v5209_v51  ;;  %vm4410_vm6 = vcmask 31744  }
  0xdb   : > { %v5214_v25 = vunpack.i.h.bf16 %v6195_v43  ;;  %v5213_v28 = vunpack.i.l.bf16 %v6195_v43  ;;  %v6200_v3 = vpop.permute.xlu1 %5216 }
  0xdc   : > { %v5219_v10 = vunpack.i.h.bf16 %v6200_v3  ;;  %v5218_v16 = vunpack.i.l.bf16 %v6200_v3  ;;  %4729 = vmatprep.subr.msk.bf16.mxu1 %vm5561_vm2, %v4727_v5  ;;  %4556 = vmatmul.mubr.msk.f32.vlgmr.msra.gmra.mrb[4].mxu0 %vm225_vm3, %v6193_v38 }
  0xdd   : > { %v2528_v44 = vsel %vm2513_vm8, %v5213_v28, %v5214_v25  ;;  %4732 = vmatpush1.bf16.msk.msra.mxu1 %vm5561_vm2, %v4730_v46  ;;  %2771 = vmatprep.mubr.f32.mxu0 %v5411_v30 }
  0xde   : > { %v4781_v54 = vpack.c.bf16 %v2528_v44, %v2519_v22  ;;  %v2527_v35 = vsel %vm2513_vm8, %v5219_v10, %v5213_v28  ;;  %v2518_v19 = vsel %vm2513_vm8, %v5218_v16, %v5208_v62  ;;  %v5222_v15 = vpop.permute.xlu0 %5221 }
  0xdf   : > { %v4784_v20 = vpack.c.bf16 %v2527_v35, %v2518_v19  ;;  %v5224_v18 = vunpack.i.h.bf16 %v5222_v15  ;;  %v5223_v31 = vunpack.i.l.bf16 %v5222_v15  ;;  %v6223_v42 = vpop.permute.xlu1 %5226 }
  0xe0   : > { %v5229_v27 = vunpack.i.h.bf16 %v6223_v42  ;;  %v5228_v45 = vunpack.i.l.bf16 %v6223_v42  ;;  %4783 = vmatprep.subr.msk.bf16.mxu0 %vm5561_vm2, %v4781_v54  ;;  %4533 = vmatmul.mubr.msk.f32.vlgmr.msra.gmra.mrb[6].mxu1 %vm225_vm3, %v5899_v23 }
  0xe1   : > { %v2057_v55 = vsel %vm2054_vm7, %v5134_v53, %v5223_v31  ;;  %v2058_v8 = vsel %vm2054_vm7, %v5223_v31, %v5163_v2  ;;  %v2066_v29 = vsel %vm2054_vm7, %v5139_v50, %v5224_v18  ;;  %v2067_v58 = vsel %vm2054_vm7, %v5224_v18, %v5164_v61  ;;  %4786 = vmatpush1.bf16.msk.msra.mxu0 %vm5561_vm2, %v4784_v20 }
  0xe2   : > { %v4745_v23 = vpack.c.bf16 %v2067_v58, %v2058_v8  ;;  %v4748_v48 = vpack.c.bf16 %v2066_v29, %v2057_v55  ;;  %v6245_v12 = vpop.permute.xlu0 %5231  ;;  %2241 = vmatprep.mubr.f32.mxu1 %v5411_v30  ;;  %v2522_v26 = vsel %vm2513_vm8, %v5228_v45, %v5229_v27 }
  0xe3   : > { %v5234_v53 = vunpack.i.h.bf16 %v6245_v12  ;;  %v5233_v2 = vunpack.i.l.bf16 %v6245_v12  ;;  %v5237_v0 = vpop.permute.xlu1 %5236 }
  0xe4   : > { %v5239_v34 = vunpack.i.h.bf16 %v5237_v0  ;;  %v5238_v50 = vunpack.i.l.bf16 %v5237_v0  ;;  %4747 = vmatprep.subr.msk.bf16.mxu1 %vm5561_vm2, %v4745_v23  ;;  %4562 = vmatmul.mubr.msk.f32.vlgmr.msra.gmra.mrb[0].mxu0 %vm225_vm3, %v6193_v38 }
  0xe5   : > { %v2531_v61 = vsel %vm2513_vm8, %v5233_v2, %v5234_v53  ;;  %v4793_v14 = vpack.c.bf16 %v5234_v53, %v5229_v27  ;;  %4750 = vmatpush1.bf16.msk.msra.mxu1 %vm5561_vm2, %v4748_v48  ;;  %2913 = vmatprep.mubr.f32.mxu0 %v5411_v30 }
  0xe6   : > { %v4796_v57 = vpack.c.bf16 %v2531_v61, %v2522_v26  ;;  %v2061_v59 = vsel %vm2054_vm7, %v5154_v36, %v5238_v50  ;;  %v2062_v7 = vsel %vm2054_vm7, %v5238_v50, %v5173_v60  ;;  %v2070_v9 = vsel %vm2054_vm7, %v5159_v21, %v5239_v34  ;;  %v6272_v41 = vpop.permute.xlu0 %5241 }
  0xe7   : > { %v2071_v63 = vsel %vm2054_vm7, %v5239_v34, %v5178_v40  ;;  %v4760_v62 = vpack.c.bf16 %v2070_v9, %v2061_v59  ;;  %v5244_v11 = vunpack.i.h.bf16 %v6272_v41  ;;  %v5243_v6 = vunpack.i.l.bf16 %v6272_v41  ;;  %v6279_v36 = vpop.permute.xlu1 %5246  ;;  %4795 = vmatprep.subr.msk.bf16.mxu0 %vm5561_vm2, %v4793_v14 }
  0xe8   : > { %v4757_v13 = vpack.c.bf16 %v2071_v63, %v2062_v7  ;;  %v5249_v24 = vunpack.i.h.bf16 %v6279_v36  ;;  %v5248_v21 = vunpack.i.l.bf16 %v6279_v36  ;;  %4798 = vmatpush1.bf16.msk.msra.mxu0 %vm5561_vm2, %v4796_v57  ;;  %4543 = vmatmul.mubr.msk.f32.vlgmr.msra.gmra.mrb[2].mxu1 %vm225_vm3, %v6061_v33 }
  0xe9   : > { %v2974_v60 = vsel %vm2972_vm9, %v5243_v6, %v5244_v11  ;;  %2383 = vmatprep.mubr.f32.mxu1 %v5411_v30 }
  0xea   : > { %v2983_v4 = vsel %vm2972_vm9, %v5248_v21, %v5249_v24  ;;  %4759 = vmatprep.subr.msk.bf16.mxu1 %vm5561_vm2, %v4757_v13  ;;  %v5252_v40 = vpop.permute.xlu0 %5251 }
  0xeb   : > { %v4799_v1 = vpack.c.bf16 %v2983_v4, %v2974_v60  ;;  %4762 = vmatpush1.bf16.msk.msra.mxu1 %vm5561_vm2, %v4760_v62  ;;  %v5254_v39 = vunpack.i.h.bf16 %v5252_v40  ;;  %v5253_v37 = vunpack.i.l.bf16 %v5252_v40  ;;  %v5257_v5 = vpop.permute.xlu1 %5256  ;;  %4568 = vmatmul.mubr.msk.f32.vlgmr.msra.gmra.mrb[2].mxu0 %vm225_vm3, %v6193_v38 }
  0xec   : > { %v5259_v46 = vunpack.i.h.bf16 %v5257_v5  ;;  %v5258_v28 = vunpack.i.l.bf16 %v5257_v5  ;;  %3088 = vmatprep.mubr.f32.mxu0 %v5411_v30 }
  0xed   : > { %v2973_v22 = vsel %vm2972_vm9, %v5253_v37, %v5243_v6  ;;  %v2982_v44 = vsel %vm2972_vm9, %v5254_v39, %v5248_v21  ;;  %4801 = vmatprep.subr.msk.bf16.mxu0 %vm5561_vm2, %v4799_v1 }
  0xee   : > { %v4802_v54 = vpack.c.bf16 %v2982_v44, %v2973_v22  ;;  %v2525_v35 = vsel %vm2513_vm8, %v5194_v56, %v5259_v46  ;;  %v2516_v19 = vsel %vm2513_vm8, %v5189_v52, %v5258_v28  ;;  %v2517_v15 = vsel %vm2513_vm8, %v5258_v28, %v5218_v16  ;;  %v6316_v20 = vpop.permute.xlu0 %5261  ;;  %4549 = vmatmul.mubr.msk.f32.vlgmr.msra.gmra.mrb[6].mxu1 %vm225_vm3, %v6061_v33  ;;  %v6335_v33 = vld [vmem:[%s6629_s1 + $0x30] sm:$0xff] }
  0xef   : > { %v2526_v18 = vsel %vm2513_vm8, %v5259_v46, %v5219_v10  ;;  %v4778_v17 = vpack.c.bf16 %v2525_v35, %v2516_v19  ;;  %v5264_v56 = vunpack.i.h.bf16 %v6316_v20  ;;  %v5263_v49 = vunpack.i.l.bf16 %v6316_v20  ;;  %v6325_v31 = vpop.permute.xlu1 %5266  ;;  %2700 = vmatprep.mubr.f32.mxu1 %v5411_v30 }
  0xf0   : > { %v4775_v52 = vpack.c.bf16 %v2526_v18, %v2517_v15  ;;  %v5269_v16 = vunpack.i.h.bf16 %v6325_v31  ;;  %v5268_v27 = vunpack.i.l.bf16 %v6325_v31  ;;  %4804 = vmatpush1.bf16.msk.msra.mxu0 %vm5561_vm2, %v4802_v54 }
  0xf1   : > { %v2978_v3 = vsel %vm2972_vm9, %v5263_v49, %v5264_v56 }
  0xf2   : > { %v2987_v10 = vsel %vm2972_vm9, %v5268_v27, %v5269_v16  ;;  %4777 = vmatprep.subr.msk.bf16.mxu1 %vm5561_vm2, %v4775_v52  ;;  %v5272_v55 = vpop.permute.xlu0 %5271 }
  0xf3   : > { %v4811_v8 = vpack.c.bf16 %v2987_v10, %v2978_v3  ;;  %4780 = vmatpush1.bf16.msk.msra.mxu1 %vm5561_vm2, %v4778_v17  ;;  %v5274_v29 = vunpack.i.h.bf16 %v5272_v55  ;;  %v5273_v58 = vunpack.i.l.bf16 %v5272_v55  ;;  %v5277_v23 = vpop.permute.xlu1 %5276  ;;  %4572 = vmatmul.mubr.msk.f32.vlgmr.msra.gmra.mrb[4].mxu0 %vm225_vm3, %v6335_v33 }
  0xf4   : > { %v5279_v48 = vunpack.i.h.bf16 %v5277_v23  ;;  %v5278_v53 = vunpack.i.l.bf16 %v5277_v23  ;;  %3230 = vmatprep.mubr.f32.mxu0 %v5411_v30  ;;  %v6445_v23 = vld [vmem:[%s6629_s1 + $0x38] sm:$0xff] }
  0xf5   : > { %v2977_v0 = vsel %vm2972_vm9, %v5273_v58, %v5263_v49  ;;  %v2986_v34 = vsel %vm2972_vm9, %v5274_v29, %v5268_v27  ;;  %4813 = vmatprep.subr.msk.bf16.mxu0 %vm5561_vm2, %v4811_v8 }
  0xf6   : > { %v4814_v50 = vpack.c.bf16 %v2986_v34, %v2977_v0  ;;  %v2529_v26 = vsel %vm2513_vm8, %v5214_v25, %v5279_v48  ;;  %v2530_v61 = vsel %vm2513_vm8, %v5279_v48, %v5233_v2  ;;  %v2520_v14 = vsel %vm2513_vm8, %v5209_v51, %v5278_v53  ;;  %v6363_v57 = vpop.permute.xlu0 %5281  ;;  %4559 = vmatmul.mubr.msk.f32.vlgmr.msra.gmra.mrb[2].mxu1 %vm225_vm3, %v6193_v38 }
  0xf7   : > { %v2521_v59 = vsel %vm2513_vm8, %v5278_v53, %v5228_v45  ;;  %v4790_v43 = vpack.c.bf16 %v2529_v26, %v2520_v14  ;;  %v5284_v25 = vunpack.i.h.bf16 %v6363_v57  ;;  %v5283_v12 = vunpack.i.l.bf16 %v6363_v57  ;;  %v5287_v7 = vpop.permute.xlu1 %5286  ;;  %2842 = vmatprep.mubr.f32.mxu1 %v5411_v30  ;;  %v6430_v10 = vpop.f32.mrb[4].mxu1 }
  0xf8   : > { %v4787_v47 = vpack.c.bf16 %v2530_v61, %v2521_v59  ;;  %v5289_v2 = vunpack.i.h.bf16 %v5287_v7  ;;  %v5288_v51 = vunpack.i.l.bf16 %v5287_v7  ;;  %4816 = vmatpush1.bf16.msk.msra.mxu0 %vm5561_vm2, %v4814_v50  ;;  %v6447_v48 = vpop.f32.mrb[5].mxu1 }
  0xf9   : > { %v2981_v9 = vsel %vm2972_vm9, %v5283_v12, %v5284_v25 }
  0xfa   : > { %v4823_v63 = vpack.c.bf16 %v5289_v2, %v5284_v25  ;;  %v2990_v42 = vsel %vm2972_vm9, %v5288_v51, %v5289_v2  ;;  %4789 = vmatprep.subr.msk.bf16.mxu1 %vm5561_vm2, %v4787_v47  ;;  %v5292_v45 = vpop.permute.xlu0 %5291 }
  0xfb   : > { %v4826_v62 = vpack.c.bf16 %v2990_v42, %v2981_v9  ;;  %4792 = vmatpush1.bf16.msk.msra.mxu1 %vm5561_vm2, %v4790_v43  ;;  %v5294_v6 = vunpack.i.h.bf16 %v5292_v45  ;;  %v5293_v13 = vunpack.i.l.bf16 %v5292_v45  ;;  %v6381_v21 = vpop.permute.xlu1 %5296  ;;  %4578 = vmatmul.mubr.msk.f32.vlgmr.msra.gmra.mrb[0].mxu0 %vm225_vm3, %v6335_v33 }
  0xfc   : > { %v5299_v60 = vunpack.i.h.bf16 %v6381_v21  ;;  %v5298_v4 = vunpack.i.l.bf16 %v6381_v21  ;;  %4825 = vmatprep.subr.msk.bf16.mxu0 %vm5561_vm2, %v4823_v63  ;;  %3372 = vmatprep.mubr.f32.mxu0 %v5411_v30 }
  0xfd   : > { %v2975_v40 = vsel %vm2972_vm9, %v5244_v11, %v5293_v13  ;;  %v2976_v1 = vsel %vm2972_vm9, %v5293_v13, %v5273_v58  ;;  %v2984_v39 = vsel %vm2972_vm9, %v5249_v24, %v5294_v6  ;;  %v2985_v37 = vsel %vm2972_vm9, %v5294_v6, %v5274_v29  ;;  %4828 = vmatpush1.bf16.msk.msra.mxu0 %vm5561_vm2, %v4826_v62 }
  0xfe   : > { %v4805_v5 = vpack.c.bf16 %v2985_v37, %v2976_v1  ;;  %v4808_v46 = vpack.c.bf16 %v2984_v39, %v2975_v40  ;;  %v6400_v28 = vpop.permute.xlu0 %5301  ;;  %4565 = vmatmul.mubr.msk.f32.vlgmr.msra.gmra.mrb[6].mxu1 %vm225_vm3, %v6193_v38  ;;  %v3433_v44 = vsel %vm3431_vm10, %v5298_v4, %v5299_v60 }
  0xff   : > { %v5304_v41 = vunpack.i.h.bf16 %v6400_v28  ;;  %v5303_v11 = vunpack.i.l.bf16 %v6400_v28  ;;  %v5307_v36 = vpop.permute.xlu1 %5306  ;;  %3159 = vmatprep.mubr.f32.mxu1 %v5411_v30  ;;  %v6467_v9 = vpop.f32.mrb[8].mxu1 }
 0x100   : > { %v5309_v24 = vunpack.i.h.bf16 %v5307_v36  ;;  %v5308_v22 = vunpack.i.l.bf16 %v5307_v36  ;;  %4807 = vmatprep.subr.msk.bf16.mxu1 %vm5561_vm2, %v4805_v5  ;;  %4584 = vmatmul.mubr.msk.f32.vlgmr.msra.gmra.mrb[2].mxu0 %vm225_vm3, %v6335_v33  ;;  %v6479_v6 = vpop.f32.mrb[9].mxu1 }
 0x101   : > { %v3442_v38 = vsel %vm3431_vm10, %v5303_v11, %v5304_v41  ;;  %4810 = vmatpush1.bf16.msk.msra.mxu1 %vm5561_vm2, %v4808_v46  ;;  %3547 = vmatprep.mubr.f32.mxu0 %v5411_v30 }
 0x102   : > { %v4829_v54 = vpack.c.bf16 %v3442_v38, %v3433_v44  ;;  %v3441_v35 = vsel %vm3431_vm10, %v5309_v24, %v5303_v11  ;;  %v3432_v19 = vsel %vm3431_vm10, %v5308_v22, %v5298_v4  ;;  %v5312_v15 = vpop.permute.xlu0 %5311 }
 0x103   : > { %v4832_v18 = vpack.c.bf16 %v3441_v35, %v3432_v19  ;;  %v5314_v17 = vunpack.i.h.bf16 %v5312_v15  ;;  %v5313_v49 = vunpack.i.l.bf16 %v5312_v15  ;;  %v6422_v52 = vpop.permute.xlu1 %5316 }
 0x104   : > { %v5319_v27 = vunpack.i.h.bf16 %v6422_v52  ;;  %v5318_v3 = vunpack.i.l.bf16 %v6422_v52  ;;  %4831 = vmatprep.subr.msk.bf16.mxu0 %vm5561_vm2, %v4829_v54  ;;  %4575 = vmatmul.mubr.msk.f32.vlgmr.msra.gmra.mrb[2].mxu1 %vm225_vm3, %v6335_v33 }
 0x105   : > { %v2979_v55 = vsel %vm2972_vm9, %v5264_v56, %v5313_v49  ;;  %v2980_v8 = vsel %vm2972_vm9, %v5313_v49, %v5283_v12  ;;  %v2988_v29 = vsel %vm2972_vm9, %v5269_v16, %v5314_v17  ;;  %v2989_v58 = vsel %vm2972_vm9, %v5314_v17, %v5288_v51  ;;  %4834 = vmatpush1.bf16.msk.msra.mxu0 %vm5561_vm2, %v4832_v18 }
 0x106   : > { %v4817_v20 = vpack.c.bf16 %v2989_v58, %v2980_v8  ;;  %v4820_v56 = vpack.c.bf16 %v2988_v29, %v2979_v55  ;;  %v5322_v53 = vpop.permute.xlu0 %5321  ;;  %3301 = vmatprep.mubr.f32.mxu1 %v5411_v30  ;;  %v3437_v26 = vsel %vm3431_vm10, %v5318_v3, %v5319_v27 }
 0x107   : > { %v5324_v31 = vunpack.i.h.bf16 %v5322_v53  ;;  %v5323_v0 = vunpack.i.l.bf16 %v5322_v53  ;;  %v5327_v16 = vpop.permute.xlu1 %5326 }
 0x108   : > { %v5329_v34 = vunpack.i.h.bf16 %v5327_v16  ;;  %v5328_v50 = vunpack.i.l.bf16 %v5327_v16  ;;  %4819 = vmatprep.subr.msk.bf16.mxu1 %vm5561_vm2, %v4817_v20  ;;  %4588 = vmatmul.mubr.msk.f32.vlgmr.msra.gmra.mrb[4].mxu0 %vm225_vm3, %v6445_v23 }
 0x109   : > { %v3446_v61 = vsel %vm3431_vm10, %v5323_v0, %v5324_v31  ;;  %4822 = vmatpush1.bf16.msk.msra.mxu1 %vm5561_vm2, %v4820_v56  ;;  %3689 = vmatprep.mubr.f32.mxu0 %v5411_v30 }
 0x10a   : > { %v4841_v14 = vpack.c.bf16 %v3446_v61, %v3437_v26  ;;  %v3445_v57 = vsel %vm3431_vm10, %v5329_v34, %v5323_v0  ;;  %v3436_v59 = vsel %vm3431_vm10, %v5328_v50, %v5318_v3  ;;  %v5332_v43 = vpop.permute.xlu0 %5331  ;;  %v4601_v26 = vld [vmem:[%s6629_s1 + $0x40] sm:$0xff] }
 0x10b   : > { %v4844_v25 = vpack.c.bf16 %v3445_v57, %v3436_v59  ;;  %v5334_v12 = vunpack.i.h.bf16 %v5332_v43  ;;  %v5333_v7 = vunpack.i.l.bf16 %v5332_v43  ;;  %v5337_v47 = vpop.permute.xlu1 %5336 }
 0x10c   : > { %v5339_v2 = vunpack.i.h.bf16 %v5337_v47  ;;  %v5338_v51 = vunpack.i.l.bf16 %v5337_v47  ;;  %4843 = vmatprep.subr.msk.bf16.mxu0 %vm5561_vm2, %v4841_v14  ;;  %4581 = vmatmul.mubr.msk.f32.vlgmr.msra.gmra.mrb[6].mxu1 %vm225_vm3, %v6335_v33 }
 0x10d   : > { %v3434_v63 = vsel %vm3431_vm10, %v5299_v60, %v5333_v7  ;;  %v3435_v42 = vsel %vm3431_vm10, %v5333_v7, %v5328_v50  ;;  %v3443_v45 = vsel %vm3431_vm10, %v5304_v41, %v5334_v12  ;;  %v3444_v62 = vsel %vm3431_vm10, %v5334_v12, %v5329_v34  ;;  %4846 = vmatpush1.bf16.msk.msra.mxu0 %vm5561_vm2, %v4844_v25 }
 0x10e   : > { %v4835_v33 = vpack.c.bf16 %v3444_v62, %v3435_v42  ;;  %v4838_v13 = vpack.c.bf16 %v3443_v45, %v3434_v63  ;;  %v5342_v4 = vpop.permute.xlu0 %5341  ;;  %3618 = vmatprep.mubr.f32.mxu1 %v5411_v30  ;;  %v3440_v37 = vsel %vm3431_vm10, %v5338_v51, %v5339_v2 }
 0x10f   : > { %v5344_v21 = vunpack.i.h.bf16 %v5342_v4  ;;  %v5343_v60 = vunpack.i.l.bf16 %v5342_v4  ;;  %v5347_v40 = vpop.permute.xlu1 %5346 }
 0x110   : > { %v5349_v1 = vunpack.i.h.bf16 %v5347_v40  ;;  %v5348_v39 = vunpack.i.l.bf16 %v5347_v40  ;;  %4837 = vmatprep.subr.msk.bf16.mxu1 %vm5561_vm2, %v4835_v33  ;;  %4594 = vmatmul.mubr.msk.f32.vlgmr.msra.gmra.mrb[0].mxu0 %vm225_vm3, %v6445_v23 }
 0x111   : > { %v3449_v5 = vsel %vm3431_vm10, %v5343_v60, %v5344_v21  ;;  %v4853_v46 = vpack.c.bf16 %v5344_v21, %v5339_v2  ;;  %4840 = vmatpush1.bf16.msk.msra.mxu1 %vm5561_vm2, %v4838_v13  ;;  %3831 = vmatprep.mubr.f32.mxu0 %v5411_v30 }
 0x112   : > { %v4856_v28 = vpack.c.bf16 %v3449_v5, %v3440_v37  ;;  %v3447_v41 = vsel %vm3431_vm10, %v5324_v31, %v5349_v1  ;;  %v3448_v11 = vsel %vm3431_vm10, %v5349_v1, %v5343_v60  ;;  %v3438_v36 = vsel %vm3431_vm10, %v5319_v27, %v5348_v39  ;;  %v5352_v24 = vpop.permute.xlu0 %5351 }
 0x113   : > { %v3439_v22 = vsel %vm3431_vm10, %v5348_v39, %v5338_v51  ;;  %v4850_v44 = vpack.c.bf16 %v3447_v41, %v3438_v36  ;;  %v5354_v38 = vunpack.i.h.bf16 %v5352_v24  ;;  %v5353_v54 = vunpack.i.l.bf16 %v5352_v24  ;;  %v5357_v35 = vpop.permute.xlu1 %5356  ;;  %4855 = vmatprep.subr.msk.bf16.mxu0 %vm5561_vm2, %v4853_v46 }
 0x114   : > { %v4847_v19 = vpack.c.bf16 %v3448_v11, %v3439_v22  ;;  %v5359_v15 = vunpack.i.h.bf16 %v5357_v35  ;;  %v5358_v18 = vunpack.i.l.bf16 %v5357_v35  ;;  %4858 = vmatpush1.bf16.msk.msra.mxu0 %vm5561_vm2, %v4856_v28  ;;  %4591 = vmatmul.mubr.msk.f32.vlgmr.msra.gmra.mrb[2].mxu1 %vm225_vm3, %v6445_v23 }
 0x115   : > { %v3892_v17 = vsel %vm3890_vm11, %v5353_v54, %v5354_v38  ;;  %3760 = vmatprep.mubr.f32.mxu1 %v5411_v30 }
 0x116   : > { %v3901_v49 = vsel %vm3890_vm11, %v5358_v18, %v5359_v15  ;;  %4849 = vmatprep.subr.msk.bf16.mxu1 %vm5561_vm2, %v4847_v19  ;;  %v5362_v52 = vpop.permute.xlu0 %5361  ;;  %v4341_v19 = vlaneseq }
 0x117   : > { %v4859_v27 = vpack.c.bf16 %v3901_v49, %v3892_v17  ;;  %4852 = vmatpush1.bf16.msk.msra.mxu1 %vm5561_vm2, %v4850_v44  ;;  %v5364_v3 = vunpack.i.h.bf16 %v5362_v52  ;;  %v5363_v55 = vunpack.i.l.bf16 %v5362_v52  ;;  %v5367_v8 = vpop.permute.xlu1 %5366  ;;  %4600 = vmatmul.mubr.msk.f32.vlgmr.msra.gmra.mrb[2].mxu0 %vm225_vm3, %v6445_v23 }
 0x118   : > { %4006 = vmatprep.mubr.f32.mxu0 %v5411_v30  ;;  %v5369_v56 = vunpack.i.h.bf16 %v5367_v8  ;;  %v5368_v53 = vunpack.i.l.bf16 %v5367_v8 }
 0x119   : > { %v3891_v29 = vsel %vm3890_vm11, %v5363_v55, %v5353_v54  ;;  %v3900_v58 = vsel %vm3890_vm11, %v5364_v3, %v5358_v18  ;;  %4861 = vmatprep.subr.msk.bf16.mxu0 %vm5561_vm2, %v4859_v27 }
 0x11a   : > { %v4862_v20 = vpack.c.bf16 %v3900_v58, %v3891_v29  ;;  %v5372_v31 = vpop.permute.xlu0 %5371  ;;  %4597 = vmatmul.mubr.msk.f32.vlgmr.msra.gmra.mrb[6].mxu1 %vm225_vm3, %v6445_v23  ;;  %v3893_v14 = vsel %vm3890_vm11, %v5354_v38, %v5368_v53  ;;  %v3894_v57 = vsel %vm3890_vm11, %v5368_v53, %v5369_v56 }
 0x11b   : > { %v5377_v0 = vpop.permute.xlu1 %5376  ;;  %4077 = vmatprep.mubr.f32.mxu1 %v5411_v30  ;;  %v5373_v16 = vunpack.i.l.bf16 %v5372_v31  ;;  %v5374_v61 = vunpack.i.h.bf16 %v5372_v31 }
 0x11c   : > { %v5379_v34 = vunpack.i.h.bf16 %v5377_v0  ;;  %v5378_v50 = vunpack.i.l.bf16 %v5377_v0  ;;  %4864 = vmatpush1.bf16.msk.msra.mxu0 %vm5561_vm2, %v4862_v20 }
 0x11d   : > { %v3895_v51 = vsel %vm3890_vm11, %v5369_v56, %v5373_v16  ;;  %v3896_v42 = vsel %vm3890_vm11, %v5373_v16, %v5374_v61 }
 0x11e   : > { %v3902_v23 = vsel %vm3890_vm11, %v5359_v15, %v5378_v50  ;;  %v3903_v59 = vsel %vm3890_vm11, %v5378_v50, %v5379_v34  ;;  %v5382_v43 = vpop.permute.xlu0 %5381  ;;  %v6563_v15 = vshrl.u32 %v4341_v19, 7 }
 0x11f   : > { %v4865_v25 = vpack.c.bf16 %v3903_v59, %v3894_v57  ;;  %v4868_v12 = vpack.c.bf16 %v3902_v23, %v3893_v14  ;;  %v5384_v7 = vunpack.i.h.bf16 %v5382_v43  ;;  %v5383_v47 = vunpack.i.l.bf16 %v5382_v43  ;;  %v5387_v2 = vpop.permute.xlu1 %5386  ;;  %4604 = vmatmul.mubr.msk.f32.vlgmr.msra.gmra.mrb[4].mxu0 %vm225_vm3, %v4601_v26 }
 0x120   : > { %v5388_v63 = vunpack.i.l.bf16 %v5387_v2  ;;  %4148 = vmatprep.mubr.f32.mxu0 %v5411_v30  ;;  %v5389_v33 = vunpack.i.h.bf16 %v5387_v2  ;;  %v4343_v17 = vsub.s32 0, %v6563_v15  ;;  %v4351_v53 = vsub.s32 2, %v6563_v15 }
 0x121   : > { %v3904_v45 = vsel %vm3890_vm11, %v5379_v34, %v5383_v47  ;;  %v3905_v62 = vsel %vm3890_vm11, %v5383_v47, %v5384_v7  ;;  %4867 = vmatprep.subr.msk.bf16.mxu1 %vm5561_vm2, %v4865_v25  ;;  %v4355_v0 = vsub.s32 3, %v6563_v15  ;;  %v4359_v16 = vsub.s32 4, %v6563_v15 }
 0x122   : > { %v4871_v13 = vpack.c.bf16 %v3905_v62, %v3896_v42  ;;  %v4874_v4 = vpack.c.bf16 %v3904_v45, %v3895_v51  ;;  %4870 = vmatpush1.bf16.msk.msra.mxu1 %vm5561_vm2, %v4868_v12  ;;  %v5392_v21 = vpop.permute.xlu0 %5391  ;;  %v3897_v39 = vsel %vm3890_vm11, %v5374_v61, %v5388_v63  ;;  %v3898_v46 = vsel %vm3890_vm11, %v5388_v63, %v5389_v33  ;;  %v4338_v42 = vld [vmem:[%s6631_s3 + $0x8] sm:$0x3] }
 0x123   : > { %v5394_v60 = vunpack.i.h.bf16 %v5392_v21  ;;  %v5393_v40 = vunpack.i.l.bf16 %v5392_v21  ;;  %v5397_v1 = vpop.permute.xlu1 %5396  ;;  %v4344_v8 = vrot.slane %v6572_v32, %v4343_v17  ;;  %v4363_v43 = vsub.s32 5, %v6563_v15 }
 0x124   : > { %v5399_v37 = vunpack.i.h.bf16 %v5397_v1  ;;  %v5398_v5 = vunpack.i.l.bf16 %v5397_v1  ;;  %4873 = vmatprep.subr.msk.bf16.mxu0 %vm5561_vm2, %v4871_v13  ;;  %v4367_v25 = vsub.s32 6, %v6563_v15  ;;  %v4352_v12 = vrot.slane %v6572_v32, %v4351_v53 }
 0x125   : > { %v3906_v28 = vsel %vm3890_vm11, %v5384_v7, %v5393_v40  ;;  %v3907_v41 = vsel %vm3890_vm11, %v5393_v40, %v5394_v60  ;;  %4607 = vmatmul.mubr.msk.f32.vlgmr.msra.gmra.mrb[2].mxu1 %vm225_vm3, %v4601_v26  ;;  %4876 = vmatpush1.bf16.msk.msra.mxu0 %vm5561_vm2, %v4874_v4  ;;  %v4356_v2 = vrot.slane %v6572_v32, %v4355_v0 }
 0x126   : > { %v4877_v11 = vpack.c.bf16 %v3907_v41, %v3898_v46  ;;  %v4880_v36 = vpack.c.bf16 %v3906_v28, %v3897_v39  ;;  %v3908_v24 = vsel %vm3890_vm11, %v5394_v60, %v5399_v37  ;;  %v3899_v22 = vsel %vm3890_vm11, %v5389_v33, %v5398_v5  ;;  %4219 = vmatprep.mubr.f32.mxu1 %v5411_v30 }
 0x127   : > { %v4883_v44 = vpack.c.bf16 %v5399_v37, %v5398_v5  ;;  %v4886_v38 = vpack.c.bf16 %v3908_v24, %v3899_v22  ;;  %v4360_v63 = vrot.slane %v6572_v32, %v4359_v16  ;;  %v4371_v33 = vsub.s32 7, %v6563_v15 }
 0x128   : > { %4610 = vmatmul.mubr.msk.f32.vlgmr.msra.gmra.mrb[0].mxu0 %vm225_vm3, %v4601_v26  ;;  %4879 = vmatprep.subr.msk.bf16.mxu1 %vm5561_vm2, %v4877_v11  ;;  %v4364_v4 = vrot.slane %v6572_v32, %v4363_v43  ;;  %v4368_v21 = vrot.slane %v6572_v32, %v4367_v25  ;;  %v4376_v46 = vrot.slane %v4338_v42, %v4343_v17 }
 0x129   : > { %4885 = vmatprep.subr.msk.bf16.mxu0 %vm5561_vm2, %v4883_v44  ;;  %4882 = vmatpush1.bf16.msk.msra.mxu1 %vm5561_vm2, %v4880_v36  ;;  %v4372_v24 = vrot.slane %v6572_v32, %v4371_v33 }
 0x12a   : > { %4888 = vmatpush1.bf16.msk.msra.mxu0 %vm5561_vm2, %v4886_v38  ;;  %4290 = vmatprep.mubr.f32.mxu0 %v5411_v30  ;;  %v4347_v30 = vsub.s32 1, %v6563_v15 }
 0x12c   : > { %4613 = vmatmul.mubr.msk.f32.vlgmr.msra.gmra.mrb[6].mxu1 %vm225_vm3, %v4601_v26  ;;  %v4348_v20 = vrot.slane %v6572_v32, %v4347_v30  ;;  %v4380_v22 = vrot.slane %v4338_v42, %v4347_v30 }
 0x12d   : > { %4616 = vmatmul.mubr.msk.f32.vlgmr.msra.gmra.mrb[2].mxu0 %vm225_vm3, %v4601_v26 }
 0x133   : > { %v6565_v18 = vpop.permute.xlu0 %201 }
 0x134   : > { %v619_v61 = vadd.f32 %v6430_v10, %v6565_v18  ;;  %v620_v14 = vadd.f32 %v6447_v48, %v6565_v18  ;;  %v623_v47 = vadd.f32 %v6467_v9, %v6565_v18  ;;  %v624_v10 = vadd.f32 %v6479_v6, %v6565_v18 }
 0x18a   : > { %v795_v54 = vpop.f32.mrb[0].mxu1 }
 0x18b   : > { %v797_v35 = vpop.f32.mrb[1].mxu1  ;;  %v4889_v49 = vadd.f32 %v795_v54, %v6565_v18 }
 0x18c   : > { %v4891_v52 = vadd.f32 %v797_v35, %v6565_v18 }
 0x1f2   : > { %v4008_v27 = vpop.f32.mrb[4].mxu0 }
 0x1f3   : > { %v4890_v3 = vadd.f32 %v4889_v49, %v4008_v27  ;;  %v4010_v55 = vpop.f32.mrb[5].mxu0 }
 0x1f4   : > { %v4892_v29 = vadd.f32 %v4891_v52, %v4010_v55 }
 0x1f5   : > { %vm4307_vm12 = vcmp.ge.f32.partialorder %v4890_v3, 0.0  ;;  %v4317_v58 = vmul.f32 0.2, %v4890_v3 }
 0x1f6   : > { %vm4308_vm13 = vcmp.ge.f32.partialorder %v4892_v29, 0.0  ;;  %v4318_v56 = vmul.f32 0.2, %v4892_v29 }
 0x1f7   : > { %v4327_v31 = vsel %vm4307_vm12, %v4890_v3, %v4317_v58 }
 0x1f8   : > { %v4391_v34 = vmul.f32 %v4344_v8, %v4327_v31  ;;  %v4328_v50 = vsel %vm4308_vm13, %v4892_v29, %v4318_v56  ;;  %v4079_v26 = vpop.f32.mrb[2].mxu1 }
 0x1f9   : > { %v4392_v57 = vmul.f32 %v4348_v20, %v4328_v50  ;;  %v4893_v23 = vadd.f32 %v4079_v26, %v6565_v18  ;;  %v4081_v59 = vpop.f32.mrb[3].mxu1 }
 0x1fa   : > { %4401 = vst [vmem:[%s6585_s30] sm:$0xff] %v4391_v34  ;;  %v4894_v7 = vadd.f32 %v4081_v59, %v6565_v18 }
 0x1fb   : > { %4402 = vst [vmem:[%s6585_s30 + $0x8] sm:$0xff] %v4392_v57  ;;  %vm4309_vm14 = vcmp.ge.f32.partialorder %v4893_v23, 0.0  ;;  %v4319_v48 = vmul.f32 0.2, %v4893_v23  ;;  %v4150_v51 = vpop.f32.mrb[0].mxu0 }
 0x1fc   : > { %vm4310_vm15 = vcmp.ge.f32.partialorder %v4894_v7, 0.0  ;;  %v4320_v45 = vmul.f32 0.2, %v4894_v7  ;;  %v4896_v62 = vadd.f32 %v4150_v51, %v619_v61  ;;  %v4152_v9 = vpop.f32.mrb[1].mxu0 }
 0x1fd   : > { %v4329_v6 = vsel %vm4309_vm14, %v4893_v23, %v4319_v48  ;;  %v4898_v13 = vadd.f32 %v4152_v9, %v620_v14 }
 0x1fe   : > { %v4393_v60 = vmul.f32 %v4352_v12, %v4329_v6  ;;  %v4330_v40 = vsel %vm4310_vm15, %v4894_v7, %v4320_v45  ;;  %vm4311_vm0 = vcmp.ge.f32.partialorder %v4896_v62, 0.0  ;;  %v4321_v1 = vmul.f32 0.2, %v4896_v62 }
 0x1ff   : > { %v4394_v39 = vmul.f32 %v4356_v2, %v4330_v40  ;;  %vm4312_vm1 = vcmp.ge.f32.partialorder %v4898_v13, 0.0  ;;  %v4322_v37 = vmul.f32 0.2, %v4898_v13  ;;  %v4221_v5 = vpop.f32.mrb[6].mxu1 }
 0x200   : > { %4403 = vst [vmem:[%s6585_s30 + $0x10] sm:$0xff] %v4393_v60  ;;  %v4331_v28 = vsel %vm4311_vm0, %v4896_v62, %v4321_v1  ;;  %v4899_v41 = vadd.f32 %v4221_v5, %v6565_v18  ;;  %v4292_v11 = vpop.f32.mrb[2].mxu0  ;;  %v4223_v36 = vpop.f32.mrb[7].mxu1 }
 0x201   : > { %4404 = vst [vmem:[%s6585_s30 + $0x18] sm:$0xff] %v4394_v39  ;;  %v4395_v44 = vmul.f32 %v4360_v63, %v4331_v28  ;;  %v4332_v38 = vsel %vm4312_vm1, %v4898_v13, %v4322_v37  ;;  %v4902_v54 = vadd.f32 %v4292_v11, %v623_v47  ;;  %v4900_v35 = vadd.f32 %v4223_v36, %v6565_v18  ;;  %v4294_v19 = vpop.f32.mrb[3].mxu0 }
 0x202   : > { %v4396_v17 = vmul.f32 %v4364_v4, %v4332_v38  ;;  %vm4313_vm2 = vcmp.ge.f32.partialorder %v4899_v41, 0.0  ;;  %v4323_v49 = vmul.f32 0.2, %v4899_v41  ;;  %v4904_v52 = vadd.f32 %v4294_v19, %v624_v10 }
 0x203   : > { %4405 = vst [vmem:[%s6585_s30 + $0x20] sm:$0xff] %v4395_v44  ;;  %vm4315_vm3 = vcmp.ge.f32.partialorder %v4902_v54, 0.0  ;;  %v4325_v27 = vmul.f32 0.2, %v4902_v54  ;;  %vm4314_vm4 = vcmp.ge.f32.partialorder %v4900_v35, 0.0 }
 0x204   : > { %v4324_v15 = vmul.f32 0.2, %v4900_v35  ;;  %4406 = vst [vmem:[%s6585_s30 + $0x28] sm:$0xff] %v4396_v17  ;;  %v4333_v32 = vsel %vm4313_vm2, %v4899_v41, %v4323_v49  ;;  %vm4316_vm5 = vcmp.ge.f32.partialorder %v4904_v52, 0.0  ;;  %v4326_v30 = vmul.f32 0.2, %v4904_v52 }
 0x205   : > { %v4397_v3 = vmul.f32 %v4368_v21, %v4333_v32  ;;  %v4335_v18 = vsel %vm4315_vm3, %v4902_v54, %v4325_v27 }
 0x206   : > { %v4334_v55 = vsel %vm4314_vm4, %v4900_v35, %v4324_v15  ;;  %v4399_v8 = vmul.f32 %v4376_v46, %v4335_v18  ;;  %v4336_v58 = vsel %vm4316_vm5, %v4904_v52, %v4326_v30 }
 0x207   : > { %v4398_v29 = vmul.f32 %v4372_v24, %v4334_v55  ;;  %4407 = vst [vmem:[%s6585_s30 + $0x30] sm:$0xff] %v4397_v3  ;;  %v4400_v20 = vmul.f32 %v4380_v22, %v4336_v58 }
 0x208   : > { %4409 = vst [vmem:[%s6585_s30 + $0x40] sm:$0xff] %v4399_v8 }
 0x209   : > { %4408 = vst [vmem:[%s6585_s30 + $0x38] sm:$0xff] %v4398_v29  ;;  %4411 = vst.msk [vmem:[%s6585_s30 + $0x48] sm:$0xff] %vm4410_vm6, %v4400_v20 }
 0x20a PF: > { %s14_s15 = sadd.s32 1, %s5407_s15  }
 0x20b   : > { %p11_p4 = scmp.ge.s32.totalorder %s14_s15, 4  }
 0x20d   :  { %13 = sbr.rel (!%p11_p4) target bundleno = 1 (0x1), region = 74 }

</bundles_post_ra>
